<compile_context>
chip_gen: v7x
topology: tpu7x:2x2x1
jax: 0.10.0
libtpu: 0.0.40
codegen_flags: <defaults>
</compile_context>

<pallas_src>
import functools

import jax
import jax.numpy as jnp
from jax.experimental import pallas as pl
from jax.experimental.pallas import tpu as pltpu

BN_EPS = 1e-5


# ------------------------------ fused kernel --------------------------------

def _fused_inception_kernel(*refs, depth, n_sc, B, L, K):
    """Entire InceptionTime forward for the whole batch, in one kernel.

    Lane-dense activation layout: (channels, B*L), B*L = 128 lanes.

    refs (in order):
      x_ref                      : (ni0, B*L)   network input (channel-padded)
      [wb_d, wmod_d] * depth     : (cb, ni_d), (4*nf, K*cb + ni_d)
      wsc_s * n_sc               : (4*nf, nr_s) BN-folded shortcut maps
      pool_ref                   : (B*L, B)     block-averaging (GAP) matrix
      fcw_ref, fcb_ref           : (c_out, 4*nf), (c_out, 1)
      o_ref                      : (c_out, B)
      slab_ref (scratch)         : (max_rows, B*L) im2col slab, reused per module
    """
    idx = 0
    x_ref = refs[idx]; idx += 1
    mod_refs = []
    for _ in range(depth):
        mod_refs.append((refs[idx], refs[idx + 1]))
        idx += 2
    sc_refs = [refs[idx + i] for i in range(n_sc)]; idx += n_sc
    pool_ref, fcw_ref, fcb_ref = refs[idx], refs[idx + 1], refs[idx + 2]; idx += 3
    o_ref = refs[idx]; idx += 1
    slab_ref = refs[idx]

    BL = B * L
    pad = K // 2

    # Batch-seam masks, hoisted once and shared by every module.
    # t = position within a sample; lane l = b*L + t.
    t = jax.lax.broadcasted_iota(jnp.int32, (1, BL), 1) % L
    valid = {s: (t + s >= 0) & (t + s < L) for s in range(-pad, pad + 1)}

    def run_module(a, wb_ref, wmod_ref):
        cb = wb_ref.shape[0]
        ni = a.shape[0]
        # bottleneck 1x1 conv for the whole batch in one MXU matmul
        xb = jnp.dot(wb_ref[...], a, preferred_element_type=jnp.float32)  # (cb, BL)

        # im2col taps: full-width XLU rolls + seam masks, streamed into scratch.
        # tap_j[:, l] = xb[:, l + (j - pad)] if same-sample, else 0
        # (pltpu.roll follows jnp.roll semantics: out[i] = in[(i - shift) % N])
        for j in range(K):
            s = j - pad
            if s == 0:
                tap = xb
            else:
                tap = pltpu.roll(xb, (-s) % BL, axis=1)
                tap = jnp.where(valid[s], tap, 0.0)
            slab_ref[j * cb:(j + 1) * cb, :] = tap

        # MaxPool1d(3, stride=1, padding=1): rolls with -inf at the seams
        nxt = jnp.where(valid[1], pltpu.roll(a, BL - 1, axis=1), -jnp.inf)  # value at t+1
        prv = jnp.where(valid[-1], pltpu.roll(a, 1, axis=1), -jnp.inf)      # value at t-1
        mp = jnp.maximum(a, jnp.maximum(nxt, prv))
        rows = K * cb + ni
        slab_ref[K * cb:rows, :] = mp

        # all 4*nf output channels in one MXU matmul (BN pre-folded into wmod)
        return jnp.dot(wmod_ref[...], slab_ref[0:rows, :],
                       preferred_element_type=jnp.float32)

    a = x_ref[...]
    res, si = a, 0
    for d in range(depth):
        wb_ref, wmod_ref = mod_refs[d]
        y = jnp.maximum(run_module(a, wb_ref, wmod_ref), 0.0)       # module ReLU
        if d % 3 == 2:                                              # residual junction
            sc = jnp.dot(sc_refs[si][...], res,
                         preferred_element_type=jnp.float32)
            y = jnp.maximum(y + sc, 0.0)
            res, si = y, si + 1
        a = y

    # head: Linear(GAP(x)) == GAP(Linear(x)); do the lane-dense matmul first
    h = jnp.dot(fcw_ref[...], a, preferred_element_type=jnp.float32)     # (c_out, BL)
    o_ref[...] = jnp.dot(h, pool_ref[...],
                         preferred_element_type=jnp.float32) + fcb_ref[...]


# --------------------------- parameter construction --------------------------

def _w(key, shape):
    return (0.1 * jax.random.normal(key, shape)).astype(jnp.float32)


def _bn_scale(c):
    # eval-mode BN with default stats (gamma=1, beta=0, mean=0, var=1) -> pure scale
    return jnp.full((c, 1), 1.0 / jnp.sqrt(1.0 + BN_EPS), jnp.float32)


def _round_up(n, m):
    return -(-n // m) * m


def init_inception_time(key, c_in, c_out, nf=8, depth=6, ks=40):
    """Raw (PyTorch-shaped) InceptionTime parameters, tsai defaults (nf shrunk)."""
    kss = [ks // (2 ** i) for i in range(3)]
    kss = [k if k % 2 != 0 else k - 1 for k in kss]           # -> [39, 19, 9]
    raw = {"modules": [], "shortcuts": [], "nf": nf, "kss": kss}
    for d in range(depth):
        ni = c_in if d == 0 else nf * 4
        key, *sub = jax.random.split(key, 6)
        bottleneck = ni > 1
        m = {
            "bottleneck": _w(sub[0], (nf, ni, 1)) if bottleneck else None,
            "convs": [_w(sub[1 + i], (nf, nf if bottleneck else ni, k))
                      for i, k in enumerate(kss)],
            "mpconv": _w(sub[4], (nf, ni, 1)),
            "bn_scale": _bn_scale(nf * 4),
        }
        raw["modules"].append(m)
        if d % 3 == 2:                                        # shortcut every 3 modules
            n_in, n_out = (c_in if d == 2 else nf * 4), nf * 4
            key, k1 = jax.random.split(key)
            raw["shortcuts"].append({
                "conv": _w(k1, (n_out, n_in, 1)) if n_in != n_out else None,
                "bn_scale": _bn_scale(n_out if n_in != n_out else n_in),
            })
    key, kw, kb = jax.random.split(key, 3)
    raw["fc_w"] = _w(kw, (c_out, nf * 4))
    raw["fc_b"] = _w(kb, (c_out,))
    return raw


def _fuse_module(m, ni, kss):
    """Embed the 3 branch convs + mpconv into one BN-folded weight matrix."""
    nf = m["convs"][0].shape[0]
    K = max(kss)
    assert K % 2 == 1
    wb = (m["bottleneck"][:, :, 0] if m["bottleneck"] is not None
          else jnp.eye(ni, dtype=jnp.float32))                # (cb, ni)
    cb = wb.shape[0]
    blocks = []
    for w in m["convs"]:                                      # (nf, cb, Ki), Ki odd
        Ki = w.shape[2]
        off = (K - Ki) // 2                                   # centered => same padding
        wp = jnp.pad(w, ((0, 0), (0, 0), (off, K - Ki - off)))
        blocks.append(jnp.transpose(wp, (0, 2, 1)).reshape(nf, K * cb))
    conv_part = jnp.concatenate(blocks, axis=0)               # (3*nf, K*cb)
    top = jnp.concatenate([conv_part, jnp.zeros((3 * nf, ni), jnp.float32)], axis=1)
    bot = jnp.concatenate([jnp.zeros((nf, K * cb), jnp.float32),
                           m["mpconv"][:, :, 0]], axis=1)
    wmod = jnp.concatenate([top, bot], axis=0)                # (4*nf, K*cb + ni)
    return wb.astype(jnp.float32), (wmod * m["bn_scale"]).astype(jnp.float32)


def fuse_params(raw, c_in, B, L):
    nf, kss = raw["nf"], raw["kss"]
    fused = {"modules": [], "shortcuts": []}
    ni0 = max(_round_up(c_in, 8), 8)                          # sublane-aligned input width
    pad0 = ni0 - c_in
    for d, m in enumerate(raw["modules"]):
        ni = ni0 if d == 0 else nf * 4
        if d == 0 and pad0:
            m = dict(m)
            if m["bottleneck"] is None:                       # realize implicit identity
                m["bottleneck"] = jnp.eye(c_in, dtype=jnp.float32)[:, :, None]
            m["bottleneck"] = jnp.pad(m["bottleneck"], ((0, 0), (0, pad0), (0, 0)))
            m["mpconv"] = jnp.pad(m["mpconv"], ((0, 0), (0, pad0), (0, 0)))
        fused["modules"].append(_fuse_module(m, ni, kss))
    for i, sc in enumerate(raw["shortcuts"]):
        if sc["conv"] is not None:                            # ConvBlock(1x1) + BN
            conv = sc["conv"]
            if i == 0 and pad0 and conv.shape[1] == c_in:
                conv = jnp.pad(conv, ((0, 0), (0, pad0), (0, 0)))
            wsc = sc["bn_scale"] * conv[:, :, 0]
        else:                                                 # BN only -> diag scale
            wsc = sc["bn_scale"] * jnp.eye(sc["bn_scale"].shape[0], dtype=jnp.float32)
        fused["shortcuts"].append(wsc.astype(jnp.float32))
    fused["fc_w"] = raw["fc_w"]
    fused["fc_b"] = raw["fc_b"].reshape(-1, 1)
    # block-averaging matrix so GAP is a matmul (no in-kernel reshapes/transposes)
    fused["pool"] = jnp.repeat(jnp.eye(B, dtype=jnp.float32), L, axis=0) / L
    return fused


# --------------------------------- forward -----------------------------------

def trans_model_fwd(x, fused):
    """TransModel.forward: self.model(x.transpose(-1, -2)); x is (B, L, C)."""
    B, L, C = x.shape
    BL = B * L
    mods, scs = fused["modules"], fused["shortcuts"]
    wb0, wmod0 = mods[0]
    ni0 = wb0.shape[1]
    K = (wmod0.shape[1] - ni0) // wb0.shape[0]                # static, from shapes

    # entry layout transform (tiny, one-time): (B, L, C) -> lane-dense (C, B*L)
    a0 = jnp.transpose(x, (2, 0, 1)).reshape(C, BL)
    if ni0 > C:                                               # pad to sublane multiple
        a0 = jnp.concatenate([a0, jnp.zeros((ni0 - C, BL), jnp.float32)], axis=0)

    args = [a0]
    for wb, wmod in mods:
        args += [wb, wmod]
    args += list(scs)
    args += [fused["pool"], fused["fc_w"], fused["fc_b"]]

    c_out = fused["fc_w"].shape[0]
    max_rows = max(wmod.shape[1] for _, wmod in mods)

    flops = 0
    for wb, wmod in mods:
        flops += 2 * wb.shape[0] * wb.shape[1] * BL
        flops += 2 * wmod.shape[0] * wmod.shape[1] * BL
    for wsc in scs:
        flops += 2 * wsc.shape[0] * wsc.shape[1] * BL
    flops += 2 * c_out * fused["fc_w"].shape[1] * BL + 2 * c_out * BL * B
    bytes_accessed = sum(int(a.size) * 4 for a in args) + c_out * B * 4

    out_cb = pl.pallas_call(
        functools.partial(_fused_inception_kernel, depth=len(mods),
                          n_sc=len(scs), B=B, L=L, K=K),
        out_shape=jax.ShapeDtypeStruct((c_out, B), jnp.float32),
        in_specs=[pl.BlockSpec(memory_space=pltpu.MemorySpace.VMEM)] * len(args),
        out_specs=pl.BlockSpec(memory_space=pltpu.MemorySpace.VMEM),
        scratch_shapes=[pltpu.VMEM((max_rows, BL), jnp.float32)],
        cost_estimate=pl.CostEstimate(flops=flops, transcendentals=0,
                                      bytes_accessed=bytes_accessed),
    )(*args)
    return out_cb.T                                           # (B, c_out), tiny


# -------------------------- pure-JAX reference check -------------------------

def _reference_fwd(x, fused):
    """Same math from the same fused weights, per-sample padded-slice im2col."""
    hp = jax.lax.Precision.HIGHEST
    B, L, C = x.shape
    BL = B * L
    wb0, wmod0 = fused["modules"][0]
    ni0 = wb0.shape[1]
    K = (wmod0.shape[1] - ni0) // wb0.shape[0]
    pad = K // 2
    a = jnp.transpose(x, (2, 0, 1)).reshape(C, BL)
    if ni0 > C:
        a = jnp.concatenate([a, jnp.zeros((ni0 - C, BL), jnp.float32)], axis=0)
    res, si = a, 0
    for d, (wb, wmod) in enumerate(fused["modules"]):
        cb = wb.shape[0]
        xb = jnp.dot(wb, a, precision=hp)
        cols = []
        for b in range(B):
            xb_b = xb[:, b * L:(b + 1) * L]
            x_b = a[:, b * L:(b + 1) * L]
            z = jnp.zeros((cb, pad), jnp.float32)
            xb_p = jnp.concatenate([z, xb_b, z], axis=1)
            taps = [xb_p[:, j:j + L] for j in range(K)]
            ninf = jnp.full((x_b.shape[0], 1), -jnp.inf, jnp.float32)
            left = jnp.concatenate([x_b[:, 1:], ninf], axis=1)
            right = jnp.concatenate([ninf, x_b[:, :L - 1]], axis=1)
            taps.append(jnp.maximum(x_b, jnp.maximum(left, right)))
            cols.append(jnp.concatenate(taps, axis=0))
        slab = jnp.concatenate(cols, axis=1)
        y = jnp.maximum(jnp.dot(wmod, slab, precision=hp), 0.0)
        if d % 3 == 2:
            y = jnp.maximum(y + jnp.dot(fused["shortcuts"][si], res, precision=hp), 0.0)
            si += 1
            res = y
        a = y
    h = jnp.dot(fused["fc_w"], a, precision=hp)
    return (jnp.dot(h, fused["pool"], precision=hp) + fused["fc_b"]).T


# ----------------------------------- main -------------------------------------

if __name__ == "__main__":
    B, L, C_in, n_classes = 2, 64, 3, 2                       # x: (batch, seq_len, vars)
    key = jax.random.PRNGKey(0)
    kx, kp = jax.random.split(key)
    x = jax.random.normal(kx, (B, L, C_in), dtype=jnp.float32)

    raw = init_inception_time(kp, C_in, n_classes, nf=8, depth=6)
    fused = fuse_params(raw, C_in, B, L)

    fwd = jax.jit(trans_model_fwd)
    out = jax.block_until_ready(fwd(x, fused))
    assert out.shape == (B, n_classes), out.shape
    assert bool(jnp.all(jnp.isfinite(out)))

    ref = _reference_fwd(x, fused)
    assert bool(jnp.allclose(out, ref, atol=2e-3, rtol=2e-3)), (out, ref)
    print("KERNEL_OK")
</pallas_src>

<mosaic_0001>
module attributes {stable_mosaic.version = 11 : i64} {
  func.func @_fused_inception_kernel(%arg0: memref<8x128xf32, #tpu.memory_space<vmem>>, %arg1: memref<8x8xf32, #tpu.memory_space<vmem>>, %arg2: memref<32x320xf32, #tpu.memory_space<vmem>>, %arg3: memref<8x32xf32, #tpu.memory_space<vmem>>, %arg4: memref<32x344xf32, #tpu.memory_space<vmem>>, %arg5: memref<8x32xf32, #tpu.memory_space<vmem>>, %arg6: memref<32x344xf32, #tpu.memory_space<vmem>>, %arg7: memref<8x32xf32, #tpu.memory_space<vmem>>, %arg8: memref<32x344xf32, #tpu.memory_space<vmem>>, %arg9: memref<8x32xf32, #tpu.memory_space<vmem>>, %arg10: memref<32x344xf32, #tpu.memory_space<vmem>>, %arg11: memref<8x32xf32, #tpu.memory_space<vmem>>, %arg12: memref<32x344xf32, #tpu.memory_space<vmem>>, %arg13: memref<32x8xf32, #tpu.memory_space<vmem>>, %arg14: memref<32x32xf32, #tpu.memory_space<vmem>>, %arg15: memref<128x2xf32, #tpu.memory_space<vmem>>, %arg16: memref<2x32xf32, #tpu.memory_space<vmem>>, %arg17: memref<2x1xf32, #tpu.memory_space<vmem>>, %arg18: memref<2x2xf32, #tpu.memory_space<vmem>>, %arg19: memref<344x128xf32, #tpu.memory_space<vmem>>) attributes {dimension_semantics = [], scalar_prefetch = 0 : i64, scratch_operands = 1 : i64, tpu.core_type = #tpu.core_type<tc>} {
    %0 = tpu.iota {dimensions = array<i32: 1>} : vector<1x128xi32>
    %c64_i32 = arith.constant 64 : i32
    %c0_i32 = arith.constant 0 : i32
    %1 = arith.cmpi eq, %c64_i32, %c0_i32 : i32
    %c1_i32 = arith.constant 1 : i32
    %2 = arith.select %1, %c1_i32, %c64_i32 : i32
    %3 = vector.broadcast %2 : i32 to vector<1x128xi32>
    %4 = arith.remsi %0, %3 : vector<1x128xi32>
    %c0_i32_0 = arith.constant 0 : i32
    %5 = vector.broadcast %c0_i32_0 : i32 to vector<1x128xi32>
    %6 = arith.cmpi ne, %4, %5 : vector<1x128xi32>
    %c0_i32_1 = arith.constant 0 : i32
    %7 = vector.broadcast %c0_i32_1 : i32 to vector<1x128xi32>
    %8 = arith.cmpi slt, %4, %7 : vector<1x128xi32>
    %c0_i32_2 = arith.constant 0 : i32
    %9 = arith.cmpi slt, %2, %c0_i32_2 : i32
    %10 = vector.broadcast %9 : i1 to vector<1x128xi1>
    %11 = vector.broadcast %10 : vector<1x128xi1> to vector<1x128xi1>
    %12 = arith.xori %8, %11 : vector<1x128xi1>
    %13 = arith.andi %12, %6 : vector<1x128xi1>
    %14 = vector.broadcast %2 : i32 to vector<1x128xi32>
    %15 = arith.addi %4, %14 : vector<1x128xi32>
    %16 = arith.select %13, %15, %4 : vector<1x128xi1>, vector<1x128xi32>
    %c-19_i32 = arith.constant -19 : i32
    %17 = vector.broadcast %c-19_i32 : i32 to vector<1x128xi32>
    %18 = arith.addi %16, %17 : vector<1x128xi32>
    %c0_i32_3 = arith.constant 0 : i32
    %19 = vector.broadcast %c0_i32_3 : i32 to vector<1x128xi32>
    %20 = arith.cmpi sge, %18, %19 : vector<1x128xi32>
    %c-19_i32_4 = arith.constant -19 : i32
    %21 = vector.broadcast %c-19_i32_4 : i32 to vector<1x128xi32>
    %22 = arith.addi %16, %21 : vector<1x128xi32>
    %c64_i32_5 = arith.constant 64 : i32
    %23 = vector.broadcast %c64_i32_5 : i32 to vector<1x128xi32>
    %24 = arith.cmpi slt, %22, %23 : vector<1x128xi32>
    %25 = arith.andi %20, %24 : vector<1x128xi1>
    %c-18_i32 = arith.constant -18 : i32
    %26 = vector.broadcast %c-18_i32 : i32 to vector<1x128xi32>
    %27 = arith.addi %16, %26 : vector<1x128xi32>
    %c0_i32_6 = arith.constant 0 : i32
    %28 = vector.broadcast %c0_i32_6 : i32 to vector<1x128xi32>
    %29 = arith.cmpi sge, %27, %28 : vector<1x128xi32>
    %c-18_i32_7 = arith.constant -18 : i32
    %30 = vector.broadcast %c-18_i32_7 : i32 to vector<1x128xi32>
    %31 = arith.addi %16, %30 : vector<1x128xi32>
    %c64_i32_8 = arith.constant 64 : i32
    %32 = vector.broadcast %c64_i32_8 : i32 to vector<1x128xi32>
    %33 = arith.cmpi slt, %31, %32 : vector<1x128xi32>
    %34 = arith.andi %29, %33 : vector<1x128xi1>
    %c-17_i32 = arith.constant -17 : i32
    %35 = vector.broadcast %c-17_i32 : i32 to vector<1x128xi32>
    %36 = arith.addi %16, %35 : vector<1x128xi32>
    %c0_i32_9 = arith.constant 0 : i32
    %37 = vector.broadcast %c0_i32_9 : i32 to vector<1x128xi32>
    %38 = arith.cmpi sge, %36, %37 : vector<1x128xi32>
    %c-17_i32_10 = arith.constant -17 : i32
    %39 = vector.broadcast %c-17_i32_10 : i32 to vector<1x128xi32>
    %40 = arith.addi %16, %39 : vector<1x128xi32>
    %c64_i32_11 = arith.constant 64 : i32
    %41 = vector.broadcast %c64_i32_11 : i32 to vector<1x128xi32>
    %42 = arith.cmpi slt, %40, %41 : vector<1x128xi32>
    %43 = arith.andi %38, %42 : vector<1x128xi1>
    %c-16_i32 = arith.constant -16 : i32
    %44 = vector.broadcast %c-16_i32 : i32 to vector<1x128xi32>
    %45 = arith.addi %16, %44 : vector<1x128xi32>
    %c0_i32_12 = arith.constant 0 : i32
    %46 = vector.broadcast %c0_i32_12 : i32 to vector<1x128xi32>
    %47 = arith.cmpi sge, %45, %46 : vector<1x128xi32>
    %c-16_i32_13 = arith.constant -16 : i32
    %48 = vector.broadcast %c-16_i32_13 : i32 to vector<1x128xi32>
    %49 = arith.addi %16, %48 : vector<1x128xi32>
    %c64_i32_14 = arith.constant 64 : i32
    %50 = vector.broadcast %c64_i32_14 : i32 to vector<1x128xi32>
    %51 = arith.cmpi slt, %49, %50 : vector<1x128xi32>
    %52 = arith.andi %47, %51 : vector<1x128xi1>
    %c-15_i32 = arith.constant -15 : i32
    %53 = vector.broadcast %c-15_i32 : i32 to vector<1x128xi32>
    %54 = arith.addi %16, %53 : vector<1x128xi32>
    %c0_i32_15 = arith.constant 0 : i32
    %55 = vector.broadcast %c0_i32_15 : i32 to vector<1x128xi32>
    %56 = arith.cmpi sge, %54, %55 : vector<1x128xi32>
    %c-15_i32_16 = arith.constant -15 : i32
    %57 = vector.broadcast %c-15_i32_16 : i32 to vector<1x128xi32>
    %58 = arith.addi %16, %57 : vector<1x128xi32>
    %c64_i32_17 = arith.constant 64 : i32
    %59 = vector.broadcast %c64_i32_17 : i32 to vector<1x128xi32>
    %60 = arith.cmpi slt, %58, %59 : vector<1x128xi32>
    %61 = arith.andi %56, %60 : vector<1x128xi1>
    %c-14_i32 = arith.constant -14 : i32
    %62 = vector.broadcast %c-14_i32 : i32 to vector<1x128xi32>
    %63 = arith.addi %16, %62 : vector<1x128xi32>
    %c0_i32_18 = arith.constant 0 : i32
    %64 = vector.broadcast %c0_i32_18 : i32 to vector<1x128xi32>
    %65 = arith.cmpi sge, %63, %64 : vector<1x128xi32>
    %c-14_i32_19 = arith.constant -14 : i32
    %66 = vector.broadcast %c-14_i32_19 : i32 to vector<1x128xi32>
    %67 = arith.addi %16, %66 : vector<1x128xi32>
    %c64_i32_20 = arith.constant 64 : i32
    %68 = vector.broadcast %c64_i32_20 : i32 to vector<1x128xi32>
    %69 = arith.cmpi slt, %67, %68 : vector<1x128xi32>
    %70 = arith.andi %65, %69 : vector<1x128xi1>
    %c-13_i32 = arith.constant -13 : i32
    %71 = vector.broadcast %c-13_i32 : i32 to vector<1x128xi32>
    %72 = arith.addi %16, %71 : vector<1x128xi32>
    %c0_i32_21 = arith.constant 0 : i32
    %73 = vector.broadcast %c0_i32_21 : i32 to vector<1x128xi32>
    %74 = arith.cmpi sge, %72, %73 : vector<1x128xi32>
    %c-13_i32_22 = arith.constant -13 : i32
    %75 = vector.broadcast %c-13_i32_22 : i32 to vector<1x128xi32>
    %76 = arith.addi %16, %75 : vector<1x128xi32>
    %c64_i32_23 = arith.constant 64 : i32
    %77 = vector.broadcast %c64_i32_23 : i32 to vector<1x128xi32>
    %78 = arith.cmpi slt, %76, %77 : vector<1x128xi32>
    %79 = arith.andi %74, %78 : vector<1x128xi1>
    %c-12_i32 = arith.constant -12 : i32
    %80 = vector.broadcast %c-12_i32 : i32 to vector<1x128xi32>
    %81 = arith.addi %16, %80 : vector<1x128xi32>
    %c0_i32_24 = arith.constant 0 : i32
    %82 = vector.broadcast %c0_i32_24 : i32 to vector<1x128xi32>
    %83 = arith.cmpi sge, %81, %82 : vector<1x128xi32>
    %c-12_i32_25 = arith.constant -12 : i32
    %84 = vector.broadcast %c-12_i32_25 : i32 to vector<1x128xi32>
    %85 = arith.addi %16, %84 : vector<1x128xi32>
    %c64_i32_26 = arith.constant 64 : i32
    %86 = vector.broadcast %c64_i32_26 : i32 to vector<1x128xi32>
    %87 = arith.cmpi slt, %85, %86 : vector<1x128xi32>
    %88 = arith.andi %83, %87 : vector<1x128xi1>
    %c-11_i32 = arith.constant -11 : i32
    %89 = vector.broadcast %c-11_i32 : i32 to vector<1x128xi32>
    %90 = arith.addi %16, %89 : vector<1x128xi32>
    %c0_i32_27 = arith.constant 0 : i32
    %91 = vector.broadcast %c0_i32_27 : i32 to vector<1x128xi32>
    %92 = arith.cmpi sge, %90, %91 : vector<1x128xi32>
    %c-11_i32_28 = arith.constant -11 : i32
    %93 = vector.broadcast %c-11_i32_28 : i32 to vector<1x128xi32>
    %94 = arith.addi %16, %93 : vector<1x128xi32>
    %c64_i32_29 = arith.constant 64 : i32
    %95 = vector.broadcast %c64_i32_29 : i32 to vector<1x128xi32>
    %96 = arith.cmpi slt, %94, %95 : vector<1x128xi32>
    %97 = arith.andi %92, %96 : vector<1x128xi1>
    %c-10_i32 = arith.constant -10 : i32
    %98 = vector.broadcast %c-10_i32 : i32 to vector<1x128xi32>
    %99 = arith.addi %16, %98 : vector<1x128xi32>
    %c0_i32_30 = arith.constant 0 : i32
    %100 = vector.broadcast %c0_i32_30 : i32 to vector<1x128xi32>
    %101 = arith.cmpi sge, %99, %100 : vector<1x128xi32>
    %c-10_i32_31 = arith.constant -10 : i32
    %102 = vector.broadcast %c-10_i32_31 : i32 to vector<1x128xi32>
    %103 = arith.addi %16, %102 : vector<1x128xi32>
    %c64_i32_32 = arith.constant 64 : i32
    %104 = vector.broadcast %c64_i32_32 : i32 to vector<1x128xi32>
    %105 = arith.cmpi slt, %103, %104 : vector<1x128xi32>
    %106 = arith.andi %101, %105 : vector<1x128xi1>
    %c-9_i32 = arith.constant -9 : i32
    %107 = vector.broadcast %c-9_i32 : i32 to vector<1x128xi32>
    %108 = arith.addi %16, %107 : vector<1x128xi32>
    %c0_i32_33 = arith.constant 0 : i32
    %109 = vector.broadcast %c0_i32_33 : i32 to vector<1x128xi32>
    %110 = arith.cmpi sge, %108, %109 : vector<1x128xi32>
    %c-9_i32_34 = arith.constant -9 : i32
    %111 = vector.broadcast %c-9_i32_34 : i32 to vector<1x128xi32>
    %112 = arith.addi %16, %111 : vector<1x128xi32>
    %c64_i32_35 = arith.constant 64 : i32
    %113 = vector.broadcast %c64_i32_35 : i32 to vector<1x128xi32>
    %114 = arith.cmpi slt, %112, %113 : vector<1x128xi32>
    %115 = arith.andi %110, %114 : vector<1x128xi1>
    %c-8_i32 = arith.constant -8 : i32
    %116 = vector.broadcast %c-8_i32 : i32 to vector<1x128xi32>
    %117 = arith.addi %16, %116 : vector<1x128xi32>
    %c0_i32_36 = arith.constant 0 : i32
    %118 = vector.broadcast %c0_i32_36 : i32 to vector<1x128xi32>
    %119 = arith.cmpi sge, %117, %118 : vector<1x128xi32>
    %c-8_i32_37 = arith.constant -8 : i32
    %120 = vector.broadcast %c-8_i32_37 : i32 to vector<1x128xi32>
    %121 = arith.addi %16, %120 : vector<1x128xi32>
    %c64_i32_38 = arith.constant 64 : i32
    %122 = vector.broadcast %c64_i32_38 : i32 to vector<1x128xi32>
    %123 = arith.cmpi slt, %121, %122 : vector<1x128xi32>
    %124 = arith.andi %119, %123 : vector<1x128xi1>
    %c-7_i32 = arith.constant -7 : i32
    %125 = vector.broadcast %c-7_i32 : i32 to vector<1x128xi32>
    %126 = arith.addi %16, %125 : vector<1x128xi32>
    %c0_i32_39 = arith.constant 0 : i32
    %127 = vector.broadcast %c0_i32_39 : i32 to vector<1x128xi32>
    %128 = arith.cmpi sge, %126, %127 : vector<1x128xi32>
    %c-7_i32_40 = arith.constant -7 : i32
    %129 = vector.broadcast %c-7_i32_40 : i32 to vector<1x128xi32>
    %130 = arith.addi %16, %129 : vector<1x128xi32>
    %c64_i32_41 = arith.constant 64 : i32
    %131 = vector.broadcast %c64_i32_41 : i32 to vector<1x128xi32>
    %132 = arith.cmpi slt, %130, %131 : vector<1x128xi32>
    %133 = arith.andi %128, %132 : vector<1x128xi1>
    %c-6_i32 = arith.constant -6 : i32
    %134 = vector.broadcast %c-6_i32 : i32 to vector<1x128xi32>
    %135 = arith.addi %16, %134 : vector<1x128xi32>
    %c0_i32_42 = arith.constant 0 : i32
    %136 = vector.broadcast %c0_i32_42 : i32 to vector<1x128xi32>
    %137 = arith.cmpi sge, %135, %136 : vector<1x128xi32>
    %c-6_i32_43 = arith.constant -6 : i32
    %138 = vector.broadcast %c-6_i32_43 : i32 to vector<1x128xi32>
    %139 = arith.addi %16, %138 : vector<1x128xi32>
    %c64_i32_44 = arith.constant 64 : i32
    %140 = vector.broadcast %c64_i32_44 : i32 to vector<1x128xi32>
    %141 = arith.cmpi slt, %139, %140 : vector<1x128xi32>
    %142 = arith.andi %137, %141 : vector<1x128xi1>
    %c-5_i32 = arith.constant -5 : i32
    %143 = vector.broadcast %c-5_i32 : i32 to vector<1x128xi32>
    %144 = arith.addi %16, %143 : vector<1x128xi32>
    %c0_i32_45 = arith.constant 0 : i32
    %145 = vector.broadcast %c0_i32_45 : i32 to vector<1x128xi32>
    %146 = arith.cmpi sge, %144, %145 : vector<1x128xi32>
    %c-5_i32_46 = arith.constant -5 : i32
    %147 = vector.broadcast %c-5_i32_46 : i32 to vector<1x128xi32>
    %148 = arith.addi %16, %147 : vector<1x128xi32>
    %c64_i32_47 = arith.constant 64 : i32
    %149 = vector.broadcast %c64_i32_47 : i32 to vector<1x128xi32>
    %150 = arith.cmpi slt, %148, %149 : vector<1x128xi32>
    %151 = arith.andi %146, %150 : vector<1x128xi1>
    %c-4_i32 = arith.constant -4 : i32
    %152 = vector.broadcast %c-4_i32 : i32 to vector<1x128xi32>
    %153 = arith.addi %16, %152 : vector<1x128xi32>
    %c0_i32_48 = arith.constant 0 : i32
    %154 = vector.broadcast %c0_i32_48 : i32 to vector<1x128xi32>
    %155 = arith.cmpi sge, %153, %154 : vector<1x128xi32>
    %c-4_i32_49 = arith.constant -4 : i32
    %156 = vector.broadcast %c-4_i32_49 : i32 to vector<1x128xi32>
    %157 = arith.addi %16, %156 : vector<1x128xi32>
    %c64_i32_50 = arith.constant 64 : i32
    %158 = vector.broadcast %c64_i32_50 : i32 to vector<1x128xi32>
    %159 = arith.cmpi slt, %157, %158 : vector<1x128xi32>
    %160 = arith.andi %155, %159 : vector<1x128xi1>
    %c-3_i32 = arith.constant -3 : i32
    %161 = vector.broadcast %c-3_i32 : i32 to vector<1x128xi32>
    %162 = arith.addi %16, %161 : vector<1x128xi32>
    %c0_i32_51 = arith.constant 0 : i32
    %163 = vector.broadcast %c0_i32_51 : i32 to vector<1x128xi32>
    %164 = arith.cmpi sge, %162, %163 : vector<1x128xi32>
    %c-3_i32_52 = arith.constant -3 : i32
    %165 = vector.broadcast %c-3_i32_52 : i32 to vector<1x128xi32>
    %166 = arith.addi %16, %165 : vector<1x128xi32>
    %c64_i32_53 = arith.constant 64 : i32
    %167 = vector.broadcast %c64_i32_53 : i32 to vector<1x128xi32>
    %168 = arith.cmpi slt, %166, %167 : vector<1x128xi32>
    %169 = arith.andi %164, %168 : vector<1x128xi1>
    %c-2_i32 = arith.constant -2 : i32
    %170 = vector.broadcast %c-2_i32 : i32 to vector<1x128xi32>
    %171 = arith.addi %16, %170 : vector<1x128xi32>
    %c0_i32_54 = arith.constant 0 : i32
    %172 = vector.broadcast %c0_i32_54 : i32 to vector<1x128xi32>
    %173 = arith.cmpi sge, %171, %172 : vector<1x128xi32>
    %c-2_i32_55 = arith.constant -2 : i32
    %174 = vector.broadcast %c-2_i32_55 : i32 to vector<1x128xi32>
    %175 = arith.addi %16, %174 : vector<1x128xi32>
    %c64_i32_56 = arith.constant 64 : i32
    %176 = vector.broadcast %c64_i32_56 : i32 to vector<1x128xi32>
    %177 = arith.cmpi slt, %175, %176 : vector<1x128xi32>
    %178 = arith.andi %173, %177 : vector<1x128xi1>
    %c-1_i32 = arith.constant -1 : i32
    %179 = vector.broadcast %c-1_i32 : i32 to vector<1x128xi32>
    %180 = arith.addi %16, %179 : vector<1x128xi32>
    %c0_i32_57 = arith.constant 0 : i32
    %181 = vector.broadcast %c0_i32_57 : i32 to vector<1x128xi32>
    %182 = arith.cmpi sge, %180, %181 : vector<1x128xi32>
    %c-1_i32_58 = arith.constant -1 : i32
    %183 = vector.broadcast %c-1_i32_58 : i32 to vector<1x128xi32>
    %184 = arith.addi %16, %183 : vector<1x128xi32>
    %c64_i32_59 = arith.constant 64 : i32
    %185 = vector.broadcast %c64_i32_59 : i32 to vector<1x128xi32>
    %186 = arith.cmpi slt, %184, %185 : vector<1x128xi32>
    %187 = arith.andi %182, %186 : vector<1x128xi1>
    %c1_i32_60 = arith.constant 1 : i32
    %188 = vector.broadcast %c1_i32_60 : i32 to vector<1x128xi32>
    %189 = arith.addi %16, %188 : vector<1x128xi32>
    %c0_i32_61 = arith.constant 0 : i32
    %190 = vector.broadcast %c0_i32_61 : i32 to vector<1x128xi32>
    %191 = arith.cmpi sge, %189, %190 : vector<1x128xi32>
    %c1_i32_62 = arith.constant 1 : i32
    %192 = vector.broadcast %c1_i32_62 : i32 to vector<1x128xi32>
    %193 = arith.addi %16, %192 : vector<1x128xi32>
    %c64_i32_63 = arith.constant 64 : i32
    %194 = vector.broadcast %c64_i32_63 : i32 to vector<1x128xi32>
    %195 = arith.cmpi slt, %193, %194 : vector<1x128xi32>
    %196 = arith.andi %191, %195 : vector<1x128xi1>
    %c2_i32 = arith.constant 2 : i32
    %197 = vector.broadcast %c2_i32 : i32 to vector<1x128xi32>
    %198 = arith.addi %16, %197 : vector<1x128xi32>
    %c0_i32_64 = arith.constant 0 : i32
    %199 = vector.broadcast %c0_i32_64 : i32 to vector<1x128xi32>
    %200 = arith.cmpi sge, %198, %199 : vector<1x128xi32>
    %c2_i32_65 = arith.constant 2 : i32
    %201 = vector.broadcast %c2_i32_65 : i32 to vector<1x128xi32>
    %202 = arith.addi %16, %201 : vector<1x128xi32>
    %c64_i32_66 = arith.constant 64 : i32
    %203 = vector.broadcast %c64_i32_66 : i32 to vector<1x128xi32>
    %204 = arith.cmpi slt, %202, %203 : vector<1x128xi32>
    %205 = arith.andi %200, %204 : vector<1x128xi1>
    %c3_i32 = arith.constant 3 : i32
    %206 = vector.broadcast %c3_i32 : i32 to vector<1x128xi32>
    %207 = arith.addi %16, %206 : vector<1x128xi32>
    %c0_i32_67 = arith.constant 0 : i32
    %208 = vector.broadcast %c0_i32_67 : i32 to vector<1x128xi32>
    %209 = arith.cmpi sge, %207, %208 : vector<1x128xi32>
    %c3_i32_68 = arith.constant 3 : i32
    %210 = vector.broadcast %c3_i32_68 : i32 to vector<1x128xi32>
    %211 = arith.addi %16, %210 : vector<1x128xi32>
    %c64_i32_69 = arith.constant 64 : i32
    %212 = vector.broadcast %c64_i32_69 : i32 to vector<1x128xi32>
    %213 = arith.cmpi slt, %211, %212 : vector<1x128xi32>
    %214 = arith.andi %209, %213 : vector<1x128xi1>
    %c4_i32 = arith.constant 4 : i32
    %215 = vector.broadcast %c4_i32 : i32 to vector<1x128xi32>
    %216 = arith.addi %16, %215 : vector<1x128xi32>
    %c0_i32_70 = arith.constant 0 : i32
    %217 = vector.broadcast %c0_i32_70 : i32 to vector<1x128xi32>
    %218 = arith.cmpi sge, %216, %217 : vector<1x128xi32>
    %c4_i32_71 = arith.constant 4 : i32
    %219 = vector.broadcast %c4_i32_71 : i32 to vector<1x128xi32>
    %220 = arith.addi %16, %219 : vector<1x128xi32>
    %c64_i32_72 = arith.constant 64 : i32
    %221 = vector.broadcast %c64_i32_72 : i32 to vector<1x128xi32>
    %222 = arith.cmpi slt, %220, %221 : vector<1x128xi32>
    %223 = arith.andi %218, %222 : vector<1x128xi1>
    %c5_i32 = arith.constant 5 : i32
    %224 = vector.broadcast %c5_i32 : i32 to vector<1x128xi32>
    %225 = arith.addi %16, %224 : vector<1x128xi32>
    %c0_i32_73 = arith.constant 0 : i32
    %226 = vector.broadcast %c0_i32_73 : i32 to vector<1x128xi32>
    %227 = arith.cmpi sge, %225, %226 : vector<1x128xi32>
    %c5_i32_74 = arith.constant 5 : i32
    %228 = vector.broadcast %c5_i32_74 : i32 to vector<1x128xi32>
    %229 = arith.addi %16, %228 : vector<1x128xi32>
    %c64_i32_75 = arith.constant 64 : i32
    %230 = vector.broadcast %c64_i32_75 : i32 to vector<1x128xi32>
    %231 = arith.cmpi slt, %229, %230 : vector<1x128xi32>
    %232 = arith.andi %227, %231 : vector<1x128xi1>
    %c6_i32 = arith.constant 6 : i32
    %233 = vector.broadcast %c6_i32 : i32 to vector<1x128xi32>
    %234 = arith.addi %16, %233 : vector<1x128xi32>
    %c0_i32_76 = arith.constant 0 : i32
    %235 = vector.broadcast %c0_i32_76 : i32 to vector<1x128xi32>
    %236 = arith.cmpi sge, %234, %235 : vector<1x128xi32>
    %c6_i32_77 = arith.constant 6 : i32
    %237 = vector.broadcast %c6_i32_77 : i32 to vector<1x128xi32>
    %238 = arith.addi %16, %237 : vector<1x128xi32>
    %c64_i32_78 = arith.constant 64 : i32
    %239 = vector.broadcast %c64_i32_78 : i32 to vector<1x128xi32>
    %240 = arith.cmpi slt, %238, %239 : vector<1x128xi32>
    %241 = arith.andi %236, %240 : vector<1x128xi1>
    %c7_i32 = arith.constant 7 : i32
    %242 = vector.broadcast %c7_i32 : i32 to vector<1x128xi32>
    %243 = arith.addi %16, %242 : vector<1x128xi32>
    %c0_i32_79 = arith.constant 0 : i32
    %244 = vector.broadcast %c0_i32_79 : i32 to vector<1x128xi32>
    %245 = arith.cmpi sge, %243, %244 : vector<1x128xi32>
    %c7_i32_80 = arith.constant 7 : i32
    %246 = vector.broadcast %c7_i32_80 : i32 to vector<1x128xi32>
    %247 = arith.addi %16, %246 : vector<1x128xi32>
    %c64_i32_81 = arith.constant 64 : i32
    %248 = vector.broadcast %c64_i32_81 : i32 to vector<1x128xi32>
    %249 = arith.cmpi slt, %247, %248 : vector<1x128xi32>
    %250 = arith.andi %245, %249 : vector<1x128xi1>
    %c8_i32 = arith.constant 8 : i32
    %251 = vector.broadcast %c8_i32 : i32 to vector<1x128xi32>
    %252 = arith.addi %16, %251 : vector<1x128xi32>
    %c0_i32_82 = arith.constant 0 : i32
    %253 = vector.broadcast %c0_i32_82 : i32 to vector<1x128xi32>
    %254 = arith.cmpi sge, %252, %253 : vector<1x128xi32>
    %c8_i32_83 = arith.constant 8 : i32
    %255 = vector.broadcast %c8_i32_83 : i32 to vector<1x128xi32>
    %256 = arith.addi %16, %255 : vector<1x128xi32>
    %c64_i32_84 = arith.constant 64 : i32
    %257 = vector.broadcast %c64_i32_84 : i32 to vector<1x128xi32>
    %258 = arith.cmpi slt, %256, %257 : vector<1x128xi32>
    %259 = arith.andi %254, %258 : vector<1x128xi1>
    %c9_i32 = arith.constant 9 : i32
    %260 = vector.broadcast %c9_i32 : i32 to vector<1x128xi32>
    %261 = arith.addi %16, %260 : vector<1x128xi32>
    %c0_i32_85 = arith.constant 0 : i32
    %262 = vector.broadcast %c0_i32_85 : i32 to vector<1x128xi32>
    %263 = arith.cmpi sge, %261, %262 : vector<1x128xi32>
    %c9_i32_86 = arith.constant 9 : i32
    %264 = vector.broadcast %c9_i32_86 : i32 to vector<1x128xi32>
    %265 = arith.addi %16, %264 : vector<1x128xi32>
    %c64_i32_87 = arith.constant 64 : i32
    %266 = vector.broadcast %c64_i32_87 : i32 to vector<1x128xi32>
    %267 = arith.cmpi slt, %265, %266 : vector<1x128xi32>
    %268 = arith.andi %263, %267 : vector<1x128xi1>
    %c10_i32 = arith.constant 10 : i32
    %269 = vector.broadcast %c10_i32 : i32 to vector<1x128xi32>
    %270 = arith.addi %16, %269 : vector<1x128xi32>
    %c0_i32_88 = arith.constant 0 : i32
    %271 = vector.broadcast %c0_i32_88 : i32 to vector<1x128xi32>
    %272 = arith.cmpi sge, %270, %271 : vector<1x128xi32>
    %c10_i32_89 = arith.constant 10 : i32
    %273 = vector.broadcast %c10_i32_89 : i32 to vector<1x128xi32>
    %274 = arith.addi %16, %273 : vector<1x128xi32>
    %c64_i32_90 = arith.constant 64 : i32
    %275 = vector.broadcast %c64_i32_90 : i32 to vector<1x128xi32>
    %276 = arith.cmpi slt, %274, %275 : vector<1x128xi32>
    %277 = arith.andi %272, %276 : vector<1x128xi1>
    %c11_i32 = arith.constant 11 : i32
    %278 = vector.broadcast %c11_i32 : i32 to vector<1x128xi32>
    %279 = arith.addi %16, %278 : vector<1x128xi32>
    %c0_i32_91 = arith.constant 0 : i32
    %280 = vector.broadcast %c0_i32_91 : i32 to vector<1x128xi32>
    %281 = arith.cmpi sge, %279, %280 : vector<1x128xi32>
    %c11_i32_92 = arith.constant 11 : i32
    %282 = vector.broadcast %c11_i32_92 : i32 to vector<1x128xi32>
    %283 = arith.addi %16, %282 : vector<1x128xi32>
    %c64_i32_93 = arith.constant 64 : i32
    %284 = vector.broadcast %c64_i32_93 : i32 to vector<1x128xi32>
    %285 = arith.cmpi slt, %283, %284 : vector<1x128xi32>
    %286 = arith.andi %281, %285 : vector<1x128xi1>
    %c12_i32 = arith.constant 12 : i32
    %287 = vector.broadcast %c12_i32 : i32 to vector<1x128xi32>
    %288 = arith.addi %16, %287 : vector<1x128xi32>
    %c0_i32_94 = arith.constant 0 : i32
    %289 = vector.broadcast %c0_i32_94 : i32 to vector<1x128xi32>
    %290 = arith.cmpi sge, %288, %289 : vector<1x128xi32>
    %c12_i32_95 = arith.constant 12 : i32
    %291 = vector.broadcast %c12_i32_95 : i32 to vector<1x128xi32>
    %292 = arith.addi %16, %291 : vector<1x128xi32>
    %c64_i32_96 = arith.constant 64 : i32
    %293 = vector.broadcast %c64_i32_96 : i32 to vector<1x128xi32>
    %294 = arith.cmpi slt, %292, %293 : vector<1x128xi32>
    %295 = arith.andi %290, %294 : vector<1x128xi1>
    %c13_i32 = arith.constant 13 : i32
    %296 = vector.broadcast %c13_i32 : i32 to vector<1x128xi32>
    %297 = arith.addi %16, %296 : vector<1x128xi32>
    %c0_i32_97 = arith.constant 0 : i32
    %298 = vector.broadcast %c0_i32_97 : i32 to vector<1x128xi32>
    %299 = arith.cmpi sge, %297, %298 : vector<1x128xi32>
    %c13_i32_98 = arith.constant 13 : i32
    %300 = vector.broadcast %c13_i32_98 : i32 to vector<1x128xi32>
    %301 = arith.addi %16, %300 : vector<1x128xi32>
    %c64_i32_99 = arith.constant 64 : i32
    %302 = vector.broadcast %c64_i32_99 : i32 to vector<1x128xi32>
    %303 = arith.cmpi slt, %301, %302 : vector<1x128xi32>
    %304 = arith.andi %299, %303 : vector<1x128xi1>
    %c14_i32 = arith.constant 14 : i32
    %305 = vector.broadcast %c14_i32 : i32 to vector<1x128xi32>
    %306 = arith.addi %16, %305 : vector<1x128xi32>
    %c0_i32_100 = arith.constant 0 : i32
    %307 = vector.broadcast %c0_i32_100 : i32 to vector<1x128xi32>
    %308 = arith.cmpi sge, %306, %307 : vector<1x128xi32>
    %c14_i32_101 = arith.constant 14 : i32
    %309 = vector.broadcast %c14_i32_101 : i32 to vector<1x128xi32>
    %310 = arith.addi %16, %309 : vector<1x128xi32>
    %c64_i32_102 = arith.constant 64 : i32
    %311 = vector.broadcast %c64_i32_102 : i32 to vector<1x128xi32>
    %312 = arith.cmpi slt, %310, %311 : vector<1x128xi32>
    %313 = arith.andi %308, %312 : vector<1x128xi1>
    %c15_i32 = arith.constant 15 : i32
    %314 = vector.broadcast %c15_i32 : i32 to vector<1x128xi32>
    %315 = arith.addi %16, %314 : vector<1x128xi32>
    %c0_i32_103 = arith.constant 0 : i32
    %316 = vector.broadcast %c0_i32_103 : i32 to vector<1x128xi32>
    %317 = arith.cmpi sge, %315, %316 : vector<1x128xi32>
    %c15_i32_104 = arith.constant 15 : i32
    %318 = vector.broadcast %c15_i32_104 : i32 to vector<1x128xi32>
    %319 = arith.addi %16, %318 : vector<1x128xi32>
    %c64_i32_105 = arith.constant 64 : i32
    %320 = vector.broadcast %c64_i32_105 : i32 to vector<1x128xi32>
    %321 = arith.cmpi slt, %319, %320 : vector<1x128xi32>
    %322 = arith.andi %317, %321 : vector<1x128xi1>
    %c16_i32 = arith.constant 16 : i32
    %323 = vector.broadcast %c16_i32 : i32 to vector<1x128xi32>
    %324 = arith.addi %16, %323 : vector<1x128xi32>
    %c0_i32_106 = arith.constant 0 : i32
    %325 = vector.broadcast %c0_i32_106 : i32 to vector<1x128xi32>
    %326 = arith.cmpi sge, %324, %325 : vector<1x128xi32>
    %c16_i32_107 = arith.constant 16 : i32
    %327 = vector.broadcast %c16_i32_107 : i32 to vector<1x128xi32>
    %328 = arith.addi %16, %327 : vector<1x128xi32>
    %c64_i32_108 = arith.constant 64 : i32
    %329 = vector.broadcast %c64_i32_108 : i32 to vector<1x128xi32>
    %330 = arith.cmpi slt, %328, %329 : vector<1x128xi32>
    %331 = arith.andi %326, %330 : vector<1x128xi1>
    %c17_i32 = arith.constant 17 : i32
    %332 = vector.broadcast %c17_i32 : i32 to vector<1x128xi32>
    %333 = arith.addi %16, %332 : vector<1x128xi32>
    %c0_i32_109 = arith.constant 0 : i32
    %334 = vector.broadcast %c0_i32_109 : i32 to vector<1x128xi32>
    %335 = arith.cmpi sge, %333, %334 : vector<1x128xi32>
    %c17_i32_110 = arith.constant 17 : i32
    %336 = vector.broadcast %c17_i32_110 : i32 to vector<1x128xi32>
    %337 = arith.addi %16, %336 : vector<1x128xi32>
    %c64_i32_111 = arith.constant 64 : i32
    %338 = vector.broadcast %c64_i32_111 : i32 to vector<1x128xi32>
    %339 = arith.cmpi slt, %337, %338 : vector<1x128xi32>
    %340 = arith.andi %335, %339 : vector<1x128xi1>
    %c18_i32 = arith.constant 18 : i32
    %341 = vector.broadcast %c18_i32 : i32 to vector<1x128xi32>
    %342 = arith.addi %16, %341 : vector<1x128xi32>
    %c0_i32_112 = arith.constant 0 : i32
    %343 = vector.broadcast %c0_i32_112 : i32 to vector<1x128xi32>
    %344 = arith.cmpi sge, %342, %343 : vector<1x128xi32>
    %c18_i32_113 = arith.constant 18 : i32
    %345 = vector.broadcast %c18_i32_113 : i32 to vector<1x128xi32>
    %346 = arith.addi %16, %345 : vector<1x128xi32>
    %c64_i32_114 = arith.constant 64 : i32
    %347 = vector.broadcast %c64_i32_114 : i32 to vector<1x128xi32>
    %348 = arith.cmpi slt, %346, %347 : vector<1x128xi32>
    %349 = arith.andi %344, %348 : vector<1x128xi1>
    %c19_i32 = arith.constant 19 : i32
    %350 = vector.broadcast %c19_i32 : i32 to vector<1x128xi32>
    %351 = arith.addi %16, %350 : vector<1x128xi32>
    %c0_i32_115 = arith.constant 0 : i32
    %352 = vector.broadcast %c0_i32_115 : i32 to vector<1x128xi32>
    %353 = arith.cmpi sge, %351, %352 : vector<1x128xi32>
    %c19_i32_116 = arith.constant 19 : i32
    %354 = vector.broadcast %c19_i32_116 : i32 to vector<1x128xi32>
    %355 = arith.addi %16, %354 : vector<1x128xi32>
    %c64_i32_117 = arith.constant 64 : i32
    %356 = vector.broadcast %c64_i32_117 : i32 to vector<1x128xi32>
    %357 = arith.cmpi slt, %355, %356 : vector<1x128xi32>
    %358 = arith.andi %353, %357 : vector<1x128xi1>
    %c0 = arith.constant 0 : index
    %c0_118 = arith.constant 0 : index
    %359 = vector.load %arg0[%c0, %c0_118] : memref<8x128xf32, #tpu.memory_space<vmem>>, vector<8x128xf32>
    %c0_119 = arith.constant 0 : index
    %c0_120 = arith.constant 0 : index
    %360 = vector.load %arg1[%c0_119, %c0_120] : memref<8x8xf32, #tpu.memory_space<vmem>>, vector<8x8xf32>
    %cst = arith.constant dense<0.000000e+00> : vector<8x128xf32>
    %361 = tpu.matmul %360, %359, %cst {dimension_numbers = #tpu.dot_dimension_numbers<[1], [0], [0], [1], [0, 0, 1, 1], [], []>} : vector<8x8xf32>, vector<8x128xf32>, vector<8x128xf32> -> vector<8x128xf32>
    %c19_i32_121 = arith.constant 19 : i32
    %362 = tpu.dynamic_rotate %361 by %c19_i32_121 dim 1 : vector<8x128xf32>, i32 -> vector<8x128xf32>
    %cst_122 = arith.constant 0.000000e+00 : f32
    %363 = vector.shape_cast %25 : vector<1x128xi1> to vector<1x128xi1>
    %364 = vector.broadcast %363 : vector<1x128xi1> to vector<8x128xi1>
    %365 = vector.broadcast %cst_122 : f32 to vector<8x128xf32>
    %366 = arith.select %364, %362, %365 : vector<8x128xi1>, vector<8x128xf32>
    %c0_123 = arith.constant 0 : index
    %c0_124 = arith.constant 0 : index
    %367 = vector.load %arg19[%c0_123, %c0_124] : memref<344x128xf32, #tpu.memory_space<vmem>>, vector<8x128xf32>
    tpu.vector_store %arg19[%c0_123, %c0_124], %366 {strides = array<i32>} : memref<344x128xf32, #tpu.memory_space<vmem>>, vector<8x128xf32>,
    %c18_i32_125 = arith.constant 18 : i32
    %368 = tpu.dynamic_rotate %361 by %c18_i32_125 dim 1 : vector<8x128xf32>, i32 -> vector<8x128xf32>
    %cst_126 = arith.constant 0.000000e+00 : f32
    %369 = vector.shape_cast %34 : vector<1x128xi1> to vector<1x128xi1>
    %370 = vector.broadcast %369 : vector<1x128xi1> to vector<8x128xi1>
    %371 = vector.broadcast %cst_126 : f32 to vector<8x128xf32>
    %372 = arith.select %370, %368, %371 : vector<8x128xi1>, vector<8x128xf32>
    %c8 = arith.constant 8 : index
    %c0_127 = arith.constant 0 : index
    %373 = vector.load %arg19[%c8, %c0_127] : memref<344x128xf32, #tpu.memory_space<vmem>>, vector<8x128xf32>
    tpu.vector_store %arg19[%c8, %c0_127], %372 {strides = array<i32>} : memref<344x128xf32, #tpu.memory_space<vmem>>, vector<8x128xf32>,
    %c17_i32_128 = arith.constant 17 : i32
    %374 = tpu.dynamic_rotate %361 by %c17_i32_128 dim 1 : vector<8x128xf32>, i32 -> vector<8x128xf32>
    %cst_129 = arith.constant 0.000000e+00 : f32
    %375 = vector.shape_cast %43 : vector<1x128xi1> to vector<1x128xi1>
    %376 = vector.broadcast %375 : vector<1x128xi1> to vector<8x128xi1>
    %377 = vector.broadcast %cst_129 : f32 to vector<8x128xf32>
    %378 = arith.select %376, %374, %377 : vector<8x128xi1>, vector<8x128xf32>
    %c16 = arith.constant 16 : index
    %c0_130 = arith.constant 0 : index
    %379 = vector.load %arg19[%c16, %c0_130] : memref<344x128xf32, #tpu.memory_space<vmem>>, vector<8x128xf32>
    tpu.vector_store %arg19[%c16, %c0_130], %378 {strides = array<i32>} : memref<344x128xf32, #tpu.memory_space<vmem>>, vector<8x128xf32>,
    %c16_i32_131 = arith.constant 16 : i32
    %380 = tpu.dynamic_rotate %361 by %c16_i32_131 dim 1 : vector<8x128xf32>, i32 -> vector<8x128xf32>
    %cst_132 = arith.constant 0.000000e+00 : f32
    %381 = vector.shape_cast %52 : vector<1x128xi1> to vector<1x128xi1>
    %382 = vector.broadcast %381 : vector<1x128xi1> to vector<8x128xi1>
    %383 = vector.broadcast %cst_132 : f32 to vector<8x128xf32>
    %384 = arith.select %382, %380, %383 : vector<8x128xi1>, vector<8x128xf32>
    %c24 = arith.constant 24 : index
    %c0_133 = arith.constant 0 : index
    %385 = vector.load %arg19[%c24, %c0_133] : memref<344x128xf32, #tpu.memory_space<vmem>>, vector<8x128xf32>
    tpu.vector_store %arg19[%c24, %c0_133], %384 {strides = array<i32>} : memref<344x128xf32, #tpu.memory_space<vmem>>, vector<8x128xf32>,
    %c15_i32_134 = arith.constant 15 : i32
    %386 = tpu.dynamic_rotate %361 by %c15_i32_134 dim 1 : vector<8x128xf32>, i32 -> vector<8x128xf32>
    %cst_135 = arith.constant 0.000000e+00 : f32
    %387 = vector.shape_cast %61 : vector<1x128xi1> to vector<1x128xi1>
    %388 = vector.broadcast %387 : vector<1x128xi1> to vector<8x128xi1>
    %389 = vector.broadcast %cst_135 : f32 to vector<8x128xf32>
    %390 = arith.select %388, %386, %389 : vector<8x128xi1>, vector<8x128xf32>
    %c32 = arith.constant 32 : index
    %c0_136 = arith.constant 0 : index
    %391 = vector.load %arg19[%c32, %c0_136] : memref<344x128xf32, #tpu.memory_space<vmem>>, vector<8x128xf32>
    tpu.vector_store %arg19[%c32, %c0_136], %390 {strides = array<i32>} : memref<344x128xf32, #tpu.memory_space<vmem>>, vector<8x128xf32>,
    %c14_i32_137 = arith.constant 14 : i32
    %392 = tpu.dynamic_rotate %361 by %c14_i32_137 dim 1 : vector<8x128xf32>, i32 -> vector<8x128xf32>
    %cst_138 = arith.constant 0.000000e+00 : f32
    %393 = vector.shape_cast %70 : vector<1x128xi1> to vector<1x128xi1>
    %394 = vector.broadcast %393 : vector<1x128xi1> to vector<8x128xi1>
    %395 = vector.broadcast %cst_138 : f32 to vector<8x128xf32>
    %396 = arith.select %394, %392, %395 : vector<8x128xi1>, vector<8x128xf32>
    %c40 = arith.constant 40 : index
    %c0_139 = arith.constant 0 : index
    %397 = vector.load %arg19[%c40, %c0_139] : memref<344x128xf32, #tpu.memory_space<vmem>>, vector<8x128xf32>
    tpu.vector_store %arg19[%c40, %c0_139], %396 {strides = array<i32>} : memref<344x128xf32, #tpu.memory_space<vmem>>, vector<8x128xf32>,
    %c13_i32_140 = arith.constant 13 : i32
    %398 = tpu.dynamic_rotate %361 by %c13_i32_140 dim 1 : vector<8x128xf32>, i32 -> vector<8x128xf32>
    %cst_141 = arith.constant 0.000000e+00 : f32
    %399 = vector.shape_cast %79 : vector<1x128xi1> to vector<1x128xi1>
    %400 = vector.broadcast %399 : vector<1x128xi1> to vector<8x128xi1>
    %401 = vector.broadcast %cst_141 : f32 to vector<8x128xf32>
    %402 = arith.select %400, %398, %401 : vector<8x128xi1>, vector<8x128xf32>
    %c48 = arith.constant 48 : index
    %c0_142 = arith.constant 0 : index
    %403 = vector.load %arg19[%c48, %c0_142] : memref<344x128xf32, #tpu.memory_space<vmem>>, vector<8x128xf32>
    tpu.vector_store %arg19[%c48, %c0_142], %402 {strides = array<i32>} : memref<344x128xf32, #tpu.memory_space<vmem>>, vector<8x128xf32>,
    %c12_i32_143 = arith.constant 12 : i32
    %404 = tpu.dynamic_rotate %361 by %c12_i32_143 dim 1 : vector<8x128xf32>, i32 -> vector<8x128xf32>
    %cst_144 = arith.constant 0.000000e+00 : f32
    %405 = vector.shape_cast %88 : vector<1x128xi1> to vector<1x128xi1>
    %406 = vector.broadcast %405 : vector<1x128xi1> to vector<8x128xi1>
    %407 = vector.broadcast %cst_144 : f32 to vector<8x128xf32>
    %408 = arith.select %406, %404, %407 : vector<8x128xi1>, vector<8x128xf32>
    %c56 = arith.constant 56 : index
    %c0_145 = arith.constant 0 : index
    %409 = vector.load %arg19[%c56, %c0_145] : memref<344x128xf32, #tpu.memory_space<vmem>>, vector<8x128xf32>
    tpu.vector_store %arg19[%c56, %c0_145], %408 {strides = array<i32>} : memref<344x128xf32, #tpu.memory_space<vmem>>, vector<8x128xf32>,
    %c11_i32_146 = arith.constant 11 : i32
    %410 = tpu.dynamic_rotate %361 by %c11_i32_146 dim 1 : vector<8x128xf32>, i32 -> vector<8x128xf32>
    %cst_147 = arith.constant 0.000000e+00 : f32
    %411 = vector.shape_cast %97 : vector<1x128xi1> to vector<1x128xi1>
    %412 = vector.broadcast %411 : vector<1x128xi1> to vector<8x128xi1>
    %413 = vector.broadcast %cst_147 : f32 to vector<8x128xf32>
    %414 = arith.select %412, %410, %413 : vector<8x128xi1>, vector<8x128xf32>
    %c64 = arith.constant 64 : index
    %c0_148 = arith.constant 0 : index
    %415 = vector.load %arg19[%c64, %c0_148] : memref<344x128xf32, #tpu.memory_space<vmem>>, vector<8x128xf32>
    tpu.vector_store %arg19[%c64, %c0_148], %414 {strides = array<i32>} : memref<344x128xf32, #tpu.memory_space<vmem>>, vector<8x128xf32>,
    %c10_i32_149 = arith.constant 10 : i32
    %416 = tpu.dynamic_rotate %361 by %c10_i32_149 dim 1 : vector<8x128xf32>, i32 -> vector<8x128xf32>
    %cst_150 = arith.constant 0.000000e+00 : f32
    %417 = vector.shape_cast %106 : vector<1x128xi1> to vector<1x128xi1>
    %418 = vector.broadcast %417 : vector<1x128xi1> to vector<8x128xi1>
    %419 = vector.broadcast %cst_150 : f32 to vector<8x128xf32>
    %420 = arith.select %418, %416, %419 : vector<8x128xi1>, vector<8x128xf32>
    %c72 = arith.constant 72 : index
    %c0_151 = arith.constant 0 : index
    %421 = vector.load %arg19[%c72, %c0_151] : memref<344x128xf32, #tpu.memory_space<vmem>>, vector<8x128xf32>
    tpu.vector_store %arg19[%c72, %c0_151], %420 {strides = array<i32>} : memref<344x128xf32, #tpu.memory_space<vmem>>, vector<8x128xf32>,
    %c9_i32_152 = arith.constant 9 : i32
    %422 = tpu.dynamic_rotate %361 by %c9_i32_152 dim 1 : vector<8x128xf32>, i32 -> vector<8x128xf32>
    %cst_153 = arith.constant 0.000000e+00 : f32
    %423 = vector.shape_cast %115 : vector<1x128xi1> to vector<1x128xi1>
    %424 = vector.broadcast %423 : vector<1x128xi1> to vector<8x128xi1>
    %425 = vector.broadcast %cst_153 : f32 to vector<8x128xf32>
    %426 = arith.select %424, %422, %425 : vector<8x128xi1>, vector<8x128xf32>
    %c80 = arith.constant 80 : index
    %c0_154 = arith.constant 0 : index
    %427 = vector.load %arg19[%c80, %c0_154] : memref<344x128xf32, #tpu.memory_space<vmem>>, vector<8x128xf32>
    tpu.vector_store %arg19[%c80, %c0_154], %426 {strides = array<i32>} : memref<344x128xf32, #tpu.memory_space<vmem>>, vector<8x128xf32>,
    %c8_i32_155 = arith.constant 8 : i32
    %428 = tpu.dynamic_rotate %361 by %c8_i32_155 dim 1 : vector<8x128xf32>, i32 -> vector<8x128xf32>
    %cst_156 = arith.constant 0.000000e+00 : f32
    %429 = vector.shape_cast %124 : vector<1x128xi1> to vector<1x128xi1>
    %430 = vector.broadcast %429 : vector<1x128xi1> to vector<8x128xi1>
    %431 = vector.broadcast %cst_156 : f32 to vector<8x128xf32>
    %432 = arith.select %430, %428, %431 : vector<8x128xi1>, vector<8x128xf32>
    %c88 = arith.constant 88 : index
    %c0_157 = arith.constant 0 : index
    %433 = vector.load %arg19[%c88, %c0_157] : memref<344x128xf32, #tpu.memory_space<vmem>>, vector<8x128xf32>
    tpu.vector_store %arg19[%c88, %c0_157], %432 {strides = array<i32>} : memref<344x128xf32, #tpu.memory_space<vmem>>, vector<8x128xf32>,
    %c7_i32_158 = arith.constant 7 : i32
    %434 = tpu.dynamic_rotate %361 by %c7_i32_158 dim 1 : vector<8x128xf32>, i32 -> vector<8x128xf32>
    %cst_159 = arith.constant 0.000000e+00 : f32
    %435 = vector.shape_cast %133 : vector<1x128xi1> to vector<1x128xi1>
    %436 = vector.broadcast %435 : vector<1x128xi1> to vector<8x128xi1>
    %437 = vector.broadcast %cst_159 : f32 to vector<8x128xf32>
    %438 = arith.select %436, %434, %437 : vector<8x128xi1>, vector<8x128xf32>
    %c96 = arith.constant 96 : index
    %c0_160 = arith.constant 0 : index
    %439 = vector.load %arg19[%c96, %c0_160] : memref<344x128xf32, #tpu.memory_space<vmem>>, vector<8x128xf32>
    tpu.vector_store %arg19[%c96, %c0_160], %438 {strides = array<i32>} : memref<344x128xf32, #tpu.memory_space<vmem>>, vector<8x128xf32>,
    %c6_i32_161 = arith.constant 6 : i32
    %440 = tpu.dynamic_rotate %361 by %c6_i32_161 dim 1 : vector<8x128xf32>, i32 -> vector<8x128xf32>
    %cst_162 = arith.constant 0.000000e+00 : f32
    %441 = vector.shape_cast %142 : vector<1x128xi1> to vector<1x128xi1>
    %442 = vector.broadcast %441 : vector<1x128xi1> to vector<8x128xi1>
    %443 = vector.broadcast %cst_162 : f32 to vector<8x128xf32>
    %444 = arith.select %442, %440, %443 : vector<8x128xi1>, vector<8x128xf32>
    %c104 = arith.constant 104 : index
    %c0_163 = arith.constant 0 : index
    %445 = vector.load %arg19[%c104, %c0_163] : memref<344x128xf32, #tpu.memory_space<vmem>>, vector<8x128xf32>
    tpu.vector_store %arg19[%c104, %c0_163], %444 {strides = array<i32>} : memref<344x128xf32, #tpu.memory_space<vmem>>, vector<8x128xf32>,
    %c5_i32_164 = arith.constant 5 : i32
    %446 = tpu.dynamic_rotate %361 by %c5_i32_164 dim 1 : vector<8x128xf32>, i32 -> vector<8x128xf32>
    %cst_165 = arith.constant 0.000000e+00 : f32
    %447 = vector.shape_cast %151 : vector<1x128xi1> to vector<1x128xi1>
    %448 = vector.broadcast %447 : vector<1x128xi1> to vector<8x128xi1>
    %449 = vector.broadcast %cst_165 : f32 to vector<8x128xf32>
    %450 = arith.select %448, %446, %449 : vector<8x128xi1>, vector<8x128xf32>
    %c112 = arith.constant 112 : index
    %c0_166 = arith.constant 0 : index
    %451 = vector.load %arg19[%c112, %c0_166] : memref<344x128xf32, #tpu.memory_space<vmem>>, vector<8x128xf32>
    tpu.vector_store %arg19[%c112, %c0_166], %450 {strides = array<i32>} : memref<344x128xf32, #tpu.memory_space<vmem>>, vector<8x128xf32>,
    %c4_i32_167 = arith.constant 4 : i32
    %452 = tpu.dynamic_rotate %361 by %c4_i32_167 dim 1 : vector<8x128xf32>, i32 -> vector<8x128xf32>
    %cst_168 = arith.constant 0.000000e+00 : f32
    %453 = vector.shape_cast %160 : vector<1x128xi1> to vector<1x128xi1>
    %454 = vector.broadcast %453 : vector<1x128xi1> to vector<8x128xi1>
    %455 = vector.broadcast %cst_168 : f32 to vector<8x128xf32>
    %456 = arith.select %454, %452, %455 : vector<8x128xi1>, vector<8x128xf32>
    %c120 = arith.constant 120 : index
    %c0_169 = arith.constant 0 : index
    %457 = vector.load %arg19[%c120, %c0_169] : memref<344x128xf32, #tpu.memory_space<vmem>>, vector<8x128xf32>
    tpu.vector_store %arg19[%c120, %c0_169], %456 {strides = array<i32>} : memref<344x128xf32, #tpu.memory_space<vmem>>, vector<8x128xf32>,
    %c3_i32_170 = arith.constant 3 : i32
    %458 = tpu.dynamic_rotate %361 by %c3_i32_170 dim 1 : vector<8x128xf32>, i32 -> vector<8x128xf32>
    %cst_171 = arith.constant 0.000000e+00 : f32
    %459 = vector.shape_cast %169 : vector<1x128xi1> to vector<1x128xi1>
    %460 = vector.broadcast %459 : vector<1x128xi1> to vector<8x128xi1>
    %461 = vector.broadcast %cst_171 : f32 to vector<8x128xf32>
    %462 = arith.select %460, %458, %461 : vector<8x128xi1>, vector<8x128xf32>
    %c128 = arith.constant 128 : index
    %c0_172 = arith.constant 0 : index
    %463 = vector.load %arg19[%c128, %c0_172] : memref<344x128xf32, #tpu.memory_space<vmem>>, vector<8x128xf32>
    tpu.vector_store %arg19[%c128, %c0_172], %462 {strides = array<i32>} : memref<344x128xf32, #tpu.memory_space<vmem>>, vector<8x128xf32>,
    %c2_i32_173 = arith.constant 2 : i32
    %464 = tpu.dynamic_rotate %361 by %c2_i32_173 dim 1 : vector<8x128xf32>, i32 -> vector<8x128xf32>
    %cst_174 = arith.constant 0.000000e+00 : f32
    %465 = vector.shape_cast %178 : vector<1x128xi1> to vector<1x128xi1>
    %466 = vector.broadcast %465 : vector<1x128xi1> to vector<8x128xi1>
    %467 = vector.broadcast %cst_174 : f32 to vector<8x128xf32>
    %468 = arith.select %466, %464, %467 : vector<8x128xi1>, vector<8x128xf32>
    %c136 = arith.constant 136 : index
    %c0_175 = arith.constant 0 : index
    %469 = vector.load %arg19[%c136, %c0_175] : memref<344x128xf32, #tpu.memory_space<vmem>>, vector<8x128xf32>
    tpu.vector_store %arg19[%c136, %c0_175], %468 {strides = array<i32>} : memref<344x128xf32, #tpu.memory_space<vmem>>, vector<8x128xf32>,
    %c1_i32_176 = arith.constant 1 : i32
    %470 = tpu.dynamic_rotate %361 by %c1_i32_176 dim 1 : vector<8x128xf32>, i32 -> vector<8x128xf32>
    %cst_177 = arith.constant 0.000000e+00 : f32
    %471 = vector.shape_cast %187 : vector<1x128xi1> to vector<1x128xi1>
    %472 = vector.broadcast %471 : vector<1x128xi1> to vector<8x128xi1>
    %473 = vector.broadcast %cst_177 : f32 to vector<8x128xf32>
    %474 = arith.select %472, %470, %473 : vector<8x128xi1>, vector<8x128xf32>
    %c144 = arith.constant 144 : index
    %c0_178 = arith.constant 0 : index
    %475 = vector.load %arg19[%c144, %c0_178] : memref<344x128xf32, #tpu.memory_space<vmem>>, vector<8x128xf32>
    tpu.vector_store %arg19[%c144, %c0_178], %474 {strides = array<i32>} : memref<344x128xf32, #tpu.memory_space<vmem>>, vector<8x128xf32>,
    %c152 = arith.constant 152 : index
    %c0_179 = arith.constant 0 : index
    %476 = vector.load %arg19[%c152, %c0_179] : memref<344x128xf32, #tpu.memory_space<vmem>>, vector<8x128xf32>
    tpu.vector_store %arg19[%c152, %c0_179], %361 {strides = array<i32>} : memref<344x128xf32, #tpu.memory_space<vmem>>, vector<8x128xf32>,
    %c127_i32 = arith.constant 127 : i32
    %477 = tpu.dynamic_rotate %361 by %c127_i32 dim 1 : vector<8x128xf32>, i32 -> vector<8x128xf32>
    %cst_180 = arith.constant 0.000000e+00 : f32
    %478 = vector.shape_cast %196 : vector<1x128xi1> to vector<1x128xi1>
    %479 = vector.broadcast %478 : vector<1x128xi1> to vector<8x128xi1>
    %480 = vector.broadcast %cst_180 : f32 to vector<8x128xf32>
    %481 = arith.select %479, %477, %480 : vector<8x128xi1>, vector<8x128xf32>
    %c160 = arith.constant 160 : index
    %c0_181 = arith.constant 0 : index
    %482 = vector.load %arg19[%c160, %c0_181] : memref<344x128xf32, #tpu.memory_space<vmem>>, vector<8x128xf32>
    tpu.vector_store %arg19[%c160, %c0_181], %481 {strides = array<i32>} : memref<344x128xf32, #tpu.memory_space<vmem>>, vector<8x128xf32>,
    %c126_i32 = arith.constant 126 : i32
    %483 = tpu.dynamic_rotate %361 by %c126_i32 dim 1 : vector<8x128xf32>, i32 -> vector<8x128xf32>
    %cst_182 = arith.constant 0.000000e+00 : f32
    %484 = vector.shape_cast %205 : vector<1x128xi1> to vector<1x128xi1>
    %485 = vector.broadcast %484 : vector<1x128xi1> to vector<8x128xi1>
    %486 = vector.broadcast %cst_182 : f32 to vector<8x128xf32>
    %487 = arith.select %485, %483, %486 : vector<8x128xi1>, vector<8x128xf32>
    %c168 = arith.constant 168 : index
    %c0_183 = arith.constant 0 : index
    %488 = vector.load %arg19[%c168, %c0_183] : memref<344x128xf32, #tpu.memory_space<vmem>>, vector<8x128xf32>
    tpu.vector_store %arg19[%c168, %c0_183], %487 {strides = array<i32>} : memref<344x128xf32, #tpu.memory_space<vmem>>, vector<8x128xf32>,
    %c125_i32 = arith.constant 125 : i32
    %489 = tpu.dynamic_rotate %361 by %c125_i32 dim 1 : vector<8x128xf32>, i32 -> vector<8x128xf32>
    %cst_184 = arith.constant 0.000000e+00 : f32
    %490 = vector.shape_cast %214 : vector<1x128xi1> to vector<1x128xi1>
    %491 = vector.broadcast %490 : vector<1x128xi1> to vector<8x128xi1>
    %492 = vector.broadcast %cst_184 : f32 to vector<8x128xf32>
    %493 = arith.select %491, %489, %492 : vector<8x128xi1>, vector<8x128xf32>
    %c176 = arith.constant 176 : index
    %c0_185 = arith.constant 0 : index
    %494 = vector.load %arg19[%c176, %c0_185] : memref<344x128xf32, #tpu.memory_space<vmem>>, vector<8x128xf32>
    tpu.vector_store %arg19[%c176, %c0_185], %493 {strides = array<i32>} : memref<344x128xf32, #tpu.memory_space<vmem>>, vector<8x128xf32>,
    %c124_i32 = arith.constant 124 : i32
    %495 = tpu.dynamic_rotate %361 by %c124_i32 dim 1 : vector<8x128xf32>, i32 -> vector<8x128xf32>
    %cst_186 = arith.constant 0.000000e+00 : f32
    %496 = vector.shape_cast %223 : vector<1x128xi1> to vector<1x128xi1>
    %497 = vector.broadcast %496 : vector<1x128xi1> to vector<8x128xi1>
    %498 = vector.broadcast %cst_186 : f32 to vector<8x128xf32>
    %499 = arith.select %497, %495, %498 : vector<8x128xi1>, vector<8x128xf32>
    %c184 = arith.constant 184 : index
    %c0_187 = arith.constant 0 : index
    %500 = vector.load %arg19[%c184, %c0_187] : memref<344x128xf32, #tpu.memory_space<vmem>>, vector<8x128xf32>
    tpu.vector_store %arg19[%c184, %c0_187], %499 {strides = array<i32>} : memref<344x128xf32, #tpu.memory_space<vmem>>, vector<8x128xf32>,
    %c123_i32 = arith.constant 123 : i32
    %501 = tpu.dynamic_rotate %361 by %c123_i32 dim 1 : vector<8x128xf32>, i32 -> vector<8x128xf32>
    %cst_188 = arith.constant 0.000000e+00 : f32
    %502 = vector.shape_cast %232 : vector<1x128xi1> to vector<1x128xi1>
    %503 = vector.broadcast %502 : vector<1x128xi1> to vector<8x128xi1>
    %504 = vector.broadcast %cst_188 : f32 to vector<8x128xf32>
    %505 = arith.select %503, %501, %504 : vector<8x128xi1>, vector<8x128xf32>
    %c192 = arith.constant 192 : index
    %c0_189 = arith.constant 0 : index
    %506 = vector.load %arg19[%c192, %c0_189] : memref<344x128xf32, #tpu.memory_space<vmem>>, vector<8x128xf32>
    tpu.vector_store %arg19[%c192, %c0_189], %505 {strides = array<i32>} : memref<344x128xf32, #tpu.memory_space<vmem>>, vector<8x128xf32>,
    %c122_i32 = arith.constant 122 : i32
    %507 = tpu.dynamic_rotate %361 by %c122_i32 dim 1 : vector<8x128xf32>, i32 -> vector<8x128xf32>
    %cst_190 = arith.constant 0.000000e+00 : f32
    %508 = vector.shape_cast %241 : vector<1x128xi1> to vector<1x128xi1>
    %509 = vector.broadcast %508 : vector<1x128xi1> to vector<8x128xi1>
    %510 = vector.broadcast %cst_190 : f32 to vector<8x128xf32>
    %511 = arith.select %509, %507, %510 : vector<8x128xi1>, vector<8x128xf32>
    %c200 = arith.constant 200 : index
    %c0_191 = arith.constant 0 : index
    %512 = vector.load %arg19[%c200, %c0_191] : memref<344x128xf32, #tpu.memory_space<vmem>>, vector<8x128xf32>
    tpu.vector_store %arg19[%c200, %c0_191], %511 {strides = array<i32>} : memref<344x128xf32, #tpu.memory_space<vmem>>, vector<8x128xf32>,
    %c121_i32 = arith.constant 121 : i32
    %513 = tpu.dynamic_rotate %361 by %c121_i32 dim 1 : vector<8x128xf32>, i32 -> vector<8x128xf32>
    %cst_192 = arith.constant 0.000000e+00 : f32
    %514 = vector.shape_cast %250 : vector<1x128xi1> to vector<1x128xi1>
    %515 = vector.broadcast %514 : vector<1x128xi1> to vector<8x128xi1>
    %516 = vector.broadcast %cst_192 : f32 to vector<8x128xf32>
    %517 = arith.select %515, %513, %516 : vector<8x128xi1>, vector<8x128xf32>
    %c208 = arith.constant 208 : index
    %c0_193 = arith.constant 0 : index
    %518 = vector.load %arg19[%c208, %c0_193] : memref<344x128xf32, #tpu.memory_space<vmem>>, vector<8x128xf32>
    tpu.vector_store %arg19[%c208, %c0_193], %517 {strides = array<i32>} : memref<344x128xf32, #tpu.memory_space<vmem>>, vector<8x128xf32>,
    %c120_i32 = arith.constant 120 : i32
    %519 = tpu.dynamic_rotate %361 by %c120_i32 dim 1 : vector<8x128xf32>, i32 -> vector<8x128xf32>
    %cst_194 = arith.constant 0.000000e+00 : f32
    %520 = vector.shape_cast %259 : vector<1x128xi1> to vector<1x128xi1>
    %521 = vector.broadcast %520 : vector<1x128xi1> to vector<8x128xi1>
    %522 = vector.broadcast %cst_194 : f32 to vector<8x128xf32>
    %523 = arith.select %521, %519, %522 : vector<8x128xi1>, vector<8x128xf32>
    %c216 = arith.constant 216 : index
    %c0_195 = arith.constant 0 : index
    %524 = vector.load %arg19[%c216, %c0_195] : memref<344x128xf32, #tpu.memory_space<vmem>>, vector<8x128xf32>
    tpu.vector_store %arg19[%c216, %c0_195], %523 {strides = array<i32>} : memref<344x128xf32, #tpu.memory_space<vmem>>, vector<8x128xf32>,
    %c119_i32 = arith.constant 119 : i32
    %525 = tpu.dynamic_rotate %361 by %c119_i32 dim 1 : vector<8x128xf32>, i32 -> vector<8x128xf32>
    %cst_196 = arith.constant 0.000000e+00 : f32
    %526 = vector.shape_cast %268 : vector<1x128xi1> to vector<1x128xi1>
    %527 = vector.broadcast %526 : vector<1x128xi1> to vector<8x128xi1>
    %528 = vector.broadcast %cst_196 : f32 to vector<8x128xf32>
    %529 = arith.select %527, %525, %528 : vector<8x128xi1>, vector<8x128xf32>
    %c224 = arith.constant 224 : index
    %c0_197 = arith.constant 0 : index
    %530 = vector.load %arg19[%c224, %c0_197] : memref<344x128xf32, #tpu.memory_space<vmem>>, vector<8x128xf32>
    tpu.vector_store %arg19[%c224, %c0_197], %529 {strides = array<i32>} : memref<344x128xf32, #tpu.memory_space<vmem>>, vector<8x128xf32>,
    %c118_i32 = arith.constant 118 : i32
    %531 = tpu.dynamic_rotate %361 by %c118_i32 dim 1 : vector<8x128xf32>, i32 -> vector<8x128xf32>
    %cst_198 = arith.constant 0.000000e+00 : f32
    %532 = vector.shape_cast %277 : vector<1x128xi1> to vector<1x128xi1>
    %533 = vector.broadcast %532 : vector<1x128xi1> to vector<8x128xi1>
    %534 = vector.broadcast %cst_198 : f32 to vector<8x128xf32>
    %535 = arith.select %533, %531, %534 : vector<8x128xi1>, vector<8x128xf32>
    %c232 = arith.constant 232 : index
    %c0_199 = arith.constant 0 : index
    %536 = vector.load %arg19[%c232, %c0_199] : memref<344x128xf32, #tpu.memory_space<vmem>>, vector<8x128xf32>
    tpu.vector_store %arg19[%c232, %c0_199], %535 {strides = array<i32>} : memref<344x128xf32, #tpu.memory_space<vmem>>, vector<8x128xf32>,
    %c117_i32 = arith.constant 117 : i32
    %537 = tpu.dynamic_rotate %361 by %c117_i32 dim 1 : vector<8x128xf32>, i32 -> vector<8x128xf32>
    %cst_200 = arith.constant 0.000000e+00 : f32
    %538 = vector.shape_cast %286 : vector<1x128xi1> to vector<1x128xi1>
    %539 = vector.broadcast %538 : vector<1x128xi1> to vector<8x128xi1>
    %540 = vector.broadcast %cst_200 : f32 to vector<8x128xf32>
    %541 = arith.select %539, %537, %540 : vector<8x128xi1>, vector<8x128xf32>
    %c240 = arith.constant 240 : index
    %c0_201 = arith.constant 0 : index
    %542 = vector.load %arg19[%c240, %c0_201] : memref<344x128xf32, #tpu.memory_space<vmem>>, vector<8x128xf32>
    tpu.vector_store %arg19[%c240, %c0_201], %541 {strides = array<i32>} : memref<344x128xf32, #tpu.memory_space<vmem>>, vector<8x128xf32>,
    %c116_i32 = arith.constant 116 : i32
    %543 = tpu.dynamic_rotate %361 by %c116_i32 dim 1 : vector<8x128xf32>, i32 -> vector<8x128xf32>
    %cst_202 = arith.constant 0.000000e+00 : f32
    %544 = vector.shape_cast %295 : vector<1x128xi1> to vector<1x128xi1>
    %545 = vector.broadcast %544 : vector<1x128xi1> to vector<8x128xi1>
    %546 = vector.broadcast %cst_202 : f32 to vector<8x128xf32>
    %547 = arith.select %545, %543, %546 : vector<8x128xi1>, vector<8x128xf32>
    %c248 = arith.constant 248 : index
    %c0_203 = arith.constant 0 : index
    %548 = vector.load %arg19[%c248, %c0_203] : memref<344x128xf32, #tpu.memory_space<vmem>>, vector<8x128xf32>
    tpu.vector_store %arg19[%c248, %c0_203], %547 {strides = array<i32>} : memref<344x128xf32, #tpu.memory_space<vmem>>, vector<8x128xf32>,
    %c115_i32 = arith.constant 115 : i32
    %549 = tpu.dynamic_rotate %361 by %c115_i32 dim 1 : vector<8x128xf32>, i32 -> vector<8x128xf32>
    %cst_204 = arith.constant 0.000000e+00 : f32
    %550 = vector.shape_cast %304 : vector<1x128xi1> to vector<1x128xi1>
    %551 = vector.broadcast %550 : vector<1x128xi1> to vector<8x128xi1>
    %552 = vector.broadcast %cst_204 : f32 to vector<8x128xf32>
    %553 = arith.select %551, %549, %552 : vector<8x128xi1>, vector<8x128xf32>
    %c256 = arith.constant 256 : index
    %c0_205 = arith.constant 0 : index
    %554 = vector.load %arg19[%c256, %c0_205] : memref<344x128xf32, #tpu.memory_space<vmem>>, vector<8x128xf32>
    tpu.vector_store %arg19[%c256, %c0_205], %553 {strides = array<i32>} : memref<344x128xf32, #tpu.memory_space<vmem>>, vector<8x128xf32>,
    %c114_i32 = arith.constant 114 : i32
    %555 = tpu.dynamic_rotate %361 by %c114_i32 dim 1 : vector<8x128xf32>, i32 -> vector<8x128xf32>
    %cst_206 = arith.constant 0.000000e+00 : f32
    %556 = vector.shape_cast %313 : vector<1x128xi1> to vector<1x128xi1>
    %557 = vector.broadcast %556 : vector<1x128xi1> to vector<8x128xi1>
    %558 = vector.broadcast %cst_206 : f32 to vector<8x128xf32>
    %559 = arith.select %557, %555, %558 : vector<8x128xi1>, vector<8x128xf32>
    %c264 = arith.constant 264 : index
    %c0_207 = arith.constant 0 : index
    %560 = vector.load %arg19[%c264, %c0_207] : memref<344x128xf32, #tpu.memory_space<vmem>>, vector<8x128xf32>
    tpu.vector_store %arg19[%c264, %c0_207], %559 {strides = array<i32>} : memref<344x128xf32, #tpu.memory_space<vmem>>, vector<8x128xf32>,
    %c113_i32 = arith.constant 113 : i32
    %561 = tpu.dynamic_rotate %361 by %c113_i32 dim 1 : vector<8x128xf32>, i32 -> vector<8x128xf32>
    %cst_208 = arith.constant 0.000000e+00 : f32
    %562 = vector.shape_cast %322 : vector<1x128xi1> to vector<1x128xi1>
    %563 = vector.broadcast %562 : vector<1x128xi1> to vector<8x128xi1>
    %564 = vector.broadcast %cst_208 : f32 to vector<8x128xf32>
    %565 = arith.select %563, %561, %564 : vector<8x128xi1>, vector<8x128xf32>
    %c272 = arith.constant 272 : index
    %c0_209 = arith.constant 0 : index
    %566 = vector.load %arg19[%c272, %c0_209] : memref<344x128xf32, #tpu.memory_space<vmem>>, vector<8x128xf32>
    tpu.vector_store %arg19[%c272, %c0_209], %565 {strides = array<i32>} : memref<344x128xf32, #tpu.memory_space<vmem>>, vector<8x128xf32>,
    %c112_i32 = arith.constant 112 : i32
    %567 = tpu.dynamic_rotate %361 by %c112_i32 dim 1 : vector<8x128xf32>, i32 -> vector<8x128xf32>
    %cst_210 = arith.constant 0.000000e+00 : f32
    %568 = vector.shape_cast %331 : vector<1x128xi1> to vector<1x128xi1>
    %569 = vector.broadcast %568 : vector<1x128xi1> to vector<8x128xi1>
    %570 = vector.broadcast %cst_210 : f32 to vector<8x128xf32>
    %571 = arith.select %569, %567, %570 : vector<8x128xi1>, vector<8x128xf32>
    %c280 = arith.constant 280 : index
    %c0_211 = arith.constant 0 : index
    %572 = vector.load %arg19[%c280, %c0_211] : memref<344x128xf32, #tpu.memory_space<vmem>>, vector<8x128xf32>
    tpu.vector_store %arg19[%c280, %c0_211], %571 {strides = array<i32>} : memref<344x128xf32, #tpu.memory_space<vmem>>, vector<8x128xf32>,
    %c111_i32 = arith.constant 111 : i32
    %573 = tpu.dynamic_rotate %361 by %c111_i32 dim 1 : vector<8x128xf32>, i32 -> vector<8x128xf32>
    %cst_212 = arith.constant 0.000000e+00 : f32
    %574 = vector.shape_cast %340 : vector<1x128xi1> to vector<1x128xi1>
    %575 = vector.broadcast %574 : vector<1x128xi1> to vector<8x128xi1>
    %576 = vector.broadcast %cst_212 : f32 to vector<8x128xf32>
    %577 = arith.select %575, %573, %576 : vector<8x128xi1>, vector<8x128xf32>
    %c288 = arith.constant 288 : index
    %c0_213 = arith.constant 0 : index
    %578 = vector.load %arg19[%c288, %c0_213] : memref<344x128xf32, #tpu.memory_space<vmem>>, vector<8x128xf32>
    tpu.vector_store %arg19[%c288, %c0_213], %577 {strides = array<i32>} : memref<344x128xf32, #tpu.memory_space<vmem>>, vector<8x128xf32>,
    %c110_i32 = arith.constant 110 : i32
    %579 = tpu.dynamic_rotate %361 by %c110_i32 dim 1 : vector<8x128xf32>, i32 -> vector<8x128xf32>
    %cst_214 = arith.constant 0.000000e+00 : f32
    %580 = vector.shape_cast %349 : vector<1x128xi1> to vector<1x128xi1>
    %581 = vector.broadcast %580 : vector<1x128xi1> to vector<8x128xi1>
    %582 = vector.broadcast %cst_214 : f32 to vector<8x128xf32>
    %583 = arith.select %581, %579, %582 : vector<8x128xi1>, vector<8x128xf32>
    %c296 = arith.constant 296 : index
    %c0_215 = arith.constant 0 : index
    %584 = vector.load %arg19[%c296, %c0_215] : memref<344x128xf32, #tpu.memory_space<vmem>>, vector<8x128xf32>
    tpu.vector_store %arg19[%c296, %c0_215], %583 {strides = array<i32>} : memref<344x128xf32, #tpu.memory_space<vmem>>, vector<8x128xf32>,
    %c109_i32 = arith.constant 109 : i32
    %585 = tpu.dynamic_rotate %361 by %c109_i32 dim 1 : vector<8x128xf32>, i32 -> vector<8x128xf32>
    %cst_216 = arith.constant 0.000000e+00 : f32
    %586 = vector.shape_cast %358 : vector<1x128xi1> to vector<1x128xi1>
    %587 = vector.broadcast %586 : vector<1x128xi1> to vector<8x128xi1>
    %588 = vector.broadcast %cst_216 : f32 to vector<8x128xf32>
    %589 = arith.select %587, %585, %588 : vector<8x128xi1>, vector<8x128xf32>
    %c304 = arith.constant 304 : index
    %c0_217 = arith.constant 0 : index
    %590 = vector.load %arg19[%c304, %c0_217] : memref<344x128xf32, #tpu.memory_space<vmem>>, vector<8x128xf32>
    tpu.vector_store %arg19[%c304, %c0_217], %589 {strides = array<i32>} : memref<344x128xf32, #tpu.memory_space<vmem>>, vector<8x128xf32>,
    %c127_i32_218 = arith.constant 127 : i32
    %591 = tpu.dynamic_rotate %359 by %c127_i32_218 dim 1 : vector<8x128xf32>, i32 -> vector<8x128xf32>
    %cst_219 = arith.constant 0xFF800000 : f32
    %592 = vector.shape_cast %196 : vector<1x128xi1> to vector<1x128xi1>
    %593 = vector.broadcast %592 : vector<1x128xi1> to vector<8x128xi1>
    %594 = vector.broadcast %cst_219 : f32 to vector<8x128xf32>
    %595 = arith.select %593, %591, %594 : vector<8x128xi1>, vector<8x128xf32>
    %c1_i32_220 = arith.constant 1 : i32
    %596 = tpu.dynamic_rotate %359 by %c1_i32_220 dim 1 : vector<8x128xf32>, i32 -> vector<8x128xf32>
    %cst_221 = arith.constant 0xFF800000 : f32
    %597 = vector.shape_cast %187 : vector<1x128xi1> to vector<1x128xi1>
    %598 = vector.broadcast %597 : vector<1x128xi1> to vector<8x128xi1>
    %599 = vector.broadcast %cst_221 : f32 to vector<8x128xf32>
    %600 = arith.select %598, %596, %599 : vector<8x128xi1>, vector<8x128xf32>
    %601 = arith.maximumf %595, %600 : vector<8x128xf32>
    %602 = arith.maximumf %359, %601 : vector<8x128xf32>
    %c312 = arith.constant 312 : index
    %c0_222 = arith.constant 0 : index
    %603 = vector.load %arg19[%c312, %c0_222] : memref<344x128xf32, #tpu.memory_space<vmem>>, vector<8x128xf32>
    tpu.vector_store %arg19[%c312, %c0_222], %602 {strides = array<i32>} : memref<344x128xf32, #tpu.memory_space<vmem>>, vector<8x128xf32>,
    %c0_223 = arith.constant 0 : index
    %c0_224 = arith.constant 0 : index
    %604 = vector.load %arg2[%c0_223, %c0_224] : memref<32x320xf32, #tpu.memory_space<vmem>>, vector<32x320xf32>
    %c0_225 = arith.constant 0 : index
    %c0_226 = arith.constant 0 : index
    %605 = vector.load %arg19[%c0_225, %c0_226] : memref<344x128xf32, #tpu.memory_space<vmem>>, vector<320x128xf32>
    %cst_227 = arith.constant dense<0.000000e+00> : vector<32x128xf32>
    %606 = tpu.matmul %604, %605, %cst_227 {dimension_numbers = #tpu.dot_dimension_numbers<[1], [0], [0], [1], [0, 0, 1, 1], [], []>} : vector<32x320xf32>, vector<320x128xf32>, vector<32x128xf32> -> vector<32x128xf32>
    %cst_228 = arith.constant 0.000000e+00 : f32
    %607 = vector.broadcast %cst_228 : f32 to vector<32x128xf32>
    %608 = arith.maximumf %606, %607 : vector<32x128xf32>
    %c0_229 = arith.constant 0 : index
    %c0_230 = arith.constant 0 : index
    %609 = vector.load %arg3[%c0_229, %c0_230] : memref<8x32xf32, #tpu.memory_space<vmem>>, vector<8x32xf32>
    %cst_231 = arith.constant dense<0.000000e+00> : vector<8x128xf32>
    %610 = tpu.matmul %609, %608, %cst_231 {dimension_numbers = #tpu.dot_dimension_numbers<[1], [0], [0], [1], [0, 0, 1, 1], [], []>} : vector<8x32xf32>, vector<32x128xf32>, vector<8x128xf32> -> vector<8x128xf32>
    %c19_i32_232 = arith.constant 19 : i32
    %611 = tpu.dynamic_rotate %610 by %c19_i32_232 dim 1 : vector<8x128xf32>, i32 -> vector<8x128xf32>
    %cst_233 = arith.constant 0.000000e+00 : f32
    %612 = vector.shape_cast %25 : vector<1x128xi1> to vector<1x128xi1>
    %613 = vector.broadcast %612 : vector<1x128xi1> to vector<8x128xi1>
    %614 = vector.broadcast %cst_233 : f32 to vector<8x128xf32>
    %615 = arith.select %613, %611, %614 : vector<8x128xi1>, vector<8x128xf32>
    %c0_234 = arith.constant 0 : index
    %c0_235 = arith.constant 0 : index
    %616 = vector.load %arg19[%c0_234, %c0_235] : memref<344x128xf32, #tpu.memory_space<vmem>>, vector<8x128xf32>
    tpu.vector_store %arg19[%c0_234, %c0_235], %615 {strides = array<i32>} : memref<344x128xf32, #tpu.memory_space<vmem>>, vector<8x128xf32>,
    %c18_i32_236 = arith.constant 18 : i32
    %617 = tpu.dynamic_rotate %610 by %c18_i32_236 dim 1 : vector<8x128xf32>, i32 -> vector<8x128xf32>
    %cst_237 = arith.constant 0.000000e+00 : f32
    %618 = vector.shape_cast %34 : vector<1x128xi1> to vector<1x128xi1>
    %619 = vector.broadcast %618 : vector<1x128xi1> to vector<8x128xi1>
    %620 = vector.broadcast %cst_237 : f32 to vector<8x128xf32>
    %621 = arith.select %619, %617, %620 : vector<8x128xi1>, vector<8x128xf32>
    %c8_238 = arith.constant 8 : index
    %c0_239 = arith.constant 0 : index
    %622 = vector.load %arg19[%c8_238, %c0_239] : memref<344x128xf32, #tpu.memory_space<vmem>>, vector<8x128xf32>
    tpu.vector_store %arg19[%c8_238, %c0_239], %621 {strides = array<i32>} : memref<344x128xf32, #tpu.memory_space<vmem>>, vector<8x128xf32>,
    %c17_i32_240 = arith.constant 17 : i32
    %623 = tpu.dynamic_rotate %610 by %c17_i32_240 dim 1 : vector<8x128xf32>, i32 -> vector<8x128xf32>
    %cst_241 = arith.constant 0.000000e+00 : f32
    %624 = vector.shape_cast %43 : vector<1x128xi1> to vector<1x128xi1>
    %625 = vector.broadcast %624 : vector<1x128xi1> to vector<8x128xi1>
    %626 = vector.broadcast %cst_241 : f32 to vector<8x128xf32>
    %627 = arith.select %625, %623, %626 : vector<8x128xi1>, vector<8x128xf32>
    %c16_242 = arith.constant 16 : index
    %c0_243 = arith.constant 0 : index
    %628 = vector.load %arg19[%c16_242, %c0_243] : memref<344x128xf32, #tpu.memory_space<vmem>>, vector<8x128xf32>
    tpu.vector_store %arg19[%c16_242, %c0_243], %627 {strides = array<i32>} : memref<344x128xf32, #tpu.memory_space<vmem>>, vector<8x128xf32>,
    %c16_i32_244 = arith.constant 16 : i32
    %629 = tpu.dynamic_rotate %610 by %c16_i32_244 dim 1 : vector<8x128xf32>, i32 -> vector<8x128xf32>
    %cst_245 = arith.constant 0.000000e+00 : f32
    %630 = vector.shape_cast %52 : vector<1x128xi1> to vector<1x128xi1>
    %631 = vector.broadcast %630 : vector<1x128xi1> to vector<8x128xi1>
    %632 = vector.broadcast %cst_245 : f32 to vector<8x128xf32>
    %633 = arith.select %631, %629, %632 : vector<8x128xi1>, vector<8x128xf32>
    %c24_246 = arith.constant 24 : index
    %c0_247 = arith.constant 0 : index
    %634 = vector.load %arg19[%c24_246, %c0_247] : memref<344x128xf32, #tpu.memory_space<vmem>>, vector<8x128xf32>
    tpu.vector_store %arg19[%c24_246, %c0_247], %633 {strides = array<i32>} : memref<344x128xf32, #tpu.memory_space<vmem>>, vector<8x128xf32>,
    %c15_i32_248 = arith.constant 15 : i32
    %635 = tpu.dynamic_rotate %610 by %c15_i32_248 dim 1 : vector<8x128xf32>, i32 -> vector<8x128xf32>
    %cst_249 = arith.constant 0.000000e+00 : f32
    %636 = vector.shape_cast %61 : vector<1x128xi1> to vector<1x128xi1>
    %637 = vector.broadcast %636 : vector<1x128xi1> to vector<8x128xi1>
    %638 = vector.broadcast %cst_249 : f32 to vector<8x128xf32>
    %639 = arith.select %637, %635, %638 : vector<8x128xi1>, vector<8x128xf32>
    %c32_250 = arith.constant 32 : index
    %c0_251 = arith.constant 0 : index
    %640 = vector.load %arg19[%c32_250, %c0_251] : memref<344x128xf32, #tpu.memory_space<vmem>>, vector<8x128xf32>
    tpu.vector_store %arg19[%c32_250, %c0_251], %639 {strides = array<i32>} : memref<344x128xf32, #tpu.memory_space<vmem>>, vector<8x128xf32>,
    %c14_i32_252 = arith.constant 14 : i32
    %641 = tpu.dynamic_rotate %610 by %c14_i32_252 dim 1 : vector<8x128xf32>, i32 -> vector<8x128xf32>
    %cst_253 = arith.constant 0.000000e+00 : f32
    %642 = vector.shape_cast %70 : vector<1x128xi1> to vector<1x128xi1>
    %643 = vector.broadcast %642 : vector<1x128xi1> to vector<8x128xi1>
    %644 = vector.broadcast %cst_253 : f32 to vector<8x128xf32>
    %645 = arith.select %643, %641, %644 : vector<8x128xi1>, vector<8x128xf32>
    %c40_254 = arith.constant 40 : index
    %c0_255 = arith.constant 0 : index
    %646 = vector.load %arg19[%c40_254, %c0_255] : memref<344x128xf32, #tpu.memory_space<vmem>>, vector<8x128xf32>
    tpu.vector_store %arg19[%c40_254, %c0_255], %645 {strides = array<i32>} : memref<344x128xf32, #tpu.memory_space<vmem>>, vector<8x128xf32>,
    %c13_i32_256 = arith.constant 13 : i32
    %647 = tpu.dynamic_rotate %610 by %c13_i32_256 dim 1 : vector<8x128xf32>, i32 -> vector<8x128xf32>
    %cst_257 = arith.constant 0.000000e+00 : f32
    %648 = vector.shape_cast %79 : vector<1x128xi1> to vector<1x128xi1>
    %649 = vector.broadcast %648 : vector<1x128xi1> to vector<8x128xi1>
    %650 = vector.broadcast %cst_257 : f32 to vector<8x128xf32>
    %651 = arith.select %649, %647, %650 : vector<8x128xi1>, vector<8x128xf32>
    %c48_258 = arith.constant 48 : index
    %c0_259 = arith.constant 0 : index
    %652 = vector.load %arg19[%c48_258, %c0_259] : memref<344x128xf32, #tpu.memory_space<vmem>>, vector<8x128xf32>
    tpu.vector_store %arg19[%c48_258, %c0_259], %651 {strides = array<i32>} : memref<344x128xf32, #tpu.memory_space<vmem>>, vector<8x128xf32>,
    %c12_i32_260 = arith.constant 12 : i32
    %653 = tpu.dynamic_rotate %610 by %c12_i32_260 dim 1 : vector<8x128xf32>, i32 -> vector<8x128xf32>
    %cst_261 = arith.constant 0.000000e+00 : f32
    %654 = vector.shape_cast %88 : vector<1x128xi1> to vector<1x128xi1>
    %655 = vector.broadcast %654 : vector<1x128xi1> to vector<8x128xi1>
    %656 = vector.broadcast %cst_261 : f32 to vector<8x128xf32>
    %657 = arith.select %655, %653, %656 : vector<8x128xi1>, vector<8x128xf32>
    %c56_262 = arith.constant 56 : index
    %c0_263 = arith.constant 0 : index
    %658 = vector.load %arg19[%c56_262, %c0_263] : memref<344x128xf32, #tpu.memory_space<vmem>>, vector<8x128xf32>
    tpu.vector_store %arg19[%c56_262, %c0_263], %657 {strides = array<i32>} : memref<344x128xf32, #tpu.memory_space<vmem>>, vector<8x128xf32>,
    %c11_i32_264 = arith.constant 11 : i32
    %659 = tpu.dynamic_rotate %610 by %c11_i32_264 dim 1 : vector<8x128xf32>, i32 -> vector<8x128xf32>
    %cst_265 = arith.constant 0.000000e+00 : f32
    %660 = vector.shape_cast %97 : vector<1x128xi1> to vector<1x128xi1>
    %661 = vector.broadcast %660 : vector<1x128xi1> to vector<8x128xi1>
    %662 = vector.broadcast %cst_265 : f32 to vector<8x128xf32>
    %663 = arith.select %661, %659, %662 : vector<8x128xi1>, vector<8x128xf32>
    %c64_266 = arith.constant 64 : index
    %c0_267 = arith.constant 0 : index
    %664 = vector.load %arg19[%c64_266, %c0_267] : memref<344x128xf32, #tpu.memory_space<vmem>>, vector<8x128xf32>
    tpu.vector_store %arg19[%c64_266, %c0_267], %663 {strides = array<i32>} : memref<344x128xf32, #tpu.memory_space<vmem>>, vector<8x128xf32>,
    %c10_i32_268 = arith.constant 10 : i32
    %665 = tpu.dynamic_rotate %610 by %c10_i32_268 dim 1 : vector<8x128xf32>, i32 -> vector<8x128xf32>
    %cst_269 = arith.constant 0.000000e+00 : f32
    %666 = vector.shape_cast %106 : vector<1x128xi1> to vector<1x128xi1>
    %667 = vector.broadcast %666 : vector<1x128xi1> to vector<8x128xi1>
    %668 = vector.broadcast %cst_269 : f32 to vector<8x128xf32>
    %669 = arith.select %667, %665, %668 : vector<8x128xi1>, vector<8x128xf32>
    %c72_270 = arith.constant 72 : index
    %c0_271 = arith.constant 0 : index
    %670 = vector.load %arg19[%c72_270, %c0_271] : memref<344x128xf32, #tpu.memory_space<vmem>>, vector<8x128xf32>
    tpu.vector_store %arg19[%c72_270, %c0_271], %669 {strides = array<i32>} : memref<344x128xf32, #tpu.memory_space<vmem>>, vector<8x128xf32>,
    %c9_i32_272 = arith.constant 9 : i32
    %671 = tpu.dynamic_rotate %610 by %c9_i32_272 dim 1 : vector<8x128xf32>, i32 -> vector<8x128xf32>
    %cst_273 = arith.constant 0.000000e+00 : f32
    %672 = vector.shape_cast %115 : vector<1x128xi1> to vector<1x128xi1>
    %673 = vector.broadcast %672 : vector<1x128xi1> to vector<8x128xi1>
    %674 = vector.broadcast %cst_273 : f32 to vector<8x128xf32>
    %675 = arith.select %673, %671, %674 : vector<8x128xi1>, vector<8x128xf32>
    %c80_274 = arith.constant 80 : index
    %c0_275 = arith.constant 0 : index
    %676 = vector.load %arg19[%c80_274, %c0_275] : memref<344x128xf32, #tpu.memory_space<vmem>>, vector<8x128xf32>
    tpu.vector_store %arg19[%c80_274, %c0_275], %675 {strides = array<i32>} : memref<344x128xf32, #tpu.memory_space<vmem>>, vector<8x128xf32>,
    %c8_i32_276 = arith.constant 8 : i32
    %677 = tpu.dynamic_rotate %610 by %c8_i32_276 dim 1 : vector<8x128xf32>, i32 -> vector<8x128xf32>
    %cst_277 = arith.constant 0.000000e+00 : f32
    %678 = vector.shape_cast %124 : vector<1x128xi1> to vector<1x128xi1>
    %679 = vector.broadcast %678 : vector<1x128xi1> to vector<8x128xi1>
    %680 = vector.broadcast %cst_277 : f32 to vector<8x128xf32>
    %681 = arith.select %679, %677, %680 : vector<8x128xi1>, vector<8x128xf32>
    %c88_278 = arith.constant 88 : index
    %c0_279 = arith.constant 0 : index
    %682 = vector.load %arg19[%c88_278, %c0_279] : memref<344x128xf32, #tpu.memory_space<vmem>>, vector<8x128xf32>
    tpu.vector_store %arg19[%c88_278, %c0_279], %681 {strides = array<i32>} : memref<344x128xf32, #tpu.memory_space<vmem>>, vector<8x128xf32>,
    %c7_i32_280 = arith.constant 7 : i32
    %683 = tpu.dynamic_rotate %610 by %c7_i32_280 dim 1 : vector<8x128xf32>, i32 -> vector<8x128xf32>
    %cst_281 = arith.constant 0.000000e+00 : f32
    %684 = vector.shape_cast %133 : vector<1x128xi1> to vector<1x128xi1>
    %685 = vector.broadcast %684 : vector<1x128xi1> to vector<8x128xi1>
    %686 = vector.broadcast %cst_281 : f32 to vector<8x128xf32>
    %687 = arith.select %685, %683, %686 : vector<8x128xi1>, vector<8x128xf32>
    %c96_282 = arith.constant 96 : index
    %c0_283 = arith.constant 0 : index
    %688 = vector.load %arg19[%c96_282, %c0_283] : memref<344x128xf32, #tpu.memory_space<vmem>>, vector<8x128xf32>
    tpu.vector_store %arg19[%c96_282, %c0_283], %687 {strides = array<i32>} : memref<344x128xf32, #tpu.memory_space<vmem>>, vector<8x128xf32>,
    %c6_i32_284 = arith.constant 6 : i32
    %689 = tpu.dynamic_rotate %610 by %c6_i32_284 dim 1 : vector<8x128xf32>, i32 -> vector<8x128xf32>
    %cst_285 = arith.constant 0.000000e+00 : f32
    %690 = vector.shape_cast %142 : vector<1x128xi1> to vector<1x128xi1>
    %691 = vector.broadcast %690 : vector<1x128xi1> to vector<8x128xi1>
    %692 = vector.broadcast %cst_285 : f32 to vector<8x128xf32>
    %693 = arith.select %691, %689, %692 : vector<8x128xi1>, vector<8x128xf32>
    %c104_286 = arith.constant 104 : index
    %c0_287 = arith.constant 0 : index
    %694 = vector.load %arg19[%c104_286, %c0_287] : memref<344x128xf32, #tpu.memory_space<vmem>>, vector<8x128xf32>
    tpu.vector_store %arg19[%c104_286, %c0_287], %693 {strides = array<i32>} : memref<344x128xf32, #tpu.memory_space<vmem>>, vector<8x128xf32>,
    %c5_i32_288 = arith.constant 5 : i32
    %695 = tpu.dynamic_rotate %610 by %c5_i32_288 dim 1 : vector<8x128xf32>, i32 -> vector<8x128xf32>
    %cst_289 = arith.constant 0.000000e+00 : f32
    %696 = vector.shape_cast %151 : vector<1x128xi1> to vector<1x128xi1>
    %697 = vector.broadcast %696 : vector<1x128xi1> to vector<8x128xi1>
    %698 = vector.broadcast %cst_289 : f32 to vector<8x128xf32>
    %699 = arith.select %697, %695, %698 : vector<8x128xi1>, vector<8x128xf32>
    %c112_290 = arith.constant 112 : index
    %c0_291 = arith.constant 0 : index
    %700 = vector.load %arg19[%c112_290, %c0_291] : memref<344x128xf32, #tpu.memory_space<vmem>>, vector<8x128xf32>
    tpu.vector_store %arg19[%c112_290, %c0_291], %699 {strides = array<i32>} : memref<344x128xf32, #tpu.memory_space<vmem>>, vector<8x128xf32>,
    %c4_i32_292 = arith.constant 4 : i32
    %701 = tpu.dynamic_rotate %610 by %c4_i32_292 dim 1 : vector<8x128xf32>, i32 -> vector<8x128xf32>
    %cst_293 = arith.constant 0.000000e+00 : f32
    %702 = vector.shape_cast %160 : vector<1x128xi1> to vector<1x128xi1>
    %703 = vector.broadcast %702 : vector<1x128xi1> to vector<8x128xi1>
    %704 = vector.broadcast %cst_293 : f32 to vector<8x128xf32>
    %705 = arith.select %703, %701, %704 : vector<8x128xi1>, vector<8x128xf32>
    %c120_294 = arith.constant 120 : index
    %c0_295 = arith.constant 0 : index
    %706 = vector.load %arg19[%c120_294, %c0_295] : memref<344x128xf32, #tpu.memory_space<vmem>>, vector<8x128xf32>
    tpu.vector_store %arg19[%c120_294, %c0_295], %705 {strides = array<i32>} : memref<344x128xf32, #tpu.memory_space<vmem>>, vector<8x128xf32>,
    %c3_i32_296 = arith.constant 3 : i32
    %707 = tpu.dynamic_rotate %610 by %c3_i32_296 dim 1 : vector<8x128xf32>, i32 -> vector<8x128xf32>
    %cst_297 = arith.constant 0.000000e+00 : f32
    %708 = vector.shape_cast %169 : vector<1x128xi1> to vector<1x128xi1>
    %709 = vector.broadcast %708 : vector<1x128xi1> to vector<8x128xi1>
    %710 = vector.broadcast %cst_297 : f32 to vector<8x128xf32>
    %711 = arith.select %709, %707, %710 : vector<8x128xi1>, vector<8x128xf32>
    %c128_298 = arith.constant 128 : index
    %c0_299 = arith.constant 0 : index
    %712 = vector.load %arg19[%c128_298, %c0_299] : memref<344x128xf32, #tpu.memory_space<vmem>>, vector<8x128xf32>
    tpu.vector_store %arg19[%c128_298, %c0_299], %711 {strides = array<i32>} : memref<344x128xf32, #tpu.memory_space<vmem>>, vector<8x128xf32>,
    %c2_i32_300 = arith.constant 2 : i32
    %713 = tpu.dynamic_rotate %610 by %c2_i32_300 dim 1 : vector<8x128xf32>, i32 -> vector<8x128xf32>
    %cst_301 = arith.constant 0.000000e+00 : f32
    %714 = vector.shape_cast %178 : vector<1x128xi1> to vector<1x128xi1>
    %715 = vector.broadcast %714 : vector<1x128xi1> to vector<8x128xi1>
    %716 = vector.broadcast %cst_301 : f32 to vector<8x128xf32>
    %717 = arith.select %715, %713, %716 : vector<8x128xi1>, vector<8x128xf32>
    %c136_302 = arith.constant 136 : index
    %c0_303 = arith.constant 0 : index
    %718 = vector.load %arg19[%c136_302, %c0_303] : memref<344x128xf32, #tpu.memory_space<vmem>>, vector<8x128xf32>
    tpu.vector_store %arg19[%c136_302, %c0_303], %717 {strides = array<i32>} : memref<344x128xf32, #tpu.memory_space<vmem>>, vector<8x128xf32>,
    %c1_i32_304 = arith.constant 1 : i32
    %719 = tpu.dynamic_rotate %610 by %c1_i32_304 dim 1 : vector<8x128xf32>, i32 -> vector<8x128xf32>
    %cst_305 = arith.constant 0.000000e+00 : f32
    %720 = vector.shape_cast %187 : vector<1x128xi1> to vector<1x128xi1>
    %721 = vector.broadcast %720 : vector<1x128xi1> to vector<8x128xi1>
    %722 = vector.broadcast %cst_305 : f32 to vector<8x128xf32>
    %723 = arith.select %721, %719, %722 : vector<8x128xi1>, vector<8x128xf32>
    %c144_306 = arith.constant 144 : index
    %c0_307 = arith.constant 0 : index
    %724 = vector.load %arg19[%c144_306, %c0_307] : memref<344x128xf32, #tpu.memory_space<vmem>>, vector<8x128xf32>
    tpu.vector_store %arg19[%c144_306, %c0_307], %723 {strides = array<i32>} : memref<344x128xf32, #tpu.memory_space<vmem>>, vector<8x128xf32>,
    %c152_308 = arith.constant 152 : index
    %c0_309 = arith.constant 0 : index
    %725 = vector.load %arg19[%c152_308, %c0_309] : memref<344x128xf32, #tpu.memory_space<vmem>>, vector<8x128xf32>
    tpu.vector_store %arg19[%c152_308, %c0_309], %610 {strides = array<i32>} : memref<344x128xf32, #tpu.memory_space<vmem>>, vector<8x128xf32>,
    %c127_i32_310 = arith.constant 127 : i32
    %726 = tpu.dynamic_rotate %610 by %c127_i32_310 dim 1 : vector<8x128xf32>, i32 -> vector<8x128xf32>
    %cst_311 = arith.constant 0.000000e+00 : f32
    %727 = vector.shape_cast %196 : vector<1x128xi1> to vector<1x128xi1>
    %728 = vector.broadcast %727 : vector<1x128xi1> to vector<8x128xi1>
    %729 = vector.broadcast %cst_311 : f32 to vector<8x128xf32>
    %730 = arith.select %728, %726, %729 : vector<8x128xi1>, vector<8x128xf32>
    %c160_312 = arith.constant 160 : index
    %c0_313 = arith.constant 0 : index
    %731 = vector.load %arg19[%c160_312, %c0_313] : memref<344x128xf32, #tpu.memory_space<vmem>>, vector<8x128xf32>
    tpu.vector_store %arg19[%c160_312, %c0_313], %730 {strides = array<i32>} : memref<344x128xf32, #tpu.memory_space<vmem>>, vector<8x128xf32>,
    %c126_i32_314 = arith.constant 126 : i32
    %732 = tpu.dynamic_rotate %610 by %c126_i32_314 dim 1 : vector<8x128xf32>, i32 -> vector<8x128xf32>
    %cst_315 = arith.constant 0.000000e+00 : f32
    %733 = vector.shape_cast %205 : vector<1x128xi1> to vector<1x128xi1>
    %734 = vector.broadcast %733 : vector<1x128xi1> to vector<8x128xi1>
    %735 = vector.broadcast %cst_315 : f32 to vector<8x128xf32>
    %736 = arith.select %734, %732, %735 : vector<8x128xi1>, vector<8x128xf32>
    %c168_316 = arith.constant 168 : index
    %c0_317 = arith.constant 0 : index
    %737 = vector.load %arg19[%c168_316, %c0_317] : memref<344x128xf32, #tpu.memory_space<vmem>>, vector<8x128xf32>
    tpu.vector_store %arg19[%c168_316, %c0_317], %736 {strides = array<i32>} : memref<344x128xf32, #tpu.memory_space<vmem>>, vector<8x128xf32>,
    %c125_i32_318 = arith.constant 125 : i32
    %738 = tpu.dynamic_rotate %610 by %c125_i32_318 dim 1 : vector<8x128xf32>, i32 -> vector<8x128xf32>
    %cst_319 = arith.constant 0.000000e+00 : f32
    %739 = vector.shape_cast %214 : vector<1x128xi1> to vector<1x128xi1>
    %740 = vector.broadcast %739 : vector<1x128xi1> to vector<8x128xi1>
    %741 = vector.broadcast %cst_319 : f32 to vector<8x128xf32>
    %742 = arith.select %740, %738, %741 : vector<8x128xi1>, vector<8x128xf32>
    %c176_320 = arith.constant 176 : index
    %c0_321 = arith.constant 0 : index
    %743 = vector.load %arg19[%c176_320, %c0_321] : memref<344x128xf32, #tpu.memory_space<vmem>>, vector<8x128xf32>
    tpu.vector_store %arg19[%c176_320, %c0_321], %742 {strides = array<i32>} : memref<344x128xf32, #tpu.memory_space<vmem>>, vector<8x128xf32>,
    %c124_i32_322 = arith.constant 124 : i32
    %744 = tpu.dynamic_rotate %610 by %c124_i32_322 dim 1 : vector<8x128xf32>, i32 -> vector<8x128xf32>
    %cst_323 = arith.constant 0.000000e+00 : f32
    %745 = vector.shape_cast %223 : vector<1x128xi1> to vector<1x128xi1>
    %746 = vector.broadcast %745 : vector<1x128xi1> to vector<8x128xi1>
    %747 = vector.broadcast %cst_323 : f32 to vector<8x128xf32>
    %748 = arith.select %746, %744, %747 : vector<8x128xi1>, vector<8x128xf32>
    %c184_324 = arith.constant 184 : index
    %c0_325 = arith.constant 0 : index
    %749 = vector.load %arg19[%c184_324, %c0_325] : memref<344x128xf32, #tpu.memory_space<vmem>>, vector<8x128xf32>
    tpu.vector_store %arg19[%c184_324, %c0_325], %748 {strides = array<i32>} : memref<344x128xf32, #tpu.memory_space<vmem>>, vector<8x128xf32>,
    %c123_i32_326 = arith.constant 123 : i32
    %750 = tpu.dynamic_rotate %610 by %c123_i32_326 dim 1 : vector<8x128xf32>, i32 -> vector<8x128xf32>
    %cst_327 = arith.constant 0.000000e+00 : f32
    %751 = vector.shape_cast %232 : vector<1x128xi1> to vector<1x128xi1>
    %752 = vector.broadcast %751 : vector<1x128xi1> to vector<8x128xi1>
    %753 = vector.broadcast %cst_327 : f32 to vector<8x128xf32>
    %754 = arith.select %752, %750, %753 : vector<8x128xi1>, vector<8x128xf32>
    %c192_328 = arith.constant 192 : index
    %c0_329 = arith.constant 0 : index
    %755 = vector.load %arg19[%c192_328, %c0_329] : memref<344x128xf32, #tpu.memory_space<vmem>>, vector<8x128xf32>
    tpu.vector_store %arg19[%c192_328, %c0_329], %754 {strides = array<i32>} : memref<344x128xf32, #tpu.memory_space<vmem>>, vector<8x128xf32>,
    %c122_i32_330 = arith.constant 122 : i32
    %756 = tpu.dynamic_rotate %610 by %c122_i32_330 dim 1 : vector<8x128xf32>, i32 -> vector<8x128xf32>
    %cst_331 = arith.constant 0.000000e+00 : f32
    %757 = vector.shape_cast %241 : vector<1x128xi1> to vector<1x128xi1>
    %758 = vector.broadcast %757 : vector<1x128xi1> to vector<8x128xi1>
    %759 = vector.broadcast %cst_331 : f32 to vector<8x128xf32>
    %760 = arith.select %758, %756, %759 : vector<8x128xi1>, vector<8x128xf32>
    %c200_332 = arith.constant 200 : index
    %c0_333 = arith.constant 0 : index
    %761 = vector.load %arg19[%c200_332, %c0_333] : memref<344x128xf32, #tpu.memory_space<vmem>>, vector<8x128xf32>
    tpu.vector_store %arg19[%c200_332, %c0_333], %760 {strides = array<i32>} : memref<344x128xf32, #tpu.memory_space<vmem>>, vector<8x128xf32>,
    %c121_i32_334 = arith.constant 121 : i32
    %762 = tpu.dynamic_rotate %610 by %c121_i32_334 dim 1 : vector<8x128xf32>, i32 -> vector<8x128xf32>
    %cst_335 = arith.constant 0.000000e+00 : f32
    %763 = vector.shape_cast %250 : vector<1x128xi1> to vector<1x128xi1>
    %764 = vector.broadcast %763 : vector<1x128xi1> to vector<8x128xi1>
    %765 = vector.broadcast %cst_335 : f32 to vector<8x128xf32>
    %766 = arith.select %764, %762, %765 : vector<8x128xi1>, vector<8x128xf32>
    %c208_336 = arith.constant 208 : index
    %c0_337 = arith.constant 0 : index
    %767 = vector.load %arg19[%c208_336, %c0_337] : memref<344x128xf32, #tpu.memory_space<vmem>>, vector<8x128xf32>
    tpu.vector_store %arg19[%c208_336, %c0_337], %766 {strides = array<i32>} : memref<344x128xf32, #tpu.memory_space<vmem>>, vector<8x128xf32>,
    %c120_i32_338 = arith.constant 120 : i32
    %768 = tpu.dynamic_rotate %610 by %c120_i32_338 dim 1 : vector<8x128xf32>, i32 -> vector<8x128xf32>
    %cst_339 = arith.constant 0.000000e+00 : f32
    %769 = vector.shape_cast %259 : vector<1x128xi1> to vector<1x128xi1>
    %770 = vector.broadcast %769 : vector<1x128xi1> to vector<8x128xi1>
    %771 = vector.broadcast %cst_339 : f32 to vector<8x128xf32>
    %772 = arith.select %770, %768, %771 : vector<8x128xi1>, vector<8x128xf32>
    %c216_340 = arith.constant 216 : index
    %c0_341 = arith.constant 0 : index
    %773 = vector.load %arg19[%c216_340, %c0_341] : memref<344x128xf32, #tpu.memory_space<vmem>>, vector<8x128xf32>
    tpu.vector_store %arg19[%c216_340, %c0_341], %772 {strides = array<i32>} : memref<344x128xf32, #tpu.memory_space<vmem>>, vector<8x128xf32>,
    %c119_i32_342 = arith.constant 119 : i32
    %774 = tpu.dynamic_rotate %610 by %c119_i32_342 dim 1 : vector<8x128xf32>, i32 -> vector<8x128xf32>
    %cst_343 = arith.constant 0.000000e+00 : f32
    %775 = vector.shape_cast %268 : vector<1x128xi1> to vector<1x128xi1>
    %776 = vector.broadcast %775 : vector<1x128xi1> to vector<8x128xi1>
    %777 = vector.broadcast %cst_343 : f32 to vector<8x128xf32>
    %778 = arith.select %776, %774, %777 : vector<8x128xi1>, vector<8x128xf32>
    %c224_344 = arith.constant 224 : index
    %c0_345 = arith.constant 0 : index
    %779 = vector.load %arg19[%c224_344, %c0_345] : memref<344x128xf32, #tpu.memory_space<vmem>>, vector<8x128xf32>
    tpu.vector_store %arg19[%c224_344, %c0_345], %778 {strides = array<i32>} : memref<344x128xf32, #tpu.memory_space<vmem>>, vector<8x128xf32>,
    %c118_i32_346 = arith.constant 118 : i32
    %780 = tpu.dynamic_rotate %610 by %c118_i32_346 dim 1 : vector<8x128xf32>, i32 -> vector<8x128xf32>
    %cst_347 = arith.constant 0.000000e+00 : f32
    %781 = vector.shape_cast %277 : vector<1x128xi1> to vector<1x128xi1>
    %782 = vector.broadcast %781 : vector<1x128xi1> to vector<8x128xi1>
    %783 = vector.broadcast %cst_347 : f32 to vector<8x128xf32>
    %784 = arith.select %782, %780, %783 : vector<8x128xi1>, vector<8x128xf32>
    %c232_348 = arith.constant 232 : index
    %c0_349 = arith.constant 0 : index
    %785 = vector.load %arg19[%c232_348, %c0_349] : memref<344x128xf32, #tpu.memory_space<vmem>>, vector<8x128xf32>
    tpu.vector_store %arg19[%c232_348, %c0_349], %784 {strides = array<i32>} : memref<344x128xf32, #tpu.memory_space<vmem>>, vector<8x128xf32>,
    %c117_i32_350 = arith.constant 117 : i32
    %786 = tpu.dynamic_rotate %610 by %c117_i32_350 dim 1 : vector<8x128xf32>, i32 -> vector<8x128xf32>
    %cst_351 = arith.constant 0.000000e+00 : f32
    %787 = vector.shape_cast %286 : vector<1x128xi1> to vector<1x128xi1>
    %788 = vector.broadcast %787 : vector<1x128xi1> to vector<8x128xi1>
    %789 = vector.broadcast %cst_351 : f32 to vector<8x128xf32>
    %790 = arith.select %788, %786, %789 : vector<8x128xi1>, vector<8x128xf32>
    %c240_352 = arith.constant 240 : index
    %c0_353 = arith.constant 0 : index
    %791 = vector.load %arg19[%c240_352, %c0_353] : memref<344x128xf32, #tpu.memory_space<vmem>>, vector<8x128xf32>
    tpu.vector_store %arg19[%c240_352, %c0_353], %790 {strides = array<i32>} : memref<344x128xf32, #tpu.memory_space<vmem>>, vector<8x128xf32>,
    %c116_i32_354 = arith.constant 116 : i32
    %792 = tpu.dynamic_rotate %610 by %c116_i32_354 dim 1 : vector<8x128xf32>, i32 -> vector<8x128xf32>
    %cst_355 = arith.constant 0.000000e+00 : f32
    %793 = vector.shape_cast %295 : vector<1x128xi1> to vector<1x128xi1>
    %794 = vector.broadcast %793 : vector<1x128xi1> to vector<8x128xi1>
    %795 = vector.broadcast %cst_355 : f32 to vector<8x128xf32>
    %796 = arith.select %794, %792, %795 : vector<8x128xi1>, vector<8x128xf32>
    %c248_356 = arith.constant 248 : index
    %c0_357 = arith.constant 0 : index
    %797 = vector.load %arg19[%c248_356, %c0_357] : memref<344x128xf32, #tpu.memory_space<vmem>>, vector<8x128xf32>
    tpu.vector_store %arg19[%c248_356, %c0_357], %796 {strides = array<i32>} : memref<344x128xf32, #tpu.memory_space<vmem>>, vector<8x128xf32>,
    %c115_i32_358 = arith.constant 115 : i32
    %798 = tpu.dynamic_rotate %610 by %c115_i32_358 dim 1 : vector<8x128xf32>, i32 -> vector<8x128xf32>
    %cst_359 = arith.constant 0.000000e+00 : f32
    %799 = vector.shape_cast %304 : vector<1x128xi1> to vector<1x128xi1>
    %800 = vector.broadcast %799 : vector<1x128xi1> to vector<8x128xi1>
    %801 = vector.broadcast %cst_359 : f32 to vector<8x128xf32>
    %802 = arith.select %800, %798, %801 : vector<8x128xi1>, vector<8x128xf32>
    %c256_360 = arith.constant 256 : index
    %c0_361 = arith.constant 0 : index
    %803 = vector.load %arg19[%c256_360, %c0_361] : memref<344x128xf32, #tpu.memory_space<vmem>>, vector<8x128xf32>
    tpu.vector_store %arg19[%c256_360, %c0_361], %802 {strides = array<i32>} : memref<344x128xf32, #tpu.memory_space<vmem>>, vector<8x128xf32>,
    %c114_i32_362 = arith.constant 114 : i32
    %804 = tpu.dynamic_rotate %610 by %c114_i32_362 dim 1 : vector<8x128xf32>, i32 -> vector<8x128xf32>
    %cst_363 = arith.constant 0.000000e+00 : f32
    %805 = vector.shape_cast %313 : vector<1x128xi1> to vector<1x128xi1>
    %806 = vector.broadcast %805 : vector<1x128xi1> to vector<8x128xi1>
    %807 = vector.broadcast %cst_363 : f32 to vector<8x128xf32>
    %808 = arith.select %806, %804, %807 : vector<8x128xi1>, vector<8x128xf32>
    %c264_364 = arith.constant 264 : index
    %c0_365 = arith.constant 0 : index
    %809 = vector.load %arg19[%c264_364, %c0_365] : memref<344x128xf32, #tpu.memory_space<vmem>>, vector<8x128xf32>
    tpu.vector_store %arg19[%c264_364, %c0_365], %808 {strides = array<i32>} : memref<344x128xf32, #tpu.memory_space<vmem>>, vector<8x128xf32>,
    %c113_i32_366 = arith.constant 113 : i32
    %810 = tpu.dynamic_rotate %610 by %c113_i32_366 dim 1 : vector<8x128xf32>, i32 -> vector<8x128xf32>
    %cst_367 = arith.constant 0.000000e+00 : f32
    %811 = vector.shape_cast %322 : vector<1x128xi1> to vector<1x128xi1>
    %812 = vector.broadcast %811 : vector<1x128xi1> to vector<8x128xi1>
    %813 = vector.broadcast %cst_367 : f32 to vector<8x128xf32>
    %814 = arith.select %812, %810, %813 : vector<8x128xi1>, vector<8x128xf32>
    %c272_368 = arith.constant 272 : index
    %c0_369 = arith.constant 0 : index
    %815 = vector.load %arg19[%c272_368, %c0_369] : memref<344x128xf32, #tpu.memory_space<vmem>>, vector<8x128xf32>
    tpu.vector_store %arg19[%c272_368, %c0_369], %814 {strides = array<i32>} : memref<344x128xf32, #tpu.memory_space<vmem>>, vector<8x128xf32>,
    %c112_i32_370 = arith.constant 112 : i32
    %816 = tpu.dynamic_rotate %610 by %c112_i32_370 dim 1 : vector<8x128xf32>, i32 -> vector<8x128xf32>
    %cst_371 = arith.constant 0.000000e+00 : f32
    %817 = vector.shape_cast %331 : vector<1x128xi1> to vector<1x128xi1>
    %818 = vector.broadcast %817 : vector<1x128xi1> to vector<8x128xi1>
    %819 = vector.broadcast %cst_371 : f32 to vector<8x128xf32>
    %820 = arith.select %818, %816, %819 : vector<8x128xi1>, vector<8x128xf32>
    %c280_372 = arith.constant 280 : index
    %c0_373 = arith.constant 0 : index
    %821 = vector.load %arg19[%c280_372, %c0_373] : memref<344x128xf32, #tpu.memory_space<vmem>>, vector<8x128xf32>
    tpu.vector_store %arg19[%c280_372, %c0_373], %820 {strides = array<i32>} : memref<344x128xf32, #tpu.memory_space<vmem>>, vector<8x128xf32>,
    %c111_i32_374 = arith.constant 111 : i32
    %822 = tpu.dynamic_rotate %610 by %c111_i32_374 dim 1 : vector<8x128xf32>, i32 -> vector<8x128xf32>
    %cst_375 = arith.constant 0.000000e+00 : f32
    %823 = vector.shape_cast %340 : vector<1x128xi1> to vector<1x128xi1>
    %824 = vector.broadcast %823 : vector<1x128xi1> to vector<8x128xi1>
    %825 = vector.broadcast %cst_375 : f32 to vector<8x128xf32>
    %826 = arith.select %824, %822, %825 : vector<8x128xi1>, vector<8x128xf32>
    %c288_376 = arith.constant 288 : index
    %c0_377 = arith.constant 0 : index
    %827 = vector.load %arg19[%c288_376, %c0_377] : memref<344x128xf32, #tpu.memory_space<vmem>>, vector<8x128xf32>
    tpu.vector_store %arg19[%c288_376, %c0_377], %826 {strides = array<i32>} : memref<344x128xf32, #tpu.memory_space<vmem>>, vector<8x128xf32>,
    %c110_i32_378 = arith.constant 110 : i32
    %828 = tpu.dynamic_rotate %610 by %c110_i32_378 dim 1 : vector<8x128xf32>, i32 -> vector<8x128xf32>
    %cst_379 = arith.constant 0.000000e+00 : f32
    %829 = vector.shape_cast %349 : vector<1x128xi1> to vector<1x128xi1>
    %830 = vector.broadcast %829 : vector<1x128xi1> to vector<8x128xi1>
    %831 = vector.broadcast %cst_379 : f32 to vector<8x128xf32>
    %832 = arith.select %830, %828, %831 : vector<8x128xi1>, vector<8x128xf32>
    %c296_380 = arith.constant 296 : index
    %c0_381 = arith.constant 0 : index
    %833 = vector.load %arg19[%c296_380, %c0_381] : memref<344x128xf32, #tpu.memory_space<vmem>>, vector<8x128xf32>
    tpu.vector_store %arg19[%c296_380, %c0_381], %832 {strides = array<i32>} : memref<344x128xf32, #tpu.memory_space<vmem>>, vector<8x128xf32>,
    %c109_i32_382 = arith.constant 109 : i32
    %834 = tpu.dynamic_rotate %610 by %c109_i32_382 dim 1 : vector<8x128xf32>, i32 -> vector<8x128xf32>
    %cst_383 = arith.constant 0.000000e+00 : f32
    %835 = vector.shape_cast %358 : vector<1x128xi1> to vector<1x128xi1>
    %836 = vector.broadcast %835 : vector<1x128xi1> to vector<8x128xi1>
    %837 = vector.broadcast %cst_383 : f32 to vector<8x128xf32>
    %838 = arith.select %836, %834, %837 : vector<8x128xi1>, vector<8x128xf32>
    %c304_384 = arith.constant 304 : index
    %c0_385 = arith.constant 0 : index
    %839 = vector.load %arg19[%c304_384, %c0_385] : memref<344x128xf32, #tpu.memory_space<vmem>>, vector<8x128xf32>
    tpu.vector_store %arg19[%c304_384, %c0_385], %838 {strides = array<i32>} : memref<344x128xf32, #tpu.memory_space<vmem>>, vector<8x128xf32>,
    %c127_i32_386 = arith.constant 127 : i32
    %840 = tpu.dynamic_rotate %608 by %c127_i32_386 dim 1 : vector<32x128xf32>, i32 -> vector<32x128xf32>
    %cst_387 = arith.constant 0xFF800000 : f32
    %841 = vector.shape_cast %196 : vector<1x128xi1> to vector<1x128xi1>
    %842 = vector.broadcast %841 : vector<1x128xi1> to vector<32x128xi1>
    %843 = vector.broadcast %cst_387 : f32 to vector<32x128xf32>
    %844 = arith.select %842, %840, %843 : vector<32x128xi1>, vector<32x128xf32>
    %c1_i32_388 = arith.constant 1 : i32
    %845 = tpu.dynamic_rotate %608 by %c1_i32_388 dim 1 : vector<32x128xf32>, i32 -> vector<32x128xf32>
    %cst_389 = arith.constant 0xFF800000 : f32
    %846 = vector.shape_cast %187 : vector<1x128xi1> to vector<1x128xi1>
    %847 = vector.broadcast %846 : vector<1x128xi1> to vector<32x128xi1>
    %848 = vector.broadcast %cst_389 : f32 to vector<32x128xf32>
    %849 = arith.select %847, %845, %848 : vector<32x128xi1>, vector<32x128xf32>
    %850 = arith.maximumf %844, %849 : vector<32x128xf32>
    %851 = arith.maximumf %608, %850 : vector<32x128xf32>
    %c312_390 = arith.constant 312 : index
    %c0_391 = arith.constant 0 : index
    %852 = vector.load %arg19[%c312_390, %c0_391] : memref<344x128xf32, #tpu.memory_space<vmem>>, vector<32x128xf32>
    tpu.vector_store %arg19[%c312_390, %c0_391], %851 {strides = array<i32>} : memref<344x128xf32, #tpu.memory_space<vmem>>, vector<32x128xf32>,
    %c0_392 = arith.constant 0 : index
    %c0_393 = arith.constant 0 : index
    %853 = vector.load %arg4[%c0_392, %c0_393] : memref<32x344xf32, #tpu.memory_space<vmem>>, vector<32x344xf32>
    %c0_394 = arith.constant 0 : index
    %c0_395 = arith.constant 0 : index
    %854 = vector.load %arg19[%c0_394, %c0_395] : memref<344x128xf32, #tpu.memory_space<vmem>>, vector<344x128xf32>
    %cst_396 = arith.constant dense<0.000000e+00> : vector<32x128xf32>
    %855 = tpu.matmul %853, %854, %cst_396 {dimension_numbers = #tpu.dot_dimension_numbers<[1], [0], [0], [1], [0, 0, 1, 1], [], []>} : vector<32x344xf32>, vector<344x128xf32>, vector<32x128xf32> -> vector<32x128xf32>
    %cst_397 = arith.constant 0.000000e+00 : f32
    %856 = vector.broadcast %cst_397 : f32 to vector<32x128xf32>
    %857 = arith.maximumf %855, %856 : vector<32x128xf32>
    %c0_398 = arith.constant 0 : index
    %c0_399 = arith.constant 0 : index
    %858 = vector.load %arg5[%c0_398, %c0_399] : memref<8x32xf32, #tpu.memory_space<vmem>>, vector<8x32xf32>
    %cst_400 = arith.constant dense<0.000000e+00> : vector<8x128xf32>
    %859 = tpu.matmul %858, %857, %cst_400 {dimension_numbers = #tpu.dot_dimension_numbers<[1], [0], [0], [1], [0, 0, 1, 1], [], []>} : vector<8x32xf32>, vector<32x128xf32>, vector<8x128xf32> -> vector<8x128xf32>
    %c19_i32_401 = arith.constant 19 : i32
    %860 = tpu.dynamic_rotate %859 by %c19_i32_401 dim 1 : vector<8x128xf32>, i32 -> vector<8x128xf32>
    %cst_402 = arith.constant 0.000000e+00 : f32
    %861 = vector.shape_cast %25 : vector<1x128xi1> to vector<1x128xi1>
    %862 = vector.broadcast %861 : vector<1x128xi1> to vector<8x128xi1>
    %863 = vector.broadcast %cst_402 : f32 to vector<8x128xf32>
    %864 = arith.select %862, %860, %863 : vector<8x128xi1>, vector<8x128xf32>
    %c0_403 = arith.constant 0 : index
    %c0_404 = arith.constant 0 : index
    %865 = vector.load %arg19[%c0_403, %c0_404] : memref<344x128xf32, #tpu.memory_space<vmem>>, vector<8x128xf32>
    tpu.vector_store %arg19[%c0_403, %c0_404], %864 {strides = array<i32>} : memref<344x128xf32, #tpu.memory_space<vmem>>, vector<8x128xf32>,
    %c18_i32_405 = arith.constant 18 : i32
    %866 = tpu.dynamic_rotate %859 by %c18_i32_405 dim 1 : vector<8x128xf32>, i32 -> vector<8x128xf32>
    %cst_406 = arith.constant 0.000000e+00 : f32
    %867 = vector.shape_cast %34 : vector<1x128xi1> to vector<1x128xi1>
    %868 = vector.broadcast %867 : vector<1x128xi1> to vector<8x128xi1>
    %869 = vector.broadcast %cst_406 : f32 to vector<8x128xf32>
    %870 = arith.select %868, %866, %869 : vector<8x128xi1>, vector<8x128xf32>
    %c8_407 = arith.constant 8 : index
    %c0_408 = arith.constant 0 : index
    %871 = vector.load %arg19[%c8_407, %c0_408] : memref<344x128xf32, #tpu.memory_space<vmem>>, vector<8x128xf32>
    tpu.vector_store %arg19[%c8_407, %c0_408], %870 {strides = array<i32>} : memref<344x128xf32, #tpu.memory_space<vmem>>, vector<8x128xf32>,
    %c17_i32_409 = arith.constant 17 : i32
    %872 = tpu.dynamic_rotate %859 by %c17_i32_409 dim 1 : vector<8x128xf32>, i32 -> vector<8x128xf32>
    %cst_410 = arith.constant 0.000000e+00 : f32
    %873 = vector.shape_cast %43 : vector<1x128xi1> to vector<1x128xi1>
    %874 = vector.broadcast %873 : vector<1x128xi1> to vector<8x128xi1>
    %875 = vector.broadcast %cst_410 : f32 to vector<8x128xf32>
    %876 = arith.select %874, %872, %875 : vector<8x128xi1>, vector<8x128xf32>
    %c16_411 = arith.constant 16 : index
    %c0_412 = arith.constant 0 : index
    %877 = vector.load %arg19[%c16_411, %c0_412] : memref<344x128xf32, #tpu.memory_space<vmem>>, vector<8x128xf32>
    tpu.vector_store %arg19[%c16_411, %c0_412], %876 {strides = array<i32>} : memref<344x128xf32, #tpu.memory_space<vmem>>, vector<8x128xf32>,
    %c16_i32_413 = arith.constant 16 : i32
    %878 = tpu.dynamic_rotate %859 by %c16_i32_413 dim 1 : vector<8x128xf32>, i32 -> vector<8x128xf32>
    %cst_414 = arith.constant 0.000000e+00 : f32
    %879 = vector.shape_cast %52 : vector<1x128xi1> to vector<1x128xi1>
    %880 = vector.broadcast %879 : vector<1x128xi1> to vector<8x128xi1>
    %881 = vector.broadcast %cst_414 : f32 to vector<8x128xf32>
    %882 = arith.select %880, %878, %881 : vector<8x128xi1>, vector<8x128xf32>
    %c24_415 = arith.constant 24 : index
    %c0_416 = arith.constant 0 : index
    %883 = vector.load %arg19[%c24_415, %c0_416] : memref<344x128xf32, #tpu.memory_space<vmem>>, vector<8x128xf32>
    tpu.vector_store %arg19[%c24_415, %c0_416], %882 {strides = array<i32>} : memref<344x128xf32, #tpu.memory_space<vmem>>, vector<8x128xf32>,
    %c15_i32_417 = arith.constant 15 : i32
    %884 = tpu.dynamic_rotate %859 by %c15_i32_417 dim 1 : vector<8x128xf32>, i32 -> vector<8x128xf32>
    %cst_418 = arith.constant 0.000000e+00 : f32
    %885 = vector.shape_cast %61 : vector<1x128xi1> to vector<1x128xi1>
    %886 = vector.broadcast %885 : vector<1x128xi1> to vector<8x128xi1>
    %887 = vector.broadcast %cst_418 : f32 to vector<8x128xf32>
    %888 = arith.select %886, %884, %887 : vector<8x128xi1>, vector<8x128xf32>
    %c32_419 = arith.constant 32 : index
    %c0_420 = arith.constant 0 : index
    %889 = vector.load %arg19[%c32_419, %c0_420] : memref<344x128xf32, #tpu.memory_space<vmem>>, vector<8x128xf32>
    tpu.vector_store %arg19[%c32_419, %c0_420], %888 {strides = array<i32>} : memref<344x128xf32, #tpu.memory_space<vmem>>, vector<8x128xf32>,
    %c14_i32_421 = arith.constant 14 : i32
    %890 = tpu.dynamic_rotate %859 by %c14_i32_421 dim 1 : vector<8x128xf32>, i32 -> vector<8x128xf32>
    %cst_422 = arith.constant 0.000000e+00 : f32
    %891 = vector.shape_cast %70 : vector<1x128xi1> to vector<1x128xi1>
    %892 = vector.broadcast %891 : vector<1x128xi1> to vector<8x128xi1>
    %893 = vector.broadcast %cst_422 : f32 to vector<8x128xf32>
    %894 = arith.select %892, %890, %893 : vector<8x128xi1>, vector<8x128xf32>
    %c40_423 = arith.constant 40 : index
    %c0_424 = arith.constant 0 : index
    %895 = vector.load %arg19[%c40_423, %c0_424] : memref<344x128xf32, #tpu.memory_space<vmem>>, vector<8x128xf32>
    tpu.vector_store %arg19[%c40_423, %c0_424], %894 {strides = array<i32>} : memref<344x128xf32, #tpu.memory_space<vmem>>, vector<8x128xf32>,
    %c13_i32_425 = arith.constant 13 : i32
    %896 = tpu.dynamic_rotate %859 by %c13_i32_425 dim 1 : vector<8x128xf32>, i32 -> vector<8x128xf32>
    %cst_426 = arith.constant 0.000000e+00 : f32
    %897 = vector.shape_cast %79 : vector<1x128xi1> to vector<1x128xi1>
    %898 = vector.broadcast %897 : vector<1x128xi1> to vector<8x128xi1>
    %899 = vector.broadcast %cst_426 : f32 to vector<8x128xf32>
    %900 = arith.select %898, %896, %899 : vector<8x128xi1>, vector<8x128xf32>
    %c48_427 = arith.constant 48 : index
    %c0_428 = arith.constant 0 : index
    %901 = vector.load %arg19[%c48_427, %c0_428] : memref<344x128xf32, #tpu.memory_space<vmem>>, vector<8x128xf32>
    tpu.vector_store %arg19[%c48_427, %c0_428], %900 {strides = array<i32>} : memref<344x128xf32, #tpu.memory_space<vmem>>, vector<8x128xf32>,
    %c12_i32_429 = arith.constant 12 : i32
    %902 = tpu.dynamic_rotate %859 by %c12_i32_429 dim 1 : vector<8x128xf32>, i32 -> vector<8x128xf32>
    %cst_430 = arith.constant 0.000000e+00 : f32
    %903 = vector.shape_cast %88 : vector<1x128xi1> to vector<1x128xi1>
    %904 = vector.broadcast %903 : vector<1x128xi1> to vector<8x128xi1>
    %905 = vector.broadcast %cst_430 : f32 to vector<8x128xf32>
    %906 = arith.select %904, %902, %905 : vector<8x128xi1>, vector<8x128xf32>
    %c56_431 = arith.constant 56 : index
    %c0_432 = arith.constant 0 : index
    %907 = vector.load %arg19[%c56_431, %c0_432] : memref<344x128xf32, #tpu.memory_space<vmem>>, vector<8x128xf32>
    tpu.vector_store %arg19[%c56_431, %c0_432], %906 {strides = array<i32>} : memref<344x128xf32, #tpu.memory_space<vmem>>, vector<8x128xf32>,
    %c11_i32_433 = arith.constant 11 : i32
    %908 = tpu.dynamic_rotate %859 by %c11_i32_433 dim 1 : vector<8x128xf32>, i32 -> vector<8x128xf32>
    %cst_434 = arith.constant 0.000000e+00 : f32
    %909 = vector.shape_cast %97 : vector<1x128xi1> to vector<1x128xi1>
    %910 = vector.broadcast %909 : vector<1x128xi1> to vector<8x128xi1>
    %911 = vector.broadcast %cst_434 : f32 to vector<8x128xf32>
    %912 = arith.select %910, %908, %911 : vector<8x128xi1>, vector<8x128xf32>
    %c64_435 = arith.constant 64 : index
    %c0_436 = arith.constant 0 : index
    %913 = vector.load %arg19[%c64_435, %c0_436] : memref<344x128xf32, #tpu.memory_space<vmem>>, vector<8x128xf32>
    tpu.vector_store %arg19[%c64_435, %c0_436], %912 {strides = array<i32>} : memref<344x128xf32, #tpu.memory_space<vmem>>, vector<8x128xf32>,
    %c10_i32_437 = arith.constant 10 : i32
    %914 = tpu.dynamic_rotate %859 by %c10_i32_437 dim 1 : vector<8x128xf32>, i32 -> vector<8x128xf32>
    %cst_438 = arith.constant 0.000000e+00 : f32
    %915 = vector.shape_cast %106 : vector<1x128xi1> to vector<1x128xi1>
    %916 = vector.broadcast %915 : vector<1x128xi1> to vector<8x128xi1>
    %917 = vector.broadcast %cst_438 : f32 to vector<8x128xf32>
    %918 = arith.select %916, %914, %917 : vector<8x128xi1>, vector<8x128xf32>
    %c72_439 = arith.constant 72 : index
    %c0_440 = arith.constant 0 : index
    %919 = vector.load %arg19[%c72_439, %c0_440] : memref<344x128xf32, #tpu.memory_space<vmem>>, vector<8x128xf32>
    tpu.vector_store %arg19[%c72_439, %c0_440], %918 {strides = array<i32>} : memref<344x128xf32, #tpu.memory_space<vmem>>, vector<8x128xf32>,
    %c9_i32_441 = arith.constant 9 : i32
    %920 = tpu.dynamic_rotate %859 by %c9_i32_441 dim 1 : vector<8x128xf32>, i32 -> vector<8x128xf32>
    %cst_442 = arith.constant 0.000000e+00 : f32
    %921 = vector.shape_cast %115 : vector<1x128xi1> to vector<1x128xi1>
    %922 = vector.broadcast %921 : vector<1x128xi1> to vector<8x128xi1>
    %923 = vector.broadcast %cst_442 : f32 to vector<8x128xf32>
    %924 = arith.select %922, %920, %923 : vector<8x128xi1>, vector<8x128xf32>
    %c80_443 = arith.constant 80 : index
    %c0_444 = arith.constant 0 : index
    %925 = vector.load %arg19[%c80_443, %c0_444] : memref<344x128xf32, #tpu.memory_space<vmem>>, vector<8x128xf32>
    tpu.vector_store %arg19[%c80_443, %c0_444], %924 {strides = array<i32>} : memref<344x128xf32, #tpu.memory_space<vmem>>, vector<8x128xf32>,
    %c8_i32_445 = arith.constant 8 : i32
    %926 = tpu.dynamic_rotate %859 by %c8_i32_445 dim 1 : vector<8x128xf32>, i32 -> vector<8x128xf32>
    %cst_446 = arith.constant 0.000000e+00 : f32
    %927 = vector.shape_cast %124 : vector<1x128xi1> to vector<1x128xi1>
    %928 = vector.broadcast %927 : vector<1x128xi1> to vector<8x128xi1>
    %929 = vector.broadcast %cst_446 : f32 to vector<8x128xf32>
    %930 = arith.select %928, %926, %929 : vector<8x128xi1>, vector<8x128xf32>
    %c88_447 = arith.constant 88 : index
    %c0_448 = arith.constant 0 : index
    %931 = vector.load %arg19[%c88_447, %c0_448] : memref<344x128xf32, #tpu.memory_space<vmem>>, vector<8x128xf32>
    tpu.vector_store %arg19[%c88_447, %c0_448], %930 {strides = array<i32>} : memref<344x128xf32, #tpu.memory_space<vmem>>, vector<8x128xf32>,
    %c7_i32_449 = arith.constant 7 : i32
    %932 = tpu.dynamic_rotate %859 by %c7_i32_449 dim 1 : vector<8x128xf32>, i32 -> vector<8x128xf32>
    %cst_450 = arith.constant 0.000000e+00 : f32
    %933 = vector.shape_cast %133 : vector<1x128xi1> to vector<1x128xi1>
    %934 = vector.broadcast %933 : vector<1x128xi1> to vector<8x128xi1>
    %935 = vector.broadcast %cst_450 : f32 to vector<8x128xf32>
    %936 = arith.select %934, %932, %935 : vector<8x128xi1>, vector<8x128xf32>
    %c96_451 = arith.constant 96 : index
    %c0_452 = arith.constant 0 : index
    %937 = vector.load %arg19[%c96_451, %c0_452] : memref<344x128xf32, #tpu.memory_space<vmem>>, vector<8x128xf32>
    tpu.vector_store %arg19[%c96_451, %c0_452], %936 {strides = array<i32>} : memref<344x128xf32, #tpu.memory_space<vmem>>, vector<8x128xf32>,
    %c6_i32_453 = arith.constant 6 : i32
    %938 = tpu.dynamic_rotate %859 by %c6_i32_453 dim 1 : vector<8x128xf32>, i32 -> vector<8x128xf32>
    %cst_454 = arith.constant 0.000000e+00 : f32
    %939 = vector.shape_cast %142 : vector<1x128xi1> to vector<1x128xi1>
    %940 = vector.broadcast %939 : vector<1x128xi1> to vector<8x128xi1>
    %941 = vector.broadcast %cst_454 : f32 to vector<8x128xf32>
    %942 = arith.select %940, %938, %941 : vector<8x128xi1>, vector<8x128xf32>
    %c104_455 = arith.constant 104 : index
    %c0_456 = arith.constant 0 : index
    %943 = vector.load %arg19[%c104_455, %c0_456] : memref<344x128xf32, #tpu.memory_space<vmem>>, vector<8x128xf32>
    tpu.vector_store %arg19[%c104_455, %c0_456], %942 {strides = array<i32>} : memref<344x128xf32, #tpu.memory_space<vmem>>, vector<8x128xf32>,
    %c5_i32_457 = arith.constant 5 : i32
    %944 = tpu.dynamic_rotate %859 by %c5_i32_457 dim 1 : vector<8x128xf32>, i32 -> vector<8x128xf32>
    %cst_458 = arith.constant 0.000000e+00 : f32
    %945 = vector.shape_cast %151 : vector<1x128xi1> to vector<1x128xi1>
    %946 = vector.broadcast %945 : vector<1x128xi1> to vector<8x128xi1>
    %947 = vector.broadcast %cst_458 : f32 to vector<8x128xf32>
    %948 = arith.select %946, %944, %947 : vector<8x128xi1>, vector<8x128xf32>
    %c112_459 = arith.constant 112 : index
    %c0_460 = arith.constant 0 : index
    %949 = vector.load %arg19[%c112_459, %c0_460] : memref<344x128xf32, #tpu.memory_space<vmem>>, vector<8x128xf32>
    tpu.vector_store %arg19[%c112_459, %c0_460], %948 {strides = array<i32>} : memref<344x128xf32, #tpu.memory_space<vmem>>, vector<8x128xf32>,
    %c4_i32_461 = arith.constant 4 : i32
    %950 = tpu.dynamic_rotate %859 by %c4_i32_461 dim 1 : vector<8x128xf32>, i32 -> vector<8x128xf32>
    %cst_462 = arith.constant 0.000000e+00 : f32
    %951 = vector.shape_cast %160 : vector<1x128xi1> to vector<1x128xi1>
    %952 = vector.broadcast %951 : vector<1x128xi1> to vector<8x128xi1>
    %953 = vector.broadcast %cst_462 : f32 to vector<8x128xf32>
    %954 = arith.select %952, %950, %953 : vector<8x128xi1>, vector<8x128xf32>
    %c120_463 = arith.constant 120 : index
    %c0_464 = arith.constant 0 : index
    %955 = vector.load %arg19[%c120_463, %c0_464] : memref<344x128xf32, #tpu.memory_space<vmem>>, vector<8x128xf32>
    tpu.vector_store %arg19[%c120_463, %c0_464], %954 {strides = array<i32>} : memref<344x128xf32, #tpu.memory_space<vmem>>, vector<8x128xf32>,
    %c3_i32_465 = arith.constant 3 : i32
    %956 = tpu.dynamic_rotate %859 by %c3_i32_465 dim 1 : vector<8x128xf32>, i32 -> vector<8x128xf32>
    %cst_466 = arith.constant 0.000000e+00 : f32
    %957 = vector.shape_cast %169 : vector<1x128xi1> to vector<1x128xi1>
    %958 = vector.broadcast %957 : vector<1x128xi1> to vector<8x128xi1>
    %959 = vector.broadcast %cst_466 : f32 to vector<8x128xf32>
    %960 = arith.select %958, %956, %959 : vector<8x128xi1>, vector<8x128xf32>
    %c128_467 = arith.constant 128 : index
    %c0_468 = arith.constant 0 : index
    %961 = vector.load %arg19[%c128_467, %c0_468] : memref<344x128xf32, #tpu.memory_space<vmem>>, vector<8x128xf32>
    tpu.vector_store %arg19[%c128_467, %c0_468], %960 {strides = array<i32>} : memref<344x128xf32, #tpu.memory_space<vmem>>, vector<8x128xf32>,
    %c2_i32_469 = arith.constant 2 : i32
    %962 = tpu.dynamic_rotate %859 by %c2_i32_469 dim 1 : vector<8x128xf32>, i32 -> vector<8x128xf32>
    %cst_470 = arith.constant 0.000000e+00 : f32
    %963 = vector.shape_cast %178 : vector<1x128xi1> to vector<1x128xi1>
    %964 = vector.broadcast %963 : vector<1x128xi1> to vector<8x128xi1>
    %965 = vector.broadcast %cst_470 : f32 to vector<8x128xf32>
    %966 = arith.select %964, %962, %965 : vector<8x128xi1>, vector<8x128xf32>
    %c136_471 = arith.constant 136 : index
    %c0_472 = arith.constant 0 : index
    %967 = vector.load %arg19[%c136_471, %c0_472] : memref<344x128xf32, #tpu.memory_space<vmem>>, vector<8x128xf32>
    tpu.vector_store %arg19[%c136_471, %c0_472], %966 {strides = array<i32>} : memref<344x128xf32, #tpu.memory_space<vmem>>, vector<8x128xf32>,
    %c1_i32_473 = arith.constant 1 : i32
    %968 = tpu.dynamic_rotate %859 by %c1_i32_473 dim 1 : vector<8x128xf32>, i32 -> vector<8x128xf32>
    %cst_474 = arith.constant 0.000000e+00 : f32
    %969 = vector.shape_cast %187 : vector<1x128xi1> to vector<1x128xi1>
    %970 = vector.broadcast %969 : vector<1x128xi1> to vector<8x128xi1>
    %971 = vector.broadcast %cst_474 : f32 to vector<8x128xf32>
    %972 = arith.select %970, %968, %971 : vector<8x128xi1>, vector<8x128xf32>
    %c144_475 = arith.constant 144 : index
    %c0_476 = arith.constant 0 : index
    %973 = vector.load %arg19[%c144_475, %c0_476] : memref<344x128xf32, #tpu.memory_space<vmem>>, vector<8x128xf32>
    tpu.vector_store %arg19[%c144_475, %c0_476], %972 {strides = array<i32>} : memref<344x128xf32, #tpu.memory_space<vmem>>, vector<8x128xf32>,
    %c152_477 = arith.constant 152 : index
    %c0_478 = arith.constant 0 : index
    %974 = vector.load %arg19[%c152_477, %c0_478] : memref<344x128xf32, #tpu.memory_space<vmem>>, vector<8x128xf32>
    tpu.vector_store %arg19[%c152_477, %c0_478], %859 {strides = array<i32>} : memref<344x128xf32, #tpu.memory_space<vmem>>, vector<8x128xf32>,
    %c127_i32_479 = arith.constant 127 : i32
    %975 = tpu.dynamic_rotate %859 by %c127_i32_479 dim 1 : vector<8x128xf32>, i32 -> vector<8x128xf32>
    %cst_480 = arith.constant 0.000000e+00 : f32
    %976 = vector.shape_cast %196 : vector<1x128xi1> to vector<1x128xi1>
    %977 = vector.broadcast %976 : vector<1x128xi1> to vector<8x128xi1>
    %978 = vector.broadcast %cst_480 : f32 to vector<8x128xf32>
    %979 = arith.select %977, %975, %978 : vector<8x128xi1>, vector<8x128xf32>
    %c160_481 = arith.constant 160 : index
    %c0_482 = arith.constant 0 : index
    %980 = vector.load %arg19[%c160_481, %c0_482] : memref<344x128xf32, #tpu.memory_space<vmem>>, vector<8x128xf32>
    tpu.vector_store %arg19[%c160_481, %c0_482], %979 {strides = array<i32>} : memref<344x128xf32, #tpu.memory_space<vmem>>, vector<8x128xf32>,
    %c126_i32_483 = arith.constant 126 : i32
    %981 = tpu.dynamic_rotate %859 by %c126_i32_483 dim 1 : vector<8x128xf32>, i32 -> vector<8x128xf32>
    %cst_484 = arith.constant 0.000000e+00 : f32
    %982 = vector.shape_cast %205 : vector<1x128xi1> to vector<1x128xi1>
    %983 = vector.broadcast %982 : vector<1x128xi1> to vector<8x128xi1>
    %984 = vector.broadcast %cst_484 : f32 to vector<8x128xf32>
    %985 = arith.select %983, %981, %984 : vector<8x128xi1>, vector<8x128xf32>
    %c168_485 = arith.constant 168 : index
    %c0_486 = arith.constant 0 : index
    %986 = vector.load %arg19[%c168_485, %c0_486] : memref<344x128xf32, #tpu.memory_space<vmem>>, vector<8x128xf32>
    tpu.vector_store %arg19[%c168_485, %c0_486], %985 {strides = array<i32>} : memref<344x128xf32, #tpu.memory_space<vmem>>, vector<8x128xf32>,
    %c125_i32_487 = arith.constant 125 : i32
    %987 = tpu.dynamic_rotate %859 by %c125_i32_487 dim 1 : vector<8x128xf32>, i32 -> vector<8x128xf32>
    %cst_488 = arith.constant 0.000000e+00 : f32
    %988 = vector.shape_cast %214 : vector<1x128xi1> to vector<1x128xi1>
    %989 = vector.broadcast %988 : vector<1x128xi1> to vector<8x128xi1>
    %990 = vector.broadcast %cst_488 : f32 to vector<8x128xf32>
    %991 = arith.select %989, %987, %990 : vector<8x128xi1>, vector<8x128xf32>
    %c176_489 = arith.constant 176 : index
    %c0_490 = arith.constant 0 : index
    %992 = vector.load %arg19[%c176_489, %c0_490] : memref<344x128xf32, #tpu.memory_space<vmem>>, vector<8x128xf32>
    tpu.vector_store %arg19[%c176_489, %c0_490], %991 {strides = array<i32>} : memref<344x128xf32, #tpu.memory_space<vmem>>, vector<8x128xf32>,
    %c124_i32_491 = arith.constant 124 : i32
    %993 = tpu.dynamic_rotate %859 by %c124_i32_491 dim 1 : vector<8x128xf32>, i32 -> vector<8x128xf32>
    %cst_492 = arith.constant 0.000000e+00 : f32
    %994 = vector.shape_cast %223 : vector<1x128xi1> to vector<1x128xi1>
    %995 = vector.broadcast %994 : vector<1x128xi1> to vector<8x128xi1>
    %996 = vector.broadcast %cst_492 : f32 to vector<8x128xf32>
    %997 = arith.select %995, %993, %996 : vector<8x128xi1>, vector<8x128xf32>
    %c184_493 = arith.constant 184 : index
    %c0_494 = arith.constant 0 : index
    %998 = vector.load %arg19[%c184_493, %c0_494] : memref<344x128xf32, #tpu.memory_space<vmem>>, vector<8x128xf32>
    tpu.vector_store %arg19[%c184_493, %c0_494], %997 {strides = array<i32>} : memref<344x128xf32, #tpu.memory_space<vmem>>, vector<8x128xf32>,
    %c123_i32_495 = arith.constant 123 : i32
    %999 = tpu.dynamic_rotate %859 by %c123_i32_495 dim 1 : vector<8x128xf32>, i32 -> vector<8x128xf32>
    %cst_496 = arith.constant 0.000000e+00 : f32
    %1000 = vector.shape_cast %232 : vector<1x128xi1> to vector<1x128xi1>
    %1001 = vector.broadcast %1000 : vector<1x128xi1> to vector<8x128xi1>
    %1002 = vector.broadcast %cst_496 : f32 to vector<8x128xf32>
    %1003 = arith.select %1001, %999, %1002 : vector<8x128xi1>, vector<8x128xf32>
    %c192_497 = arith.constant 192 : index
    %c0_498 = arith.constant 0 : index
    %1004 = vector.load %arg19[%c192_497, %c0_498] : memref<344x128xf32, #tpu.memory_space<vmem>>, vector<8x128xf32>
    tpu.vector_store %arg19[%c192_497, %c0_498], %1003 {strides = array<i32>} : memref<344x128xf32, #tpu.memory_space<vmem>>, vector<8x128xf32>,
    %c122_i32_499 = arith.constant 122 : i32
    %1005 = tpu.dynamic_rotate %859 by %c122_i32_499 dim 1 : vector<8x128xf32>, i32 -> vector<8x128xf32>
    %cst_500 = arith.constant 0.000000e+00 : f32
    %1006 = vector.shape_cast %241 : vector<1x128xi1> to vector<1x128xi1>
    %1007 = vector.broadcast %1006 : vector<1x128xi1> to vector<8x128xi1>
    %1008 = vector.broadcast %cst_500 : f32 to vector<8x128xf32>
    %1009 = arith.select %1007, %1005, %1008 : vector<8x128xi1>, vector<8x128xf32>
    %c200_501 = arith.constant 200 : index
    %c0_502 = arith.constant 0 : index
    %1010 = vector.load %arg19[%c200_501, %c0_502] : memref<344x128xf32, #tpu.memory_space<vmem>>, vector<8x128xf32>
    tpu.vector_store %arg19[%c200_501, %c0_502], %1009 {strides = array<i32>} : memref<344x128xf32, #tpu.memory_space<vmem>>, vector<8x128xf32>,
    %c121_i32_503 = arith.constant 121 : i32
    %1011 = tpu.dynamic_rotate %859 by %c121_i32_503 dim 1 : vector<8x128xf32>, i32 -> vector<8x128xf32>
    %cst_504 = arith.constant 0.000000e+00 : f32
    %1012 = vector.shape_cast %250 : vector<1x128xi1> to vector<1x128xi1>
    %1013 = vector.broadcast %1012 : vector<1x128xi1> to vector<8x128xi1>
    %1014 = vector.broadcast %cst_504 : f32 to vector<8x128xf32>
    %1015 = arith.select %1013, %1011, %1014 : vector<8x128xi1>, vector<8x128xf32>
    %c208_505 = arith.constant 208 : index
    %c0_506 = arith.constant 0 : index
    %1016 = vector.load %arg19[%c208_505, %c0_506] : memref<344x128xf32, #tpu.memory_space<vmem>>, vector<8x128xf32>
    tpu.vector_store %arg19[%c208_505, %c0_506], %1015 {strides = array<i32>} : memref<344x128xf32, #tpu.memory_space<vmem>>, vector<8x128xf32>,
    %c120_i32_507 = arith.constant 120 : i32
    %1017 = tpu.dynamic_rotate %859 by %c120_i32_507 dim 1 : vector<8x128xf32>, i32 -> vector<8x128xf32>
    %cst_508 = arith.constant 0.000000e+00 : f32
    %1018 = vector.shape_cast %259 : vector<1x128xi1> to vector<1x128xi1>
    %1019 = vector.broadcast %1018 : vector<1x128xi1> to vector<8x128xi1>
    %1020 = vector.broadcast %cst_508 : f32 to vector<8x128xf32>
    %1021 = arith.select %1019, %1017, %1020 : vector<8x128xi1>, vector<8x128xf32>
    %c216_509 = arith.constant 216 : index
    %c0_510 = arith.constant 0 : index
    %1022 = vector.load %arg19[%c216_509, %c0_510] : memref<344x128xf32, #tpu.memory_space<vmem>>, vector<8x128xf32>
    tpu.vector_store %arg19[%c216_509, %c0_510], %1021 {strides = array<i32>} : memref<344x128xf32, #tpu.memory_space<vmem>>, vector<8x128xf32>,
    %c119_i32_511 = arith.constant 119 : i32
    %1023 = tpu.dynamic_rotate %859 by %c119_i32_511 dim 1 : vector<8x128xf32>, i32 -> vector<8x128xf32>
    %cst_512 = arith.constant 0.000000e+00 : f32
    %1024 = vector.shape_cast %268 : vector<1x128xi1> to vector<1x128xi1>
    %1025 = vector.broadcast %1024 : vector<1x128xi1> to vector<8x128xi1>
    %1026 = vector.broadcast %cst_512 : f32 to vector<8x128xf32>
    %1027 = arith.select %1025, %1023, %1026 : vector<8x128xi1>, vector<8x128xf32>
    %c224_513 = arith.constant 224 : index
    %c0_514 = arith.constant 0 : index
    %1028 = vector.load %arg19[%c224_513, %c0_514] : memref<344x128xf32, #tpu.memory_space<vmem>>, vector<8x128xf32>
    tpu.vector_store %arg19[%c224_513, %c0_514], %1027 {strides = array<i32>} : memref<344x128xf32, #tpu.memory_space<vmem>>, vector<8x128xf32>,
    %c118_i32_515 = arith.constant 118 : i32
    %1029 = tpu.dynamic_rotate %859 by %c118_i32_515 dim 1 : vector<8x128xf32>, i32 -> vector<8x128xf32>
    %cst_516 = arith.constant 0.000000e+00 : f32
    %1030 = vector.shape_cast %277 : vector<1x128xi1> to vector<1x128xi1>
    %1031 = vector.broadcast %1030 : vector<1x128xi1> to vector<8x128xi1>
    %1032 = vector.broadcast %cst_516 : f32 to vector<8x128xf32>
    %1033 = arith.select %1031, %1029, %1032 : vector<8x128xi1>, vector<8x128xf32>
    %c232_517 = arith.constant 232 : index
    %c0_518 = arith.constant 0 : index
    %1034 = vector.load %arg19[%c232_517, %c0_518] : memref<344x128xf32, #tpu.memory_space<vmem>>, vector<8x128xf32>
    tpu.vector_store %arg19[%c232_517, %c0_518], %1033 {strides = array<i32>} : memref<344x128xf32, #tpu.memory_space<vmem>>, vector<8x128xf32>,
    %c117_i32_519 = arith.constant 117 : i32
    %1035 = tpu.dynamic_rotate %859 by %c117_i32_519 dim 1 : vector<8x128xf32>, i32 -> vector<8x128xf32>
    %cst_520 = arith.constant 0.000000e+00 : f32
    %1036 = vector.shape_cast %286 : vector<1x128xi1> to vector<1x128xi1>
    %1037 = vector.broadcast %1036 : vector<1x128xi1> to vector<8x128xi1>
    %1038 = vector.broadcast %cst_520 : f32 to vector<8x128xf32>
    %1039 = arith.select %1037, %1035, %1038 : vector<8x128xi1>, vector<8x128xf32>
    %c240_521 = arith.constant 240 : index
    %c0_522 = arith.constant 0 : index
    %1040 = vector.load %arg19[%c240_521, %c0_522] : memref<344x128xf32, #tpu.memory_space<vmem>>, vector<8x128xf32>
    tpu.vector_store %arg19[%c240_521, %c0_522], %1039 {strides = array<i32>} : memref<344x128xf32, #tpu.memory_space<vmem>>, vector<8x128xf32>,
    %c116_i32_523 = arith.constant 116 : i32
    %1041 = tpu.dynamic_rotate %859 by %c116_i32_523 dim 1 : vector<8x128xf32>, i32 -> vector<8x128xf32>
    %cst_524 = arith.constant 0.000000e+00 : f32
    %1042 = vector.shape_cast %295 : vector<1x128xi1> to vector<1x128xi1>
    %1043 = vector.broadcast %1042 : vector<1x128xi1> to vector<8x128xi1>
    %1044 = vector.broadcast %cst_524 : f32 to vector<8x128xf32>
    %1045 = arith.select %1043, %1041, %1044 : vector<8x128xi1>, vector<8x128xf32>
    %c248_525 = arith.constant 248 : index
    %c0_526 = arith.constant 0 : index
    %1046 = vector.load %arg19[%c248_525, %c0_526] : memref<344x128xf32, #tpu.memory_space<vmem>>, vector<8x128xf32>
    tpu.vector_store %arg19[%c248_525, %c0_526], %1045 {strides = array<i32>} : memref<344x128xf32, #tpu.memory_space<vmem>>, vector<8x128xf32>,
    %c115_i32_527 = arith.constant 115 : i32
    %1047 = tpu.dynamic_rotate %859 by %c115_i32_527 dim 1 : vector<8x128xf32>, i32 -> vector<8x128xf32>
    %cst_528 = arith.constant 0.000000e+00 : f32
    %1048 = vector.shape_cast %304 : vector<1x128xi1> to vector<1x128xi1>
    %1049 = vector.broadcast %1048 : vector<1x128xi1> to vector<8x128xi1>
    %1050 = vector.broadcast %cst_528 : f32 to vector<8x128xf32>
    %1051 = arith.select %1049, %1047, %1050 : vector<8x128xi1>, vector<8x128xf32>
    %c256_529 = arith.constant 256 : index
    %c0_530 = arith.constant 0 : index
    %1052 = vector.load %arg19[%c256_529, %c0_530] : memref<344x128xf32, #tpu.memory_space<vmem>>, vector<8x128xf32>
    tpu.vector_store %arg19[%c256_529, %c0_530], %1051 {strides = array<i32>} : memref<344x128xf32, #tpu.memory_space<vmem>>, vector<8x128xf32>,
    %c114_i32_531 = arith.constant 114 : i32
    %1053 = tpu.dynamic_rotate %859 by %c114_i32_531 dim 1 : vector<8x128xf32>, i32 -> vector<8x128xf32>
    %cst_532 = arith.constant 0.000000e+00 : f32
    %1054 = vector.shape_cast %313 : vector<1x128xi1> to vector<1x128xi1>
    %1055 = vector.broadcast %1054 : vector<1x128xi1> to vector<8x128xi1>
    %1056 = vector.broadcast %cst_532 : f32 to vector<8x128xf32>
    %1057 = arith.select %1055, %1053, %1056 : vector<8x128xi1>, vector<8x128xf32>
    %c264_533 = arith.constant 264 : index
    %c0_534 = arith.constant 0 : index
    %1058 = vector.load %arg19[%c264_533, %c0_534] : memref<344x128xf32, #tpu.memory_space<vmem>>, vector<8x128xf32>
    tpu.vector_store %arg19[%c264_533, %c0_534], %1057 {strides = array<i32>} : memref<344x128xf32, #tpu.memory_space<vmem>>, vector<8x128xf32>,
    %c113_i32_535 = arith.constant 113 : i32
    %1059 = tpu.dynamic_rotate %859 by %c113_i32_535 dim 1 : vector<8x128xf32>, i32 -> vector<8x128xf32>
    %cst_536 = arith.constant 0.000000e+00 : f32
    %1060 = vector.shape_cast %322 : vector<1x128xi1> to vector<1x128xi1>
    %1061 = vector.broadcast %1060 : vector<1x128xi1> to vector<8x128xi1>
    %1062 = vector.broadcast %cst_536 : f32 to vector<8x128xf32>
    %1063 = arith.select %1061, %1059, %1062 : vector<8x128xi1>, vector<8x128xf32>
    %c272_537 = arith.constant 272 : index
    %c0_538 = arith.constant 0 : index
    %1064 = vector.load %arg19[%c272_537, %c0_538] : memref<344x128xf32, #tpu.memory_space<vmem>>, vector<8x128xf32>
    tpu.vector_store %arg19[%c272_537, %c0_538], %1063 {strides = array<i32>} : memref<344x128xf32, #tpu.memory_space<vmem>>, vector<8x128xf32>,
    %c112_i32_539 = arith.constant 112 : i32
    %1065 = tpu.dynamic_rotate %859 by %c112_i32_539 dim 1 : vector<8x128xf32>, i32 -> vector<8x128xf32>
    %cst_540 = arith.constant 0.000000e+00 : f32
    %1066 = vector.shape_cast %331 : vector<1x128xi1> to vector<1x128xi1>
    %1067 = vector.broadcast %1066 : vector<1x128xi1> to vector<8x128xi1>
    %1068 = vector.broadcast %cst_540 : f32 to vector<8x128xf32>
    %1069 = arith.select %1067, %1065, %1068 : vector<8x128xi1>, vector<8x128xf32>
    %c280_541 = arith.constant 280 : index
    %c0_542 = arith.constant 0 : index
    %1070 = vector.load %arg19[%c280_541, %c0_542] : memref<344x128xf32, #tpu.memory_space<vmem>>, vector<8x128xf32>
    tpu.vector_store %arg19[%c280_541, %c0_542], %1069 {strides = array<i32>} : memref<344x128xf32, #tpu.memory_space<vmem>>, vector<8x128xf32>,
    %c111_i32_543 = arith.constant 111 : i32
    %1071 = tpu.dynamic_rotate %859 by %c111_i32_543 dim 1 : vector<8x128xf32>, i32 -> vector<8x128xf32>
    %cst_544 = arith.constant 0.000000e+00 : f32
    %1072 = vector.shape_cast %340 : vector<1x128xi1> to vector<1x128xi1>
    %1073 = vector.broadcast %1072 : vector<1x128xi1> to vector<8x128xi1>
    %1074 = vector.broadcast %cst_544 : f32 to vector<8x128xf32>
    %1075 = arith.select %1073, %1071, %1074 : vector<8x128xi1>, vector<8x128xf32>
    %c288_545 = arith.constant 288 : index
    %c0_546 = arith.constant 0 : index
    %1076 = vector.load %arg19[%c288_545, %c0_546] : memref<344x128xf32, #tpu.memory_space<vmem>>, vector<8x128xf32>
    tpu.vector_store %arg19[%c288_545, %c0_546], %1075 {strides = array<i32>} : memref<344x128xf32, #tpu.memory_space<vmem>>, vector<8x128xf32>,
    %c110_i32_547 = arith.constant 110 : i32
    %1077 = tpu.dynamic_rotate %859 by %c110_i32_547 dim 1 : vector<8x128xf32>, i32 -> vector<8x128xf32>
    %cst_548 = arith.constant 0.000000e+00 : f32
    %1078 = vector.shape_cast %349 : vector<1x128xi1> to vector<1x128xi1>
    %1079 = vector.broadcast %1078 : vector<1x128xi1> to vector<8x128xi1>
    %1080 = vector.broadcast %cst_548 : f32 to vector<8x128xf32>
    %1081 = arith.select %1079, %1077, %1080 : vector<8x128xi1>, vector<8x128xf32>
    %c296_549 = arith.constant 296 : index
    %c0_550 = arith.constant 0 : index
    %1082 = vector.load %arg19[%c296_549, %c0_550] : memref<344x128xf32, #tpu.memory_space<vmem>>, vector<8x128xf32>
    tpu.vector_store %arg19[%c296_549, %c0_550], %1081 {strides = array<i32>} : memref<344x128xf32, #tpu.memory_space<vmem>>, vector<8x128xf32>,
    %c109_i32_551 = arith.constant 109 : i32
    %1083 = tpu.dynamic_rotate %859 by %c109_i32_551 dim 1 : vector<8x128xf32>, i32 -> vector<8x128xf32>
    %cst_552 = arith.constant 0.000000e+00 : f32
    %1084 = vector.shape_cast %358 : vector<1x128xi1> to vector<1x128xi1>
    %1085 = vector.broadcast %1084 : vector<1x128xi1> to vector<8x128xi1>
    %1086 = vector.broadcast %cst_552 : f32 to vector<8x128xf32>
    %1087 = arith.select %1085, %1083, %1086 : vector<8x128xi1>, vector<8x128xf32>
    %c304_553 = arith.constant 304 : index
    %c0_554 = arith.constant 0 : index
    %1088 = vector.load %arg19[%c304_553, %c0_554] : memref<344x128xf32, #tpu.memory_space<vmem>>, vector<8x128xf32>
    tpu.vector_store %arg19[%c304_553, %c0_554], %1087 {strides = array<i32>} : memref<344x128xf32, #tpu.memory_space<vmem>>, vector<8x128xf32>,
    %c127_i32_555 = arith.constant 127 : i32
    %1089 = tpu.dynamic_rotate %857 by %c127_i32_555 dim 1 : vector<32x128xf32>, i32 -> vector<32x128xf32>
    %cst_556 = arith.constant 0xFF800000 : f32
    %1090 = vector.shape_cast %196 : vector<1x128xi1> to vector<1x128xi1>
    %1091 = vector.broadcast %1090 : vector<1x128xi1> to vector<32x128xi1>
    %1092 = vector.broadcast %cst_556 : f32 to vector<32x128xf32>
    %1093 = arith.select %1091, %1089, %1092 : vector<32x128xi1>, vector<32x128xf32>
    %c1_i32_557 = arith.constant 1 : i32
    %1094 = tpu.dynamic_rotate %857 by %c1_i32_557 dim 1 : vector<32x128xf32>, i32 -> vector<32x128xf32>
    %cst_558 = arith.constant 0xFF800000 : f32
    %1095 = vector.shape_cast %187 : vector<1x128xi1> to vector<1x128xi1>
    %1096 = vector.broadcast %1095 : vector<1x128xi1> to vector<32x128xi1>
    %1097 = vector.broadcast %cst_558 : f32 to vector<32x128xf32>
    %1098 = arith.select %1096, %1094, %1097 : vector<32x128xi1>, vector<32x128xf32>
    %1099 = arith.maximumf %1093, %1098 : vector<32x128xf32>
    %1100 = arith.maximumf %857, %1099 : vector<32x128xf32>
    %c312_559 = arith.constant 312 : index
    %c0_560 = arith.constant 0 : index
    %1101 = vector.load %arg19[%c312_559, %c0_560] : memref<344x128xf32, #tpu.memory_space<vmem>>, vector<32x128xf32>
    tpu.vector_store %arg19[%c312_559, %c0_560], %1100 {strides = array<i32>} : memref<344x128xf32, #tpu.memory_space<vmem>>, vector<32x128xf32>,
    %c0_561 = arith.constant 0 : index
    %c0_562 = arith.constant 0 : index
    %1102 = vector.load %arg6[%c0_561, %c0_562] : memref<32x344xf32, #tpu.memory_space<vmem>>, vector<32x344xf32>
    %c0_563 = arith.constant 0 : index
    %c0_564 = arith.constant 0 : index
    %1103 = vector.load %arg19[%c0_563, %c0_564] : memref<344x128xf32, #tpu.memory_space<vmem>>, vector<344x128xf32>
    %cst_565 = arith.constant dense<0.000000e+00> : vector<32x128xf32>
    %1104 = tpu.matmul %1102, %1103, %cst_565 {dimension_numbers = #tpu.dot_dimension_numbers<[1], [0], [0], [1], [0, 0, 1, 1], [], []>} : vector<32x344xf32>, vector<344x128xf32>, vector<32x128xf32> -> vector<32x128xf32>
    %cst_566 = arith.constant 0.000000e+00 : f32
    %1105 = vector.broadcast %cst_566 : f32 to vector<32x128xf32>
    %1106 = arith.maximumf %1104, %1105 : vector<32x128xf32>
    %c0_567 = arith.constant 0 : index
    %c0_568 = arith.constant 0 : index
    %1107 = vector.load %arg13[%c0_567, %c0_568] : memref<32x8xf32, #tpu.memory_space<vmem>>, vector<32x8xf32>
    %cst_569 = arith.constant dense<0.000000e+00> : vector<32x128xf32>
    %1108 = tpu.matmul %1107, %359, %cst_569 {dimension_numbers = #tpu.dot_dimension_numbers<[1], [0], [0], [1], [0, 0, 1, 1], [], []>} : vector<32x8xf32>, vector<8x128xf32>, vector<32x128xf32> -> vector<32x128xf32>
    %1109 = arith.addf %1106, %1108 : vector<32x128xf32>
    %cst_570 = arith.constant 0.000000e+00 : f32
    %1110 = vector.broadcast %cst_570 : f32 to vector<32x128xf32>
    %1111 = arith.maximumf %1109, %1110 : vector<32x128xf32>
    %c0_571 = arith.constant 0 : index
    %c0_572 = arith.constant 0 : index
    %1112 = vector.load %arg7[%c0_571, %c0_572] : memref<8x32xf32, #tpu.memory_space<vmem>>, vector<8x32xf32>
    %cst_573 = arith.constant dense<0.000000e+00> : vector<8x128xf32>
    %1113 = tpu.matmul %1112, %1111, %cst_573 {dimension_numbers = #tpu.dot_dimension_numbers<[1], [0], [0], [1], [0, 0, 1, 1], [], []>} : vector<8x32xf32>, vector<32x128xf32>, vector<8x128xf32> -> vector<8x128xf32>
    %c19_i32_574 = arith.constant 19 : i32
    %1114 = tpu.dynamic_rotate %1113 by %c19_i32_574 dim 1 : vector<8x128xf32>, i32 -> vector<8x128xf32>
    %cst_575 = arith.constant 0.000000e+00 : f32
    %1115 = vector.shape_cast %25 : vector<1x128xi1> to vector<1x128xi1>
    %1116 = vector.broadcast %1115 : vector<1x128xi1> to vector<8x128xi1>
    %1117 = vector.broadcast %cst_575 : f32 to vector<8x128xf32>
    %1118 = arith.select %1116, %1114, %1117 : vector<8x128xi1>, vector<8x128xf32>
    %c0_576 = arith.constant 0 : index
    %c0_577 = arith.constant 0 : index
    %1119 = vector.load %arg19[%c0_576, %c0_577] : memref<344x128xf32, #tpu.memory_space<vmem>>, vector<8x128xf32>
    tpu.vector_store %arg19[%c0_576, %c0_577], %1118 {strides = array<i32>} : memref<344x128xf32, #tpu.memory_space<vmem>>, vector<8x128xf32>,
    %c18_i32_578 = arith.constant 18 : i32
    %1120 = tpu.dynamic_rotate %1113 by %c18_i32_578 dim 1 : vector<8x128xf32>, i32 -> vector<8x128xf32>
    %cst_579 = arith.constant 0.000000e+00 : f32
    %1121 = vector.shape_cast %34 : vector<1x128xi1> to vector<1x128xi1>
    %1122 = vector.broadcast %1121 : vector<1x128xi1> to vector<8x128xi1>
    %1123 = vector.broadcast %cst_579 : f32 to vector<8x128xf32>
    %1124 = arith.select %1122, %1120, %1123 : vector<8x128xi1>, vector<8x128xf32>
    %c8_580 = arith.constant 8 : index
    %c0_581 = arith.constant 0 : index
    %1125 = vector.load %arg19[%c8_580, %c0_581] : memref<344x128xf32, #tpu.memory_space<vmem>>, vector<8x128xf32>
    tpu.vector_store %arg19[%c8_580, %c0_581], %1124 {strides = array<i32>} : memref<344x128xf32, #tpu.memory_space<vmem>>, vector<8x128xf32>,
    %c17_i32_582 = arith.constant 17 : i32
    %1126 = tpu.dynamic_rotate %1113 by %c17_i32_582 dim 1 : vector<8x128xf32>, i32 -> vector<8x128xf32>
    %cst_583 = arith.constant 0.000000e+00 : f32
    %1127 = vector.shape_cast %43 : vector<1x128xi1> to vector<1x128xi1>
    %1128 = vector.broadcast %1127 : vector<1x128xi1> to vector<8x128xi1>
    %1129 = vector.broadcast %cst_583 : f32 to vector<8x128xf32>
    %1130 = arith.select %1128, %1126, %1129 : vector<8x128xi1>, vector<8x128xf32>
    %c16_584 = arith.constant 16 : index
    %c0_585 = arith.constant 0 : index
    %1131 = vector.load %arg19[%c16_584, %c0_585] : memref<344x128xf32, #tpu.memory_space<vmem>>, vector<8x128xf32>
    tpu.vector_store %arg19[%c16_584, %c0_585], %1130 {strides = array<i32>} : memref<344x128xf32, #tpu.memory_space<vmem>>, vector<8x128xf32>,
    %c16_i32_586 = arith.constant 16 : i32
    %1132 = tpu.dynamic_rotate %1113 by %c16_i32_586 dim 1 : vector<8x128xf32>, i32 -> vector<8x128xf32>
    %cst_587 = arith.constant 0.000000e+00 : f32
    %1133 = vector.shape_cast %52 : vector<1x128xi1> to vector<1x128xi1>
    %1134 = vector.broadcast %1133 : vector<1x128xi1> to vector<8x128xi1>
    %1135 = vector.broadcast %cst_587 : f32 to vector<8x128xf32>
    %1136 = arith.select %1134, %1132, %1135 : vector<8x128xi1>, vector<8x128xf32>
    %c24_588 = arith.constant 24 : index
    %c0_589 = arith.constant 0 : index
    %1137 = vector.load %arg19[%c24_588, %c0_589] : memref<344x128xf32, #tpu.memory_space<vmem>>, vector<8x128xf32>
    tpu.vector_store %arg19[%c24_588, %c0_589], %1136 {strides = array<i32>} : memref<344x128xf32, #tpu.memory_space<vmem>>, vector<8x128xf32>,
    %c15_i32_590 = arith.constant 15 : i32
    %1138 = tpu.dynamic_rotate %1113 by %c15_i32_590 dim 1 : vector<8x128xf32>, i32 -> vector<8x128xf32>
    %cst_591 = arith.constant 0.000000e+00 : f32
    %1139 = vector.shape_cast %61 : vector<1x128xi1> to vector<1x128xi1>
    %1140 = vector.broadcast %1139 : vector<1x128xi1> to vector<8x128xi1>
    %1141 = vector.broadcast %cst_591 : f32 to vector<8x128xf32>
    %1142 = arith.select %1140, %1138, %1141 : vector<8x128xi1>, vector<8x128xf32>
    %c32_592 = arith.constant 32 : index
    %c0_593 = arith.constant 0 : index
    %1143 = vector.load %arg19[%c32_592, %c0_593] : memref<344x128xf32, #tpu.memory_space<vmem>>, vector<8x128xf32>
    tpu.vector_store %arg19[%c32_592, %c0_593], %1142 {strides = array<i32>} : memref<344x128xf32, #tpu.memory_space<vmem>>, vector<8x128xf32>,
    %c14_i32_594 = arith.constant 14 : i32
    %1144 = tpu.dynamic_rotate %1113 by %c14_i32_594 dim 1 : vector<8x128xf32>, i32 -> vector<8x128xf32>
    %cst_595 = arith.constant 0.000000e+00 : f32
    %1145 = vector.shape_cast %70 : vector<1x128xi1> to vector<1x128xi1>
    %1146 = vector.broadcast %1145 : vector<1x128xi1> to vector<8x128xi1>
    %1147 = vector.broadcast %cst_595 : f32 to vector<8x128xf32>
    %1148 = arith.select %1146, %1144, %1147 : vector<8x128xi1>, vector<8x128xf32>
    %c40_596 = arith.constant 40 : index
    %c0_597 = arith.constant 0 : index
    %1149 = vector.load %arg19[%c40_596, %c0_597] : memref<344x128xf32, #tpu.memory_space<vmem>>, vector<8x128xf32>
    tpu.vector_store %arg19[%c40_596, %c0_597], %1148 {strides = array<i32>} : memref<344x128xf32, #tpu.memory_space<vmem>>, vector<8x128xf32>,
    %c13_i32_598 = arith.constant 13 : i32
    %1150 = tpu.dynamic_rotate %1113 by %c13_i32_598 dim 1 : vector<8x128xf32>, i32 -> vector<8x128xf32>
    %cst_599 = arith.constant 0.000000e+00 : f32
    %1151 = vector.shape_cast %79 : vector<1x128xi1> to vector<1x128xi1>
    %1152 = vector.broadcast %1151 : vector<1x128xi1> to vector<8x128xi1>
    %1153 = vector.broadcast %cst_599 : f32 to vector<8x128xf32>
    %1154 = arith.select %1152, %1150, %1153 : vector<8x128xi1>, vector<8x128xf32>
    %c48_600 = arith.constant 48 : index
    %c0_601 = arith.constant 0 : index
    %1155 = vector.load %arg19[%c48_600, %c0_601] : memref<344x128xf32, #tpu.memory_space<vmem>>, vector<8x128xf32>
    tpu.vector_store %arg19[%c48_600, %c0_601], %1154 {strides = array<i32>} : memref<344x128xf32, #tpu.memory_space<vmem>>, vector<8x128xf32>,
    %c12_i32_602 = arith.constant 12 : i32
    %1156 = tpu.dynamic_rotate %1113 by %c12_i32_602 dim 1 : vector<8x128xf32>, i32 -> vector<8x128xf32>
    %cst_603 = arith.constant 0.000000e+00 : f32
    %1157 = vector.shape_cast %88 : vector<1x128xi1> to vector<1x128xi1>
    %1158 = vector.broadcast %1157 : vector<1x128xi1> to vector<8x128xi1>
    %1159 = vector.broadcast %cst_603 : f32 to vector<8x128xf32>
    %1160 = arith.select %1158, %1156, %1159 : vector<8x128xi1>, vector<8x128xf32>
    %c56_604 = arith.constant 56 : index
    %c0_605 = arith.constant 0 : index
    %1161 = vector.load %arg19[%c56_604, %c0_605] : memref<344x128xf32, #tpu.memory_space<vmem>>, vector<8x128xf32>
    tpu.vector_store %arg19[%c56_604, %c0_605], %1160 {strides = array<i32>} : memref<344x128xf32, #tpu.memory_space<vmem>>, vector<8x128xf32>,
    %c11_i32_606 = arith.constant 11 : i32
    %1162 = tpu.dynamic_rotate %1113 by %c11_i32_606 dim 1 : vector<8x128xf32>, i32 -> vector<8x128xf32>
    %cst_607 = arith.constant 0.000000e+00 : f32
    %1163 = vector.shape_cast %97 : vector<1x128xi1> to vector<1x128xi1>
    %1164 = vector.broadcast %1163 : vector<1x128xi1> to vector<8x128xi1>
    %1165 = vector.broadcast %cst_607 : f32 to vector<8x128xf32>
    %1166 = arith.select %1164, %1162, %1165 : vector<8x128xi1>, vector<8x128xf32>
    %c64_608 = arith.constant 64 : index
    %c0_609 = arith.constant 0 : index
    %1167 = vector.load %arg19[%c64_608, %c0_609] : memref<344x128xf32, #tpu.memory_space<vmem>>, vector<8x128xf32>
    tpu.vector_store %arg19[%c64_608, %c0_609], %1166 {strides = array<i32>} : memref<344x128xf32, #tpu.memory_space<vmem>>, vector<8x128xf32>,
    %c10_i32_610 = arith.constant 10 : i32
    %1168 = tpu.dynamic_rotate %1113 by %c10_i32_610 dim 1 : vector<8x128xf32>, i32 -> vector<8x128xf32>
    %cst_611 = arith.constant 0.000000e+00 : f32
    %1169 = vector.shape_cast %106 : vector<1x128xi1> to vector<1x128xi1>
    %1170 = vector.broadcast %1169 : vector<1x128xi1> to vector<8x128xi1>
    %1171 = vector.broadcast %cst_611 : f32 to vector<8x128xf32>
    %1172 = arith.select %1170, %1168, %1171 : vector<8x128xi1>, vector<8x128xf32>
    %c72_612 = arith.constant 72 : index
    %c0_613 = arith.constant 0 : index
    %1173 = vector.load %arg19[%c72_612, %c0_613] : memref<344x128xf32, #tpu.memory_space<vmem>>, vector<8x128xf32>
    tpu.vector_store %arg19[%c72_612, %c0_613], %1172 {strides = array<i32>} : memref<344x128xf32, #tpu.memory_space<vmem>>, vector<8x128xf32>,
    %c9_i32_614 = arith.constant 9 : i32
    %1174 = tpu.dynamic_rotate %1113 by %c9_i32_614 dim 1 : vector<8x128xf32>, i32 -> vector<8x128xf32>
    %cst_615 = arith.constant 0.000000e+00 : f32
    %1175 = vector.shape_cast %115 : vector<1x128xi1> to vector<1x128xi1>
    %1176 = vector.broadcast %1175 : vector<1x128xi1> to vector<8x128xi1>
    %1177 = vector.broadcast %cst_615 : f32 to vector<8x128xf32>
    %1178 = arith.select %1176, %1174, %1177 : vector<8x128xi1>, vector<8x128xf32>
    %c80_616 = arith.constant 80 : index
    %c0_617 = arith.constant 0 : index
    %1179 = vector.load %arg19[%c80_616, %c0_617] : memref<344x128xf32, #tpu.memory_space<vmem>>, vector<8x128xf32>
    tpu.vector_store %arg19[%c80_616, %c0_617], %1178 {strides = array<i32>} : memref<344x128xf32, #tpu.memory_space<vmem>>, vector<8x128xf32>,
    %c8_i32_618 = arith.constant 8 : i32
    %1180 = tpu.dynamic_rotate %1113 by %c8_i32_618 dim 1 : vector<8x128xf32>, i32 -> vector<8x128xf32>
    %cst_619 = arith.constant 0.000000e+00 : f32
    %1181 = vector.shape_cast %124 : vector<1x128xi1> to vector<1x128xi1>
    %1182 = vector.broadcast %1181 : vector<1x128xi1> to vector<8x128xi1>
    %1183 = vector.broadcast %cst_619 : f32 to vector<8x128xf32>
    %1184 = arith.select %1182, %1180, %1183 : vector<8x128xi1>, vector<8x128xf32>
    %c88_620 = arith.constant 88 : index
    %c0_621 = arith.constant 0 : index
    %1185 = vector.load %arg19[%c88_620, %c0_621] : memref<344x128xf32, #tpu.memory_space<vmem>>, vector<8x128xf32>
    tpu.vector_store %arg19[%c88_620, %c0_621], %1184 {strides = array<i32>} : memref<344x128xf32, #tpu.memory_space<vmem>>, vector<8x128xf32>,
    %c7_i32_622 = arith.constant 7 : i32
    %1186 = tpu.dynamic_rotate %1113 by %c7_i32_622 dim 1 : vector<8x128xf32>, i32 -> vector<8x128xf32>
    %cst_623 = arith.constant 0.000000e+00 : f32
    %1187 = vector.shape_cast %133 : vector<1x128xi1> to vector<1x128xi1>
    %1188 = vector.broadcast %1187 : vector<1x128xi1> to vector<8x128xi1>
    %1189 = vector.broadcast %cst_623 : f32 to vector<8x128xf32>
    %1190 = arith.select %1188, %1186, %1189 : vector<8x128xi1>, vector<8x128xf32>
    %c96_624 = arith.constant 96 : index
    %c0_625 = arith.constant 0 : index
    %1191 = vector.load %arg19[%c96_624, %c0_625] : memref<344x128xf32, #tpu.memory_space<vmem>>, vector<8x128xf32>
    tpu.vector_store %arg19[%c96_624, %c0_625], %1190 {strides = array<i32>} : memref<344x128xf32, #tpu.memory_space<vmem>>, vector<8x128xf32>,
    %c6_i32_626 = arith.constant 6 : i32
    %1192 = tpu.dynamic_rotate %1113 by %c6_i32_626 dim 1 : vector<8x128xf32>, i32 -> vector<8x128xf32>
    %cst_627 = arith.constant 0.000000e+00 : f32
    %1193 = vector.shape_cast %142 : vector<1x128xi1> to vector<1x128xi1>
    %1194 = vector.broadcast %1193 : vector<1x128xi1> to vector<8x128xi1>
    %1195 = vector.broadcast %cst_627 : f32 to vector<8x128xf32>
    %1196 = arith.select %1194, %1192, %1195 : vector<8x128xi1>, vector<8x128xf32>
    %c104_628 = arith.constant 104 : index
    %c0_629 = arith.constant 0 : index
    %1197 = vector.load %arg19[%c104_628, %c0_629] : memref<344x128xf32, #tpu.memory_space<vmem>>, vector<8x128xf32>
    tpu.vector_store %arg19[%c104_628, %c0_629], %1196 {strides = array<i32>} : memref<344x128xf32, #tpu.memory_space<vmem>>, vector<8x128xf32>,
    %c5_i32_630 = arith.constant 5 : i32
    %1198 = tpu.dynamic_rotate %1113 by %c5_i32_630 dim 1 : vector<8x128xf32>, i32 -> vector<8x128xf32>
    %cst_631 = arith.constant 0.000000e+00 : f32
    %1199 = vector.shape_cast %151 : vector<1x128xi1> to vector<1x128xi1>
    %1200 = vector.broadcast %1199 : vector<1x128xi1> to vector<8x128xi1>
    %1201 = vector.broadcast %cst_631 : f32 to vector<8x128xf32>
    %1202 = arith.select %1200, %1198, %1201 : vector<8x128xi1>, vector<8x128xf32>
    %c112_632 = arith.constant 112 : index
    %c0_633 = arith.constant 0 : index
    %1203 = vector.load %arg19[%c112_632, %c0_633] : memref<344x128xf32, #tpu.memory_space<vmem>>, vector<8x128xf32>
    tpu.vector_store %arg19[%c112_632, %c0_633], %1202 {strides = array<i32>} : memref<344x128xf32, #tpu.memory_space<vmem>>, vector<8x128xf32>,
    %c4_i32_634 = arith.constant 4 : i32
    %1204 = tpu.dynamic_rotate %1113 by %c4_i32_634 dim 1 : vector<8x128xf32>, i32 -> vector<8x128xf32>
    %cst_635 = arith.constant 0.000000e+00 : f32
    %1205 = vector.shape_cast %160 : vector<1x128xi1> to vector<1x128xi1>
    %1206 = vector.broadcast %1205 : vector<1x128xi1> to vector<8x128xi1>
    %1207 = vector.broadcast %cst_635 : f32 to vector<8x128xf32>
    %1208 = arith.select %1206, %1204, %1207 : vector<8x128xi1>, vector<8x128xf32>
    %c120_636 = arith.constant 120 : index
    %c0_637 = arith.constant 0 : index
    %1209 = vector.load %arg19[%c120_636, %c0_637] : memref<344x128xf32, #tpu.memory_space<vmem>>, vector<8x128xf32>
    tpu.vector_store %arg19[%c120_636, %c0_637], %1208 {strides = array<i32>} : memref<344x128xf32, #tpu.memory_space<vmem>>, vector<8x128xf32>,
    %c3_i32_638 = arith.constant 3 : i32
    %1210 = tpu.dynamic_rotate %1113 by %c3_i32_638 dim 1 : vector<8x128xf32>, i32 -> vector<8x128xf32>
    %cst_639 = arith.constant 0.000000e+00 : f32
    %1211 = vector.shape_cast %169 : vector<1x128xi1> to vector<1x128xi1>
    %1212 = vector.broadcast %1211 : vector<1x128xi1> to vector<8x128xi1>
    %1213 = vector.broadcast %cst_639 : f32 to vector<8x128xf32>
    %1214 = arith.select %1212, %1210, %1213 : vector<8x128xi1>, vector<8x128xf32>
    %c128_640 = arith.constant 128 : index
    %c0_641 = arith.constant 0 : index
    %1215 = vector.load %arg19[%c128_640, %c0_641] : memref<344x128xf32, #tpu.memory_space<vmem>>, vector<8x128xf32>
    tpu.vector_store %arg19[%c128_640, %c0_641], %1214 {strides = array<i32>} : memref<344x128xf32, #tpu.memory_space<vmem>>, vector<8x128xf32>,
    %c2_i32_642 = arith.constant 2 : i32
    %1216 = tpu.dynamic_rotate %1113 by %c2_i32_642 dim 1 : vector<8x128xf32>, i32 -> vector<8x128xf32>
    %cst_643 = arith.constant 0.000000e+00 : f32
    %1217 = vector.shape_cast %178 : vector<1x128xi1> to vector<1x128xi1>
    %1218 = vector.broadcast %1217 : vector<1x128xi1> to vector<8x128xi1>
    %1219 = vector.broadcast %cst_643 : f32 to vector<8x128xf32>
    %1220 = arith.select %1218, %1216, %1219 : vector<8x128xi1>, vector<8x128xf32>
    %c136_644 = arith.constant 136 : index
    %c0_645 = arith.constant 0 : index
    %1221 = vector.load %arg19[%c136_644, %c0_645] : memref<344x128xf32, #tpu.memory_space<vmem>>, vector<8x128xf32>
    tpu.vector_store %arg19[%c136_644, %c0_645], %1220 {strides = array<i32>} : memref<344x128xf32, #tpu.memory_space<vmem>>, vector<8x128xf32>,
    %c1_i32_646 = arith.constant 1 : i32
    %1222 = tpu.dynamic_rotate %1113 by %c1_i32_646 dim 1 : vector<8x128xf32>, i32 -> vector<8x128xf32>
    %cst_647 = arith.constant 0.000000e+00 : f32
    %1223 = vector.shape_cast %187 : vector<1x128xi1> to vector<1x128xi1>
    %1224 = vector.broadcast %1223 : vector<1x128xi1> to vector<8x128xi1>
    %1225 = vector.broadcast %cst_647 : f32 to vector<8x128xf32>
    %1226 = arith.select %1224, %1222, %1225 : vector<8x128xi1>, vector<8x128xf32>
    %c144_648 = arith.constant 144 : index
    %c0_649 = arith.constant 0 : index
    %1227 = vector.load %arg19[%c144_648, %c0_649] : memref<344x128xf32, #tpu.memory_space<vmem>>, vector<8x128xf32>
    tpu.vector_store %arg19[%c144_648, %c0_649], %1226 {strides = array<i32>} : memref<344x128xf32, #tpu.memory_space<vmem>>, vector<8x128xf32>,
    %c152_650 = arith.constant 152 : index
    %c0_651 = arith.constant 0 : index
    %1228 = vector.load %arg19[%c152_650, %c0_651] : memref<344x128xf32, #tpu.memory_space<vmem>>, vector<8x128xf32>
    tpu.vector_store %arg19[%c152_650, %c0_651], %1113 {strides = array<i32>} : memref<344x128xf32, #tpu.memory_space<vmem>>, vector<8x128xf32>,
    %c127_i32_652 = arith.constant 127 : i32
    %1229 = tpu.dynamic_rotate %1113 by %c127_i32_652 dim 1 : vector<8x128xf32>, i32 -> vector<8x128xf32>
    %cst_653 = arith.constant 0.000000e+00 : f32
    %1230 = vector.shape_cast %196 : vector<1x128xi1> to vector<1x128xi1>
    %1231 = vector.broadcast %1230 : vector<1x128xi1> to vector<8x128xi1>
    %1232 = vector.broadcast %cst_653 : f32 to vector<8x128xf32>
    %1233 = arith.select %1231, %1229, %1232 : vector<8x128xi1>, vector<8x128xf32>
    %c160_654 = arith.constant 160 : index
    %c0_655 = arith.constant 0 : index
    %1234 = vector.load %arg19[%c160_654, %c0_655] : memref<344x128xf32, #tpu.memory_space<vmem>>, vector<8x128xf32>
    tpu.vector_store %arg19[%c160_654, %c0_655], %1233 {strides = array<i32>} : memref<344x128xf32, #tpu.memory_space<vmem>>, vector<8x128xf32>,
    %c126_i32_656 = arith.constant 126 : i32
    %1235 = tpu.dynamic_rotate %1113 by %c126_i32_656 dim 1 : vector<8x128xf32>, i32 -> vector<8x128xf32>
    %cst_657 = arith.constant 0.000000e+00 : f32
    %1236 = vector.shape_cast %205 : vector<1x128xi1> to vector<1x128xi1>
    %1237 = vector.broadcast %1236 : vector<1x128xi1> to vector<8x128xi1>
    %1238 = vector.broadcast %cst_657 : f32 to vector<8x128xf32>
    %1239 = arith.select %1237, %1235, %1238 : vector<8x128xi1>, vector<8x128xf32>
    %c168_658 = arith.constant 168 : index
    %c0_659 = arith.constant 0 : index
    %1240 = vector.load %arg19[%c168_658, %c0_659] : memref<344x128xf32, #tpu.memory_space<vmem>>, vector<8x128xf32>
    tpu.vector_store %arg19[%c168_658, %c0_659], %1239 {strides = array<i32>} : memref<344x128xf32, #tpu.memory_space<vmem>>, vector<8x128xf32>,
    %c125_i32_660 = arith.constant 125 : i32
    %1241 = tpu.dynamic_rotate %1113 by %c125_i32_660 dim 1 : vector<8x128xf32>, i32 -> vector<8x128xf32>
    %cst_661 = arith.constant 0.000000e+00 : f32
    %1242 = vector.shape_cast %214 : vector<1x128xi1> to vector<1x128xi1>
    %1243 = vector.broadcast %1242 : vector<1x128xi1> to vector<8x128xi1>
    %1244 = vector.broadcast %cst_661 : f32 to vector<8x128xf32>
    %1245 = arith.select %1243, %1241, %1244 : vector<8x128xi1>, vector<8x128xf32>
    %c176_662 = arith.constant 176 : index
    %c0_663 = arith.constant 0 : index
    %1246 = vector.load %arg19[%c176_662, %c0_663] : memref<344x128xf32, #tpu.memory_space<vmem>>, vector<8x128xf32>
    tpu.vector_store %arg19[%c176_662, %c0_663], %1245 {strides = array<i32>} : memref<344x128xf32, #tpu.memory_space<vmem>>, vector<8x128xf32>,
    %c124_i32_664 = arith.constant 124 : i32
    %1247 = tpu.dynamic_rotate %1113 by %c124_i32_664 dim 1 : vector<8x128xf32>, i32 -> vector<8x128xf32>
    %cst_665 = arith.constant 0.000000e+00 : f32
    %1248 = vector.shape_cast %223 : vector<1x128xi1> to vector<1x128xi1>
    %1249 = vector.broadcast %1248 : vector<1x128xi1> to vector<8x128xi1>
    %1250 = vector.broadcast %cst_665 : f32 to vector<8x128xf32>
    %1251 = arith.select %1249, %1247, %1250 : vector<8x128xi1>, vector<8x128xf32>
    %c184_666 = arith.constant 184 : index
    %c0_667 = arith.constant 0 : index
    %1252 = vector.load %arg19[%c184_666, %c0_667] : memref<344x128xf32, #tpu.memory_space<vmem>>, vector<8x128xf32>
    tpu.vector_store %arg19[%c184_666, %c0_667], %1251 {strides = array<i32>} : memref<344x128xf32, #tpu.memory_space<vmem>>, vector<8x128xf32>,
    %c123_i32_668 = arith.constant 123 : i32
    %1253 = tpu.dynamic_rotate %1113 by %c123_i32_668 dim 1 : vector<8x128xf32>, i32 -> vector<8x128xf32>
    %cst_669 = arith.constant 0.000000e+00 : f32
    %1254 = vector.shape_cast %232 : vector<1x128xi1> to vector<1x128xi1>
    %1255 = vector.broadcast %1254 : vector<1x128xi1> to vector<8x128xi1>
    %1256 = vector.broadcast %cst_669 : f32 to vector<8x128xf32>
    %1257 = arith.select %1255, %1253, %1256 : vector<8x128xi1>, vector<8x128xf32>
    %c192_670 = arith.constant 192 : index
    %c0_671 = arith.constant 0 : index
    %1258 = vector.load %arg19[%c192_670, %c0_671] : memref<344x128xf32, #tpu.memory_space<vmem>>, vector<8x128xf32>
    tpu.vector_store %arg19[%c192_670, %c0_671], %1257 {strides = array<i32>} : memref<344x128xf32, #tpu.memory_space<vmem>>, vector<8x128xf32>,
    %c122_i32_672 = arith.constant 122 : i32
    %1259 = tpu.dynamic_rotate %1113 by %c122_i32_672 dim 1 : vector<8x128xf32>, i32 -> vector<8x128xf32>
    %cst_673 = arith.constant 0.000000e+00 : f32
    %1260 = vector.shape_cast %241 : vector<1x128xi1> to vector<1x128xi1>
    %1261 = vector.broadcast %1260 : vector<1x128xi1> to vector<8x128xi1>
    %1262 = vector.broadcast %cst_673 : f32 to vector<8x128xf32>
    %1263 = arith.select %1261, %1259, %1262 : vector<8x128xi1>, vector<8x128xf32>
    %c200_674 = arith.constant 200 : index
    %c0_675 = arith.constant 0 : index
    %1264 = vector.load %arg19[%c200_674, %c0_675] : memref<344x128xf32, #tpu.memory_space<vmem>>, vector<8x128xf32>
    tpu.vector_store %arg19[%c200_674, %c0_675], %1263 {strides = array<i32>} : memref<344x128xf32, #tpu.memory_space<vmem>>, vector<8x128xf32>,
    %c121_i32_676 = arith.constant 121 : i32
    %1265 = tpu.dynamic_rotate %1113 by %c121_i32_676 dim 1 : vector<8x128xf32>, i32 -> vector<8x128xf32>
    %cst_677 = arith.constant 0.000000e+00 : f32
    %1266 = vector.shape_cast %250 : vector<1x128xi1> to vector<1x128xi1>
    %1267 = vector.broadcast %1266 : vector<1x128xi1> to vector<8x128xi1>
    %1268 = vector.broadcast %cst_677 : f32 to vector<8x128xf32>
    %1269 = arith.select %1267, %1265, %1268 : vector<8x128xi1>, vector<8x128xf32>
    %c208_678 = arith.constant 208 : index
    %c0_679 = arith.constant 0 : index
    %1270 = vector.load %arg19[%c208_678, %c0_679] : memref<344x128xf32, #tpu.memory_space<vmem>>, vector<8x128xf32>
    tpu.vector_store %arg19[%c208_678, %c0_679], %1269 {strides = array<i32>} : memref<344x128xf32, #tpu.memory_space<vmem>>, vector<8x128xf32>,
    %c120_i32_680 = arith.constant 120 : i32
    %1271 = tpu.dynamic_rotate %1113 by %c120_i32_680 dim 1 : vector<8x128xf32>, i32 -> vector<8x128xf32>
    %cst_681 = arith.constant 0.000000e+00 : f32
    %1272 = vector.shape_cast %259 : vector<1x128xi1> to vector<1x128xi1>
    %1273 = vector.broadcast %1272 : vector<1x128xi1> to vector<8x128xi1>
    %1274 = vector.broadcast %cst_681 : f32 to vector<8x128xf32>
    %1275 = arith.select %1273, %1271, %1274 : vector<8x128xi1>, vector<8x128xf32>
    %c216_682 = arith.constant 216 : index
    %c0_683 = arith.constant 0 : index
    %1276 = vector.load %arg19[%c216_682, %c0_683] : memref<344x128xf32, #tpu.memory_space<vmem>>, vector<8x128xf32>
    tpu.vector_store %arg19[%c216_682, %c0_683], %1275 {strides = array<i32>} : memref<344x128xf32, #tpu.memory_space<vmem>>, vector<8x128xf32>,
    %c119_i32_684 = arith.constant 119 : i32
    %1277 = tpu.dynamic_rotate %1113 by %c119_i32_684 dim 1 : vector<8x128xf32>, i32 -> vector<8x128xf32>
    %cst_685 = arith.constant 0.000000e+00 : f32
    %1278 = vector.shape_cast %268 : vector<1x128xi1> to vector<1x128xi1>
    %1279 = vector.broadcast %1278 : vector<1x128xi1> to vector<8x128xi1>
    %1280 = vector.broadcast %cst_685 : f32 to vector<8x128xf32>
    %1281 = arith.select %1279, %1277, %1280 : vector<8x128xi1>, vector<8x128xf32>
    %c224_686 = arith.constant 224 : index
    %c0_687 = arith.constant 0 : index
    %1282 = vector.load %arg19[%c224_686, %c0_687] : memref<344x128xf32, #tpu.memory_space<vmem>>, vector<8x128xf32>
    tpu.vector_store %arg19[%c224_686, %c0_687], %1281 {strides = array<i32>} : memref<344x128xf32, #tpu.memory_space<vmem>>, vector<8x128xf32>,
    %c118_i32_688 = arith.constant 118 : i32
    %1283 = tpu.dynamic_rotate %1113 by %c118_i32_688 dim 1 : vector<8x128xf32>, i32 -> vector<8x128xf32>
    %cst_689 = arith.constant 0.000000e+00 : f32
    %1284 = vector.shape_cast %277 : vector<1x128xi1> to vector<1x128xi1>
    %1285 = vector.broadcast %1284 : vector<1x128xi1> to vector<8x128xi1>
    %1286 = vector.broadcast %cst_689 : f32 to vector<8x128xf32>
    %1287 = arith.select %1285, %1283, %1286 : vector<8x128xi1>, vector<8x128xf32>
    %c232_690 = arith.constant 232 : index
    %c0_691 = arith.constant 0 : index
    %1288 = vector.load %arg19[%c232_690, %c0_691] : memref<344x128xf32, #tpu.memory_space<vmem>>, vector<8x128xf32>
    tpu.vector_store %arg19[%c232_690, %c0_691], %1287 {strides = array<i32>} : memref<344x128xf32, #tpu.memory_space<vmem>>, vector<8x128xf32>,
    %c117_i32_692 = arith.constant 117 : i32
    %1289 = tpu.dynamic_rotate %1113 by %c117_i32_692 dim 1 : vector<8x128xf32>, i32 -> vector<8x128xf32>
    %cst_693 = arith.constant 0.000000e+00 : f32
    %1290 = vector.shape_cast %286 : vector<1x128xi1> to vector<1x128xi1>
    %1291 = vector.broadcast %1290 : vector<1x128xi1> to vector<8x128xi1>
    %1292 = vector.broadcast %cst_693 : f32 to vector<8x128xf32>
    %1293 = arith.select %1291, %1289, %1292 : vector<8x128xi1>, vector<8x128xf32>
    %c240_694 = arith.constant 240 : index
    %c0_695 = arith.constant 0 : index
    %1294 = vector.load %arg19[%c240_694, %c0_695] : memref<344x128xf32, #tpu.memory_space<vmem>>, vector<8x128xf32>
    tpu.vector_store %arg19[%c240_694, %c0_695], %1293 {strides = array<i32>} : memref<344x128xf32, #tpu.memory_space<vmem>>, vector<8x128xf32>,
    %c116_i32_696 = arith.constant 116 : i32
    %1295 = tpu.dynamic_rotate %1113 by %c116_i32_696 dim 1 : vector<8x128xf32>, i32 -> vector<8x128xf32>
    %cst_697 = arith.constant 0.000000e+00 : f32
    %1296 = vector.shape_cast %295 : vector<1x128xi1> to vector<1x128xi1>
    %1297 = vector.broadcast %1296 : vector<1x128xi1> to vector<8x128xi1>
    %1298 = vector.broadcast %cst_697 : f32 to vector<8x128xf32>
    %1299 = arith.select %1297, %1295, %1298 : vector<8x128xi1>, vector<8x128xf32>
    %c248_698 = arith.constant 248 : index
    %c0_699 = arith.constant 0 : index
    %1300 = vector.load %arg19[%c248_698, %c0_699] : memref<344x128xf32, #tpu.memory_space<vmem>>, vector<8x128xf32>
    tpu.vector_store %arg19[%c248_698, %c0_699], %1299 {strides = array<i32>} : memref<344x128xf32, #tpu.memory_space<vmem>>, vector<8x128xf32>,
    %c115_i32_700 = arith.constant 115 : i32
    %1301 = tpu.dynamic_rotate %1113 by %c115_i32_700 dim 1 : vector<8x128xf32>, i32 -> vector<8x128xf32>
    %cst_701 = arith.constant 0.000000e+00 : f32
    %1302 = vector.shape_cast %304 : vector<1x128xi1> to vector<1x128xi1>
    %1303 = vector.broadcast %1302 : vector<1x128xi1> to vector<8x128xi1>
    %1304 = vector.broadcast %cst_701 : f32 to vector<8x128xf32>
    %1305 = arith.select %1303, %1301, %1304 : vector<8x128xi1>, vector<8x128xf32>
    %c256_702 = arith.constant 256 : index
    %c0_703 = arith.constant 0 : index
    %1306 = vector.load %arg19[%c256_702, %c0_703] : memref<344x128xf32, #tpu.memory_space<vmem>>, vector<8x128xf32>
    tpu.vector_store %arg19[%c256_702, %c0_703], %1305 {strides = array<i32>} : memref<344x128xf32, #tpu.memory_space<vmem>>, vector<8x128xf32>,
    %c114_i32_704 = arith.constant 114 : i32
    %1307 = tpu.dynamic_rotate %1113 by %c114_i32_704 dim 1 : vector<8x128xf32>, i32 -> vector<8x128xf32>
    %cst_705 = arith.constant 0.000000e+00 : f32
    %1308 = vector.shape_cast %313 : vector<1x128xi1> to vector<1x128xi1>
    %1309 = vector.broadcast %1308 : vector<1x128xi1> to vector<8x128xi1>
    %1310 = vector.broadcast %cst_705 : f32 to vector<8x128xf32>
    %1311 = arith.select %1309, %1307, %1310 : vector<8x128xi1>, vector<8x128xf32>
    %c264_706 = arith.constant 264 : index
    %c0_707 = arith.constant 0 : index
    %1312 = vector.load %arg19[%c264_706, %c0_707] : memref<344x128xf32, #tpu.memory_space<vmem>>, vector<8x128xf32>
    tpu.vector_store %arg19[%c264_706, %c0_707], %1311 {strides = array<i32>} : memref<344x128xf32, #tpu.memory_space<vmem>>, vector<8x128xf32>,
    %c113_i32_708 = arith.constant 113 : i32
    %1313 = tpu.dynamic_rotate %1113 by %c113_i32_708 dim 1 : vector<8x128xf32>, i32 -> vector<8x128xf32>
    %cst_709 = arith.constant 0.000000e+00 : f32
    %1314 = vector.shape_cast %322 : vector<1x128xi1> to vector<1x128xi1>
    %1315 = vector.broadcast %1314 : vector<1x128xi1> to vector<8x128xi1>
    %1316 = vector.broadcast %cst_709 : f32 to vector<8x128xf32>
    %1317 = arith.select %1315, %1313, %1316 : vector<8x128xi1>, vector<8x128xf32>
    %c272_710 = arith.constant 272 : index
    %c0_711 = arith.constant 0 : index
    %1318 = vector.load %arg19[%c272_710, %c0_711] : memref<344x128xf32, #tpu.memory_space<vmem>>, vector<8x128xf32>
    tpu.vector_store %arg19[%c272_710, %c0_711], %1317 {strides = array<i32>} : memref<344x128xf32, #tpu.memory_space<vmem>>, vector<8x128xf32>,
    %c112_i32_712 = arith.constant 112 : i32
    %1319 = tpu.dynamic_rotate %1113 by %c112_i32_712 dim 1 : vector<8x128xf32>, i32 -> vector<8x128xf32>
    %cst_713 = arith.constant 0.000000e+00 : f32
    %1320 = vector.shape_cast %331 : vector<1x128xi1> to vector<1x128xi1>
    %1321 = vector.broadcast %1320 : vector<1x128xi1> to vector<8x128xi1>
    %1322 = vector.broadcast %cst_713 : f32 to vector<8x128xf32>
    %1323 = arith.select %1321, %1319, %1322 : vector<8x128xi1>, vector<8x128xf32>
    %c280_714 = arith.constant 280 : index
    %c0_715 = arith.constant 0 : index
    %1324 = vector.load %arg19[%c280_714, %c0_715] : memref<344x128xf32, #tpu.memory_space<vmem>>, vector<8x128xf32>
    tpu.vector_store %arg19[%c280_714, %c0_715], %1323 {strides = array<i32>} : memref<344x128xf32, #tpu.memory_space<vmem>>, vector<8x128xf32>,
    %c111_i32_716 = arith.constant 111 : i32
    %1325 = tpu.dynamic_rotate %1113 by %c111_i32_716 dim 1 : vector<8x128xf32>, i32 -> vector<8x128xf32>
    %cst_717 = arith.constant 0.000000e+00 : f32
    %1326 = vector.shape_cast %340 : vector<1x128xi1> to vector<1x128xi1>
    %1327 = vector.broadcast %1326 : vector<1x128xi1> to vector<8x128xi1>
    %1328 = vector.broadcast %cst_717 : f32 to vector<8x128xf32>
    %1329 = arith.select %1327, %1325, %1328 : vector<8x128xi1>, vector<8x128xf32>
    %c288_718 = arith.constant 288 : index
    %c0_719 = arith.constant 0 : index
    %1330 = vector.load %arg19[%c288_718, %c0_719] : memref<344x128xf32, #tpu.memory_space<vmem>>, vector<8x128xf32>
    tpu.vector_store %arg19[%c288_718, %c0_719], %1329 {strides = array<i32>} : memref<344x128xf32, #tpu.memory_space<vmem>>, vector<8x128xf32>,
    %c110_i32_720 = arith.constant 110 : i32
    %1331 = tpu.dynamic_rotate %1113 by %c110_i32_720 dim 1 : vector<8x128xf32>, i32 -> vector<8x128xf32>
    %cst_721 = arith.constant 0.000000e+00 : f32
    %1332 = vector.shape_cast %349 : vector<1x128xi1> to vector<1x128xi1>
    %1333 = vector.broadcast %1332 : vector<1x128xi1> to vector<8x128xi1>
    %1334 = vector.broadcast %cst_721 : f32 to vector<8x128xf32>
    %1335 = arith.select %1333, %1331, %1334 : vector<8x128xi1>, vector<8x128xf32>
    %c296_722 = arith.constant 296 : index
    %c0_723 = arith.constant 0 : index
    %1336 = vector.load %arg19[%c296_722, %c0_723] : memref<344x128xf32, #tpu.memory_space<vmem>>, vector<8x128xf32>
    tpu.vector_store %arg19[%c296_722, %c0_723], %1335 {strides = array<i32>} : memref<344x128xf32, #tpu.memory_space<vmem>>, vector<8x128xf32>,
    %c109_i32_724 = arith.constant 109 : i32
    %1337 = tpu.dynamic_rotate %1113 by %c109_i32_724 dim 1 : vector<8x128xf32>, i32 -> vector<8x128xf32>
    %cst_725 = arith.constant 0.000000e+00 : f32
    %1338 = vector.shape_cast %358 : vector<1x128xi1> to vector<1x128xi1>
    %1339 = vector.broadcast %1338 : vector<1x128xi1> to vector<8x128xi1>
    %1340 = vector.broadcast %cst_725 : f32 to vector<8x128xf32>
    %1341 = arith.select %1339, %1337, %1340 : vector<8x128xi1>, vector<8x128xf32>
    %c304_726 = arith.constant 304 : index
    %c0_727 = arith.constant 0 : index
    %1342 = vector.load %arg19[%c304_726, %c0_727] : memref<344x128xf32, #tpu.memory_space<vmem>>, vector<8x128xf32>
    tpu.vector_store %arg19[%c304_726, %c0_727], %1341 {strides = array<i32>} : memref<344x128xf32, #tpu.memory_space<vmem>>, vector<8x128xf32>,
    %c127_i32_728 = arith.constant 127 : i32
    %1343 = tpu.dynamic_rotate %1111 by %c127_i32_728 dim 1 : vector<32x128xf32>, i32 -> vector<32x128xf32>
    %cst_729 = arith.constant 0xFF800000 : f32
    %1344 = vector.shape_cast %196 : vector<1x128xi1> to vector<1x128xi1>
    %1345 = vector.broadcast %1344 : vector<1x128xi1> to vector<32x128xi1>
    %1346 = vector.broadcast %cst_729 : f32 to vector<32x128xf32>
    %1347 = arith.select %1345, %1343, %1346 : vector<32x128xi1>, vector<32x128xf32>
    %c1_i32_730 = arith.constant 1 : i32
    %1348 = tpu.dynamic_rotate %1111 by %c1_i32_730 dim 1 : vector<32x128xf32>, i32 -> vector<32x128xf32>
    %cst_731 = arith.constant 0xFF800000 : f32
    %1349 = vector.shape_cast %187 : vector<1x128xi1> to vector<1x128xi1>
    %1350 = vector.broadcast %1349 : vector<1x128xi1> to vector<32x128xi1>
    %1351 = vector.broadcast %cst_731 : f32 to vector<32x128xf32>
    %1352 = arith.select %1350, %1348, %1351 : vector<32x128xi1>, vector<32x128xf32>
    %1353 = arith.maximumf %1347, %1352 : vector<32x128xf32>
    %1354 = arith.maximumf %1111, %1353 : vector<32x128xf32>
    %c312_732 = arith.constant 312 : index
    %c0_733 = arith.constant 0 : index
    %1355 = vector.load %arg19[%c312_732, %c0_733] : memref<344x128xf32, #tpu.memory_space<vmem>>, vector<32x128xf32>
    tpu.vector_store %arg19[%c312_732, %c0_733], %1354 {strides = array<i32>} : memref<344x128xf32, #tpu.memory_space<vmem>>, vector<32x128xf32>,
    %c0_734 = arith.constant 0 : index
    %c0_735 = arith.constant 0 : index
    %1356 = vector.load %arg8[%c0_734, %c0_735] : memref<32x344xf32, #tpu.memory_space<vmem>>, vector<32x344xf32>
    %c0_736 = arith.constant 0 : index
    %c0_737 = arith.constant 0 : index
    %1357 = vector.load %arg19[%c0_736, %c0_737] : memref<344x128xf32, #tpu.memory_space<vmem>>, vector<344x128xf32>
    %cst_738 = arith.constant dense<0.000000e+00> : vector<32x128xf32>
    %1358 = tpu.matmul %1356, %1357, %cst_738 {dimension_numbers = #tpu.dot_dimension_numbers<[1], [0], [0], [1], [0, 0, 1, 1], [], []>} : vector<32x344xf32>, vector<344x128xf32>, vector<32x128xf32> -> vector<32x128xf32>
    %cst_739 = arith.constant 0.000000e+00 : f32
    %1359 = vector.broadcast %cst_739 : f32 to vector<32x128xf32>
    %1360 = arith.maximumf %1358, %1359 : vector<32x128xf32>
    %c0_740 = arith.constant 0 : index
    %c0_741 = arith.constant 0 : index
    %1361 = vector.load %arg9[%c0_740, %c0_741] : memref<8x32xf32, #tpu.memory_space<vmem>>, vector<8x32xf32>
    %cst_742 = arith.constant dense<0.000000e+00> : vector<8x128xf32>
    %1362 = tpu.matmul %1361, %1360, %cst_742 {dimension_numbers = #tpu.dot_dimension_numbers<[1], [0], [0], [1], [0, 0, 1, 1], [], []>} : vector<8x32xf32>, vector<32x128xf32>, vector<8x128xf32> -> vector<8x128xf32>
    %c19_i32_743 = arith.constant 19 : i32
    %1363 = tpu.dynamic_rotate %1362 by %c19_i32_743 dim 1 : vector<8x128xf32>, i32 -> vector<8x128xf32>
    %cst_744 = arith.constant 0.000000e+00 : f32
    %1364 = vector.shape_cast %25 : vector<1x128xi1> to vector<1x128xi1>
    %1365 = vector.broadcast %1364 : vector<1x128xi1> to vector<8x128xi1>
    %1366 = vector.broadcast %cst_744 : f32 to vector<8x128xf32>
    %1367 = arith.select %1365, %1363, %1366 : vector<8x128xi1>, vector<8x128xf32>
    %c0_745 = arith.constant 0 : index
    %c0_746 = arith.constant 0 : index
    %1368 = vector.load %arg19[%c0_745, %c0_746] : memref<344x128xf32, #tpu.memory_space<vmem>>, vector<8x128xf32>
    tpu.vector_store %arg19[%c0_745, %c0_746], %1367 {strides = array<i32>} : memref<344x128xf32, #tpu.memory_space<vmem>>, vector<8x128xf32>,
    %c18_i32_747 = arith.constant 18 : i32
    %1369 = tpu.dynamic_rotate %1362 by %c18_i32_747 dim 1 : vector<8x128xf32>, i32 -> vector<8x128xf32>
    %cst_748 = arith.constant 0.000000e+00 : f32
    %1370 = vector.shape_cast %34 : vector<1x128xi1> to vector<1x128xi1>
    %1371 = vector.broadcast %1370 : vector<1x128xi1> to vector<8x128xi1>
    %1372 = vector.broadcast %cst_748 : f32 to vector<8x128xf32>
    %1373 = arith.select %1371, %1369, %1372 : vector<8x128xi1>, vector<8x128xf32>
    %c8_749 = arith.constant 8 : index
    %c0_750 = arith.constant 0 : index
    %1374 = vector.load %arg19[%c8_749, %c0_750] : memref<344x128xf32, #tpu.memory_space<vmem>>, vector<8x128xf32>
    tpu.vector_store %arg19[%c8_749, %c0_750], %1373 {strides = array<i32>} : memref<344x128xf32, #tpu.memory_space<vmem>>, vector<8x128xf32>,
    %c17_i32_751 = arith.constant 17 : i32
    %1375 = tpu.dynamic_rotate %1362 by %c17_i32_751 dim 1 : vector<8x128xf32>, i32 -> vector<8x128xf32>
    %cst_752 = arith.constant 0.000000e+00 : f32
    %1376 = vector.shape_cast %43 : vector<1x128xi1> to vector<1x128xi1>
    %1377 = vector.broadcast %1376 : vector<1x128xi1> to vector<8x128xi1>
    %1378 = vector.broadcast %cst_752 : f32 to vector<8x128xf32>
    %1379 = arith.select %1377, %1375, %1378 : vector<8x128xi1>, vector<8x128xf32>
    %c16_753 = arith.constant 16 : index
    %c0_754 = arith.constant 0 : index
    %1380 = vector.load %arg19[%c16_753, %c0_754] : memref<344x128xf32, #tpu.memory_space<vmem>>, vector<8x128xf32>
    tpu.vector_store %arg19[%c16_753, %c0_754], %1379 {strides = array<i32>} : memref<344x128xf32, #tpu.memory_space<vmem>>, vector<8x128xf32>,
    %c16_i32_755 = arith.constant 16 : i32
    %1381 = tpu.dynamic_rotate %1362 by %c16_i32_755 dim 1 : vector<8x128xf32>, i32 -> vector<8x128xf32>
    %cst_756 = arith.constant 0.000000e+00 : f32
    %1382 = vector.shape_cast %52 : vector<1x128xi1> to vector<1x128xi1>
    %1383 = vector.broadcast %1382 : vector<1x128xi1> to vector<8x128xi1>
    %1384 = vector.broadcast %cst_756 : f32 to vector<8x128xf32>
    %1385 = arith.select %1383, %1381, %1384 : vector<8x128xi1>, vector<8x128xf32>
    %c24_757 = arith.constant 24 : index
    %c0_758 = arith.constant 0 : index
    %1386 = vector.load %arg19[%c24_757, %c0_758] : memref<344x128xf32, #tpu.memory_space<vmem>>, vector<8x128xf32>
    tpu.vector_store %arg19[%c24_757, %c0_758], %1385 {strides = array<i32>} : memref<344x128xf32, #tpu.memory_space<vmem>>, vector<8x128xf32>,
    %c15_i32_759 = arith.constant 15 : i32
    %1387 = tpu.dynamic_rotate %1362 by %c15_i32_759 dim 1 : vector<8x128xf32>, i32 -> vector<8x128xf32>
    %cst_760 = arith.constant 0.000000e+00 : f32
    %1388 = vector.shape_cast %61 : vector<1x128xi1> to vector<1x128xi1>
    %1389 = vector.broadcast %1388 : vector<1x128xi1> to vector<8x128xi1>
    %1390 = vector.broadcast %cst_760 : f32 to vector<8x128xf32>
    %1391 = arith.select %1389, %1387, %1390 : vector<8x128xi1>, vector<8x128xf32>
    %c32_761 = arith.constant 32 : index
    %c0_762 = arith.constant 0 : index
    %1392 = vector.load %arg19[%c32_761, %c0_762] : memref<344x128xf32, #tpu.memory_space<vmem>>, vector<8x128xf32>
    tpu.vector_store %arg19[%c32_761, %c0_762], %1391 {strides = array<i32>} : memref<344x128xf32, #tpu.memory_space<vmem>>, vector<8x128xf32>,
    %c14_i32_763 = arith.constant 14 : i32
    %1393 = tpu.dynamic_rotate %1362 by %c14_i32_763 dim 1 : vector<8x128xf32>, i32 -> vector<8x128xf32>
    %cst_764 = arith.constant 0.000000e+00 : f32
    %1394 = vector.shape_cast %70 : vector<1x128xi1> to vector<1x128xi1>
    %1395 = vector.broadcast %1394 : vector<1x128xi1> to vector<8x128xi1>
    %1396 = vector.broadcast %cst_764 : f32 to vector<8x128xf32>
    %1397 = arith.select %1395, %1393, %1396 : vector<8x128xi1>, vector<8x128xf32>
    %c40_765 = arith.constant 40 : index
    %c0_766 = arith.constant 0 : index
    %1398 = vector.load %arg19[%c40_765, %c0_766] : memref<344x128xf32, #tpu.memory_space<vmem>>, vector<8x128xf32>
    tpu.vector_store %arg19[%c40_765, %c0_766], %1397 {strides = array<i32>} : memref<344x128xf32, #tpu.memory_space<vmem>>, vector<8x128xf32>,
    %c13_i32_767 = arith.constant 13 : i32
    %1399 = tpu.dynamic_rotate %1362 by %c13_i32_767 dim 1 : vector<8x128xf32>, i32 -> vector<8x128xf32>
    %cst_768 = arith.constant 0.000000e+00 : f32
    %1400 = vector.shape_cast %79 : vector<1x128xi1> to vector<1x128xi1>
    %1401 = vector.broadcast %1400 : vector<1x128xi1> to vector<8x128xi1>
    %1402 = vector.broadcast %cst_768 : f32 to vector<8x128xf32>
    %1403 = arith.select %1401, %1399, %1402 : vector<8x128xi1>, vector<8x128xf32>
    %c48_769 = arith.constant 48 : index
    %c0_770 = arith.constant 0 : index
    %1404 = vector.load %arg19[%c48_769, %c0_770] : memref<344x128xf32, #tpu.memory_space<vmem>>, vector<8x128xf32>
    tpu.vector_store %arg19[%c48_769, %c0_770], %1403 {strides = array<i32>} : memref<344x128xf32, #tpu.memory_space<vmem>>, vector<8x128xf32>,
    %c12_i32_771 = arith.constant 12 : i32
    %1405 = tpu.dynamic_rotate %1362 by %c12_i32_771 dim 1 : vector<8x128xf32>, i32 -> vector<8x128xf32>
    %cst_772 = arith.constant 0.000000e+00 : f32
    %1406 = vector.shape_cast %88 : vector<1x128xi1> to vector<1x128xi1>
    %1407 = vector.broadcast %1406 : vector<1x128xi1> to vector<8x128xi1>
    %1408 = vector.broadcast %cst_772 : f32 to vector<8x128xf32>
    %1409 = arith.select %1407, %1405, %1408 : vector<8x128xi1>, vector<8x128xf32>
    %c56_773 = arith.constant 56 : index
    %c0_774 = arith.constant 0 : index
    %1410 = vector.load %arg19[%c56_773, %c0_774] : memref<344x128xf32, #tpu.memory_space<vmem>>, vector<8x128xf32>
    tpu.vector_store %arg19[%c56_773, %c0_774], %1409 {strides = array<i32>} : memref<344x128xf32, #tpu.memory_space<vmem>>, vector<8x128xf32>,
    %c11_i32_775 = arith.constant 11 : i32
    %1411 = tpu.dynamic_rotate %1362 by %c11_i32_775 dim 1 : vector<8x128xf32>, i32 -> vector<8x128xf32>
    %cst_776 = arith.constant 0.000000e+00 : f32
    %1412 = vector.shape_cast %97 : vector<1x128xi1> to vector<1x128xi1>
    %1413 = vector.broadcast %1412 : vector<1x128xi1> to vector<8x128xi1>
    %1414 = vector.broadcast %cst_776 : f32 to vector<8x128xf32>
    %1415 = arith.select %1413, %1411, %1414 : vector<8x128xi1>, vector<8x128xf32>
    %c64_777 = arith.constant 64 : index
    %c0_778 = arith.constant 0 : index
    %1416 = vector.load %arg19[%c64_777, %c0_778] : memref<344x128xf32, #tpu.memory_space<vmem>>, vector<8x128xf32>
    tpu.vector_store %arg19[%c64_777, %c0_778], %1415 {strides = array<i32>} : memref<344x128xf32, #tpu.memory_space<vmem>>, vector<8x128xf32>,
    %c10_i32_779 = arith.constant 10 : i32
    %1417 = tpu.dynamic_rotate %1362 by %c10_i32_779 dim 1 : vector<8x128xf32>, i32 -> vector<8x128xf32>
    %cst_780 = arith.constant 0.000000e+00 : f32
    %1418 = vector.shape_cast %106 : vector<1x128xi1> to vector<1x128xi1>
    %1419 = vector.broadcast %1418 : vector<1x128xi1> to vector<8x128xi1>
    %1420 = vector.broadcast %cst_780 : f32 to vector<8x128xf32>
    %1421 = arith.select %1419, %1417, %1420 : vector<8x128xi1>, vector<8x128xf32>
    %c72_781 = arith.constant 72 : index
    %c0_782 = arith.constant 0 : index
    %1422 = vector.load %arg19[%c72_781, %c0_782] : memref<344x128xf32, #tpu.memory_space<vmem>>, vector<8x128xf32>
    tpu.vector_store %arg19[%c72_781, %c0_782], %1421 {strides = array<i32>} : memref<344x128xf32, #tpu.memory_space<vmem>>, vector<8x128xf32>,
    %c9_i32_783 = arith.constant 9 : i32
    %1423 = tpu.dynamic_rotate %1362 by %c9_i32_783 dim 1 : vector<8x128xf32>, i32 -> vector<8x128xf32>
    %cst_784 = arith.constant 0.000000e+00 : f32
    %1424 = vector.shape_cast %115 : vector<1x128xi1> to vector<1x128xi1>
    %1425 = vector.broadcast %1424 : vector<1x128xi1> to vector<8x128xi1>
    %1426 = vector.broadcast %cst_784 : f32 to vector<8x128xf32>
    %1427 = arith.select %1425, %1423, %1426 : vector<8x128xi1>, vector<8x128xf32>
    %c80_785 = arith.constant 80 : index
    %c0_786 = arith.constant 0 : index
    %1428 = vector.load %arg19[%c80_785, %c0_786] : memref<344x128xf32, #tpu.memory_space<vmem>>, vector<8x128xf32>
    tpu.vector_store %arg19[%c80_785, %c0_786], %1427 {strides = array<i32>} : memref<344x128xf32, #tpu.memory_space<vmem>>, vector<8x128xf32>,
    %c8_i32_787 = arith.constant 8 : i32
    %1429 = tpu.dynamic_rotate %1362 by %c8_i32_787 dim 1 : vector<8x128xf32>, i32 -> vector<8x128xf32>
    %cst_788 = arith.constant 0.000000e+00 : f32
    %1430 = vector.shape_cast %124 : vector<1x128xi1> to vector<1x128xi1>
    %1431 = vector.broadcast %1430 : vector<1x128xi1> to vector<8x128xi1>
    %1432 = vector.broadcast %cst_788 : f32 to vector<8x128xf32>
    %1433 = arith.select %1431, %1429, %1432 : vector<8x128xi1>, vector<8x128xf32>
    %c88_789 = arith.constant 88 : index
    %c0_790 = arith.constant 0 : index
    %1434 = vector.load %arg19[%c88_789, %c0_790] : memref<344x128xf32, #tpu.memory_space<vmem>>, vector<8x128xf32>
    tpu.vector_store %arg19[%c88_789, %c0_790], %1433 {strides = array<i32>} : memref<344x128xf32, #tpu.memory_space<vmem>>, vector<8x128xf32>,
    %c7_i32_791 = arith.constant 7 : i32
    %1435 = tpu.dynamic_rotate %1362 by %c7_i32_791 dim 1 : vector<8x128xf32>, i32 -> vector<8x128xf32>
    %cst_792 = arith.constant 0.000000e+00 : f32
    %1436 = vector.shape_cast %133 : vector<1x128xi1> to vector<1x128xi1>
    %1437 = vector.broadcast %1436 : vector<1x128xi1> to vector<8x128xi1>
    %1438 = vector.broadcast %cst_792 : f32 to vector<8x128xf32>
    %1439 = arith.select %1437, %1435, %1438 : vector<8x128xi1>, vector<8x128xf32>
    %c96_793 = arith.constant 96 : index
    %c0_794 = arith.constant 0 : index
    %1440 = vector.load %arg19[%c96_793, %c0_794] : memref<344x128xf32, #tpu.memory_space<vmem>>, vector<8x128xf32>
    tpu.vector_store %arg19[%c96_793, %c0_794], %1439 {strides = array<i32>} : memref<344x128xf32, #tpu.memory_space<vmem>>, vector<8x128xf32>,
    %c6_i32_795 = arith.constant 6 : i32
    %1441 = tpu.dynamic_rotate %1362 by %c6_i32_795 dim 1 : vector<8x128xf32>, i32 -> vector<8x128xf32>
    %cst_796 = arith.constant 0.000000e+00 : f32
    %1442 = vector.shape_cast %142 : vector<1x128xi1> to vector<1x128xi1>
    %1443 = vector.broadcast %1442 : vector<1x128xi1> to vector<8x128xi1>
    %1444 = vector.broadcast %cst_796 : f32 to vector<8x128xf32>
    %1445 = arith.select %1443, %1441, %1444 : vector<8x128xi1>, vector<8x128xf32>
    %c104_797 = arith.constant 104 : index
    %c0_798 = arith.constant 0 : index
    %1446 = vector.load %arg19[%c104_797, %c0_798] : memref<344x128xf32, #tpu.memory_space<vmem>>, vector<8x128xf32>
    tpu.vector_store %arg19[%c104_797, %c0_798], %1445 {strides = array<i32>} : memref<344x128xf32, #tpu.memory_space<vmem>>, vector<8x128xf32>,
    %c5_i32_799 = arith.constant 5 : i32
    %1447 = tpu.dynamic_rotate %1362 by %c5_i32_799 dim 1 : vector<8x128xf32>, i32 -> vector<8x128xf32>
    %cst_800 = arith.constant 0.000000e+00 : f32
    %1448 = vector.shape_cast %151 : vector<1x128xi1> to vector<1x128xi1>
    %1449 = vector.broadcast %1448 : vector<1x128xi1> to vector<8x128xi1>
    %1450 = vector.broadcast %cst_800 : f32 to vector<8x128xf32>
    %1451 = arith.select %1449, %1447, %1450 : vector<8x128xi1>, vector<8x128xf32>
    %c112_801 = arith.constant 112 : index
    %c0_802 = arith.constant 0 : index
    %1452 = vector.load %arg19[%c112_801, %c0_802] : memref<344x128xf32, #tpu.memory_space<vmem>>, vector<8x128xf32>
    tpu.vector_store %arg19[%c112_801, %c0_802], %1451 {strides = array<i32>} : memref<344x128xf32, #tpu.memory_space<vmem>>, vector<8x128xf32>,
    %c4_i32_803 = arith.constant 4 : i32
    %1453 = tpu.dynamic_rotate %1362 by %c4_i32_803 dim 1 : vector<8x128xf32>, i32 -> vector<8x128xf32>
    %cst_804 = arith.constant 0.000000e+00 : f32
    %1454 = vector.shape_cast %160 : vector<1x128xi1> to vector<1x128xi1>
    %1455 = vector.broadcast %1454 : vector<1x128xi1> to vector<8x128xi1>
    %1456 = vector.broadcast %cst_804 : f32 to vector<8x128xf32>
    %1457 = arith.select %1455, %1453, %1456 : vector<8x128xi1>, vector<8x128xf32>
    %c120_805 = arith.constant 120 : index
    %c0_806 = arith.constant 0 : index
    %1458 = vector.load %arg19[%c120_805, %c0_806] : memref<344x128xf32, #tpu.memory_space<vmem>>, vector<8x128xf32>
    tpu.vector_store %arg19[%c120_805, %c0_806], %1457 {strides = array<i32>} : memref<344x128xf32, #tpu.memory_space<vmem>>, vector<8x128xf32>,
    %c3_i32_807 = arith.constant 3 : i32
    %1459 = tpu.dynamic_rotate %1362 by %c3_i32_807 dim 1 : vector<8x128xf32>, i32 -> vector<8x128xf32>
    %cst_808 = arith.constant 0.000000e+00 : f32
    %1460 = vector.shape_cast %169 : vector<1x128xi1> to vector<1x128xi1>
    %1461 = vector.broadcast %1460 : vector<1x128xi1> to vector<8x128xi1>
    %1462 = vector.broadcast %cst_808 : f32 to vector<8x128xf32>
    %1463 = arith.select %1461, %1459, %1462 : vector<8x128xi1>, vector<8x128xf32>
    %c128_809 = arith.constant 128 : index
    %c0_810 = arith.constant 0 : index
    %1464 = vector.load %arg19[%c128_809, %c0_810] : memref<344x128xf32, #tpu.memory_space<vmem>>, vector<8x128xf32>
    tpu.vector_store %arg19[%c128_809, %c0_810], %1463 {strides = array<i32>} : memref<344x128xf32, #tpu.memory_space<vmem>>, vector<8x128xf32>,
    %c2_i32_811 = arith.constant 2 : i32
    %1465 = tpu.dynamic_rotate %1362 by %c2_i32_811 dim 1 : vector<8x128xf32>, i32 -> vector<8x128xf32>
    %cst_812 = arith.constant 0.000000e+00 : f32
    %1466 = vector.shape_cast %178 : vector<1x128xi1> to vector<1x128xi1>
    %1467 = vector.broadcast %1466 : vector<1x128xi1> to vector<8x128xi1>
    %1468 = vector.broadcast %cst_812 : f32 to vector<8x128xf32>
    %1469 = arith.select %1467, %1465, %1468 : vector<8x128xi1>, vector<8x128xf32>
    %c136_813 = arith.constant 136 : index
    %c0_814 = arith.constant 0 : index
    %1470 = vector.load %arg19[%c136_813, %c0_814] : memref<344x128xf32, #tpu.memory_space<vmem>>, vector<8x128xf32>
    tpu.vector_store %arg19[%c136_813, %c0_814], %1469 {strides = array<i32>} : memref<344x128xf32, #tpu.memory_space<vmem>>, vector<8x128xf32>,
    %c1_i32_815 = arith.constant 1 : i32
    %1471 = tpu.dynamic_rotate %1362 by %c1_i32_815 dim 1 : vector<8x128xf32>, i32 -> vector<8x128xf32>
    %cst_816 = arith.constant 0.000000e+00 : f32
    %1472 = vector.shape_cast %187 : vector<1x128xi1> to vector<1x128xi1>
    %1473 = vector.broadcast %1472 : vector<1x128xi1> to vector<8x128xi1>
    %1474 = vector.broadcast %cst_816 : f32 to vector<8x128xf32>
    %1475 = arith.select %1473, %1471, %1474 : vector<8x128xi1>, vector<8x128xf32>
    %c144_817 = arith.constant 144 : index
    %c0_818 = arith.constant 0 : index
    %1476 = vector.load %arg19[%c144_817, %c0_818] : memref<344x128xf32, #tpu.memory_space<vmem>>, vector<8x128xf32>
    tpu.vector_store %arg19[%c144_817, %c0_818], %1475 {strides = array<i32>} : memref<344x128xf32, #tpu.memory_space<vmem>>, vector<8x128xf32>,
    %c152_819 = arith.constant 152 : index
    %c0_820 = arith.constant 0 : index
    %1477 = vector.load %arg19[%c152_819, %c0_820] : memref<344x128xf32, #tpu.memory_space<vmem>>, vector<8x128xf32>
    tpu.vector_store %arg19[%c152_819, %c0_820], %1362 {strides = array<i32>} : memref<344x128xf32, #tpu.memory_space<vmem>>, vector<8x128xf32>,
    %c127_i32_821 = arith.constant 127 : i32
    %1478 = tpu.dynamic_rotate %1362 by %c127_i32_821 dim 1 : vector<8x128xf32>, i32 -> vector<8x128xf32>
    %cst_822 = arith.constant 0.000000e+00 : f32
    %1479 = vector.shape_cast %196 : vector<1x128xi1> to vector<1x128xi1>
    %1480 = vector.broadcast %1479 : vector<1x128xi1> to vector<8x128xi1>
    %1481 = vector.broadcast %cst_822 : f32 to vector<8x128xf32>
    %1482 = arith.select %1480, %1478, %1481 : vector<8x128xi1>, vector<8x128xf32>
    %c160_823 = arith.constant 160 : index
    %c0_824 = arith.constant 0 : index
    %1483 = vector.load %arg19[%c160_823, %c0_824] : memref<344x128xf32, #tpu.memory_space<vmem>>, vector<8x128xf32>
    tpu.vector_store %arg19[%c160_823, %c0_824], %1482 {strides = array<i32>} : memref<344x128xf32, #tpu.memory_space<vmem>>, vector<8x128xf32>,
    %c126_i32_825 = arith.constant 126 : i32
    %1484 = tpu.dynamic_rotate %1362 by %c126_i32_825 dim 1 : vector<8x128xf32>, i32 -> vector<8x128xf32>
    %cst_826 = arith.constant 0.000000e+00 : f32
    %1485 = vector.shape_cast %205 : vector<1x128xi1> to vector<1x128xi1>
    %1486 = vector.broadcast %1485 : vector<1x128xi1> to vector<8x128xi1>
    %1487 = vector.broadcast %cst_826 : f32 to vector<8x128xf32>
    %1488 = arith.select %1486, %1484, %1487 : vector<8x128xi1>, vector<8x128xf32>
    %c168_827 = arith.constant 168 : index
    %c0_828 = arith.constant 0 : index
    %1489 = vector.load %arg19[%c168_827, %c0_828] : memref<344x128xf32, #tpu.memory_space<vmem>>, vector<8x128xf32>
    tpu.vector_store %arg19[%c168_827, %c0_828], %1488 {strides = array<i32>} : memref<344x128xf32, #tpu.memory_space<vmem>>, vector<8x128xf32>,
    %c125_i32_829 = arith.constant 125 : i32
    %1490 = tpu.dynamic_rotate %1362 by %c125_i32_829 dim 1 : vector<8x128xf32>, i32 -> vector<8x128xf32>
    %cst_830 = arith.constant 0.000000e+00 : f32
    %1491 = vector.shape_cast %214 : vector<1x128xi1> to vector<1x128xi1>
    %1492 = vector.broadcast %1491 : vector<1x128xi1> to vector<8x128xi1>
    %1493 = vector.broadcast %cst_830 : f32 to vector<8x128xf32>
    %1494 = arith.select %1492, %1490, %1493 : vector<8x128xi1>, vector<8x128xf32>
    %c176_831 = arith.constant 176 : index
    %c0_832 = arith.constant 0 : index
    %1495 = vector.load %arg19[%c176_831, %c0_832] : memref<344x128xf32, #tpu.memory_space<vmem>>, vector<8x128xf32>
    tpu.vector_store %arg19[%c176_831, %c0_832], %1494 {strides = array<i32>} : memref<344x128xf32, #tpu.memory_space<vmem>>, vector<8x128xf32>,
    %c124_i32_833 = arith.constant 124 : i32
    %1496 = tpu.dynamic_rotate %1362 by %c124_i32_833 dim 1 : vector<8x128xf32>, i32 -> vector<8x128xf32>
    %cst_834 = arith.constant 0.000000e+00 : f32
    %1497 = vector.shape_cast %223 : vector<1x128xi1> to vector<1x128xi1>
    %1498 = vector.broadcast %1497 : vector<1x128xi1> to vector<8x128xi1>
    %1499 = vector.broadcast %cst_834 : f32 to vector<8x128xf32>
    %1500 = arith.select %1498, %1496, %1499 : vector<8x128xi1>, vector<8x128xf32>
    %c184_835 = arith.constant 184 : index
    %c0_836 = arith.constant 0 : index
    %1501 = vector.load %arg19[%c184_835, %c0_836] : memref<344x128xf32, #tpu.memory_space<vmem>>, vector<8x128xf32>
    tpu.vector_store %arg19[%c184_835, %c0_836], %1500 {strides = array<i32>} : memref<344x128xf32, #tpu.memory_space<vmem>>, vector<8x128xf32>,
    %c123_i32_837 = arith.constant 123 : i32
    %1502 = tpu.dynamic_rotate %1362 by %c123_i32_837 dim 1 : vector<8x128xf32>, i32 -> vector<8x128xf32>
    %cst_838 = arith.constant 0.000000e+00 : f32
    %1503 = vector.shape_cast %232 : vector<1x128xi1> to vector<1x128xi1>
    %1504 = vector.broadcast %1503 : vector<1x128xi1> to vector<8x128xi1>
    %1505 = vector.broadcast %cst_838 : f32 to vector<8x128xf32>
    %1506 = arith.select %1504, %1502, %1505 : vector<8x128xi1>, vector<8x128xf32>
    %c192_839 = arith.constant 192 : index
    %c0_840 = arith.constant 0 : index
    %1507 = vector.load %arg19[%c192_839, %c0_840] : memref<344x128xf32, #tpu.memory_space<vmem>>, vector<8x128xf32>
    tpu.vector_store %arg19[%c192_839, %c0_840], %1506 {strides = array<i32>} : memref<344x128xf32, #tpu.memory_space<vmem>>, vector<8x128xf32>,
    %c122_i32_841 = arith.constant 122 : i32
    %1508 = tpu.dynamic_rotate %1362 by %c122_i32_841 dim 1 : vector<8x128xf32>, i32 -> vector<8x128xf32>
    %cst_842 = arith.constant 0.000000e+00 : f32
    %1509 = vector.shape_cast %241 : vector<1x128xi1> to vector<1x128xi1>
    %1510 = vector.broadcast %1509 : vector<1x128xi1> to vector<8x128xi1>
    %1511 = vector.broadcast %cst_842 : f32 to vector<8x128xf32>
    %1512 = arith.select %1510, %1508, %1511 : vector<8x128xi1>, vector<8x128xf32>
    %c200_843 = arith.constant 200 : index
    %c0_844 = arith.constant 0 : index
    %1513 = vector.load %arg19[%c200_843, %c0_844] : memref<344x128xf32, #tpu.memory_space<vmem>>, vector<8x128xf32>
    tpu.vector_store %arg19[%c200_843, %c0_844], %1512 {strides = array<i32>} : memref<344x128xf32, #tpu.memory_space<vmem>>, vector<8x128xf32>,
    %c121_i32_845 = arith.constant 121 : i32
    %1514 = tpu.dynamic_rotate %1362 by %c121_i32_845 dim 1 : vector<8x128xf32>, i32 -> vector<8x128xf32>
    %cst_846 = arith.constant 0.000000e+00 : f32
    %1515 = vector.shape_cast %250 : vector<1x128xi1> to vector<1x128xi1>
    %1516 = vector.broadcast %1515 : vector<1x128xi1> to vector<8x128xi1>
    %1517 = vector.broadcast %cst_846 : f32 to vector<8x128xf32>
    %1518 = arith.select %1516, %1514, %1517 : vector<8x128xi1>, vector<8x128xf32>
    %c208_847 = arith.constant 208 : index
    %c0_848 = arith.constant 0 : index
    %1519 = vector.load %arg19[%c208_847, %c0_848] : memref<344x128xf32, #tpu.memory_space<vmem>>, vector<8x128xf32>
    tpu.vector_store %arg19[%c208_847, %c0_848], %1518 {strides = array<i32>} : memref<344x128xf32, #tpu.memory_space<vmem>>, vector<8x128xf32>,
    %c120_i32_849 = arith.constant 120 : i32
    %1520 = tpu.dynamic_rotate %1362 by %c120_i32_849 dim 1 : vector<8x128xf32>, i32 -> vector<8x128xf32>
    %cst_850 = arith.constant 0.000000e+00 : f32
    %1521 = vector.shape_cast %259 : vector<1x128xi1> to vector<1x128xi1>
    %1522 = vector.broadcast %1521 : vector<1x128xi1> to vector<8x128xi1>
    %1523 = vector.broadcast %cst_850 : f32 to vector<8x128xf32>
    %1524 = arith.select %1522, %1520, %1523 : vector<8x128xi1>, vector<8x128xf32>
    %c216_851 = arith.constant 216 : index
    %c0_852 = arith.constant 0 : index
    %1525 = vector.load %arg19[%c216_851, %c0_852] : memref<344x128xf32, #tpu.memory_space<vmem>>, vector<8x128xf32>
    tpu.vector_store %arg19[%c216_851, %c0_852], %1524 {strides = array<i32>} : memref<344x128xf32, #tpu.memory_space<vmem>>, vector<8x128xf32>,
    %c119_i32_853 = arith.constant 119 : i32
    %1526 = tpu.dynamic_rotate %1362 by %c119_i32_853 dim 1 : vector<8x128xf32>, i32 -> vector<8x128xf32>
    %cst_854 = arith.constant 0.000000e+00 : f32
    %1527 = vector.shape_cast %268 : vector<1x128xi1> to vector<1x128xi1>
    %1528 = vector.broadcast %1527 : vector<1x128xi1> to vector<8x128xi1>
    %1529 = vector.broadcast %cst_854 : f32 to vector<8x128xf32>
    %1530 = arith.select %1528, %1526, %1529 : vector<8x128xi1>, vector<8x128xf32>
    %c224_855 = arith.constant 224 : index
    %c0_856 = arith.constant 0 : index
    %1531 = vector.load %arg19[%c224_855, %c0_856] : memref<344x128xf32, #tpu.memory_space<vmem>>, vector<8x128xf32>
    tpu.vector_store %arg19[%c224_855, %c0_856], %1530 {strides = array<i32>} : memref<344x128xf32, #tpu.memory_space<vmem>>, vector<8x128xf32>,
    %c118_i32_857 = arith.constant 118 : i32
    %1532 = tpu.dynamic_rotate %1362 by %c118_i32_857 dim 1 : vector<8x128xf32>, i32 -> vector<8x128xf32>
    %cst_858 = arith.constant 0.000000e+00 : f32
    %1533 = vector.shape_cast %277 : vector<1x128xi1> to vector<1x128xi1>
    %1534 = vector.broadcast %1533 : vector<1x128xi1> to vector<8x128xi1>
    %1535 = vector.broadcast %cst_858 : f32 to vector<8x128xf32>
    %1536 = arith.select %1534, %1532, %1535 : vector<8x128xi1>, vector<8x128xf32>
    %c232_859 = arith.constant 232 : index
    %c0_860 = arith.constant 0 : index
    %1537 = vector.load %arg19[%c232_859, %c0_860] : memref<344x128xf32, #tpu.memory_space<vmem>>, vector<8x128xf32>
    tpu.vector_store %arg19[%c232_859, %c0_860], %1536 {strides = array<i32>} : memref<344x128xf32, #tpu.memory_space<vmem>>, vector<8x128xf32>,
    %c117_i32_861 = arith.constant 117 : i32
    %1538 = tpu.dynamic_rotate %1362 by %c117_i32_861 dim 1 : vector<8x128xf32>, i32 -> vector<8x128xf32>
    %cst_862 = arith.constant 0.000000e+00 : f32
    %1539 = vector.shape_cast %286 : vector<1x128xi1> to vector<1x128xi1>
    %1540 = vector.broadcast %1539 : vector<1x128xi1> to vector<8x128xi1>
    %1541 = vector.broadcast %cst_862 : f32 to vector<8x128xf32>
    %1542 = arith.select %1540, %1538, %1541 : vector<8x128xi1>, vector<8x128xf32>
    %c240_863 = arith.constant 240 : index
    %c0_864 = arith.constant 0 : index
    %1543 = vector.load %arg19[%c240_863, %c0_864] : memref<344x128xf32, #tpu.memory_space<vmem>>, vector<8x128xf32>
    tpu.vector_store %arg19[%c240_863, %c0_864], %1542 {strides = array<i32>} : memref<344x128xf32, #tpu.memory_space<vmem>>, vector<8x128xf32>,
    %c116_i32_865 = arith.constant 116 : i32
    %1544 = tpu.dynamic_rotate %1362 by %c116_i32_865 dim 1 : vector<8x128xf32>, i32 -> vector<8x128xf32>
    %cst_866 = arith.constant 0.000000e+00 : f32
    %1545 = vector.shape_cast %295 : vector<1x128xi1> to vector<1x128xi1>
    %1546 = vector.broadcast %1545 : vector<1x128xi1> to vector<8x128xi1>
    %1547 = vector.broadcast %cst_866 : f32 to vector<8x128xf32>
    %1548 = arith.select %1546, %1544, %1547 : vector<8x128xi1>, vector<8x128xf32>
    %c248_867 = arith.constant 248 : index
    %c0_868 = arith.constant 0 : index
    %1549 = vector.load %arg19[%c248_867, %c0_868] : memref<344x128xf32, #tpu.memory_space<vmem>>, vector<8x128xf32>
    tpu.vector_store %arg19[%c248_867, %c0_868], %1548 {strides = array<i32>} : memref<344x128xf32, #tpu.memory_space<vmem>>, vector<8x128xf32>,
    %c115_i32_869 = arith.constant 115 : i32
    %1550 = tpu.dynamic_rotate %1362 by %c115_i32_869 dim 1 : vector<8x128xf32>, i32 -> vector<8x128xf32>
    %cst_870 = arith.constant 0.000000e+00 : f32
    %1551 = vector.shape_cast %304 : vector<1x128xi1> to vector<1x128xi1>
    %1552 = vector.broadcast %1551 : vector<1x128xi1> to vector<8x128xi1>
    %1553 = vector.broadcast %cst_870 : f32 to vector<8x128xf32>
    %1554 = arith.select %1552, %1550, %1553 : vector<8x128xi1>, vector<8x128xf32>
    %c256_871 = arith.constant 256 : index
    %c0_872 = arith.constant 0 : index
    %1555 = vector.load %arg19[%c256_871, %c0_872] : memref<344x128xf32, #tpu.memory_space<vmem>>, vector<8x128xf32>
    tpu.vector_store %arg19[%c256_871, %c0_872], %1554 {strides = array<i32>} : memref<344x128xf32, #tpu.memory_space<vmem>>, vector<8x128xf32>,
    %c114_i32_873 = arith.constant 114 : i32
    %1556 = tpu.dynamic_rotate %1362 by %c114_i32_873 dim 1 : vector<8x128xf32>, i32 -> vector<8x128xf32>
    %cst_874 = arith.constant 0.000000e+00 : f32
    %1557 = vector.shape_cast %313 : vector<1x128xi1> to vector<1x128xi1>
    %1558 = vector.broadcast %1557 : vector<1x128xi1> to vector<8x128xi1>
    %1559 = vector.broadcast %cst_874 : f32 to vector<8x128xf32>
    %1560 = arith.select %1558, %1556, %1559 : vector<8x128xi1>, vector<8x128xf32>
    %c264_875 = arith.constant 264 : index
    %c0_876 = arith.constant 0 : index
    %1561 = vector.load %arg19[%c264_875, %c0_876] : memref<344x128xf32, #tpu.memory_space<vmem>>, vector<8x128xf32>
    tpu.vector_store %arg19[%c264_875, %c0_876], %1560 {strides = array<i32>} : memref<344x128xf32, #tpu.memory_space<vmem>>, vector<8x128xf32>,
    %c113_i32_877 = arith.constant 113 : i32
    %1562 = tpu.dynamic_rotate %1362 by %c113_i32_877 dim 1 : vector<8x128xf32>, i32 -> vector<8x128xf32>
    %cst_878 = arith.constant 0.000000e+00 : f32
    %1563 = vector.shape_cast %322 : vector<1x128xi1> to vector<1x128xi1>
    %1564 = vector.broadcast %1563 : vector<1x128xi1> to vector<8x128xi1>
    %1565 = vector.broadcast %cst_878 : f32 to vector<8x128xf32>
    %1566 = arith.select %1564, %1562, %1565 : vector<8x128xi1>, vector<8x128xf32>
    %c272_879 = arith.constant 272 : index
    %c0_880 = arith.constant 0 : index
    %1567 = vector.load %arg19[%c272_879, %c0_880] : memref<344x128xf32, #tpu.memory_space<vmem>>, vector<8x128xf32>
    tpu.vector_store %arg19[%c272_879, %c0_880], %1566 {strides = array<i32>} : memref<344x128xf32, #tpu.memory_space<vmem>>, vector<8x128xf32>,
    %c112_i32_881 = arith.constant 112 : i32
    %1568 = tpu.dynamic_rotate %1362 by %c112_i32_881 dim 1 : vector<8x128xf32>, i32 -> vector<8x128xf32>
    %cst_882 = arith.constant 0.000000e+00 : f32
    %1569 = vector.shape_cast %331 : vector<1x128xi1> to vector<1x128xi1>
    %1570 = vector.broadcast %1569 : vector<1x128xi1> to vector<8x128xi1>
    %1571 = vector.broadcast %cst_882 : f32 to vector<8x128xf32>
    %1572 = arith.select %1570, %1568, %1571 : vector<8x128xi1>, vector<8x128xf32>
    %c280_883 = arith.constant 280 : index
    %c0_884 = arith.constant 0 : index
    %1573 = vector.load %arg19[%c280_883, %c0_884] : memref<344x128xf32, #tpu.memory_space<vmem>>, vector<8x128xf32>
    tpu.vector_store %arg19[%c280_883, %c0_884], %1572 {strides = array<i32>} : memref<344x128xf32, #tpu.memory_space<vmem>>, vector<8x128xf32>,
    %c111_i32_885 = arith.constant 111 : i32
    %1574 = tpu.dynamic_rotate %1362 by %c111_i32_885 dim 1 : vector<8x128xf32>, i32 -> vector<8x128xf32>
    %cst_886 = arith.constant 0.000000e+00 : f32
    %1575 = vector.shape_cast %340 : vector<1x128xi1> to vector<1x128xi1>
    %1576 = vector.broadcast %1575 : vector<1x128xi1> to vector<8x128xi1>
    %1577 = vector.broadcast %cst_886 : f32 to vector<8x128xf32>
    %1578 = arith.select %1576, %1574, %1577 : vector<8x128xi1>, vector<8x128xf32>
    %c288_887 = arith.constant 288 : index
    %c0_888 = arith.constant 0 : index
    %1579 = vector.load %arg19[%c288_887, %c0_888] : memref<344x128xf32, #tpu.memory_space<vmem>>, vector<8x128xf32>
    tpu.vector_store %arg19[%c288_887, %c0_888], %1578 {strides = array<i32>} : memref<344x128xf32, #tpu.memory_space<vmem>>, vector<8x128xf32>,
    %c110_i32_889 = arith.constant 110 : i32
    %1580 = tpu.dynamic_rotate %1362 by %c110_i32_889 dim 1 : vector<8x128xf32>, i32 -> vector<8x128xf32>
    %cst_890 = arith.constant 0.000000e+00 : f32
    %1581 = vector.shape_cast %349 : vector<1x128xi1> to vector<1x128xi1>
    %1582 = vector.broadcast %1581 : vector<1x128xi1> to vector<8x128xi1>
    %1583 = vector.broadcast %cst_890 : f32 to vector<8x128xf32>
    %1584 = arith.select %1582, %1580, %1583 : vector<8x128xi1>, vector<8x128xf32>
    %c296_891 = arith.constant 296 : index
    %c0_892 = arith.constant 0 : index
    %1585 = vector.load %arg19[%c296_891, %c0_892] : memref<344x128xf32, #tpu.memory_space<vmem>>, vector<8x128xf32>
    tpu.vector_store %arg19[%c296_891, %c0_892], %1584 {strides = array<i32>} : memref<344x128xf32, #tpu.memory_space<vmem>>, vector<8x128xf32>,
    %c109_i32_893 = arith.constant 109 : i32
    %1586 = tpu.dynamic_rotate %1362 by %c109_i32_893 dim 1 : vector<8x128xf32>, i32 -> vector<8x128xf32>
    %cst_894 = arith.constant 0.000000e+00 : f32
    %1587 = vector.shape_cast %358 : vector<1x128xi1> to vector<1x128xi1>
    %1588 = vector.broadcast %1587 : vector<1x128xi1> to vector<8x128xi1>
    %1589 = vector.broadcast %cst_894 : f32 to vector<8x128xf32>
    %1590 = arith.select %1588, %1586, %1589 : vector<8x128xi1>, vector<8x128xf32>
    %c304_895 = arith.constant 304 : index
    %c0_896 = arith.constant 0 : index
    %1591 = vector.load %arg19[%c304_895, %c0_896] : memref<344x128xf32, #tpu.memory_space<vmem>>, vector<8x128xf32>
    tpu.vector_store %arg19[%c304_895, %c0_896], %1590 {strides = array<i32>} : memref<344x128xf32, #tpu.memory_space<vmem>>, vector<8x128xf32>,
    %c127_i32_897 = arith.constant 127 : i32
    %1592 = tpu.dynamic_rotate %1360 by %c127_i32_897 dim 1 : vector<32x128xf32>, i32 -> vector<32x128xf32>
    %cst_898 = arith.constant 0xFF800000 : f32
    %1593 = vector.shape_cast %196 : vector<1x128xi1> to vector<1x128xi1>
    %1594 = vector.broadcast %1593 : vector<1x128xi1> to vector<32x128xi1>
    %1595 = vector.broadcast %cst_898 : f32 to vector<32x128xf32>
    %1596 = arith.select %1594, %1592, %1595 : vector<32x128xi1>, vector<32x128xf32>
    %c1_i32_899 = arith.constant 1 : i32
    %1597 = tpu.dynamic_rotate %1360 by %c1_i32_899 dim 1 : vector<32x128xf32>, i32 -> vector<32x128xf32>
    %cst_900 = arith.constant 0xFF800000 : f32
    %1598 = vector.shape_cast %187 : vector<1x128xi1> to vector<1x128xi1>
    %1599 = vector.broadcast %1598 : vector<1x128xi1> to vector<32x128xi1>
    %1600 = vector.broadcast %cst_900 : f32 to vector<32x128xf32>
    %1601 = arith.select %1599, %1597, %1600 : vector<32x128xi1>, vector<32x128xf32>
    %1602 = arith.maximumf %1596, %1601 : vector<32x128xf32>
    %1603 = arith.maximumf %1360, %1602 : vector<32x128xf32>
    %c312_901 = arith.constant 312 : index
    %c0_902 = arith.constant 0 : index
    %1604 = vector.load %arg19[%c312_901, %c0_902] : memref<344x128xf32, #tpu.memory_space<vmem>>, vector<32x128xf32>
    tpu.vector_store %arg19[%c312_901, %c0_902], %1603 {strides = array<i32>} : memref<344x128xf32, #tpu.memory_space<vmem>>, vector<32x128xf32>,
    %c0_903 = arith.constant 0 : index
    %c0_904 = arith.constant 0 : index
    %1605 = vector.load %arg10[%c0_903, %c0_904] : memref<32x344xf32, #tpu.memory_space<vmem>>, vector<32x344xf32>
    %c0_905 = arith.constant 0 : index
    %c0_906 = arith.constant 0 : index
    %1606 = vector.load %arg19[%c0_905, %c0_906] : memref<344x128xf32, #tpu.memory_space<vmem>>, vector<344x128xf32>
    %cst_907 = arith.constant dense<0.000000e+00> : vector<32x128xf32>
    %1607 = tpu.matmul %1605, %1606, %cst_907 {dimension_numbers = #tpu.dot_dimension_numbers<[1], [0], [0], [1], [0, 0, 1, 1], [], []>} : vector<32x344xf32>, vector<344x128xf32>, vector<32x128xf32> -> vector<32x128xf32>
    %cst_908 = arith.constant 0.000000e+00 : f32
    %1608 = vector.broadcast %cst_908 : f32 to vector<32x128xf32>
    %1609 = arith.maximumf %1607, %1608 : vector<32x128xf32>
    %c0_909 = arith.constant 0 : index
    %c0_910 = arith.constant 0 : index
    %1610 = vector.load %arg11[%c0_909, %c0_910] : memref<8x32xf32, #tpu.memory_space<vmem>>, vector<8x32xf32>
    %cst_911 = arith.constant dense<0.000000e+00> : vector<8x128xf32>
    %1611 = tpu.matmul %1610, %1609, %cst_911 {dimension_numbers = #tpu.dot_dimension_numbers<[1], [0], [0], [1], [0, 0, 1, 1], [], []>} : vector<8x32xf32>, vector<32x128xf32>, vector<8x128xf32> -> vector<8x128xf32>
    %c19_i32_912 = arith.constant 19 : i32
    %1612 = tpu.dynamic_rotate %1611 by %c19_i32_912 dim 1 : vector<8x128xf32>, i32 -> vector<8x128xf32>
    %cst_913 = arith.constant 0.000000e+00 : f32
    %1613 = vector.shape_cast %25 : vector<1x128xi1> to vector<1x128xi1>
    %1614 = vector.broadcast %1613 : vector<1x128xi1> to vector<8x128xi1>
    %1615 = vector.broadcast %cst_913 : f32 to vector<8x128xf32>
    %1616 = arith.select %1614, %1612, %1615 : vector<8x128xi1>, vector<8x128xf32>
    %c0_914 = arith.constant 0 : index
    %c0_915 = arith.constant 0 : index
    %1617 = vector.load %arg19[%c0_914, %c0_915] : memref<344x128xf32, #tpu.memory_space<vmem>>, vector<8x128xf32>
    tpu.vector_store %arg19[%c0_914, %c0_915], %1616 {strides = array<i32>} : memref<344x128xf32, #tpu.memory_space<vmem>>, vector<8x128xf32>,
    %c18_i32_916 = arith.constant 18 : i32
    %1618 = tpu.dynamic_rotate %1611 by %c18_i32_916 dim 1 : vector<8x128xf32>, i32 -> vector<8x128xf32>
    %cst_917 = arith.constant 0.000000e+00 : f32
    %1619 = vector.shape_cast %34 : vector<1x128xi1> to vector<1x128xi1>
    %1620 = vector.broadcast %1619 : vector<1x128xi1> to vector<8x128xi1>
    %1621 = vector.broadcast %cst_917 : f32 to vector<8x128xf32>
    %1622 = arith.select %1620, %1618, %1621 : vector<8x128xi1>, vector<8x128xf32>
    %c8_918 = arith.constant 8 : index
    %c0_919 = arith.constant 0 : index
    %1623 = vector.load %arg19[%c8_918, %c0_919] : memref<344x128xf32, #tpu.memory_space<vmem>>, vector<8x128xf32>
    tpu.vector_store %arg19[%c8_918, %c0_919], %1622 {strides = array<i32>} : memref<344x128xf32, #tpu.memory_space<vmem>>, vector<8x128xf32>,
    %c17_i32_920 = arith.constant 17 : i32
    %1624 = tpu.dynamic_rotate %1611 by %c17_i32_920 dim 1 : vector<8x128xf32>, i32 -> vector<8x128xf32>
    %cst_921 = arith.constant 0.000000e+00 : f32
    %1625 = vector.shape_cast %43 : vector<1x128xi1> to vector<1x128xi1>
    %1626 = vector.broadcast %1625 : vector<1x128xi1> to vector<8x128xi1>
    %1627 = vector.broadcast %cst_921 : f32 to vector<8x128xf32>
    %1628 = arith.select %1626, %1624, %1627 : vector<8x128xi1>, vector<8x128xf32>
    %c16_922 = arith.constant 16 : index
    %c0_923 = arith.constant 0 : index
    %1629 = vector.load %arg19[%c16_922, %c0_923] : memref<344x128xf32, #tpu.memory_space<vmem>>, vector<8x128xf32>
    tpu.vector_store %arg19[%c16_922, %c0_923], %1628 {strides = array<i32>} : memref<344x128xf32, #tpu.memory_space<vmem>>, vector<8x128xf32>,
    %c16_i32_924 = arith.constant 16 : i32
    %1630 = tpu.dynamic_rotate %1611 by %c16_i32_924 dim 1 : vector<8x128xf32>, i32 -> vector<8x128xf32>
    %cst_925 = arith.constant 0.000000e+00 : f32
    %1631 = vector.shape_cast %52 : vector<1x128xi1> to vector<1x128xi1>
    %1632 = vector.broadcast %1631 : vector<1x128xi1> to vector<8x128xi1>
    %1633 = vector.broadcast %cst_925 : f32 to vector<8x128xf32>
    %1634 = arith.select %1632, %1630, %1633 : vector<8x128xi1>, vector<8x128xf32>
    %c24_926 = arith.constant 24 : index
    %c0_927 = arith.constant 0 : index
    %1635 = vector.load %arg19[%c24_926, %c0_927] : memref<344x128xf32, #tpu.memory_space<vmem>>, vector<8x128xf32>
    tpu.vector_store %arg19[%c24_926, %c0_927], %1634 {strides = array<i32>} : memref<344x128xf32, #tpu.memory_space<vmem>>, vector<8x128xf32>,
    %c15_i32_928 = arith.constant 15 : i32
    %1636 = tpu.dynamic_rotate %1611 by %c15_i32_928 dim 1 : vector<8x128xf32>, i32 -> vector<8x128xf32>
    %cst_929 = arith.constant 0.000000e+00 : f32
    %1637 = vector.shape_cast %61 : vector<1x128xi1> to vector<1x128xi1>
    %1638 = vector.broadcast %1637 : vector<1x128xi1> to vector<8x128xi1>
    %1639 = vector.broadcast %cst_929 : f32 to vector<8x128xf32>
    %1640 = arith.select %1638, %1636, %1639 : vector<8x128xi1>, vector<8x128xf32>
    %c32_930 = arith.constant 32 : index
    %c0_931 = arith.constant 0 : index
    %1641 = vector.load %arg19[%c32_930, %c0_931] : memref<344x128xf32, #tpu.memory_space<vmem>>, vector<8x128xf32>
    tpu.vector_store %arg19[%c32_930, %c0_931], %1640 {strides = array<i32>} : memref<344x128xf32, #tpu.memory_space<vmem>>, vector<8x128xf32>,
    %c14_i32_932 = arith.constant 14 : i32
    %1642 = tpu.dynamic_rotate %1611 by %c14_i32_932 dim 1 : vector<8x128xf32>, i32 -> vector<8x128xf32>
    %cst_933 = arith.constant 0.000000e+00 : f32
    %1643 = vector.shape_cast %70 : vector<1x128xi1> to vector<1x128xi1>
    %1644 = vector.broadcast %1643 : vector<1x128xi1> to vector<8x128xi1>
    %1645 = vector.broadcast %cst_933 : f32 to vector<8x128xf32>
    %1646 = arith.select %1644, %1642, %1645 : vector<8x128xi1>, vector<8x128xf32>
    %c40_934 = arith.constant 40 : index
    %c0_935 = arith.constant 0 : index
    %1647 = vector.load %arg19[%c40_934, %c0_935] : memref<344x128xf32, #tpu.memory_space<vmem>>, vector<8x128xf32>
    tpu.vector_store %arg19[%c40_934, %c0_935], %1646 {strides = array<i32>} : memref<344x128xf32, #tpu.memory_space<vmem>>, vector<8x128xf32>,
    %c13_i32_936 = arith.constant 13 : i32
    %1648 = tpu.dynamic_rotate %1611 by %c13_i32_936 dim 1 : vector<8x128xf32>, i32 -> vector<8x128xf32>
    %cst_937 = arith.constant 0.000000e+00 : f32
    %1649 = vector.shape_cast %79 : vector<1x128xi1> to vector<1x128xi1>
    %1650 = vector.broadcast %1649 : vector<1x128xi1> to vector<8x128xi1>
    %1651 = vector.broadcast %cst_937 : f32 to vector<8x128xf32>
    %1652 = arith.select %1650, %1648, %1651 : vector<8x128xi1>, vector<8x128xf32>
    %c48_938 = arith.constant 48 : index
    %c0_939 = arith.constant 0 : index
    %1653 = vector.load %arg19[%c48_938, %c0_939] : memref<344x128xf32, #tpu.memory_space<vmem>>, vector<8x128xf32>
    tpu.vector_store %arg19[%c48_938, %c0_939], %1652 {strides = array<i32>} : memref<344x128xf32, #tpu.memory_space<vmem>>, vector<8x128xf32>,
    %c12_i32_940 = arith.constant 12 : i32
    %1654 = tpu.dynamic_rotate %1611 by %c12_i32_940 dim 1 : vector<8x128xf32>, i32 -> vector<8x128xf32>
    %cst_941 = arith.constant 0.000000e+00 : f32
    %1655 = vector.shape_cast %88 : vector<1x128xi1> to vector<1x128xi1>
    %1656 = vector.broadcast %1655 : vector<1x128xi1> to vector<8x128xi1>
    %1657 = vector.broadcast %cst_941 : f32 to vector<8x128xf32>
    %1658 = arith.select %1656, %1654, %1657 : vector<8x128xi1>, vector<8x128xf32>
    %c56_942 = arith.constant 56 : index
    %c0_943 = arith.constant 0 : index
    %1659 = vector.load %arg19[%c56_942, %c0_943] : memref<344x128xf32, #tpu.memory_space<vmem>>, vector<8x128xf32>
    tpu.vector_store %arg19[%c56_942, %c0_943], %1658 {strides = array<i32>} : memref<344x128xf32, #tpu.memory_space<vmem>>, vector<8x128xf32>,
    %c11_i32_944 = arith.constant 11 : i32
    %1660 = tpu.dynamic_rotate %1611 by %c11_i32_944 dim 1 : vector<8x128xf32>, i32 -> vector<8x128xf32>
    %cst_945 = arith.constant 0.000000e+00 : f32
    %1661 = vector.shape_cast %97 : vector<1x128xi1> to vector<1x128xi1>
    %1662 = vector.broadcast %1661 : vector<1x128xi1> to vector<8x128xi1>
    %1663 = vector.broadcast %cst_945 : f32 to vector<8x128xf32>
    %1664 = arith.select %1662, %1660, %1663 : vector<8x128xi1>, vector<8x128xf32>
    %c64_946 = arith.constant 64 : index
    %c0_947 = arith.constant 0 : index
    %1665 = vector.load %arg19[%c64_946, %c0_947] : memref<344x128xf32, #tpu.memory_space<vmem>>, vector<8x128xf32>
    tpu.vector_store %arg19[%c64_946, %c0_947], %1664 {strides = array<i32>} : memref<344x128xf32, #tpu.memory_space<vmem>>, vector<8x128xf32>,
    %c10_i32_948 = arith.constant 10 : i32
    %1666 = tpu.dynamic_rotate %1611 by %c10_i32_948 dim 1 : vector<8x128xf32>, i32 -> vector<8x128xf32>
    %cst_949 = arith.constant 0.000000e+00 : f32
    %1667 = vector.shape_cast %106 : vector<1x128xi1> to vector<1x128xi1>
    %1668 = vector.broadcast %1667 : vector<1x128xi1> to vector<8x128xi1>
    %1669 = vector.broadcast %cst_949 : f32 to vector<8x128xf32>
    %1670 = arith.select %1668, %1666, %1669 : vector<8x128xi1>, vector<8x128xf32>
    %c72_950 = arith.constant 72 : index
    %c0_951 = arith.constant 0 : index
    %1671 = vector.load %arg19[%c72_950, %c0_951] : memref<344x128xf32, #tpu.memory_space<vmem>>, vector<8x128xf32>
    tpu.vector_store %arg19[%c72_950, %c0_951], %1670 {strides = array<i32>} : memref<344x128xf32, #tpu.memory_space<vmem>>, vector<8x128xf32>,
    %c9_i32_952 = arith.constant 9 : i32
    %1672 = tpu.dynamic_rotate %1611 by %c9_i32_952 dim 1 : vector<8x128xf32>, i32 -> vector<8x128xf32>
    %cst_953 = arith.constant 0.000000e+00 : f32
    %1673 = vector.shape_cast %115 : vector<1x128xi1> to vector<1x128xi1>
    %1674 = vector.broadcast %1673 : vector<1x128xi1> to vector<8x128xi1>
    %1675 = vector.broadcast %cst_953 : f32 to vector<8x128xf32>
    %1676 = arith.select %1674, %1672, %1675 : vector<8x128xi1>, vector<8x128xf32>
    %c80_954 = arith.constant 80 : index
    %c0_955 = arith.constant 0 : index
    %1677 = vector.load %arg19[%c80_954, %c0_955] : memref<344x128xf32, #tpu.memory_space<vmem>>, vector<8x128xf32>
    tpu.vector_store %arg19[%c80_954, %c0_955], %1676 {strides = array<i32>} : memref<344x128xf32, #tpu.memory_space<vmem>>, vector<8x128xf32>,
    %c8_i32_956 = arith.constant 8 : i32
    %1678 = tpu.dynamic_rotate %1611 by %c8_i32_956 dim 1 : vector<8x128xf32>, i32 -> vector<8x128xf32>
    %cst_957 = arith.constant 0.000000e+00 : f32
    %1679 = vector.shape_cast %124 : vector<1x128xi1> to vector<1x128xi1>
    %1680 = vector.broadcast %1679 : vector<1x128xi1> to vector<8x128xi1>
    %1681 = vector.broadcast %cst_957 : f32 to vector<8x128xf32>
    %1682 = arith.select %1680, %1678, %1681 : vector<8x128xi1>, vector<8x128xf32>
    %c88_958 = arith.constant 88 : index
    %c0_959 = arith.constant 0 : index
    %1683 = vector.load %arg19[%c88_958, %c0_959] : memref<344x128xf32, #tpu.memory_space<vmem>>, vector<8x128xf32>
    tpu.vector_store %arg19[%c88_958, %c0_959], %1682 {strides = array<i32>} : memref<344x128xf32, #tpu.memory_space<vmem>>, vector<8x128xf32>,
    %c7_i32_960 = arith.constant 7 : i32
    %1684 = tpu.dynamic_rotate %1611 by %c7_i32_960 dim 1 : vector<8x128xf32>, i32 -> vector<8x128xf32>
    %cst_961 = arith.constant 0.000000e+00 : f32
    %1685 = vector.shape_cast %133 : vector<1x128xi1> to vector<1x128xi1>
    %1686 = vector.broadcast %1685 : vector<1x128xi1> to vector<8x128xi1>
    %1687 = vector.broadcast %cst_961 : f32 to vector<8x128xf32>
    %1688 = arith.select %1686, %1684, %1687 : vector<8x128xi1>, vector<8x128xf32>
    %c96_962 = arith.constant 96 : index
    %c0_963 = arith.constant 0 : index
    %1689 = vector.load %arg19[%c96_962, %c0_963] : memref<344x128xf32, #tpu.memory_space<vmem>>, vector<8x128xf32>
    tpu.vector_store %arg19[%c96_962, %c0_963], %1688 {strides = array<i32>} : memref<344x128xf32, #tpu.memory_space<vmem>>, vector<8x128xf32>,
    %c6_i32_964 = arith.constant 6 : i32
    %1690 = tpu.dynamic_rotate %1611 by %c6_i32_964 dim 1 : vector<8x128xf32>, i32 -> vector<8x128xf32>
    %cst_965 = arith.constant 0.000000e+00 : f32
    %1691 = vector.shape_cast %142 : vector<1x128xi1> to vector<1x128xi1>
    %1692 = vector.broadcast %1691 : vector<1x128xi1> to vector<8x128xi1>
    %1693 = vector.broadcast %cst_965 : f32 to vector<8x128xf32>
    %1694 = arith.select %1692, %1690, %1693 : vector<8x128xi1>, vector<8x128xf32>
    %c104_966 = arith.constant 104 : index
    %c0_967 = arith.constant 0 : index
    %1695 = vector.load %arg19[%c104_966, %c0_967] : memref<344x128xf32, #tpu.memory_space<vmem>>, vector<8x128xf32>
    tpu.vector_store %arg19[%c104_966, %c0_967], %1694 {strides = array<i32>} : memref<344x128xf32, #tpu.memory_space<vmem>>, vector<8x128xf32>,
    %c5_i32_968 = arith.constant 5 : i32
    %1696 = tpu.dynamic_rotate %1611 by %c5_i32_968 dim 1 : vector<8x128xf32>, i32 -> vector<8x128xf32>
    %cst_969 = arith.constant 0.000000e+00 : f32
    %1697 = vector.shape_cast %151 : vector<1x128xi1> to vector<1x128xi1>
    %1698 = vector.broadcast %1697 : vector<1x128xi1> to vector<8x128xi1>
    %1699 = vector.broadcast %cst_969 : f32 to vector<8x128xf32>
    %1700 = arith.select %1698, %1696, %1699 : vector<8x128xi1>, vector<8x128xf32>
    %c112_970 = arith.constant 112 : index
    %c0_971 = arith.constant 0 : index
    %1701 = vector.load %arg19[%c112_970, %c0_971] : memref<344x128xf32, #tpu.memory_space<vmem>>, vector<8x128xf32>
    tpu.vector_store %arg19[%c112_970, %c0_971], %1700 {strides = array<i32>} : memref<344x128xf32, #tpu.memory_space<vmem>>, vector<8x128xf32>,
    %c4_i32_972 = arith.constant 4 : i32
    %1702 = tpu.dynamic_rotate %1611 by %c4_i32_972 dim 1 : vector<8x128xf32>, i32 -> vector<8x128xf32>
    %cst_973 = arith.constant 0.000000e+00 : f32
    %1703 = vector.shape_cast %160 : vector<1x128xi1> to vector<1x128xi1>
    %1704 = vector.broadcast %1703 : vector<1x128xi1> to vector<8x128xi1>
    %1705 = vector.broadcast %cst_973 : f32 to vector<8x128xf32>
    %1706 = arith.select %1704, %1702, %1705 : vector<8x128xi1>, vector<8x128xf32>
    %c120_974 = arith.constant 120 : index
    %c0_975 = arith.constant 0 : index
    %1707 = vector.load %arg19[%c120_974, %c0_975] : memref<344x128xf32, #tpu.memory_space<vmem>>, vector<8x128xf32>
    tpu.vector_store %arg19[%c120_974, %c0_975], %1706 {strides = array<i32>} : memref<344x128xf32, #tpu.memory_space<vmem>>, vector<8x128xf32>,
    %c3_i32_976 = arith.constant 3 : i32
    %1708 = tpu.dynamic_rotate %1611 by %c3_i32_976 dim 1 : vector<8x128xf32>, i32 -> vector<8x128xf32>
    %cst_977 = arith.constant 0.000000e+00 : f32
    %1709 = vector.shape_cast %169 : vector<1x128xi1> to vector<1x128xi1>
    %1710 = vector.broadcast %1709 : vector<1x128xi1> to vector<8x128xi1>
    %1711 = vector.broadcast %cst_977 : f32 to vector<8x128xf32>
    %1712 = arith.select %1710, %1708, %1711 : vector<8x128xi1>, vector<8x128xf32>
    %c128_978 = arith.constant 128 : index
    %c0_979 = arith.constant 0 : index
    %1713 = vector.load %arg19[%c128_978, %c0_979] : memref<344x128xf32, #tpu.memory_space<vmem>>, vector<8x128xf32>
    tpu.vector_store %arg19[%c128_978, %c0_979], %1712 {strides = array<i32>} : memref<344x128xf32, #tpu.memory_space<vmem>>, vector<8x128xf32>,
    %c2_i32_980 = arith.constant 2 : i32
    %1714 = tpu.dynamic_rotate %1611 by %c2_i32_980 dim 1 : vector<8x128xf32>, i32 -> vector<8x128xf32>
    %cst_981 = arith.constant 0.000000e+00 : f32
    %1715 = vector.shape_cast %178 : vector<1x128xi1> to vector<1x128xi1>
    %1716 = vector.broadcast %1715 : vector<1x128xi1> to vector<8x128xi1>
    %1717 = vector.broadcast %cst_981 : f32 to vector<8x128xf32>
    %1718 = arith.select %1716, %1714, %1717 : vector<8x128xi1>, vector<8x128xf32>
    %c136_982 = arith.constant 136 : index
    %c0_983 = arith.constant 0 : index
    %1719 = vector.load %arg19[%c136_982, %c0_983] : memref<344x128xf32, #tpu.memory_space<vmem>>, vector<8x128xf32>
    tpu.vector_store %arg19[%c136_982, %c0_983], %1718 {strides = array<i32>} : memref<344x128xf32, #tpu.memory_space<vmem>>, vector<8x128xf32>,
    %c1_i32_984 = arith.constant 1 : i32
    %1720 = tpu.dynamic_rotate %1611 by %c1_i32_984 dim 1 : vector<8x128xf32>, i32 -> vector<8x128xf32>
    %cst_985 = arith.constant 0.000000e+00 : f32
    %1721 = vector.shape_cast %187 : vector<1x128xi1> to vector<1x128xi1>
    %1722 = vector.broadcast %1721 : vector<1x128xi1> to vector<8x128xi1>
    %1723 = vector.broadcast %cst_985 : f32 to vector<8x128xf32>
    %1724 = arith.select %1722, %1720, %1723 : vector<8x128xi1>, vector<8x128xf32>
    %c144_986 = arith.constant 144 : index
    %c0_987 = arith.constant 0 : index
    %1725 = vector.load %arg19[%c144_986, %c0_987] : memref<344x128xf32, #tpu.memory_space<vmem>>, vector<8x128xf32>
    tpu.vector_store %arg19[%c144_986, %c0_987], %1724 {strides = array<i32>} : memref<344x128xf32, #tpu.memory_space<vmem>>, vector<8x128xf32>,
    %c152_988 = arith.constant 152 : index
    %c0_989 = arith.constant 0 : index
    %1726 = vector.load %arg19[%c152_988, %c0_989] : memref<344x128xf32, #tpu.memory_space<vmem>>, vector<8x128xf32>
    tpu.vector_store %arg19[%c152_988, %c0_989], %1611 {strides = array<i32>} : memref<344x128xf32, #tpu.memory_space<vmem>>, vector<8x128xf32>,
    %c127_i32_990 = arith.constant 127 : i32
    %1727 = tpu.dynamic_rotate %1611 by %c127_i32_990 dim 1 : vector<8x128xf32>, i32 -> vector<8x128xf32>
    %cst_991 = arith.constant 0.000000e+00 : f32
    %1728 = vector.shape_cast %196 : vector<1x128xi1> to vector<1x128xi1>
    %1729 = vector.broadcast %1728 : vector<1x128xi1> to vector<8x128xi1>
    %1730 = vector.broadcast %cst_991 : f32 to vector<8x128xf32>
    %1731 = arith.select %1729, %1727, %1730 : vector<8x128xi1>, vector<8x128xf32>
    %c160_992 = arith.constant 160 : index
    %c0_993 = arith.constant 0 : index
    %1732 = vector.load %arg19[%c160_992, %c0_993] : memref<344x128xf32, #tpu.memory_space<vmem>>, vector<8x128xf32>
    tpu.vector_store %arg19[%c160_992, %c0_993], %1731 {strides = array<i32>} : memref<344x128xf32, #tpu.memory_space<vmem>>, vector<8x128xf32>,
    %c126_i32_994 = arith.constant 126 : i32
    %1733 = tpu.dynamic_rotate %1611 by %c126_i32_994 dim 1 : vector<8x128xf32>, i32 -> vector<8x128xf32>
    %cst_995 = arith.constant 0.000000e+00 : f32
    %1734 = vector.shape_cast %205 : vector<1x128xi1> to vector<1x128xi1>
    %1735 = vector.broadcast %1734 : vector<1x128xi1> to vector<8x128xi1>
    %1736 = vector.broadcast %cst_995 : f32 to vector<8x128xf32>
    %1737 = arith.select %1735, %1733, %1736 : vector<8x128xi1>, vector<8x128xf32>
    %c168_996 = arith.constant 168 : index
    %c0_997 = arith.constant 0 : index
    %1738 = vector.load %arg19[%c168_996, %c0_997] : memref<344x128xf32, #tpu.memory_space<vmem>>, vector<8x128xf32>
    tpu.vector_store %arg19[%c168_996, %c0_997], %1737 {strides = array<i32>} : memref<344x128xf32, #tpu.memory_space<vmem>>, vector<8x128xf32>,
    %c125_i32_998 = arith.constant 125 : i32
    %1739 = tpu.dynamic_rotate %1611 by %c125_i32_998 dim 1 : vector<8x128xf32>, i32 -> vector<8x128xf32>
    %cst_999 = arith.constant 0.000000e+00 : f32
    %1740 = vector.shape_cast %214 : vector<1x128xi1> to vector<1x128xi1>
    %1741 = vector.broadcast %1740 : vector<1x128xi1> to vector<8x128xi1>
    %1742 = vector.broadcast %cst_999 : f32 to vector<8x128xf32>
    %1743 = arith.select %1741, %1739, %1742 : vector<8x128xi1>, vector<8x128xf32>
    %c176_1000 = arith.constant 176 : index
    %c0_1001 = arith.constant 0 : index
    %1744 = vector.load %arg19[%c176_1000, %c0_1001] : memref<344x128xf32, #tpu.memory_space<vmem>>, vector<8x128xf32>
    tpu.vector_store %arg19[%c176_1000, %c0_1001], %1743 {strides = array<i32>} : memref<344x128xf32, #tpu.memory_space<vmem>>, vector<8x128xf32>,
    %c124_i32_1002 = arith.constant 124 : i32
    %1745 = tpu.dynamic_rotate %1611 by %c124_i32_1002 dim 1 : vector<8x128xf32>, i32 -> vector<8x128xf32>
    %cst_1003 = arith.constant 0.000000e+00 : f32
    %1746 = vector.shape_cast %223 : vector<1x128xi1> to vector<1x128xi1>
    %1747 = vector.broadcast %1746 : vector<1x128xi1> to vector<8x128xi1>
    %1748 = vector.broadcast %cst_1003 : f32 to vector<8x128xf32>
    %1749 = arith.select %1747, %1745, %1748 : vector<8x128xi1>, vector<8x128xf32>
    %c184_1004 = arith.constant 184 : index
    %c0_1005 = arith.constant 0 : index
    %1750 = vector.load %arg19[%c184_1004, %c0_1005] : memref<344x128xf32, #tpu.memory_space<vmem>>, vector<8x128xf32>
    tpu.vector_store %arg19[%c184_1004, %c0_1005], %1749 {strides = array<i32>} : memref<344x128xf32, #tpu.memory_space<vmem>>, vector<8x128xf32>,
    %c123_i32_1006 = arith.constant 123 : i32
    %1751 = tpu.dynamic_rotate %1611 by %c123_i32_1006 dim 1 : vector<8x128xf32>, i32 -> vector<8x128xf32>
    %cst_1007 = arith.constant 0.000000e+00 : f32
    %1752 = vector.shape_cast %232 : vector<1x128xi1> to vector<1x128xi1>
    %1753 = vector.broadcast %1752 : vector<1x128xi1> to vector<8x128xi1>
    %1754 = vector.broadcast %cst_1007 : f32 to vector<8x128xf32>
    %1755 = arith.select %1753, %1751, %1754 : vector<8x128xi1>, vector<8x128xf32>
    %c192_1008 = arith.constant 192 : index
    %c0_1009 = arith.constant 0 : index
    %1756 = vector.load %arg19[%c192_1008, %c0_1009] : memref<344x128xf32, #tpu.memory_space<vmem>>, vector<8x128xf32>
    tpu.vector_store %arg19[%c192_1008, %c0_1009], %1755 {strides = array<i32>} : memref<344x128xf32, #tpu.memory_space<vmem>>, vector<8x128xf32>,
    %c122_i32_1010 = arith.constant 122 : i32
    %1757 = tpu.dynamic_rotate %1611 by %c122_i32_1010 dim 1 : vector<8x128xf32>, i32 -> vector<8x128xf32>
    %cst_1011 = arith.constant 0.000000e+00 : f32
    %1758 = vector.shape_cast %241 : vector<1x128xi1> to vector<1x128xi1>
    %1759 = vector.broadcast %1758 : vector<1x128xi1> to vector<8x128xi1>
    %1760 = vector.broadcast %cst_1011 : f32 to vector<8x128xf32>
    %1761 = arith.select %1759, %1757, %1760 : vector<8x128xi1>, vector<8x128xf32>
    %c200_1012 = arith.constant 200 : index
    %c0_1013 = arith.constant 0 : index
    %1762 = vector.load %arg19[%c200_1012, %c0_1013] : memref<344x128xf32, #tpu.memory_space<vmem>>, vector<8x128xf32>
    tpu.vector_store %arg19[%c200_1012, %c0_1013], %1761 {strides = array<i32>} : memref<344x128xf32, #tpu.memory_space<vmem>>, vector<8x128xf32>,
    %c121_i32_1014 = arith.constant 121 : i32
    %1763 = tpu.dynamic_rotate %1611 by %c121_i32_1014 dim 1 : vector<8x128xf32>, i32 -> vector<8x128xf32>
    %cst_1015 = arith.constant 0.000000e+00 : f32
    %1764 = vector.shape_cast %250 : vector<1x128xi1> to vector<1x128xi1>
    %1765 = vector.broadcast %1764 : vector<1x128xi1> to vector<8x128xi1>
    %1766 = vector.broadcast %cst_1015 : f32 to vector<8x128xf32>
    %1767 = arith.select %1765, %1763, %1766 : vector<8x128xi1>, vector<8x128xf32>
    %c208_1016 = arith.constant 208 : index
    %c0_1017 = arith.constant 0 : index
    %1768 = vector.load %arg19[%c208_1016, %c0_1017] : memref<344x128xf32, #tpu.memory_space<vmem>>, vector<8x128xf32>
    tpu.vector_store %arg19[%c208_1016, %c0_1017], %1767 {strides = array<i32>} : memref<344x128xf32, #tpu.memory_space<vmem>>, vector<8x128xf32>,
    %c120_i32_1018 = arith.constant 120 : i32
    %1769 = tpu.dynamic_rotate %1611 by %c120_i32_1018 dim 1 : vector<8x128xf32>, i32 -> vector<8x128xf32>
    %cst_1019 = arith.constant 0.000000e+00 : f32
    %1770 = vector.shape_cast %259 : vector<1x128xi1> to vector<1x128xi1>
    %1771 = vector.broadcast %1770 : vector<1x128xi1> to vector<8x128xi1>
    %1772 = vector.broadcast %cst_1019 : f32 to vector<8x128xf32>
    %1773 = arith.select %1771, %1769, %1772 : vector<8x128xi1>, vector<8x128xf32>
    %c216_1020 = arith.constant 216 : index
    %c0_1021 = arith.constant 0 : index
    %1774 = vector.load %arg19[%c216_1020, %c0_1021] : memref<344x128xf32, #tpu.memory_space<vmem>>, vector<8x128xf32>
    tpu.vector_store %arg19[%c216_1020, %c0_1021], %1773 {strides = array<i32>} : memref<344x128xf32, #tpu.memory_space<vmem>>, vector<8x128xf32>,
    %c119_i32_1022 = arith.constant 119 : i32
    %1775 = tpu.dynamic_rotate %1611 by %c119_i32_1022 dim 1 : vector<8x128xf32>, i32 -> vector<8x128xf32>
    %cst_1023 = arith.constant 0.000000e+00 : f32
    %1776 = vector.shape_cast %268 : vector<1x128xi1> to vector<1x128xi1>
    %1777 = vector.broadcast %1776 : vector<1x128xi1> to vector<8x128xi1>
    %1778 = vector.broadcast %cst_1023 : f32 to vector<8x128xf32>
    %1779 = arith.select %1777, %1775, %1778 : vector<8x128xi1>, vector<8x128xf32>
    %c224_1024 = arith.constant 224 : index
    %c0_1025 = arith.constant 0 : index
    %1780 = vector.load %arg19[%c224_1024, %c0_1025] : memref<344x128xf32, #tpu.memory_space<vmem>>, vector<8x128xf32>
    tpu.vector_store %arg19[%c224_1024, %c0_1025], %1779 {strides = array<i32>} : memref<344x128xf32, #tpu.memory_space<vmem>>, vector<8x128xf32>,
    %c118_i32_1026 = arith.constant 118 : i32
    %1781 = tpu.dynamic_rotate %1611 by %c118_i32_1026 dim 1 : vector<8x128xf32>, i32 -> vector<8x128xf32>
    %cst_1027 = arith.constant 0.000000e+00 : f32
    %1782 = vector.shape_cast %277 : vector<1x128xi1> to vector<1x128xi1>
    %1783 = vector.broadcast %1782 : vector<1x128xi1> to vector<8x128xi1>
    %1784 = vector.broadcast %cst_1027 : f32 to vector<8x128xf32>
    %1785 = arith.select %1783, %1781, %1784 : vector<8x128xi1>, vector<8x128xf32>
    %c232_1028 = arith.constant 232 : index
    %c0_1029 = arith.constant 0 : index
    %1786 = vector.load %arg19[%c232_1028, %c0_1029] : memref<344x128xf32, #tpu.memory_space<vmem>>, vector<8x128xf32>
    tpu.vector_store %arg19[%c232_1028, %c0_1029], %1785 {strides = array<i32>} : memref<344x128xf32, #tpu.memory_space<vmem>>, vector<8x128xf32>,
    %c117_i32_1030 = arith.constant 117 : i32
    %1787 = tpu.dynamic_rotate %1611 by %c117_i32_1030 dim 1 : vector<8x128xf32>, i32 -> vector<8x128xf32>
    %cst_1031 = arith.constant 0.000000e+00 : f32
    %1788 = vector.shape_cast %286 : vector<1x128xi1> to vector<1x128xi1>
    %1789 = vector.broadcast %1788 : vector<1x128xi1> to vector<8x128xi1>
    %1790 = vector.broadcast %cst_1031 : f32 to vector<8x128xf32>
    %1791 = arith.select %1789, %1787, %1790 : vector<8x128xi1>, vector<8x128xf32>
    %c240_1032 = arith.constant 240 : index
    %c0_1033 = arith.constant 0 : index
    %1792 = vector.load %arg19[%c240_1032, %c0_1033] : memref<344x128xf32, #tpu.memory_space<vmem>>, vector<8x128xf32>
    tpu.vector_store %arg19[%c240_1032, %c0_1033], %1791 {strides = array<i32>} : memref<344x128xf32, #tpu.memory_space<vmem>>, vector<8x128xf32>,
    %c116_i32_1034 = arith.constant 116 : i32
    %1793 = tpu.dynamic_rotate %1611 by %c116_i32_1034 dim 1 : vector<8x128xf32>, i32 -> vector<8x128xf32>
    %cst_1035 = arith.constant 0.000000e+00 : f32
    %1794 = vector.shape_cast %295 : vector<1x128xi1> to vector<1x128xi1>
    %1795 = vector.broadcast %1794 : vector<1x128xi1> to vector<8x128xi1>
    %1796 = vector.broadcast %cst_1035 : f32 to vector<8x128xf32>
    %1797 = arith.select %1795, %1793, %1796 : vector<8x128xi1>, vector<8x128xf32>
    %c248_1036 = arith.constant 248 : index
    %c0_1037 = arith.constant 0 : index
    %1798 = vector.load %arg19[%c248_1036, %c0_1037] : memref<344x128xf32, #tpu.memory_space<vmem>>, vector<8x128xf32>
    tpu.vector_store %arg19[%c248_1036, %c0_1037], %1797 {strides = array<i32>} : memref<344x128xf32, #tpu.memory_space<vmem>>, vector<8x128xf32>,
    %c115_i32_1038 = arith.constant 115 : i32
    %1799 = tpu.dynamic_rotate %1611 by %c115_i32_1038 dim 1 : vector<8x128xf32>, i32 -> vector<8x128xf32>
    %cst_1039 = arith.constant 0.000000e+00 : f32
    %1800 = vector.shape_cast %304 : vector<1x128xi1> to vector<1x128xi1>
    %1801 = vector.broadcast %1800 : vector<1x128xi1> to vector<8x128xi1>
    %1802 = vector.broadcast %cst_1039 : f32 to vector<8x128xf32>
    %1803 = arith.select %1801, %1799, %1802 : vector<8x128xi1>, vector<8x128xf32>
    %c256_1040 = arith.constant 256 : index
    %c0_1041 = arith.constant 0 : index
    %1804 = vector.load %arg19[%c256_1040, %c0_1041] : memref<344x128xf32, #tpu.memory_space<vmem>>, vector<8x128xf32>
    tpu.vector_store %arg19[%c256_1040, %c0_1041], %1803 {strides = array<i32>} : memref<344x128xf32, #tpu.memory_space<vmem>>, vector<8x128xf32>,
    %c114_i32_1042 = arith.constant 114 : i32
    %1805 = tpu.dynamic_rotate %1611 by %c114_i32_1042 dim 1 : vector<8x128xf32>, i32 -> vector<8x128xf32>
    %cst_1043 = arith.constant 0.000000e+00 : f32
    %1806 = vector.shape_cast %313 : vector<1x128xi1> to vector<1x128xi1>
    %1807 = vector.broadcast %1806 : vector<1x128xi1> to vector<8x128xi1>
    %1808 = vector.broadcast %cst_1043 : f32 to vector<8x128xf32>
    %1809 = arith.select %1807, %1805, %1808 : vector<8x128xi1>, vector<8x128xf32>
    %c264_1044 = arith.constant 264 : index
    %c0_1045 = arith.constant 0 : index
    %1810 = vector.load %arg19[%c264_1044, %c0_1045] : memref<344x128xf32, #tpu.memory_space<vmem>>, vector<8x128xf32>
    tpu.vector_store %arg19[%c264_1044, %c0_1045], %1809 {strides = array<i32>} : memref<344x128xf32, #tpu.memory_space<vmem>>, vector<8x128xf32>,
    %c113_i32_1046 = arith.constant 113 : i32
    %1811 = tpu.dynamic_rotate %1611 by %c113_i32_1046 dim 1 : vector<8x128xf32>, i32 -> vector<8x128xf32>
    %cst_1047 = arith.constant 0.000000e+00 : f32
    %1812 = vector.shape_cast %322 : vector<1x128xi1> to vector<1x128xi1>
    %1813 = vector.broadcast %1812 : vector<1x128xi1> to vector<8x128xi1>
    %1814 = vector.broadcast %cst_1047 : f32 to vector<8x128xf32>
    %1815 = arith.select %1813, %1811, %1814 : vector<8x128xi1>, vector<8x128xf32>
    %c272_1048 = arith.constant 272 : index
    %c0_1049 = arith.constant 0 : index
    %1816 = vector.load %arg19[%c272_1048, %c0_1049] : memref<344x128xf32, #tpu.memory_space<vmem>>, vector<8x128xf32>
    tpu.vector_store %arg19[%c272_1048, %c0_1049], %1815 {strides = array<i32>} : memref<344x128xf32, #tpu.memory_space<vmem>>, vector<8x128xf32>,
    %c112_i32_1050 = arith.constant 112 : i32
    %1817 = tpu.dynamic_rotate %1611 by %c112_i32_1050 dim 1 : vector<8x128xf32>, i32 -> vector<8x128xf32>
    %cst_1051 = arith.constant 0.000000e+00 : f32
    %1818 = vector.shape_cast %331 : vector<1x128xi1> to vector<1x128xi1>
    %1819 = vector.broadcast %1818 : vector<1x128xi1> to vector<8x128xi1>
    %1820 = vector.broadcast %cst_1051 : f32 to vector<8x128xf32>
    %1821 = arith.select %1819, %1817, %1820 : vector<8x128xi1>, vector<8x128xf32>
    %c280_1052 = arith.constant 280 : index
    %c0_1053 = arith.constant 0 : index
    %1822 = vector.load %arg19[%c280_1052, %c0_1053] : memref<344x128xf32, #tpu.memory_space<vmem>>, vector<8x128xf32>
    tpu.vector_store %arg19[%c280_1052, %c0_1053], %1821 {strides = array<i32>} : memref<344x128xf32, #tpu.memory_space<vmem>>, vector<8x128xf32>,
    %c111_i32_1054 = arith.constant 111 : i32
    %1823 = tpu.dynamic_rotate %1611 by %c111_i32_1054 dim 1 : vector<8x128xf32>, i32 -> vector<8x128xf32>
    %cst_1055 = arith.constant 0.000000e+00 : f32
    %1824 = vector.shape_cast %340 : vector<1x128xi1> to vector<1x128xi1>
    %1825 = vector.broadcast %1824 : vector<1x128xi1> to vector<8x128xi1>
    %1826 = vector.broadcast %cst_1055 : f32 to vector<8x128xf32>
    %1827 = arith.select %1825, %1823, %1826 : vector<8x128xi1>, vector<8x128xf32>
    %c288_1056 = arith.constant 288 : index
    %c0_1057 = arith.constant 0 : index
    %1828 = vector.load %arg19[%c288_1056, %c0_1057] : memref<344x128xf32, #tpu.memory_space<vmem>>, vector<8x128xf32>
    tpu.vector_store %arg19[%c288_1056, %c0_1057], %1827 {strides = array<i32>} : memref<344x128xf32, #tpu.memory_space<vmem>>, vector<8x128xf32>,
    %c110_i32_1058 = arith.constant 110 : i32
    %1829 = tpu.dynamic_rotate %1611 by %c110_i32_1058 dim 1 : vector<8x128xf32>, i32 -> vector<8x128xf32>
    %cst_1059 = arith.constant 0.000000e+00 : f32
    %1830 = vector.shape_cast %349 : vector<1x128xi1> to vector<1x128xi1>
    %1831 = vector.broadcast %1830 : vector<1x128xi1> to vector<8x128xi1>
    %1832 = vector.broadcast %cst_1059 : f32 to vector<8x128xf32>
    %1833 = arith.select %1831, %1829, %1832 : vector<8x128xi1>, vector<8x128xf32>
    %c296_1060 = arith.constant 296 : index
    %c0_1061 = arith.constant 0 : index
    %1834 = vector.load %arg19[%c296_1060, %c0_1061] : memref<344x128xf32, #tpu.memory_space<vmem>>, vector<8x128xf32>
    tpu.vector_store %arg19[%c296_1060, %c0_1061], %1833 {strides = array<i32>} : memref<344x128xf32, #tpu.memory_space<vmem>>, vector<8x128xf32>,
    %c109_i32_1062 = arith.constant 109 : i32
    %1835 = tpu.dynamic_rotate %1611 by %c109_i32_1062 dim 1 : vector<8x128xf32>, i32 -> vector<8x128xf32>
    %cst_1063 = arith.constant 0.000000e+00 : f32
    %1836 = vector.shape_cast %358 : vector<1x128xi1> to vector<1x128xi1>
    %1837 = vector.broadcast %1836 : vector<1x128xi1> to vector<8x128xi1>
    %1838 = vector.broadcast %cst_1063 : f32 to vector<8x128xf32>
    %1839 = arith.select %1837, %1835, %1838 : vector<8x128xi1>, vector<8x128xf32>
    %c304_1064 = arith.constant 304 : index
    %c0_1065 = arith.constant 0 : index
    %1840 = vector.load %arg19[%c304_1064, %c0_1065] : memref<344x128xf32, #tpu.memory_space<vmem>>, vector<8x128xf32>
    tpu.vector_store %arg19[%c304_1064, %c0_1065], %1839 {strides = array<i32>} : memref<344x128xf32, #tpu.memory_space<vmem>>, vector<8x128xf32>,
    %c127_i32_1066 = arith.constant 127 : i32
    %1841 = tpu.dynamic_rotate %1609 by %c127_i32_1066 dim 1 : vector<32x128xf32>, i32 -> vector<32x128xf32>
    %cst_1067 = arith.constant 0xFF800000 : f32
    %1842 = vector.shape_cast %196 : vector<1x128xi1> to vector<1x128xi1>
    %1843 = vector.broadcast %1842 : vector<1x128xi1> to vector<32x128xi1>
    %1844 = vector.broadcast %cst_1067 : f32 to vector<32x128xf32>
    %1845 = arith.select %1843, %1841, %1844 : vector<32x128xi1>, vector<32x128xf32>
    %c1_i32_1068 = arith.constant 1 : i32
    %1846 = tpu.dynamic_rotate %1609 by %c1_i32_1068 dim 1 : vector<32x128xf32>, i32 -> vector<32x128xf32>
    %cst_1069 = arith.constant 0xFF800000 : f32
    %1847 = vector.shape_cast %187 : vector<1x128xi1> to vector<1x128xi1>
    %1848 = vector.broadcast %1847 : vector<1x128xi1> to vector<32x128xi1>
    %1849 = vector.broadcast %cst_1069 : f32 to vector<32x128xf32>
    %1850 = arith.select %1848, %1846, %1849 : vector<32x128xi1>, vector<32x128xf32>
    %1851 = arith.maximumf %1845, %1850 : vector<32x128xf32>
    %1852 = arith.maximumf %1609, %1851 : vector<32x128xf32>
    %c312_1070 = arith.constant 312 : index
    %c0_1071 = arith.constant 0 : index
    %1853 = vector.load %arg19[%c312_1070, %c0_1071] : memref<344x128xf32, #tpu.memory_space<vmem>>, vector<32x128xf32>
    tpu.vector_store %arg19[%c312_1070, %c0_1071], %1852 {strides = array<i32>} : memref<344x128xf32, #tpu.memory_space<vmem>>, vector<32x128xf32>,
    %c0_1072 = arith.constant 0 : index
    %c0_1073 = arith.constant 0 : index
    %1854 = vector.load %arg12[%c0_1072, %c0_1073] : memref<32x344xf32, #tpu.memory_space<vmem>>, vector<32x344xf32>
    %c0_1074 = arith.constant 0 : index
    %c0_1075 = arith.constant 0 : index
    %1855 = vector.load %arg19[%c0_1074, %c0_1075] : memref<344x128xf32, #tpu.memory_space<vmem>>, vector<344x128xf32>
    %cst_1076 = arith.constant dense<0.000000e+00> : vector<32x128xf32>
    %1856 = tpu.matmul %1854, %1855, %cst_1076 {dimension_numbers = #tpu.dot_dimension_numbers<[1], [0], [0], [1], [0, 0, 1, 1], [], []>} : vector<32x344xf32>, vector<344x128xf32>, vector<32x128xf32> -> vector<32x128xf32>
    %cst_1077 = arith.constant 0.000000e+00 : f32
    %1857 = vector.broadcast %cst_1077 : f32 to vector<32x128xf32>
    %1858 = arith.maximumf %1856, %1857 : vector<32x128xf32>
    %c0_1078 = arith.constant 0 : index
    %c0_1079 = arith.constant 0 : index
    %1859 = vector.load %arg14[%c0_1078, %c0_1079] : memref<32x32xf32, #tpu.memory_space<vmem>>, vector<32x32xf32>
    %cst_1080 = arith.constant dense<0.000000e+00> : vector<32x128xf32>
    %1860 = tpu.matmul %1859, %1111, %cst_1080 {dimension_numbers = #tpu.dot_dimension_numbers<[1], [0], [0], [1], [0, 0, 1, 1], [], []>} : vector<32x32xf32>, vector<32x128xf32>, vector<32x128xf32> -> vector<32x128xf32>
    %1861 = arith.addf %1858, %1860 : vector<32x128xf32>
    %cst_1081 = arith.constant 0.000000e+00 : f32
    %1862 = vector.broadcast %cst_1081 : f32 to vector<32x128xf32>
    %1863 = arith.maximumf %1861, %1862 : vector<32x128xf32>
    %c0_1082 = arith.constant 0 : index
    %c0_1083 = arith.constant 0 : index
    %1864 = vector.load %arg16[%c0_1082, %c0_1083] : memref<2x32xf32, #tpu.memory_space<vmem>>, vector<2x32xf32>
    %cst_1084 = arith.constant dense<0.000000e+00> : vector<2x128xf32>
    %1865 = tpu.matmul %1864, %1863, %cst_1084 {dimension_numbers = #tpu.dot_dimension_numbers<[1], [0], [0], [1], [0, 0, 1, 1], [], []>} : vector<2x32xf32>, vector<32x128xf32>, vector<2x128xf32> -> vector<2x128xf32>
    %c0_1085 = arith.constant 0 : index
    %c0_1086 = arith.constant 0 : index
    %1866 = vector.load %arg15[%c0_1085, %c0_1086] : memref<128x2xf32, #tpu.memory_space<vmem>>, vector<128x2xf32>
    %cst_1087 = arith.constant dense<0.000000e+00> : vector<2x2xf32>
    %1867 = tpu.matmul %1865, %1866, %cst_1087 {dimension_numbers = #tpu.dot_dimension_numbers<[1], [0], [0], [1], [0, 0, 1, 1], [], []>} : vector<2x128xf32>, vector<128x2xf32>, vector<2x2xf32> -> vector<2x2xf32>
    %c0_1088 = arith.constant 0 : index
    %c0_1089 = arith.constant 0 : index
    %1868 = vector.load %arg17[%c0_1088, %c0_1089] : memref<2x1xf32, #tpu.memory_space<vmem>>, vector<2x1xf32>
    %1869 = vector.broadcast %1868 : vector<2x1xf32> to vector<2x2xf32>
    %1870 = arith.addf %1867, %1869 : vector<2x2xf32>
    %c0_1090 = arith.constant 0 : index
    %c0_1091 = arith.constant 0 : index
    %1871 = vector.load %arg18[%c0_1090, %c0_1091] : memref<2x2xf32, #tpu.memory_space<vmem>>, vector<2x2xf32>
    tpu.vector_store %arg18[%c0_1090, %c0_1091], %1870 {strides = array<i32>} : memref<2x2xf32, #tpu.memory_space<vmem>>, vector<2x2xf32>,
    return
  }
}

</mosaic_0001>

<bundles_post_ra>
// kernel: trans_model_fwd.1
= control target key start
LH: loop header
LB: loop body
LE: loop exit
PB: predicated region body
PF: predicated region fallthrough
CT: control target
= control target key end

     0   :  { %s7142_s0 = inlined_call_operand.vmem [shape: f32[8,128], index: 0, kind: input, shape index: {}]   ;;  %s7143_s1 = inlined_call_operand.hbm [shape: f32[8,8], index: 1, kind: input, shape index: {}]   ;;  %s7144_s2 = inlined_call_operand.vmem [shape: f32[32,320], index: 2, kind: input, shape index: {}]   ;;  %s7145_s3 = inlined_call_operand.hbm [shape: f32[8,32], index: 3, kind: input, shape index: {}]   ;;  %s7146_s4 = inlined_call_operand.vmem [shape: f32[32,344], index: 4, kind: input, shape index: {}]   ;;  %s7147_s5 = inlined_call_operand.hbm [shape: f32[8,32], index: 5, kind: input, shape index: {}]   ;;  %s7148_s6 = inlined_call_operand.hbm [shape: f32[32,344], index: 6, kind: input, shape index: {}]   ;;  %s7149_s7 = inlined_call_operand.vmem [shape: f32[8,32], index: 7, kind: input, shape index: {}]   ;;  %s7150_s8 = inlined_call_operand.hbm [shape: f32[32,344], index: 8, kind: input, shape index: {}]   ;;  %s7151_s9 = inlined_call_operand.vmem [shape: f32[8,32], index: 9, kind: input, shape index: {}]   ;;  %s7152_s10 = inlined_call_operand.hbm [shape: f32[32,344], index: 10, kind: input, shape index: {}]   ;;  %s7153_s11 = inlined_call_operand.vmem [shape: f32[8,32], index: 11, kind: input, shape index: {}]   ;;  %s7154_s12 = inlined_call_operand.hbm [shape: f32[32,344], index: 12, kind: input, shape index: {}]   ;;  %s7155_s13 = inlined_call_operand.vmem [shape: f32[32,8], index: 13, kind: input, shape index: {}]   ;;  %s7156_s14 = inlined_call_operand.vmem [shape: f32[32,32], index: 14, kind: input, shape index: {}]   ;;  %s7157_s15 = inlined_call_operand.vmem [shape: f32[128,2], index: 15, kind: input, shape index: {}]   ;;  %s7158_s16 = inlined_call_operand.hbm [shape: f32[2,32], index: 16, kind: input, shape index: {}]   ;;  %s7159_s17 = inlined_call_operand.vmem [shape: f32[2,1], index: 17, kind: input, shape index: {}]   ;;  %s7160_s18 = inlined_call_operand.vmem [shape: f32[2,2], index: 18, kind: output, shape index: {}]  }
   0x1   :  { %7306 = sst [smem:[#allocation21_spill]] %s7142_s0 }
   0x2   :  { %7307 = sst [smem:[#allocation22_spill]] %s7143_s1 }
   0x3   :  { %7308 = sst [smem:[#allocation23_spill]] %s7144_s2 }
   0x4   :  { %7309 = sst [smem:[#allocation24_spill]] %s7149_s7 }
   0x5   :  { %7310 = sst [smem:[#allocation25_spill]] %s7151_s9 }
   0x6   :  { %7311 = sst [smem:[#allocation26_spill]] %s7153_s11 }
   0x7   :  { %7312 = sst [smem:[#allocation27_spill]] %s7155_s13 }
   0x8   :  { %7313 = sst [smem:[#allocation28_spill]] %s7156_s14 }
   0x9   :  { %7314 = sst [smem:[#allocation29_spill]] %s7157_s15 }
   0xa   :  { %7315 = sst [smem:[#allocation30_spill]] %s7159_s17 }
   0xb   :  { %7316 = sst [smem:[#allocation31_spill]] %s7160_s18 }
   0xc   :  { %23 = vsyncpa [#allocation4], 0 }
   0xd   :  { %24 = vsyncpa [#allocation6], 0 }
   0xe   :  { %25 = vsyncpa [#allocation9], 0 }
   0xf   :  { %26 = vsyncpa [#allocation12], 0 }
  0x10   :  { %27 = vsyncpa [#allocation15], 0  ;;  %s5613_s27 = smov [#allocation5]   ;;  %s5614_s29 = smov [#allocation8]  }
  0x11   :  { %s48_s28 = sshll.u32 %s5613_s27, 4  ;;  %s69_s30 = sshll.u32 %s5614_s29, 4  ;;  %s49_s28 = int_to_ptr.vmem [resolvable:$true] %s48_s28  ;;  %s5761_s30 = int_to_ptr.vmem [resolvable:$true] %s69_s30 }
  0x12   :  { %s5427_s1 = scalar_lea.hbm %s7145_s3, 128 }
  0x13   :  { %p5428_p0 = scmp.ne.s32.totalorder %s7145_s3, %s5427_s1  ;;  %p5431_p1 = scmp.lt.u32.totalorder %s5427_s1, %s7145_s3 }
  0x15   :  { %p5433_p2 = pnand %p5431_p1, %p5428_p0 }
  0x17   :  { %5436 = shalt.err (!%p5433_p2)
}
  0x18   :  { %s5437_s23 = scalar_lea.vmem %s49_s28, 128  ;;  %p5442_p4 = scmp.lt.s32.totalorder %s49_s28, %s49_s28 }
  0x19   :  { %p5438_p3 = scmp.ne.s32.totalorder %s49_s28, %s5437_s23  ;;  %p5443_p5 = scmp.lt.s32.totalorder %s5437_s23, %s5437_s23 }
  0x1b   :  { %p5444_p6 = por %p5443_p5, %p5442_p4 }
  0x1d   :  { %p5445_p7 = pnand %p5444_p6, %p5438_p3 }
  0x1f   :  { %5448 = shalt.err (!%p5445_p7)
}
  0x20   :  { %51 = dma.hbm_to_vmem [thread:$0]  %s7145_s3, 128, %s49_s28, [#allocation6]  }
  0x21   :  { %s5449_s29 = scalar_lea.hbm %s7148_s6, 1536 }
  0x22   :  { %p5450_p8 = scmp.ne.s32.totalorder %s7148_s6, %s5449_s29  ;;  %p5453_p9 = scmp.lt.u32.totalorder %s5449_s29, %s7148_s6 }
  0x24   :  { %p5455_p10 = pnand %p5453_p9, %p5450_p8 }
  0x26   :  { %5458 = shalt.err (!%p5455_p10)
}
  0x27   :  { %s5459_s21 = scalar_lea.vmem %s5761_s30, 1536  ;;  %p5464_p12 = scmp.lt.s32.totalorder %s5761_s30, %s5761_s30 }
  0x28   :  { %p5460_p11 = scmp.ne.s32.totalorder %s5761_s30, %s5459_s21  ;;  %p5465_p13 = scmp.lt.s32.totalorder %s5459_s21, %s5459_s21 }
  0x2a   :  { %p5466_p0 = por %p5465_p13, %p5464_p12 }
  0x2c   :  { %p5467_p1 = pnand %p5466_p0, %p5460_p11 }
  0x2e   :  { %5470 = shalt.err (!%p5467_p1)
}
  0x2f   :  { %s5615_s3 = smov 384   ;;  %s5616_s28 = smov 24  }
  0x30   :  { %75 = dma.hbm_to_vmem [thread:$0]  %s7148_s6, 1536, %s5761_s30, [#allocation9], %s5615_s3, %s5615_s3, %s5616_s28  }
  0x31   :  { %s5617_s23 = smov [#allocation11]   ;;  %s5618_s25 = smov [#allocation3]  }
  0x32   :  { %s97_s24 = sshll.u32 %s5617_s23, 4  ;;  %s36_s26 = sshll.u32 %s5618_s25, 4  ;;  %s98_s24 = int_to_ptr.vmem [resolvable:$true] %s97_s24  ;;  %s37_s26 = int_to_ptr.vmem [resolvable:$true] %s36_s26 }
  0x33   :  { %s5471_s0 = scalar_lea.hbm %s7152_s10, 1536 }
  0x34   :  { %p5472_p2 = scmp.ne.s32.totalorder %s7152_s10, %s5471_s0  ;;  %p5475_p3 = scmp.lt.u32.totalorder %s5471_s0, %s7152_s10 }
  0x36   :  { %p5477_p4 = pnand %p5475_p3, %p5472_p2 }
  0x38   :  { %5480 = shalt.err (!%p5477_p4)
}
  0x39   :  { %s5481_s6 = scalar_lea.vmem %s98_s24, 1536  ;;  %p5486_p6 = scmp.lt.s32.totalorder %s98_s24, %s98_s24 }
  0x3a   :  { %p5482_p5 = scmp.ne.s32.totalorder %s98_s24, %s5481_s6  ;;  %p5487_p7 = scmp.lt.s32.totalorder %s5481_s6, %s5481_s6 }
  0x3c   :  { %p5488_p8 = por %p5487_p7, %p5486_p6 }
  0x3e   :  { %p5489_p9 = pnand %p5488_p8, %p5482_p5 }
  0x40   :  { %5492 = shalt.err (!%p5489_p9)
}
  0x41   :  { %103 = dma.hbm_to_vmem [thread:$0]  %s7152_s10, 1536, %s98_s24, [#allocation12], %s5615_s3, %s5615_s3, %s5616_s28  }
  0x42   :  { %s7317_s25 = sld [smem:[#allocation22_spill]] }
  0x48   :  { %s5493_s27 = scalar_lea.hbm %s7317_s25, 128 }
  0x49   :  { %p5494_p10 = scmp.ne.s32.totalorder %s7317_s25, %s5493_s27  ;;  %p5497_p11 = scmp.lt.u32.totalorder %s5493_s27, %s7317_s25 }
  0x4b   :  { %p5499_p12 = pnand %p5497_p11, %p5494_p10 }
  0x4d   :  { %5502 = shalt.err (!%p5499_p12)
}
  0x4e   :  { %s5503_s20 = scalar_lea.vmem %s37_s26, 128  ;;  %p5508_p0 = scmp.lt.s32.totalorder %s37_s26, %s37_s26 }
  0x4f   :  { %p5504_p13 = scmp.ne.s32.totalorder %s37_s26, %s5503_s20  ;;  %p5509_p1 = scmp.lt.s32.totalorder %s5503_s20, %s5503_s20 }
  0x51   :  { %p5510_p2 = por %p5509_p1, %p5508_p0 }
  0x53   :  { %p5511_p3 = pnand %p5510_p2, %p5504_p13 }
  0x55   :  { %5514 = shalt.err (!%p5511_p3)
}
  0x56   :  { %39 = dma.hbm_to_vmem [thread:$0]  %s7317_s25, 128, %s37_s26, [#allocation4]  }
  0x57   :  { %s5619_s21 = smov [#allocation7]   ;;  %s5620_s30 = smov [#allocation10]  }
  0x58   :  { %s60_s6 = sshll.u32 %s5619_s21, 4  ;;  %s83_s22 = sshll.u32 %s5620_s30, 4  ;;  %s61_s6 = int_to_ptr.vmem [resolvable:$true] %s60_s6  ;;  %s5822_s22 = int_to_ptr.vmem [resolvable:$true] %s83_s22 }
  0x59   :  { %s5515_s27 = scalar_lea.hbm %s7147_s5, 128 }
  0x5a   :  { %p5516_p4 = scmp.ne.s32.totalorder %s7147_s5, %s5515_s27  ;;  %p5519_p5 = scmp.lt.u32.totalorder %s5515_s27, %s7147_s5 }
  0x5c   :  { %p5521_p6 = pnand %p5519_p5, %p5516_p4 }
  0x5e   :  { %5524 = shalt.err (!%p5521_p6)
}
  0x5f   :  { %s5525_s26 = scalar_lea.vmem %s61_s6, 128  ;;  %p5530_p8 = scmp.lt.s32.totalorder %s61_s6, %s61_s6 }
  0x60   :  { %p5526_p7 = scmp.ne.s32.totalorder %s61_s6, %s5525_s26  ;;  %p5531_p9 = scmp.lt.s32.totalorder %s5525_s26, %s5525_s26 }
  0x62   :  { %p5532_p10 = por %p5531_p9, %p5530_p8 }
  0x64   :  { %p5533_p11 = pnand %p5532_p10, %p5526_p7 }
  0x66   :  { %5536 = shalt.err (!%p5533_p11)
}
  0x67   :  { %63 = dma.hbm_to_vmem [thread:$0]  %s7147_s5, 128, %s61_s6, [#allocation6]  }
  0x68   :  { %s5537_s21 = scalar_lea.hbm %s7150_s8, 1536 }
  0x69   :  { %p5538_p12 = scmp.ne.s32.totalorder %s7150_s8, %s5537_s21  ;;  %p5541_p13 = scmp.lt.u32.totalorder %s5537_s21, %s7150_s8 }
  0x6b   :  { %p5543_p0 = pnand %p5541_p13, %p5538_p12 }
  0x6d   :  { %5546 = shalt.err (!%p5543_p0)
}
  0x6e   :  { %s5547_s29 = scalar_lea.vmem %s5822_s22, 1536  ;;  %p5552_p2 = scmp.lt.s32.totalorder %s5822_s22, %s5822_s22 }
  0x6f   :  { %p5548_p1 = scmp.ne.s32.totalorder %s5822_s22, %s5547_s29  ;;  %p5553_p3 = scmp.lt.s32.totalorder %s5547_s29, %s5547_s29 }
  0x71   :  { %p5554_p4 = por %p5553_p3, %p5552_p2 }
  0x73   :  { %p5555_p5 = pnand %p5554_p4, %p5548_p1 }
  0x75   :  { %5558 = shalt.err (!%p5555_p5)
}
  0x76   :  { %89 = dma.hbm_to_vmem [thread:$0]  %s7150_s8, 1536, %s5822_s22, [#allocation9], %s5615_s3, %s5615_s3, %s5616_s28  }
  0x77   :  { %s5621_s0 = smov [#allocation13]   ;;  %s5622_s1 = smov [#allocation14]  }
  0x78   :  { %s111_s19 = sshll.u32 %s5621_s0, 4  ;;  %s130_s26 = sshll.u32 %s5622_s1, 4  ;;  %s112_s19 = int_to_ptr.vmem [resolvable:$true] %s111_s19  ;;  %s131_s26 = int_to_ptr.vmem [resolvable:$true] %s130_s26 }
  0x79   :  { %s5559_s10 = scalar_lea.hbm %s7154_s12, 1536 }
  0x7a   :  { %p5560_p6 = scmp.ne.s32.totalorder %s7154_s12, %s5559_s10  ;;  %p5563_p7 = scmp.lt.u32.totalorder %s5559_s10, %s7154_s12 }
  0x7c   :  { %p5565_p8 = pnand %p5563_p7, %p5560_p6 }
  0x7e   :  { %5568 = shalt.err (!%p5565_p8)
}
  0x7f   :  { %s5569_s8 = scalar_lea.vmem %s112_s19, 1536  ;;  %p5574_p10 = scmp.lt.s32.totalorder %s112_s19, %s112_s19 }
  0x80   :  { %p5570_p9 = scmp.ne.s32.totalorder %s112_s19, %s5569_s8  ;;  %p5575_p11 = scmp.lt.s32.totalorder %s5569_s8, %s5569_s8 }
  0x82   :  { %p5576_p12 = por %p5575_p11, %p5574_p10 }
  0x84   :  { %p5577_p13 = pnand %p5576_p12, %p5570_p9 }
  0x86   :  { %5580 = shalt.err (!%p5577_p13)
}
  0x87   :  { %117 = dma.hbm_to_vmem [thread:$0]  %s7154_s12, 1536, %s112_s19, [#allocation12], %s5615_s3, %s5615_s3, %s5616_s28  }
  0x88   :  { %s5581_s5 = scalar_lea.hbm %s7158_s16, 32 }
  0x89   :  { %p5582_p0 = scmp.ne.s32.totalorder %s7158_s16, %s5581_s5  ;;  %p5585_p1 = scmp.lt.u32.totalorder %s5581_s5, %s7158_s16 }
  0x8b   :  { %p5587_p2 = pnand %p5585_p1, %p5582_p0 }
  0x8d   :  { %5590 = shalt.err (!%p5587_p2)
}
  0x8e   :  { %s5591_s20 = scalar_lea.vmem %s131_s26, 32  ;;  %p5596_p4 = scmp.lt.s32.totalorder %s131_s26, %s131_s26 }
  0x8f   :  { %p5592_p3 = scmp.ne.s32.totalorder %s131_s26, %s5591_s20  ;;  %p5597_p5 = scmp.lt.s32.totalorder %s5591_s20, %s5591_s20 }
  0x91   :  { %p5598_p6 = por %p5597_p5, %p5596_p4 }
  0x93   :  { %p5599_p7 = pnand %p5598_p6, %p5592_p3 }
  0x95   :  { %5602 = shalt.err (!%p5599_p7)
}
  0x96   :  { %133 = dma.hbm_to_vmem [thread:$0]  %s7158_s16, 32, %s131_s26, [#allocation15]  }
  0x97   :  { %5603 = dma.done.wait [#allocation4], 128  }
  0x98   :  { %5604 = vsyncadd [#allocation4], 4294967168 }
  0x99   :  { %5605 = dma.done.wait [#allocation6], 256  }
  0x9a   :  { %5606 = vsyncadd [#allocation6], 4294967040 }
  0x9b   :  { %5607 = dma.done.wait [#allocation9], 3072  }
  0x9c   :  { %5608 = vsyncadd [#allocation9], 4294964224 }
  0x9d   :  { %5609 = dma.done.wait [#allocation12], 3072  }
  0x9e   :  { %5610 = vsyncadd [#allocation12], 4294964224 }
  0x9f   :  { %5611 = dma.done.wait [#allocation15], 32  }
  0xa0   :  { %5612 = vsyncadd [#allocation15], 4294967264  ;;  %v5623_v0 = vmov 0.0   ;;  %vm7201_vm0 = vmmov 0   ;;  %vm7200_vm1 = vcmask 64512   ;;  %s7318_s19 = sld [smem:[#allocation21_spill]]  ;;  %v160_v6 = vlaneseq }
  0xa1   :  { %4476 = vmatprep.subr.mxu0 %v5623_v0  ;;  %4478 = vmatprep.mubr.msk.f32.mxu0 %vm7201_vm0, %v5623_v0  ;;  %v327_v2 = vld [vmem:[#allocation3] sm:$0xff]  ;;  %s7260_s26 = smov 1   ;;  %s7258_s10 = smov 127   ;;  %vm7203_vm9 = vmmov 1   ;;  %v7332_v52 = vmov 0  ;;  %v7334_v58 = vmov 0 }
  0xa2   :  { %s7250_s24 = smov 19   ;;  %s7254_s21 = smov 3   ;;  %v161_v7 = vand.u32 127, %v160_v6 }
  0xa3   :  { %s7252_s30 = smov 18   ;;  %s7256_s2 = smov 2  }
  0xa4   :  { %s7246_s8 = smov 17   ;;  %s7244_s22 = smov 16   ;;  %v5984_v10 = vand.u32 63, %v161_v7 }
  0xa5   :  { %s7242_s23 = smov 15   ;;  %s7240_s27 = smov 126  }
  0xa6   :  { %v5889_v1 = vld [vmem:[%s7318_s19] sm:$0xff]  ;;  %s7238_s29 = smov 125   ;;  %s7236_s5 = smov 14   ;;  %v238_v11 = vadd.s32 4294967293, %v5984_v10  ;;  %v242_v12 = vadd.s32 4294967294, %v5984_v10  ;;  %v174_v13 = vadd.s32 4294967277, %v5984_v10 }
  0xa7   :  { %4477 = vmatpush3.msra.mxu0 %v5889_v1  ;;  %634 = vrot.lane.b32.xlu0 %v5889_v1, %s7260_s26  ;;  %s7234_s6 = smov 13   ;;  %s7178_s0 = smov 124   ;;  %v178_v14 = vadd.s32 4294967278, %v5984_v10  ;;  %v5991_v17 = vadd.s32 4294967295, %v5984_v10  ;;  %v182_v24 = vadd.s32 4294967279, %v5984_v10  ;;  %v186_v25 = vadd.s32 4294967280, %v5984_v10 }
  0xa8   :  { %4479 = vmatmul.mubr.msk.f32.vlgmr.msra.gmra.mrb[0].mxu0 %vm7200_vm1, %v327_v2  ;;  %631 = vrot.lane.b32.xlu1 %v5889_v1, %s7258_s10  ;;  %s7176_s1 = smov 123   ;;  %s7164_s25 = smov 12   ;;  %vm239_vm2 = vcmp.ge.s32.totalorder %v238_v11, 0  ;;  %vm243_vm3 = vcmp.ge.s32.totalorder %v242_v12, 0  ;;  %vm175_vm4 = vcmp.ge.s32.totalorder %v174_v13, 0  ;;  %v254_v30 = vadd.s32 2, %v5984_v10 }
  0xa9   :  { %4511 = vmatprep.mubr.msk.f32.mxu0 %vm7201_vm0, %v5623_v0  ;;  %s7166_s20 = smov 11   ;;  %s7168_s12 = smov 122   ;;  %vm179_vm5 = vcmp.ge.s32.totalorder %v178_v14, 0  ;;  %vm5993_vm6 = vmpackc.low %vm243_vm3, %vm239_vm2  ;;  %vm7205_vm8 = vcmp.ge.s32.totalorder %v5991_v17, 0  ;;  %vm183_vm11 = vcmp.ge.s32.totalorder %v182_v24, 0  ;;  %vm187_vm12 = vcmp.ge.s32.totalorder %v186_v25, 0 }
  0xaa   :  { %s7170_s3 = smov 121   ;;  %s7172_s28 = smov 10   ;;  %vm5997_vm7 = vmpackc.low %vm179_vm5, %vm175_vm4  ;;  %v6018_v31 = vadd.s32 1, %v5984_v10  ;;  %v190_v35 = vadd.s32 4294967281, %v5984_v10  ;;  %vm256_vm14 = vcmp.lt.s32.totalorder %v254_v30, 64  ;;  %v194_v37 = vadd.s32 4294967282, %v5984_v10 }
  0xab   :  { %s7174_s16 = smov 9   ;;  %vm6011_vm10 = vmpackc.low %vm7203_vm9, %vm7205_vm8  ;;  %v258_v42 = vadd.s32 3, %v5984_v10  ;;  %v262_v43 = vadd.s32 4, %v5984_v10  ;;  %v198_v47 = vadd.s32 4294967283, %v5984_v10  ;;  %v202_v49 = vadd.s32 4294967284, %v5984_v10  ;;  %s7382_s18 = smov 117  }
  0xac   :  { %vm6022_vm13 = vmpackc.low %vm187_vm12, %vm183_vm11  ;;  %vm7204_vm15 = vcmp.lt.s32.totalorder %v6018_v31, 64  ;;  %vm191_vm3 = vcmp.ge.s32.totalorder %v190_v35, 0  ;;  %vm195_vm4 = vcmp.ge.s32.totalorder %v194_v37, 0  ;;  %v266_v54 = vadd.s32 5, %v5984_v10  ;;  %s7383_s17 = smov 4   ;;  %s7384_s15 = smov 111  }
  0xad   :  { %vm6033_vm2 = vmpackc.low %vm256_vm14, %vm7204_vm15  ;;  %vm260_vm11 = vcmp.lt.s32.totalorder %v258_v42, 64  ;;  %vm264_vm12 = vcmp.lt.s32.totalorder %v262_v43, 64  ;;  %v270_v55 = vadd.s32 6, %v5984_v10  ;;  %v206_v59 = vadd.s32 4294967285, %v5984_v10  ;;  %s7385_s14 = smov 1   ;;  %s7386_s11 = smov 5  }
  0xae   :  { %vm6041_vm5 = vmpackc.low %vm195_vm4, %vm191_vm3  ;;  %vm199_vm3 = vcmp.ge.s32.totalorder %v198_v47, 0  ;;  %vm203_vm4 = vcmp.ge.s32.totalorder %v202_v49, 0  ;;  %v210_v61 = vadd.s32 4294967286, %v5984_v10  ;;  %v7336_v2 = vmov 0  ;;  %s7387_s9 = smov 127   ;;  %s7388_s7 = smov 109  }
  0xaf   :  { %vm6049_vm14 = vmpackc.low %vm264_vm12, %vm260_vm11  ;;  %vm268_vm11 = vcmp.lt.s32.totalorder %v266_v54, 64  ;;  %vm272_vm12 = vcmp.lt.s32.totalorder %v270_v55, 64  ;;  %v7338_v11 = vmov 0  ;;  %v214_v12 = vadd.s32 4294967287, %v5984_v10  ;;  %s7412_s13 = smov 19   ;;  %s7413_s19 = smov 17  }
  0xb0   :  { %v7333_v52 = vsel %vm6049_vm14, 4294967295, %v7332_v52  ;;  %vm6057_vm1 = vmpackc.low %vm203_vm4, %vm199_vm3  ;;  %vm207_vm3 = vcmp.ge.s32.totalorder %v206_v59, 0  ;;  %vm211_vm4 = vcmp.ge.s32.totalorder %v210_v61, 0  ;;  %v218_v14 = vadd.s32 4294967288, %v5984_v10 }
  0xb1   :  { %v7335_v58 = vsel %vm6057_vm1, 4294967295, %v7334_v58  ;;  %vm6065_vm0 = vmpackc.low %vm272_vm12, %vm268_vm11  ;;  %v226_v30 = vadd.s32 4294967290, %v5984_v10  ;;  %v7344_v35 = vmov 0  ;;  %v290_v37 = vadd.s32 11, %v5984_v10 }
  0xb2   :  { %v7337_v2 = vsel %vm6065_vm0, 4294967295, %v7336_v2  ;;  %vm6073_vm9 = vmpackc.low %vm211_vm4, %vm207_vm3  ;;  %vm215_vm3 = vcmp.ge.s32.totalorder %v214_v12, 0  ;;  %vm219_vm4 = vcmp.ge.s32.totalorder %v218_v14, 0  ;;  %v7346_v42 = vmov 0 }
  0xb3   :  { %v7339_v11 = vsel %vm6073_vm9, 4294967295, %v7338_v11  ;;  %vm6089_vm8 = vmpackc.low %vm219_vm4, %vm215_vm3  ;;  %vm227_vm4 = vcmp.ge.s32.totalorder %v226_v30, 0  ;;  %v230_v43 = vadd.s32 4294967291, %v5984_v10  ;;  %v7348_v49 = vmov 0 }
  0xb4   :  { %v322_v14 = vadd.s32 19, %v5984_v10 }
 0x119   :  { %v5980_v8 = vpop.permute.xlu0 %634 }
 0x11a   :  { %v5982_v9 = vpop.permute.xlu1 %631 }
 0x17b   :  { %v5899_v3 = vpop.f32.mrb[0].mxu0 }
 0x17c   :  { %402 = vrot.lane.b32.xlu1 %v5899_v3, %s7250_s24  ;;  %498 = vrot.lane.b32.xlu0 %v5899_v3, %s7254_s21  ;;  %v4480_v4 = vpop.f32.mrb[1].mxu0 }
 0x17d   :  { %v274_v4 = vadd.s32 7, %v5984_v10 }
 0x17f   :  { %vm276_vm11 = vcmp.lt.s32.totalorder %v274_v4, 64 }
 0x180   :  { %408 = vrot.lane.b32.xlu1 %v5899_v3, %s7252_s30  ;;  %504 = vrot.lane.b32.xlu0 %v5899_v3, %s7256_s2 }
 0x184   :  { %414 = vrot.lane.b32.xlu1 %v5899_v3, %s7246_s8  ;;  %510 = vrot.lane.b32.xlu0 %v5899_v3, %s7260_s26 }
 0x188   :  { %517 = vrot.lane.b32.xlu1 %v5899_v3, %s7258_s10  ;;  %420 = vrot.lane.b32.xlu0 %v5899_v3, %s7244_s22 }
 0x18c   :  { %426 = vrot.lane.b32.xlu1 %v5899_v3, %s7242_s23  ;;  %523 = vrot.lane.b32.xlu0 %v5899_v3, %s7240_s27 }
 0x190   :  { %529 = vrot.lane.b32.xlu1 %v5899_v3, %s7238_s29  ;;  %432 = vrot.lane.b32.xlu0 %v5899_v3, %s7236_s5 }
 0x194   :  { %438 = vrot.lane.b32.xlu1 %v5899_v3, %s7234_s6  ;;  %535 = vrot.lane.b32.xlu0 %v5899_v3, %s7178_s0  ;;  %s7319_s0 = sld [smem:[#allocation23_spill]] }
 0x198   :  { %541 = vrot.lane.b32.xlu1 %v5899_v3, %s7176_s1  ;;  %444 = vrot.lane.b32.xlu0 %v5899_v3, %s7164_s25  ;;  %s7180_s25 = smov 120   ;;  %s7198_s1 = smov 4  }
 0x19a   :  { %v641_v5 = vld [vmem:[%s7319_s0 + $0x8] sm:$0xff]  ;;  %v640_v61 = vld [vmem:[%s7319_s0] sm:$0xff] }
 0x19b   :  { %769 = vmatprep.mubr.f32.mxu1 %v641_v5  ;;  %v278_v5 = vadd.s32 8, %v5984_v10  ;;  %v644_v4 = vld [vmem:[%s7319_s0 + $0x20] sm:$0xff] }
 0x19c   :  { %450 = vrot.lane.b32.xlu1 %v5899_v3, %s7166_s20  ;;  %547 = vrot.lane.b32.xlu0 %v5899_v3, %s7168_s12  ;;  %s7182_s20 = smov 119   ;;  %s7184_s12 = smov 8  }
 0x19d   :  { %vm280_vm12 = vcmp.lt.s32.totalorder %v278_v5, 64 }
 0x19e   :  { %vm6081_vm15 = vmpackc.low %vm280_vm12, %vm276_vm11 }
 0x1a0   :  { %553 = vrot.lane.b32.xlu1 %v5899_v3, %s7170_s3  ;;  %456 = vrot.lane.b32.xlu0 %v5899_v3, %s7172_s28  ;;  %s7186_s3 = smov 7   ;;  %s7188_s28 = smov 118  }
 0x1a4   :  { %462 = vrot.lane.b32.xlu1 %v5899_v3, %s7174_s16  ;;  %559 = vrot.lane.b32.xlu0 %v5899_v3, %s7180_s25  ;;  %s7190_s25 = smov 117   ;;  %s7230_s16 = smov 113  }
 0x1a8   :  { %565 = vrot.lane.b32.xlu1 %v5899_v3, %s7182_s20  ;;  %468 = vrot.lane.b32.xlu0 %v5899_v3, %s7184_s12  ;;  %s7194_s20 = smov 6   ;;  %s7192_s12 = smov 5  }
 0x1ac   :  { %474 = vrot.lane.b32.xlu1 %v5899_v3, %s7186_s3  ;;  %571 = vrot.lane.b32.xlu0 %v5899_v3, %s7188_s28  ;;  %s7196_s3 = smov 116   ;;  %s7248_s28 = smov 115  }
 0x1b0   :  { %577 = vrot.lane.b32.xlu1 %v5899_v3, %s7190_s25  ;;  %480 = vrot.lane.b32.xlu0 %v5899_v3, %s7194_s20  ;;  %s7232_s25 = smov 114   ;;  %s7220_s20 = smov 112  }
 0x1b4   :  { %486 = vrot.lane.b32.xlu1 %v5899_v3, %s7192_s12  ;;  %583 = vrot.lane.b32.xlu0 %v5899_v3, %s7196_s3  ;;  %s7216_s12 = smov 111   ;;  %s7214_s3 = smov 109  }
 0x1b8   :  { %589 = vrot.lane.b32.xlu1 %v5899_v3, %s7248_s28  ;;  %492 = vrot.lane.b32.xlu0 %v5899_v3, %s7198_s1  ;;  %s7218_s1 = smov 110  }
 0x1bc   :  { %601 = vrot.lane.b32.xlu1 %v5899_v3, %s7230_s16  ;;  %595 = vrot.lane.b32.xlu0 %v5899_v3, %s7232_s25  ;;  %s7364_s25 = smov 123   ;;  %s7365_s16 = smov 12  }
 0x1c0   :  { %613 = vrot.lane.b32.xlu1 %v5899_v3, %s7216_s12  ;;  %607 = vrot.lane.b32.xlu0 %v5899_v3, %s7220_s20  ;;  %s7366_s20 = smov 11   ;;  %s7367_s12 = smov 122  }
 0x1c4   :  { %625 = vrot.lane.b32.xlu1 %v5899_v3, %s7214_s3  ;;  %619 = vrot.lane.b32.xlu0 %v5899_v3, %s7218_s1  ;;  %s7368_s3 = smov 121   ;;  %s7369_s1 = smov 10  }
 0x1ee   :  { %v403_v15 = vpop.permute.xlu1 %402  ;;  %v499_v16 = vpop.permute.xlu0 %498 }
 0x1f2   :  { %v409_v18 = vpop.permute.xlu1 %408  ;;  %v505_v19 = vpop.permute.xlu0 %504 }
 0x1f3   :  { %v4769_v21 = vpack.c.bf16 %v409_v18, %v403_v15  ;;  %v4766_v22 = vpack.c.bf16 %v505_v19, %v499_v16  ;;  %v7340_v18 = vmov 0 }
 0x1f4   :  { %v7341_v18 = vsel %vm6081_vm15, 4294967295, %v7340_v18 }
 0x1f5   :  { %4768 = vmatprep.subr.msk.bf16.mxu1 %vm5993_vm6, %v4766_v22  ;;  %v286_v22 = vadd.s32 10, %v5984_v10 }
 0x1f6   :  { %v415_v26 = vpop.permute.xlu1 %414  ;;  %4771 = vmatpush3.bf16.msk.msra.mxu1 %vm5997_vm7, %v4769_v21  ;;  %v511_v27 = vpop.permute.xlu0 %510  ;;  %v282_v21 = vadd.s32 9, %v5984_v10 }
 0x1f7   :  { %v4772_v29 = vpack.c.bf16 %v5899_v3, %v511_v27  ;;  %v222_v27 = vadd.s32 4294967289, %v5984_v10  ;;  %vm288_vm12 = vcmp.lt.s32.totalorder %v286_v22, 64  ;;  %v646_v22 = vld [vmem:[%s7319_s0 + $0x30] sm:$0xff] }
 0x1f8   :  { %vm284_vm11 = vcmp.lt.s32.totalorder %v282_v21, 64 }
 0x1f9   :  { %4774 = vmatprep.subr.msk.bf16.mxu1 %vm6011_vm10, %v4772_v29  ;;  %vm223_vm3 = vcmp.ge.s32.totalorder %v222_v27, 0 }
 0x1fa   :  { %v518_v32 = vpop.permute.xlu1 %517  ;;  %v421_v33 = vpop.permute.xlu0 %420 }
 0x1fb   :  { %v4775_v36 = vpack.c.bf16 %v421_v33, %v415_v26  ;;  %v7342_v26 = vmov 0 }
 0x1fc   :  { %v7343_v26 = vsel %vm6089_vm8, 4294967295, %v7342_v26 }
 0x1fd   :  { %4777 = vmatpush3.bf16.msk.msra.mxu1 %vm6022_vm13, %v4775_v36 }
 0x1fe   :  { %v427_v38 = vpop.permute.xlu1 %426  ;;  %v524_v39 = vpop.permute.xlu0 %523 }
 0x1ff   :  { %v4778_v41 = vpack.c.bf16 %v524_v39, %v518_v32 }
 0x201   :  { %4780 = vmatprep.subr.msk.bf16.mxu1 %vm6033_vm2, %v4778_v41 }
 0x202   :  { %v530_v44 = vpop.permute.xlu1 %529  ;;  %v433_v45 = vpop.permute.xlu0 %432 }
 0x203   :  { %v4781_v48 = vpack.c.bf16 %v433_v45, %v427_v38  ;;  %v294_v38 = vadd.s32 12, %v5984_v10  ;;  %v234_v45 = vadd.s32 4294967292, %v5984_v10 }
 0x205   :  { %4783 = vmatpush3.bf16.msk.msra.mxu1 %vm6041_vm5, %v4781_v48 }
 0x206   :  { %v439_v50 = vpop.permute.xlu1 %438  ;;  %v536_v51 = vpop.permute.xlu0 %535 }
 0x207   :  { %v4784_v53 = vpack.c.bf16 %v536_v51, %v530_v44  ;;  %v298_v51 = vadd.s32 13, %v5984_v10 }
 0x209   :  { %4786 = vmatprep.subr.msk.bf16.mxu1 %vm6049_vm14, %v4784_v53  ;;  %v302_v53 = vadd.s32 14, %v5984_v10 }
 0x20a   :  { %v542_v56 = vpop.permute.xlu1 %541  ;;  %v445_v57 = vpop.permute.xlu0 %444 }
 0x20b   :  { %v4787_v60 = vpack.c.bf16 %v445_v57, %v439_v50  ;;  %v306_v57 = vadd.s32 15, %v5984_v10 }
 0x20d   :  { %4789 = vmatpush3.bf16.msk.msra.mxu1 %vm6057_vm1, %v4787_v60  ;;  %v310_v60 = vadd.s32 16, %v5984_v10 }
 0x20e   :  { %v451_v62 = vpop.permute.xlu1 %450  ;;  %v548_v63 = vpop.permute.xlu0 %547 }
 0x20f   :  { %v4790_v3 = vpack.c.bf16 %v548_v63, %v542_v56  ;;  %v7350_v56 = vmov 0 }
 0x211   :  { %4792 = vmatprep.subr.msk.bf16.mxu1 %vm6065_vm0, %v4790_v3  ;;  %v7352_v3 = vmov 0 }
 0x212   :  { %v554_v6 = vpop.permute.xlu1 %553  ;;  %v457_v7 = vpop.permute.xlu0 %456 }
 0x213   :  { %v4793_v13 = vpack.c.bf16 %v457_v7, %v451_v62  ;;  %v318_v7 = vadd.s32 18, %v5984_v10 }
 0x215   :  { %4795 = vmatpush3.bf16.msk.msra.mxu1 %vm6073_vm9, %v4793_v13  ;;  %vm6097_vm9 = vmpackc.low %vm288_vm12, %vm284_vm11  ;;  %vm292_vm11 = vcmp.lt.s32.totalorder %v290_v37, 64  ;;  %vm296_vm12 = vcmp.lt.s32.totalorder %v294_v38, 64  ;;  %v649_v37 = vld [vmem:[%s7319_s0 + $0x48] sm:$0xff] }
 0x216   :  { %v463_v15 = vpop.permute.xlu1 %462  ;;  %v560_v16 = vpop.permute.xlu0 %559  ;;  %v7345_v35 = vsel %vm6097_vm9, 4294967295, %v7344_v35  ;;  %v645_v38 = vld [vmem:[%s7319_s0 + $0x28] sm:$0xff] }
 0x217   :  { %v4796_v19 = vpack.c.bf16 %v560_v16, %v554_v6  ;;  %v314_v6 = vadd.s32 17, %v5984_v10 }
 0x219   :  { %4798 = vmatprep.subr.msk.bf16.mxu1 %vm6081_vm15, %v4796_v19  ;;  %vm6105_vm15 = vmpackc.low %vm227_vm4, %vm223_vm3  ;;  %vm231_vm3 = vcmp.ge.s32.totalorder %v230_v43, 0  ;;  %vm235_vm4 = vcmp.ge.s32.totalorder %v234_v45, 0  ;;  %v7356_v19 = vmov 0  ;;  %v5664_v43 = vmov 0.0|0.0  }
 0x21a   :  { %v566_v24 = vpop.permute.xlu1 %565  ;;  %v469_v25 = vpop.permute.xlu0 %468  ;;  %v7347_v42 = vsel %vm6105_vm15, 4294967295, %v7346_v42  ;;  %4838 = vmatprep.subr.bf16.mxu0 %v5664_v43 }
 0x21b   :  { %v4799_v29 = vpack.c.bf16 %v469_v25, %v463_v15  ;;  %v643_v15 = vld [vmem:[%s7319_s0 + $0x18] sm:$0xff] }
 0x21d   :  { %4801 = vmatpush3.bf16.msk.msra.mxu1 %vm6089_vm8, %v4799_v29  ;;  %vm6113_vm8 = vmpackc.low %vm296_vm12, %vm292_vm11  ;;  %vm300_vm11 = vcmp.lt.s32.totalorder %v298_v51, 64  ;;  %vm304_vm12 = vcmp.lt.s32.totalorder %v302_v53, 64  ;;  %v650_v29 = vld [vmem:[%s7319_s0 + $0x50] sm:$0xff] }
 0x21e   :  { %v475_v32 = vpop.permute.xlu1 %474  ;;  %v572_v33 = vpop.permute.xlu0 %571  ;;  %v7349_v49 = vsel %vm6113_vm8, 4294967295, %v7348_v49 }
 0x21f   :  { %v4802_v36 = vpack.c.bf16 %v572_v33, %v566_v24  ;;  %v7361_v33 = vmov 0 }
 0x221   :  { %4804 = vmatprep.subr.msk.bf16.mxu1 %vm6097_vm9, %v4802_v36  ;;  %vm6121_vm9 = vmpackc.low %vm235_vm4, %vm231_vm3  ;;  %vm308_vm4 = vcmp.lt.s32.totalorder %v306_v57, 64 }
 0x222   :  { %v578_v39 = vpop.permute.xlu1 %577  ;;  %v481_v41 = vpop.permute.xlu0 %480  ;;  %v7351_v56 = vsel %vm6121_vm9, 4294967295, %v7350_v56  ;;  %vm6132_vm3 = vmpackc.low %vm304_vm12, %vm300_vm11  ;;  %vm7355_vm11 = vcmp.lt.s32.totalorder %v6018_v31, 64  ;;  %vm316_vm12 = vcmp.lt.s32.totalorder %v314_v6, 64 }
 0x223   :  { %v4805_v44 = vpack.c.bf16 %v481_v41, %v475_v32  ;;  %v7353_v3 = vsel %vm6132_vm3, 4294967295, %v7352_v3  ;;  %v633_v13 = vsel %vm7355_vm11, %v5982_v9, -inf  ;;  %v647_v9 = vld [vmem:[%s7319_s0 + $0x38] sm:$0xff]  ;;  %vm320_vm11 = vcmp.lt.s32.totalorder %v318_v7, 64 }
 0x224   :  { %v651_v41 = vld [vmem:[%s7319_s0 + $0x58] sm:$0xff] }
 0x225   :  { %4807 = vmatpush3.bf16.msk.msra.mxu1 %vm6105_vm15, %v4805_v44  ;;  %vm324_vm15 = vcmp.lt.s32.totalorder %v322_v14, 64 }
 0x226   :  { %v487_v47 = vpop.permute.xlu1 %486  ;;  %v584_v48 = vpop.permute.xlu0 %583 }
 0x227   :  { %v4808_v50 = vpack.c.bf16 %v584_v48, %v578_v39  ;;  %v648_v39 = vld [vmem:[%s7319_s0 + $0x40] sm:$0xff] }
 0x229   :  { %4810 = vmatprep.subr.msk.bf16.mxu1 %vm6113_vm8, %v4808_v50  ;;  %vm312_vm8 = vcmp.lt.s32.totalorder %v310_v60, 64 }
 0x22a   :  { %v590_v54 = vpop.permute.xlu1 %589  ;;  %v493_v55 = vpop.permute.xlu0 %492 }
 0x22b   :  { %v4811_v59 = vpack.c.bf16 %v493_v55, %v487_v47 }
 0x22d   :  { %4813 = vmatpush3.bf16.msk.msra.mxu1 %vm6121_vm9, %v4811_v59  ;;  %vm7354_vm9 = vcmp.ge.s32.totalorder %v5991_v17, 0 }
 0x22e   :  { %v602_v62 = vpop.permute.xlu1 %601  ;;  %v596_v63 = vpop.permute.xlu0 %595  ;;  %v636_v12 = vsel %vm7354_vm9, %v5980_v8, -inf  ;;  %vm6156_vm9 = vmpackc.low %vm312_vm8, %vm308_vm4  ;;  %vm7360_vm4 = vmmov 1  }
 0x22f   :  { %v4814_v5 = vpack.c.bf16 %v596_v63, %v590_v54  ;;  %v7357_v19 = vsel %vm6156_vm9, 4294967295, %v7356_v19  ;;  %v637_v10 = vmax.f32 %v633_v13, %v636_v12  ;;  %vm6170_vm8 = vmpackc.low %vm320_vm11, %vm316_vm12  ;;  %vm7264_vm12 = vcmask 261120  }
 0x230   :  { %770 = vmatmul.mubr.f32.vlgmr.msra.gmra.mrb[0].mxu1 %v640_v61  ;;  %vm7265_vm11 = vcmask 719872  }
 0x231   :  { %4816 = vmatprep.subr.msk.bf16.mxu1 %vm6132_vm3, %v4814_v5  ;;  %774 = vmatprep.mubr.f32.mxu1 %v644_v4  ;;  %v638_v30 = vmax.f32 %v5889_v1, %v637_v10  ;;  %v642_v1 = vld [vmem:[%s7319_s0 + $0x10] sm:$0xff]  ;;  %s7363_s0 = smov 124  }
 0x232   :  { %v614_v16 = vpop.permute.xlu1 %613  ;;  %4819 = vmatpush3.bf16.msk.msra.mxu1 %vm6132_vm3, %v4814_v5  ;;  %v608_v8 = vpop.permute.xlu0 %607  ;;  %vm6179_vm3 = vmpackc.low %vm7360_vm4, %vm324_vm15  ;;  %vm692_vm15 = vcmask 523264   ;;  %vm7389_vm4 = vnez %v7339_v11 }
 0x233   :  { %v4820_v21 = vpack.c.bf16 %v608_v8, %v602_v62  ;;  %v7362_v33 = vsel %vm6179_vm3, 4294967295, %v7361_v33 }
 0x234   :  { %775 = vmatmul.mubr.f32.gmra.mrb[2].mxu1 %v643_v15 }
 0x235   :  { %4822 = vmatprep.subr.msk.bf16.mxu1 %vm6156_vm9, %v4820_v21  ;;  %779 = vmatprep.mubr.f32.mxu1 %v647_v9 }
 0x236   :  { %v626_v24 = vpop.permute.xlu1 %625  ;;  %4825 = vmatpush3.bf16.msk.msra.mxu1 %vm6156_vm9, %v4820_v21  ;;  %v620_v25 = vpop.permute.xlu0 %619 }
 0x237   :  { %v4826_v32 = vpack.c.bf16 %v620_v25, %v614_v16  ;;  %v4832_v36 = vpack.c.bf16 %v638_v30, %v626_v24  ;;  %v1144_v30 = vld [vmem:[%s7146_s4 + $0x8] sm:$0xff] }
 0x238   :  { %780 = vmatmul.mubr.f32.gmra.mrb[4].mxu1 %v646_v22  ;;  %v879_v22 = vld [vmem:[#allocation5] sm:$0xff] }
 0x239   :  { %4828 = vmatprep.subr.msk.bf16.mxu1 %vm6170_vm8, %v4826_v32  ;;  %784 = vmatprep.mubr.f32.mxu1 %v650_v29 }
 0x23a   :  { %4831 = vmatpush3.bf16.msk.msra.mxu1 %vm6170_vm8, %v4826_v32  ;;  %v1145_v32 = vld [vmem:[%s7146_s4 + $0x10] sm:$0xff] }
 0x23b   :  { %4834 = vmatprep.subr.msk.bf16.mxu1 %vm6179_vm3, %v4832_v36 }
 0x23c   :  { %785 = vmatmul.mubr.f32.gmra.mrb[6].mxu1 %v649_v37 }
 0x23d   :  { %4497 = vmatprep.mubr.msk.f32.mxu1 %vm692_vm15, %v642_v1 }
 0x23e   :  { %4837 = vmatpush3.bf16.msk.msra.mxu1 %vm6179_vm3, %v4832_v36 }
 0x241   :  { %4498 = vmatmul.mubr.msk.f32.vlgmr.msra.gmra.mrb[8].mxu1 %vm692_vm15, %v645_v38 }
 0x242   :  { %4500 = vmatprep.mubr.msk.f32.mxu1 %vm692_vm15, %v648_v39 }
 0x245   :  { %4501 = vmatmul.mubr.msk.f32.gmra.mrb[10].mxu1 %vm692_vm15, %v651_v41  ;;  %vm7390_vm15 = vnez %v7341_v18 }
 0x246   :  { %4536 = vmatprep.mubr.msk.f32.mxu1 %vm7265_vm11, %v1145_v32  ;;  %vm7392_vm11 = vnez %v7343_v26 }
 0x303   :  { %v4097_v44 = vpop.f32.mrb[0].mxu1 }
 0x304   :  { %v4098_v45 = vpop.f32.mrb[1].mxu1 }
 0x305   :  { %v4099_v47 = vadd.f32 %v4098_v45, %v4097_v44 }
 0x307   :  { %v4100_v48 = vpop.f32.mrb[2].mxu1 }
 0x308   :  { %v4101_v50 = vpop.f32.mrb[3].mxu1 }
 0x309   :  { %v4102_v51 = vadd.f32 %v4101_v50, %v4100_v48 }
 0x30b   :  { %v4103_v53 = vpop.f32.mrb[4].mxu1 }
 0x30c   :  { %v4104_v54 = vpop.f32.mrb[5].mxu1 }
 0x30d   :  { %v4105_v55 = vadd.f32 %v4104_v54, %v4103_v53 }
 0x30f   :  { %v4106_v57 = vpop.f32.mrb[6].mxu1 }
 0x310   :  { %v4107_v59 = vpop.f32.mrb[7].mxu1 }
 0x311   :  { %v4108_v60 = vadd.f32 %v4107_v59, %v4106_v57 }
 0x314   :  { %v4499_v61 = vpop.f32.mrb[8].mxu1 }
 0x315   :  { %v862_v62 = vadd.f32 %v4499_v61, %v4102_v51  ;;  %v856_v63 = vpop.f32.mrb[9].mxu1 }
 0x316   :  { %v857_v4 = vadd.f32 %v4099_v47, %v856_v63 }
 0x317   :  { %v6207_v5 = vmax.f32 %v862_v62, 0.0 }
 0x318   :  { %v6209_v6 = vmax.f32 %v857_v4, 0.0  ;;  %v4502_v7 = vpop.f32.mrb[10].mxu1 }
 0x319   :  { %v872_v12 = vadd.f32 %v4502_v7, %v4108_v60  ;;  %v866_v13 = vpop.f32.mrb[11].mxu1 }
 0x31a   :  { %v867_v14 = vadd.f32 %v4105_v55, %v866_v13  ;;  %v5339_v15 = vpack.i.bf16 %v6207_v5, %v6209_v6  ;;  %v4839_v16 = vpack.c.bf16 %v6207_v5, %v6209_v6 }
 0x31b   :  { %v6215_v8 = vmax.f32 %v872_v12, 0.0 }
 0x31c   :  { %v6217_v9 = vmax.f32 %v867_v14, 0.0  ;;  %5340 = vrot.lane.b32.xlu1 %v5339_v15, %s7260_s26  ;;  %4840 = vmatpush3.bf16.msra.mxu0 %v4839_v16 }
 0x31d   :  { %4841 = vmatprep.subr.bf16.mxu0 %v5664_v43 }
 0x31e   :  { %v5344_v10 = vpack.i.bf16 %v6217_v9, %v6207_v5  ;;  %v4842_v21 = vpack.c.bf16 %v6215_v8, %v6217_v9 }
 0x320   :  { %5345 = vrot.lane.b32.xlu0 %v5344_v10, %s7258_s10  ;;  %4843 = vmatpush3.bf16.msra.mxu0 %v4842_v21 }
 0x323   :  { %4512 = vmatmul.mubr.msk.f32.vlgmr.msra.gmra.mrb[2].mxu0 %vm7264_vm12, %v879_v22  ;;  %vm7391_vm12 = vnez %v7353_v3 }
 0x324   :  { %1275 = vmatprep.mubr.f32.mxu0 %v1144_v30 }
 0x38e   :  { %v6319_v36 = vpop.permute.xlu1 %5340 }
 0x392   :  { %v6321_v37 = vpop.permute.xlu0 %5345 }
 0x3f6   :  { %v6227_v24 = vpop.f32.mrb[2].mxu0 }
 0x3f7   :  { %1022 = vrot.lane.b32.xlu1 %v6227_v24, %s7256_s2  ;;  %1018 = vrot.lane.b32.xlu0 %v6227_v24, %s7254_s21  ;;  %v4513_v25 = vpop.f32.mrb[3].mxu0  ;;  %v5349_v29 = vpack.i.bf16 %v6209_v6, %v6227_v24  ;;  %s7380_s21 = smov 6   ;;  %s7415_s2 = smov 15  }
 0x3fb   :  { %958 = vrot.lane.b32.xlu1 %v6227_v24, %s7252_s30  ;;  %954 = vrot.lane.b32.xlu0 %v6227_v24, %s7250_s24  ;;  %s7378_s24 = smov 112   ;;  %s7379_s30 = smov 116  }
 0x3ff   :  { %962 = vrot.lane.b32.xlu1 %v6227_v24, %s7246_s8  ;;  %1026 = vrot.lane.b32.xlu0 %v6227_v24, %s7260_s26  ;;  %s7376_s8 = smov 118   ;;  %s7381_s26 = smov 110  }
 0x403   :  { %5350 = vrot.lane.b32.xlu1 %v5349_v29, %s7258_s10  ;;  %966 = vrot.lane.b32.xlu0 %v6227_v24, %s7244_s22  ;;  %s7375_s22 = smov 113   ;;  %s7416_s10 = smov 126  }
 0x407   :  { %970 = vrot.lane.b32.xlu1 %v6227_v24, %s7242_s23  ;;  %1035 = vrot.lane.b32.xlu0 %v6227_v24, %s7240_s27  ;;  %s7373_s27 = smov 119   ;;  %s7374_s23 = smov 8  }
 0x40b   :  { %1039 = vrot.lane.b32.xlu1 %v6227_v24, %s7238_s29  ;;  %974 = vrot.lane.b32.xlu0 %v6227_v24, %s7236_s5  ;;  %s7371_s5 = smov 9   ;;  %s7372_s29 = smov 114  }
 0x40f   :  { %978 = vrot.lane.b32.xlu1 %v6227_v24, %s7234_s6  ;;  %1043 = vrot.lane.b32.xlu0 %v6227_v24, %s7363_s0  ;;  %s7370_s6 = smov 120  }
 0x413   :  { %1047 = vrot.lane.b32.xlu1 %v6227_v24, %s7364_s25  ;;  %982 = vrot.lane.b32.xlu0 %v6227_v24, %s7365_s16 }
 0x417   :  { %986 = vrot.lane.b32.xlu1 %v6227_v24, %s7366_s20  ;;  %1051 = vrot.lane.b32.xlu0 %v6227_v24, %s7367_s12 }
 0x41b   :  { %1055 = vrot.lane.b32.xlu1 %v6227_v24, %s7368_s3  ;;  %990 = vrot.lane.b32.xlu0 %v6227_v24, %s7369_s1 }
 0x41f   :  { %1079 = vrot.lane.b32.xlu1 %v6227_v24, %s7248_s28  ;;  %1059 = vrot.lane.b32.xlu0 %v6227_v24, %s7370_s6  ;;  %s7377_s28 = smov 7  }
 0x423   :  { %994 = vrot.lane.b32.xlu1 %v6227_v24, %s7371_s5  ;;  %1083 = vrot.lane.b32.xlu0 %v6227_v24, %s7372_s29 }
 0x427   :  { %1063 = vrot.lane.b32.xlu1 %v6227_v24, %s7373_s27  ;;  %998 = vrot.lane.b32.xlu0 %v6227_v24, %s7374_s23 }
 0x42b   :  { %1087 = vrot.lane.b32.xlu1 %v6227_v24, %s7375_s22  ;;  %1067 = vrot.lane.b32.xlu0 %v6227_v24, %s7376_s8 }
 0x42f   :  { %1002 = vrot.lane.b32.xlu1 %v6227_v24, %s7377_s28  ;;  %1091 = vrot.lane.b32.xlu0 %v6227_v24, %s7378_s24 }
 0x433   :  { %1075 = vrot.lane.b32.xlu1 %v6227_v24, %s7379_s30  ;;  %1006 = vrot.lane.b32.xlu0 %v6227_v24, %s7380_s21  ;;  %s7411_s30 = smov 18  }
 0x437   :  { %1099 = vrot.lane.b32.xlu1 %v6227_v24, %s7381_s26  ;;  %1071 = vrot.lane.b32.xlu0 %v6227_v24, %s7382_s18 }
 0x43b   :  { %1014 = vrot.lane.b32.xlu1 %v6227_v24, %s7383_s17  ;;  %1095 = vrot.lane.b32.xlu0 %v6227_v24, %s7384_s15  ;;  %s7417_s17 = smov 125  }
 0x43f   :  { %1123 = vrot.lane.b32.xlu1 %v6217_v9, %s7385_s14  ;;  %1010 = vrot.lane.b32.xlu0 %v6227_v24, %s7386_s11  ;;  %s7414_s11 = smov 16  }
 0x443   :  { %1113 = vrot.lane.b32.xlu1 %v6215_v8, %s7387_s9  ;;  %1103 = vrot.lane.b32.xlu0 %v6227_v24, %s7388_s7  ;;  %s7410_s7 = smov 3  }
 0x447   :  { %1125 = vrot.lane.b32.xlu0 %v6215_v8, %s7385_s14 }
 0x469   :  { %v1023_v1 = vpop.permute.xlu1 %1022  ;;  %v1019_v38 = vpop.permute.xlu0 %1018 }
 0x46a   :  { %v4844_v39 = vpack.c.bf16 %v1023_v1, %v1019_v38 }
 0x46c   :  { %4846 = vmatprep.subr.msk.bf16.mxu0 %vm5993_vm6, %v4844_v39 }
 0x46d   :  { %v959_v41 = vpop.permute.xlu1 %958  ;;  %v955_v44 = vpop.permute.xlu0 %954 }
 0x46e   :  { %v4847_v45 = vpack.c.bf16 %v959_v41, %v955_v44 }
 0x470   :  { %4849 = vmatpush3.bf16.msk.msra.mxu0 %vm5997_vm7, %v4847_v45 }
 0x471   :  { %v963_v47 = vpop.permute.xlu1 %962  ;;  %v1027_v48 = vpop.permute.xlu0 %1026 }
 0x472   :  { %v4850_v50 = vpack.c.bf16 %v6227_v24, %v1027_v48 }
 0x474   :  { %4852 = vmatprep.subr.msk.bf16.mxu0 %vm6011_vm10, %v4850_v50 }
 0x475   :  { %v6330_v51 = vpop.permute.xlu1 %5350  ;;  %v967_v53 = vpop.permute.xlu0 %966 }
 0x476   :  { %v4853_v54 = vpack.c.bf16 %v967_v53, %v963_v47  ;;  %v5352_v55 = vunpack.i.l.bf16 %v6330_v51 }
 0x478   :  { %4855 = vmatpush3.bf16.msk.msra.mxu0 %vm6022_vm13, %v4853_v54 }
 0x479   :  { %v971_v57 = vpop.permute.xlu1 %970  ;;  %v1036_v59 = vpop.permute.xlu0 %1035 }
 0x47a   :  { %v4856_v60 = vpack.c.bf16 %v1036_v59, %v5352_v55 }
 0x47c   :  { %4858 = vmatprep.subr.msk.bf16.mxu0 %vm6033_vm2, %v4856_v60 }
 0x47d   :  { %v1040_v61 = vpop.permute.xlu1 %1039  ;;  %v975_v62 = vpop.permute.xlu0 %974 }
 0x47e   :  { %v4859_v63 = vpack.c.bf16 %v975_v62, %v971_v57 }
 0x480   :  { %4861 = vmatpush3.bf16.msk.msra.mxu0 %vm6041_vm5, %v4859_v63 }
 0x481   :  { %v979_v4 = vpop.permute.xlu1 %978  ;;  %v1044_v7 = vpop.permute.xlu0 %1043 }
 0x482   :  { %v4862_v12 = vpack.c.bf16 %v1044_v7, %v1040_v61  ;;  %v5353_v61 = vunpack.i.h.bf16 %v6330_v51 }
 0x484   :  { %4864 = vmatprep.subr.msk.bf16.mxu0 %vm6049_vm14, %v4862_v12  ;;  %v5342_v12 = vunpack.i.l.bf16 %v6319_v36 }
 0x485   :  { %v1048_v13 = vpop.permute.xlu1 %1047  ;;  %v983_v14 = vpop.permute.xlu0 %982 }
 0x486   :  { %v4865_v15 = vpack.c.bf16 %v983_v14, %v979_v4  ;;  %v5347_v4 = vunpack.i.l.bf16 %v6321_v37 }
 0x488   :  { %4867 = vmatpush3.bf16.msk.msra.mxu0 %vm6057_vm1, %v4865_v15 }
 0x489   :  { %v987_v16 = vpop.permute.xlu1 %986  ;;  %v1052_v10 = vpop.permute.xlu0 %1051 }
 0x48a   :  { %v4868_v21 = vpack.c.bf16 %v1052_v10, %v1048_v13  ;;  %v5343_v13 = vunpack.i.h.bf16 %v6319_v36  ;;  %v5348_v10 = vunpack.i.h.bf16 %v6321_v37 }
 0x48c   :  { %4870 = vmatprep.subr.msk.bf16.mxu0 %vm6065_vm0, %v4868_v21 }
 0x48d   :  { %v1056_v22 = vpop.permute.xlu1 %1055  ;;  %v991_v24 = vpop.permute.xlu0 %990 }
 0x48e   :  { %v4871_v25 = vpack.c.bf16 %v991_v24, %v987_v16 }
 0x490   :  { %4873 = vmatpush3.bf16.msk.msra.mxu0 %vm7389_vm4, %v4871_v25  ;;  %vm7398_vm4 = vcmp.ge.s32.totalorder %v5991_v17, 0 }
 0x491   :  { %v1080_v29 = vpop.permute.xlu1 %1079  ;;  %v1060_v30 = vpop.permute.xlu0 %1059 }
 0x492   :  { %v4874_v32 = vpack.c.bf16 %v1060_v30, %v1056_v22  ;;  %v1127_v22 = vsel %vm7398_vm4, %v5342_v12, -inf }
 0x494   :  { %4876 = vmatprep.subr.msk.bf16.mxu0 %vm7390_vm15, %v4874_v32  ;;  %vm7393_vm15 = vnez %v7345_v35 }
 0x495   :  { %v995_v1 = vpop.permute.xlu1 %994  ;;  %v1084_v38 = vpop.permute.xlu0 %1083 }
 0x496   :  { %v4892_v39 = vpack.c.bf16 %v1084_v38, %v1080_v29 }
 0x498   :  { %4894 = vmatprep.subr.msk.bf16.mxu1 %vm7391_vm12, %v4892_v39 }
 0x499   :  { %v1064_v41 = vpop.permute.xlu1 %1063  ;;  %4897 = vmatpush3.bf16.msk.msra.mxu1 %vm7391_vm12, %v4892_v39  ;;  %v999_v44 = vpop.permute.xlu0 %998  ;;  %vm7399_vm12 = vmmov %vm7398_vm4 }
 0x49a   :  { %v4877_v45 = vpack.c.bf16 %v999_v44, %v995_v1  ;;  %v1128_v36 = vsel %vm7399_vm12, %v5343_v13, -inf  ;;  %vm7401_vm12 = vnez %v7351_v56 }
 0x49c   :  { %4879 = vmatpush3.bf16.msk.msra.mxu0 %vm7392_vm11, %v4877_v45  ;;  %vm7394_vm11 = vnez %v7347_v42 }
 0x49d   :  { %v1088_v47 = vpop.permute.xlu1 %1087  ;;  %v1068_v48 = vpop.permute.xlu0 %1067 }
 0x49e   :  { %v4880_v50 = vpack.c.bf16 %v1068_v48, %v1064_v41  ;;  %v1143_v41 = vld [vmem:[%s7146_s4] sm:$0xff] }
 0x4a0   :  { %4882 = vmatprep.subr.msk.bf16.mxu0 %vm7393_vm15, %v4880_v50  ;;  %vm7395_vm15 = vnez %v7349_v49  ;;  %v3273_v49 = vld [vmem:[#allocation13 + $0x20] sm:$0xff] }
 0x4a1   :  { %v1003_v53 = vpop.permute.xlu1 %1002  ;;  %v1092_v54 = vpop.permute.xlu0 %1091 }
 0x4a2   :  { %v4898_v55 = vpack.c.bf16 %v1092_v54, %v1088_v47  ;;  %v1147_v47 = vld [vmem:[%s7146_s4 + $0x20] sm:$0xff] }
 0x4a4   :  { %4900 = vmatprep.subr.msk.bf16.mxu1 %vm6156_vm9, %v4898_v55 }
 0x4a5   :  { %v1076_v57 = vpop.permute.xlu1 %1075  ;;  %4903 = vmatpush3.bf16.msk.msra.mxu1 %vm6156_vm9, %v4898_v55  ;;  %v1007_v59 = vpop.permute.xlu0 %1006  ;;  %vm7396_vm9 = vcmp.lt.s32.totalorder %v6018_v31, 64 }
 0x4a6   :  { %v4883_v60 = vpack.c.bf16 %v1007_v59, %v1003_v53  ;;  %v1115_v14 = vsel %vm7396_vm9, %v5353_v61, -inf  ;;  %v1117_v30 = vsel %vm7396_vm9, %v5348_v10, -inf }
 0x4a7   :  { %v1131_v24 = vmax.f32 %v1115_v14, %v1127_v22 }
 0x4a8   :  { %4885 = vmatpush3.bf16.msk.msra.mxu0 %vm7394_vm11, %v4883_v60  ;;  %vm7397_vm11 = vmmov %vm7396_vm9  ;;  %v1149_v60 = vld [vmem:[%s7146_s4 + $0x30] sm:$0xff] }
 0x4a9   :  { %v1100_v62 = vpop.permute.xlu1 %1099  ;;  %v1072_v63 = vpop.permute.xlu0 %1071  ;;  %v1116_v51 = vsel %vm7397_vm11, %v5347_v4, -inf  ;;  %vm7400_vm11 = vmmov %vm7398_vm4  ;;  %v1135_v39 = vmax.f32 %v6209_v6, %v1131_v24  ;;  %v1146_v6 = vld [vmem:[%s7146_s4 + $0x18] sm:$0xff]  ;;  %v1152_v4 = vld [vmem:[%s7146_s4 + $0x48] sm:$0xff] }
 0x4aa   :  { %v4886_v7 = vpack.c.bf16 %v1076_v57, %v1072_v63  ;;  %v1132_v25 = vmax.f32 %v1116_v51, %v1128_v36  ;;  %vm7402_vm4 = vmmov %vm7396_vm9  ;;  %v1148_v63 = vld [vmem:[%s7146_s4 + $0x28] sm:$0xff] }
 0x4ab   :  { %vm7403_vm9 = vmmov %vm7400_vm11 }
 0x4ac   :  { %4888 = vmatprep.subr.msk.bf16.mxu0 %vm7395_vm15, %v4886_v7  ;;  %v1136_v48 = vmax.f32 %v6207_v5, %v1132_v25  ;;  %v1150_v5 = vld [vmem:[%s7146_s4 + $0x38] sm:$0xff]  ;;  %v1151_v7 = vld [vmem:[%s7146_s4 + $0x40] sm:$0xff] }
 0x4ad   :  { %v1015_v15 = vpop.permute.xlu1 %1014  ;;  %v1096_v16 = vpop.permute.xlu0 %1095 }
 0x4ae   :  { %v4904_v21 = vpack.c.bf16 %v1100_v62, %v1096_v16  ;;  %v1153_v62 = vld [vmem:[%s7146_s4 + $0x50] sm:$0xff] }
 0x4b0   :  { %4906 = vmatprep.subr.msk.bf16.mxu1 %vm6170_vm8, %v4904_v21 }
 0x4b1   :  { %v1124_v29 = vpop.permute.xlu1 %1123  ;;  %4909 = vmatpush3.bf16.msk.msra.mxu1 %vm6170_vm8, %v4904_v21  ;;  %v1011_v37 = vpop.permute.xlu0 %1010 }
 0x4b2   :  { %v1129_v32 = vsel %vm7400_vm11, %v1124_v29, -inf  ;;  %v4889_v1 = vpack.c.bf16 %v1015_v15, %v1011_v37  ;;  %vm7404_vm11 = vcmask 719872  }
 0x4b3   :  { %v1133_v38 = vmax.f32 %v1117_v30, %v1129_v32 }
 0x4b4   :  { %4891 = vmatpush3.bf16.msk.msra.mxu0 %vm7401_vm12, %v4889_v1  ;;  %vm7407_vm12 = vmmov 0  }
 0x4b5   :  { %v1137_v44 = vmax.f32 %v6217_v9, %v1133_v38  ;;  %v1104_v45 = vpop.permute.xlu0 %1103  ;;  %v1114_v53 = vpop.permute.xlu1 %1113 }
 0x4b6   :  { %v4910_v50 = vpack.c.bf16 %v1135_v39, %v1104_v45  ;;  %v1118_v55 = vsel %vm7402_vm4, %v1114_v53, -inf  ;;  %vm7405_vm4 = vmmov %vm7404_vm11 }
 0x4b7   :  { %1276 = vmatmul.mubr.f32.vlgmr.msra.gmra.mrb[4].mxu0 %v1143_v41  ;;  %v4916_v54 = vpack.c.bf16 %v1137_v44, %v1136_v48 }
 0x4b8   :  { %4912 = vmatprep.subr.msk.bf16.mxu1 %vm6179_vm3, %v4910_v50  ;;  %1280 = vmatprep.mubr.f32.mxu0 %v1147_v47 }
 0x4b9   :  { %4915 = vmatpush3.bf16.msk.msra.mxu1 %vm6179_vm3, %v4910_v50  ;;  %v1126_v9 = vpop.permute.xlu0 %1125 }
 0x4ba   :  { %v1130_v57 = vsel %vm7403_vm9, %v1126_v9, -inf  ;;  %4917 = vmatprep.subr.bf16.mxu1 %v4916_v54  ;;  %vm7406_vm9 = vmmov %vm7405_vm4 }
 0x4bb   :  { %v1134_v59 = vmax.f32 %v1118_v55, %v1130_v57  ;;  %1281 = vmatmul.mubr.f32.gmra.mrb[6].mxu0 %v1146_v6  ;;  %v1385_v6 = vld [vmem:[#allocation7] sm:$0xff]  ;;  %v1649_v57 = vld [vmem:[#allocation8 + $0x8] sm:$0xff] }
 0x4bc   :  { %1285 = vmatprep.mubr.f32.mxu0 %v1150_v5 }
 0x4bd   :  { %4919 = vmatpush3.bf16.msra.mxu1 %v4916_v54  ;;  %v1138_v61 = vmax.f32 %v6215_v8, %v1134_v59  ;;  %v1154_v8 = vld [vmem:[%s7146_s4 + $0x58] sm:$0xff]  ;;  %s7409_s4 = smov 2   ;;  %v1650_v59 = vld [vmem:[#allocation8 + $0x10] sm:$0xff] }
 0x4bf   :  { %1286 = vmatmul.mubr.f32.gmra.mrb[8].mxu0 %v1149_v60  ;;  %4534 = vmatprep.subr.mxu1 %v1138_v61 }
 0x4c0   :  { %1290 = vmatprep.mubr.f32.mxu0 %v1153_v62 }
 0x4c1   :  { %4535 = vmatpush3.msra.mxu1 %v1138_v61 }
 0x4c2   :  { %4537 = vmatmul.mubr.msk.f32.vlgmr.msra.gmra.mrb[12].mxu1 %vm7404_vm11, %v1148_v63  ;;  %4920 = vmatprep.subr.bf16.mxu1 %v5664_v43  ;;  %vm7408_vm11 = vcmask 261120  }
 0x4c3   :  { %1291 = vmatmul.mubr.f32.gmra.mrb[10].mxu0 %v1152_v4  ;;  %4539 = vmatprep.mubr.msk.f32.mxu1 %vm7405_vm4, %v1151_v7 }
 0x4c4   :  { %1779 = vmatprep.mubr.f32.mxu0 %v1649_v57 }
 0x4c6   :  { %4540 = vmatmul.mubr.msk.f32.gmra.mrb[14].mxu1 %vm7406_vm9, %v1154_v8  ;;  %vm7425_vm9 = vnez %v7353_v3 }
 0x4c7   :  { %4550 = vmatprep.mubr.msk.f32.mxu1 %vm7407_vm12, %v5623_v0 }
 0x58a   :  { %v4158_v12 = vpop.f32.mrb[4].mxu0 }
 0x58b   :  { %v4159_v13 = vpop.f32.mrb[5].mxu0 }
 0x58c   :  { %v4160_v14 = vadd.f32 %v4159_v13, %v4158_v12 }
 0x58e   :  { %v4161_v15 = vpop.f32.mrb[6].mxu0 }
 0x58f   :  { %v4162_v16 = vpop.f32.mrb[7].mxu0 }
 0x590   :  { %v4163_v10 = vadd.f32 %v4162_v16, %v4161_v15 }
 0x592   :  { %v4164_v51 = vpop.f32.mrb[8].mxu0 }
 0x593   :  { %v4165_v21 = vpop.f32.mrb[9].mxu0 }
 0x594   :  { %v4166_v22 = vadd.f32 %v4165_v21, %v4164_v51 }
 0x595   :  { %v4538_v36 = vpop.f32.mrb[12].mxu1 }
 0x596   :  { %v1368_v24 = vadd.f32 %v4538_v36, %v4163_v10  ;;  %v4167_v25 = vpop.f32.mrb[10].mxu0  ;;  %v1362_v29 = vpop.f32.mrb[13].mxu1 }
 0x597   :  { %v1363_v37 = vadd.f32 %v4160_v14, %v1362_v29  ;;  %v4168_v30 = vpop.f32.mrb[11].mxu0 }
 0x598   :  { %v6436_v32 = vmax.f32 %v1368_v24, 0.0  ;;  %v4169_v1 = vadd.f32 %v4168_v30, %v4167_v25 }
 0x599   :  { %v6438_v38 = vmax.f32 %v1363_v37, 0.0  ;;  %v4541_v39 = vpop.f32.mrb[14].mxu1 }
 0x59a   :  { %v1378_v41 = vadd.f32 %v4541_v39, %v4169_v1  ;;  %v1372_v44 = vpop.f32.mrb[15].mxu1 }
 0x59b   :  { %v1373_v45 = vadd.f32 %v4166_v22, %v1372_v44  ;;  %v4921_v47 = vpack.c.bf16 %v6436_v32, %v6438_v38 }
 0x59c   :  { %v6442_v48 = vmax.f32 %v1378_v41, 0.0 }
 0x59d   :  { %v6444_v50 = vmax.f32 %v1373_v45, 0.0  ;;  %4922 = vmatpush3.bf16.msra.mxu1 %v4921_v47 }
 0x59e   :  { %4923 = vmatprep.subr.bf16.mxu1 %v5664_v43 }
 0x59f   :  { %v5359_v53 = vpack.i.bf16 %v6444_v50, %v6436_v32  ;;  %v4924_v54 = vpack.c.bf16 %v6442_v48, %v6444_v50 }
 0x5a1   :  { %5360 = vrot.lane.b32.xlu1 %v5359_v53, %s7385_s14  ;;  %5355 = vrot.lane.b32.xlu0 %v5359_v53, %s7387_s9 }
 0x5a2   :  { %4925 = vmatpush3.bf16.msra.mxu1 %v4924_v54 }
 0x5a5   :  { %4551 = vmatmul.mubr.msk.f32.vlgmr.msra.gmra.mrb[16].mxu1 %vm7408_vm11, %v1385_v6  ;;  %vm7426_vm11 = vnez %v7339_v11 }
 0x5a6   :  { %4575 = vmatprep.mubr.msk.f32.mxu1 %vm7405_vm4, %v1650_v59  ;;  %vm7427_vm4 = vnez %v7341_v18 }
 0x613   :  { %v6498_v60 = vpop.permute.xlu1 %5360  ;;  %v6500_v61 = vpop.permute.xlu0 %5355 }
 0x678   :  { %v1455_v9 = vpop.f32.mrb[16].mxu1 }
 0x679   :  { %1527 = vrot.lane.b32.xlu0 %v1455_v9, %s7409_s4  ;;  %1523 = vrot.lane.b32.xlu1 %v1455_v9, %s7410_s7  ;;  %v4552_v5 = vpop.f32.mrb[17].mxu1  ;;  %v5364_v55 = vpack.i.bf16 %v6438_v38, %v1455_v9  ;;  %s7418_s7 = smov 14  }
 0x67d   :  { %1463 = vrot.lane.b32.xlu0 %v1455_v9, %s7411_s30  ;;  %1459 = vrot.lane.b32.xlu1 %v1455_v9, %s7412_s13  ;;  %s7419_s30 = smov 13  }
 0x681   :  { %1467 = vrot.lane.b32.xlu0 %v1455_v9, %s7413_s19  ;;  %5365 = vrot.lane.b32.xlu1 %v5364_v55, %s7385_s14  ;;  %s7420_s19 = smov 115  }
 0x685   :  { %5370 = vrot.lane.b32.xlu0 %v5364_v55, %s7387_s9  ;;  %1471 = vrot.lane.b32.xlu1 %v1455_v9, %s7414_s11 }
 0x689   :  { %1475 = vrot.lane.b32.xlu0 %v1455_v9, %s7415_s2  ;;  %1540 = vrot.lane.b32.xlu1 %v1455_v9, %s7416_s10 }
 0x68d   :  { %1544 = vrot.lane.b32.xlu0 %v1455_v9, %s7417_s17  ;;  %1479 = vrot.lane.b32.xlu1 %v1455_v9, %s7418_s7 }
 0x691   :  { %1483 = vrot.lane.b32.xlu0 %v1455_v9, %s7419_s30  ;;  %1548 = vrot.lane.b32.xlu1 %v1455_v9, %s7363_s0 }
 0x695   :  { %1552 = vrot.lane.b32.xlu0 %v1455_v9, %s7364_s25  ;;  %1487 = vrot.lane.b32.xlu1 %v1455_v9, %s7365_s16 }
 0x699   :  { %1584 = vrot.lane.b32.xlu0 %v1455_v9, %s7420_s19  ;;  %1556 = vrot.lane.b32.xlu1 %v1455_v9, %s7367_s12 }
 0x69d   :  { %1491 = vrot.lane.b32.xlu0 %v1455_v9, %s7366_s20  ;;  %1588 = vrot.lane.b32.xlu1 %v1455_v9, %s7372_s29 }
 0x6a1   :  { %1560 = vrot.lane.b32.xlu0 %v1455_v9, %s7368_s3  ;;  %1495 = vrot.lane.b32.xlu1 %v1455_v9, %s7369_s1 }
 0x6a5   :  { %1592 = vrot.lane.b32.xlu0 %v1455_v9, %s7375_s22  ;;  %1564 = vrot.lane.b32.xlu1 %v1455_v9, %s7370_s6  ;;  %s7421_s22 = smov 109  }
 0x6a9   :  { %1499 = vrot.lane.b32.xlu0 %v1455_v9, %s7371_s5  ;;  %1596 = vrot.lane.b32.xlu1 %v1455_v9, %s7378_s24  ;;  %s7422_s24 = smov 116  }
 0x6ad   :  { %1568 = vrot.lane.b32.xlu0 %v1455_v9, %s7373_s27  ;;  %1503 = vrot.lane.b32.xlu1 %v1455_v9, %s7374_s23 }
 0x6b1   :  { %1600 = vrot.lane.b32.xlu0 %v1455_v9, %s7384_s15  ;;  %1572 = vrot.lane.b32.xlu1 %v1455_v9, %s7376_s8  ;;  %s7423_s15 = smov 4   ;;  %s7424_s8 = smov 5  }
 0x6b5   :  { %1507 = vrot.lane.b32.xlu0 %v1455_v9, %s7377_s28  ;;  %1604 = vrot.lane.b32.xlu1 %v1455_v9, %s7381_s26  ;;  %s7453_s26 = smov 113  }
 0x6b9   :  { %1576 = vrot.lane.b32.xlu0 %v1455_v9, %s7382_s18  ;;  %1511 = vrot.lane.b32.xlu1 %v1455_v9, %s7380_s21  ;;  %s7442_s21 = sld [smem:[#allocation27_spill]]  ;;  %s7452_s18 = smov 17  }
 0x6bd   :  { %1608 = vrot.lane.b32.xlu0 %v1455_v9, %s7421_s22  ;;  %1580 = vrot.lane.b32.xlu1 %v1455_v9, %s7422_s24  ;;  %s7451_s22 = smov 18   ;;  %s7454_s24 = smov 118  }
 0x6c1   :  { %1519 = vrot.lane.b32.xlu0 %v1455_v9, %s7423_s15  ;;  %1515 = vrot.lane.b32.xlu1 %v1455_v9, %s7424_s8  ;;  %s7440_s15 = sld [smem:[#allocation21_spill]]  ;;  %s7450_s8 = smov 3  }
 0x6c5   :  { %1630 = vrot.lane.b32.xlu0 %v6442_v48, %s7385_s14  ;;  %1618 = vrot.lane.b32.xlu1 %v6442_v48, %s7387_s9 }
 0x6eb   :  { %v1528_v62 = vpop.permute.xlu0 %1527  ;;  %v1524_v63 = vpop.permute.xlu1 %1523 }
 0x6ec   :  { %v4926_v4 = vpack.c.bf16 %v1528_v62, %v1524_v63 }
 0x6ee   :  { %4928 = vmatprep.subr.msk.bf16.mxu0 %vm5993_vm6, %v4926_v4 }
 0x6ef   :  { %v1464_v7 = vpop.permute.xlu0 %1463  ;;  %v1460_v8 = vpop.permute.xlu1 %1459 }
 0x6f0   :  { %v4929_v12 = vpack.c.bf16 %v1464_v7, %v1460_v8 }
 0x6f2   :  { %4931 = vmatpush3.bf16.msk.msra.mxu0 %vm5997_vm7, %v4929_v12 }
 0x6f3   :  { %v1468_v13 = vpop.permute.xlu0 %1467  ;;  %v6506_v14 = vpop.permute.xlu1 %5365 }
 0x6f4   :  { %v5367_v15 = vunpack.i.l.bf16 %v6506_v14 }
 0x6f6   :  { %v4932_v16 = vpack.c.bf16 %v1455_v9, %v5367_v15 }
 0x6f7   :  { %v6509_v10 = vpop.permute.xlu0 %5370  ;;  %v1472_v51 = vpop.permute.xlu1 %1471 }
 0x6f8   :  { %v4935_v21 = vpack.c.bf16 %v1472_v51, %v1468_v13  ;;  %4934 = vmatprep.subr.msk.bf16.mxu0 %vm6011_vm10, %v4932_v16  ;;  %v5372_v22 = vunpack.i.l.bf16 %v6509_v10 }
 0x6fa   :  { %4937 = vmatpush3.bf16.msk.msra.mxu0 %vm6022_vm13, %v4935_v21  ;;  %v5363_v21 = vunpack.i.h.bf16 %v6498_v60 }
 0x6fb   :  { %v1476_v36 = vpop.permute.xlu0 %1475  ;;  %v1541_v24 = vpop.permute.xlu1 %1540 }
 0x6fc   :  { %v4938_v25 = vpack.c.bf16 %v1541_v24, %v5372_v22  ;;  %v5362_v22 = vunpack.i.l.bf16 %v6498_v60  ;;  %v5357_v24 = vunpack.i.l.bf16 %v6500_v61 }
 0x6fe   :  { %4940 = vmatprep.subr.msk.bf16.mxu0 %vm6033_vm2, %v4938_v25  ;;  %v5373_v25 = vunpack.i.h.bf16 %v6509_v10 }
 0x6ff   :  { %v1545_v29 = vpop.permute.xlu0 %1544  ;;  %v1480_v37 = vpop.permute.xlu1 %1479 }
 0x700   :  { %v4941_v30 = vpack.c.bf16 %v1480_v37, %v1476_v36  ;;  %v5358_v36 = vunpack.i.h.bf16 %v6500_v61 }
 0x702   :  { %4943 = vmatpush3.bf16.msk.msra.mxu0 %vm6041_vm5, %v4941_v30 }
 0x703   :  { %v1484_v1 = vpop.permute.xlu0 %1483  ;;  %v1549_v39 = vpop.permute.xlu1 %1548 }
 0x704   :  { %v4944_v41 = vpack.c.bf16 %v1549_v39, %v1545_v29 }
 0x706   :  { %4946 = vmatprep.subr.msk.bf16.mxu0 %vm6049_vm14, %v4944_v41 }
 0x707   :  { %v1553_v44 = vpop.permute.xlu0 %1552  ;;  %v1488_v45 = vpop.permute.xlu1 %1487 }
 0x708   :  { %v4947_v47 = vpack.c.bf16 %v1488_v45, %v1484_v1  ;;  %v5368_v1 = vunpack.i.h.bf16 %v6506_v14 }
 0x70a   :  { %4949 = vmatpush3.bf16.msk.msra.mxu0 %vm6057_vm1, %v4947_v47 }
 0x70b   :  { %v1585_v53 = vpop.permute.xlu0 %1584  ;;  %v1557_v54 = vpop.permute.xlu1 %1556 }
 0x70c   :  { %v4950_v6 = vpack.c.bf16 %v1557_v54, %v1553_v44 }
 0x70e   :  { %4952 = vmatprep.subr.msk.bf16.mxu0 %vm6065_vm0, %v4950_v6  ;;  %vm7428_vm0 = vnez %v7357_v19 }
 0x70f   :  { %v1492_v9 = vpop.permute.xlu0 %1491  ;;  %v1589_v5 = vpop.permute.xlu1 %1588 }
 0x710   :  { %v4974_v55 = vpack.c.bf16 %v1589_v5, %v1585_v53 }
 0x712   :  { %4976 = vmatprep.subr.msk.bf16.mxu1 %vm7425_vm9, %v4974_v55 }
 0x713   :  { %v1561_v57 = vpop.permute.xlu0 %1560  ;;  %4979 = vmatpush3.bf16.msk.msra.mxu1 %vm7425_vm9, %v4974_v55  ;;  %v1496_v59 = vpop.permute.xlu1 %1495  ;;  %vm7429_vm9 = vnez %v7343_v26 }
 0x714   :  { %v4953_v62 = vpack.c.bf16 %v1496_v59, %v1492_v9 }
 0x716   :  { %4955 = vmatpush3.bf16.msk.msra.mxu0 %vm7426_vm11, %v4953_v62  ;;  %vm7433_vm11 = vcmp.lt.s32.totalorder %v6018_v31, 64 }
 0x717   :  { %v1593_v63 = vpop.permute.xlu0 %1592  ;;  %v1565_v4 = vpop.permute.xlu1 %1564  ;;  %v1622_v41 = vsel %vm7433_vm11, %v5358_v36, -inf  ;;  %vm7434_vm1 = vmmov %vm7433_vm11 }
 0x718   :  { %v4956_v7 = vpack.c.bf16 %v1565_v4, %v1561_v57  ;;  %v1621_v61 = vsel %vm7434_vm1, %v5357_v24, -inf  ;;  %vm7435_vm14 = vmmov %vm7434_vm1  ;;  %vm7436_vm1 = vnez %v7347_v42  ;;  %v1651_v24 = vld [vmem:[#allocation8 + $0x18] sm:$0xff] }
 0x719   :  { %v1620_v10 = vsel %vm7435_vm14, %v5373_v25, -inf  ;;  %vm7437_vm14 = vnez %v7351_v56 }
 0x71a   :  { %4958 = vmatprep.subr.msk.bf16.mxu0 %vm7427_vm4, %v4956_v7  ;;  %vm7431_vm4 = vnez %v7345_v35 }
 0x71b   :  { %v1500_v8 = vpop.permute.xlu0 %1499  ;;  %v1597_v12 = vpop.permute.xlu1 %1596 }
 0x71c   :  { %v4980_v13 = vpack.c.bf16 %v1597_v12, %v1593_v63 }
 0x71e   :  { %4982 = vmatprep.subr.msk.bf16.mxu1 %vm7428_vm0, %v4980_v13 }
 0x71f   :  { %v1569_v15 = vpop.permute.xlu0 %1568  ;;  %4985 = vmatpush3.bf16.msk.msra.mxu1 %vm7428_vm0, %v4980_v13  ;;  %v1504_v16 = vpop.permute.xlu1 %1503  ;;  %vm7430_vm0 = vcmp.ge.s32.totalorder %v5991_v17, 0 }
 0x720   :  { %v4959_v51 = vpack.c.bf16 %v1504_v16, %v1500_v8  ;;  %v1634_v39 = vsel %vm7430_vm0, %v5363_v21, -inf  ;;  %v1632_v47 = vsel %vm7430_vm0, %v5368_v1, -inf  ;;  %v1654_v1 = vld [vmem:[#allocation8 + $0x30] sm:$0xff] }
 0x721   :  { %v1638_v53 = vmax.f32 %v1622_v41, %v1634_v39  ;;  %v1636_v6 = vmax.f32 %v1620_v10, %v1632_v47  ;;  %v5426_v39 = vld [vmem:[%s7440_s15] sm:$0xff]  ;;  %v1890_v10 = vld [vmem:[%s7442_s21 + $0x8] sm:$0xff]  ;;  %s7448_s15 = sld [smem:[#allocation24_spill]] }
 0x722   :  { %4961 = vmatpush3.bf16.msk.msra.mxu0 %vm7429_vm9, %v4959_v51  ;;  %vm7432_vm9 = vmmov %vm7430_vm0  ;;  %v1652_v51 = vld [vmem:[#allocation8 + $0x20] sm:$0xff]  ;;  %v1889_v41 = vld [vmem:[%s7442_s21] sm:$0xff] }
 0x723   :  { %v1601_v29 = vpop.permute.xlu0 %1600  ;;  %v1573_v37 = vpop.permute.xlu1 %1572  ;;  %v1633_v60 = vsel %vm7432_vm9, %v5362_v22, -inf  ;;  %v1640_v57 = vmax.f32 %v6438_v38, %v1636_v6  ;;  %v1642_v62 = vmax.f32 %v6444_v50, %v1638_v53  ;;  %vm7438_vm9 = vmmov %vm7430_vm0  ;;  %vm7439_vm0 = vcmask 719872  }
 0x724   :  { %v4962_v30 = vpack.c.bf16 %v1573_v37, %v1569_v15  ;;  %v1637_v54 = vmax.f32 %v1621_v61, %v1633_v60  ;;  %v1653_v37 = vld [vmem:[#allocation8 + $0x28] sm:$0xff]  ;;  %v1658_v60 = vld [vmem:[#allocation8 + $0x50] sm:$0xff] }
 0x725   :  { %v1657_v61 = vld [vmem:[#allocation8 + $0x48] sm:$0xff] }
 0x726   :  { %4964 = vmatprep.subr.msk.bf16.mxu0 %vm7431_vm4, %v4962_v30  ;;  %v1641_v59 = vmax.f32 %v6436_v32, %v1637_v54  ;;  %v1648_v32 = vld [vmem:[#allocation8] sm:$0xff] }
 0x727   :  { %v1508_v44 = vpop.permute.xlu0 %1507  ;;  %v1605_v14 = vpop.permute.xlu1 %1604  ;;  %v1656_v30 = vld [vmem:[#allocation8 + $0x40] sm:$0xff] }
 0x728   :  { %v4986_v45 = vpack.c.bf16 %v1605_v14, %v1601_v29  ;;  %v4998_v12 = vpack.c.bf16 %v1642_v62, %v1641_v59  ;;  %v1655_v29 = vld [vmem:[#allocation8 + $0x38] sm:$0xff]  ;;  %v1892_v14 = vld [vmem:[%s7442_s21 + $0x18] sm:$0xff] }
 0x72a   :  { %4988 = vmatprep.subr.msk.bf16.mxu1 %vm6170_vm8, %v4986_v45 }
 0x72b   :  { %v1577_v9 = vpop.permute.xlu0 %1576  ;;  %4991 = vmatpush3.bf16.msk.msra.mxu1 %vm6170_vm8, %v4986_v45  ;;  %v1512_v5 = vpop.permute.xlu1 %1511 }
 0x72c   :  { %v4965_v55 = vpack.c.bf16 %v1512_v5, %v1508_v44  ;;  %v1891_v44 = vld [vmem:[%s7442_s21 + $0x10] sm:$0xff]  ;;  %s7455_s21 = smov 112  }
 0x72e   :  { %4967 = vmatpush3.bf16.msk.msra.mxu0 %vm7436_vm1, %v4965_v55 }
 0x72f   :  { %v1609_v63 = vpop.permute.xlu0 %1608  ;;  %v1581_v4 = vpop.permute.xlu1 %1580 }
 0x730   :  { %v4992_v7 = vpack.c.bf16 %v1640_v57, %v1609_v63  ;;  %v4968_v8 = vpack.c.bf16 %v1581_v4, %v1577_v9 }
 0x732   :  { %4970 = vmatprep.subr.msk.bf16.mxu0 %vm7395_vm15, %v4968_v8  ;;  %4994 = vmatprep.subr.msk.bf16.mxu1 %vm6179_vm3, %v4992_v7 }
 0x733   :  { %v1520_v13 = vpop.permute.xlu0 %1519  ;;  %v1516_v15 = vpop.permute.xlu1 %1515  ;;  %4997 = vmatpush3.bf16.msk.msra.mxu1 %vm6179_vm3, %v4992_v7 }
 0x734   :  { %v4971_v38 = vpack.c.bf16 %v1520_v13, %v1516_v15  ;;  %4999 = vmatprep.subr.bf16.mxu1 %v4998_v12 }
 0x736   :  { %4973 = vmatpush3.bf16.msk.msra.mxu0 %vm7437_vm14, %v4971_v38 }
 0x737   :  { %v1631_v50 = vpop.permute.xlu0 %1630  ;;  %v1619_v16 = vpop.permute.xlu1 %1618  ;;  %5001 = vmatpush3.bf16.msra.mxu1 %v4998_v12 }
 0x738   :  { %v1635_v21 = vsel %vm7438_vm9, %v1631_v50, -inf  ;;  %v1623_v22 = vsel %vm7433_vm11, %v1619_v16, -inf  ;;  %vm7441_vm9 = vmmov %vm7439_vm0 }
 0x739   :  { %v1639_v36 = vmax.f32 %v1623_v22, %v1635_v21  ;;  %1780 = vmatmul.mubr.f32.vlgmr.msra.gmra.mrb[12].mxu0 %v1648_v32  ;;  %vm7443_vm11 = vmmov %vm7439_vm0 }
 0x73a   :  { %1784 = vmatprep.mubr.f32.mxu0 %v1652_v51 }
 0x73b   :  { %v1643_v25 = vmax.f32 %v6442_v48, %v1639_v36  ;;  %v1659_v48 = vld [vmem:[#allocation8 + $0x58] sm:$0xff] }
 0x73d   :  { %1785 = vmatmul.mubr.f32.gmra.mrb[14].mxu0 %v1651_v24  ;;  %4573 = vmatprep.subr.mxu1 %v1643_v25 }
 0x73e   :  { %4574 = vmatpush3.msra.mxu1 %v1643_v25  ;;  %1789 = vmatprep.mubr.f32.mxu0 %v1655_v29 }
 0x73f   :  { %4576 = vmatmul.mubr.msk.f32.vlgmr.msra.gmra.mrb[18].mxu1 %vm7439_vm0, %v1653_v37  ;;  %4581 = vmatprep.subr.mxu1 %v5426_v39  ;;  %vm7444_vm0 = vcmask 64512  }
 0x740   :  { %4582 = vmatpush3.msra.mxu1 %v5426_v39  ;;  %4578 = vmatprep.mubr.msk.f32.mxu1 %vm7441_vm9, %v1656_v30  ;;  %vm7445_vm9 = vmmov %vm7444_vm0 }
 0x741   :  { %1790 = vmatmul.mubr.f32.gmra.mrb[16].mxu0 %v1654_v1  ;;  %5002 = vmatprep.subr.bf16.mxu1 %v5664_v43  ;;  %vm7446_vm3 = vmmov %vm7444_vm0 }
 0x742   :  { %1794 = vmatprep.mubr.f32.mxu0 %v1658_v60 }
 0x743   :  { %4579 = vmatmul.mubr.msk.f32.gmra.mrb[20].mxu1 %vm7443_vm11, %v1659_v48  ;;  %vm7447_vm11 = vmmov %vm7444_vm0 }
 0x744   :  { %4583 = vmatprep.mubr.msk.f32.mxu1 %vm7444_vm0, %v1889_v41  ;;  %vm7463_vm0 = vcmask 719872  }
 0x745   :  { %1795 = vmatmul.mubr.f32.gmra.mrb[18].mxu0 %v1657_v61 }
 0x747   :  { %4584 = vmatmul.mubr.msk.f32.vlgmr.msra.gmra.mrb[22].mxu1 %vm7445_vm9, %v1890_v10  ;;  %vm7465_vm9 = vnez %v7333_v52 }
 0x748   :  { %4586 = vmatprep.mubr.msk.f32.mxu1 %vm7446_vm3, %v1891_v44  ;;  %vm7449_vm3 = vcmask 261120  }
 0x74b   :  { %4587 = vmatmul.mubr.msk.f32.gmra.mrb[24].mxu1 %vm7447_vm11, %v1892_v14  ;;  %vm7466_vm11 = vnez %v7335_v58 }
 0x74c   :  { %4597 = vmatprep.mubr.msk.f32.mxu1 %vm7407_vm12, %v5623_v0 }
 0x80c   :  { %v4222_v45 = vpop.f32.mrb[12].mxu0 }
 0x80d   :  { %v4223_v47 = vpop.f32.mrb[13].mxu0 }
 0x80e   :  { %v4224_v53 = vadd.f32 %v4223_v47, %v4222_v45  ;;  %v1998_v45 = vld [vmem:[%s7448_s15] sm:$0xff]  ;;  %s7456_s15 = smov 116  }
 0x810   :  { %v4225_v54 = vpop.f32.mrb[14].mxu0 }
 0x811   :  { %v4226_v6 = vpop.f32.mrb[15].mxu0 }
 0x812   :  { %v4227_v9 = vadd.f32 %v4226_v6, %v4225_v54  ;;  %v4577_v5 = vpop.f32.mrb[18].mxu1  ;;  %v2262_v6 = vld [vmem:[#allocation10 + $0x8] sm:$0xff] }
 0x813   :  { %v1866_v55 = vpop.f32.mrb[19].mxu1  ;;  %2392 = vmatprep.mubr.f32.mxu0 %v2262_v6 }
 0x814   :  { %v1872_v57 = vadd.f32 %v4577_v5, %v4227_v9  ;;  %v1867_v59 = vadd.f32 %v4224_v53, %v1866_v55  ;;  %v4228_v62 = vpop.f32.mrb[16].mxu0  ;;  %v2263_v9 = vld [vmem:[#allocation10 + $0x10] sm:$0xff] }
 0x815   :  { %v4229_v63 = vpop.f32.mrb[17].mxu0 }
 0x816   :  { %v4230_v4 = vadd.f32 %v4229_v63, %v4228_v62  ;;  %v4580_v7 = vpop.f32.mrb[20].mxu1  ;;  %v1886_v15 = vmax.f32 %v1872_v57, 0.0  ;;  %v1885_v32 = vmax.f32 %v1867_v59, 0.0 }
 0x817   :  { %v1876_v8 = vpop.f32.mrb[21].mxu1 }
 0x818   :  { %v1877_v12 = vadd.f32 %v4230_v4, %v1876_v8  ;;  %v4231_v13 = vpop.f32.mrb[18].mxu0 }
 0x819   :  { %v4232_v38 = vpop.f32.mrb[19].mxu0 }
 0x81a   :  { %v4233_v50 = vadd.f32 %v4232_v38, %v4231_v13  ;;  %v4585_v16 = vpop.f32.mrb[22].mxu1  ;;  %v1887_v25 = vmax.f32 %v1877_v12, 0.0 }
 0x81b   :  { %v1991_v51 = vadd.f32 %v4585_v16, %v1886_v15  ;;  %v1971_v21 = vpop.f32.mrb[23].mxu1 }
 0x81c   :  { %v1882_v22 = vadd.f32 %v4580_v7, %v4233_v50  ;;  %v1990_v36 = vadd.f32 %v1971_v21, %v1885_v32 }
 0x81d   :  { %v6607_v24 = vmax.f32 %v1991_v51, 0.0 }
 0x81e   :  { %v6609_v29 = vmax.f32 %v1990_v36, 0.0  ;;  %v1888_v37 = vmax.f32 %v1882_v22, 0.0  ;;  %v4588_v30 = vpop.f32.mrb[24].mxu1 }
 0x81f   :  { %v1981_v1 = vpop.f32.mrb[25].mxu1 }
 0x820   :  { %v1993_v39 = vadd.f32 %v4588_v30, %v1888_v37  ;;  %v1992_v60 = vadd.f32 %v1981_v1, %v1887_v25  ;;  %v5374_v48 = vpack.i.bf16 %v6607_v24, %v6609_v29  ;;  %v6615_v41 = vpack.c.bf16 %v6607_v24, %v6609_v29 }
 0x822   :  { %v6617_v61 = vmax.f32 %v1993_v39, 0.0  ;;  %v6619_v10 = vmax.f32 %v1992_v60, 0.0  ;;  %5375 = vrot.lane.b32.xlu0 %v5374_v48, %s7385_s14  ;;  %5004 = vmatpush3.bf16.msra.mxu1 %v6615_v41 }
 0x823   :  { %5005 = vmatprep.subr.bf16.mxu1 %v5664_v43 }
 0x824   :  { %v5379_v44 = vpack.i.bf16 %v6619_v10, %v6607_v24  ;;  %v6628_v14 = vpack.c.bf16 %v6617_v61, %v6619_v10 }
 0x826   :  { %5380 = vrot.lane.b32.xlu1 %v5379_v44, %s7387_s9  ;;  %5007 = vmatpush3.bf16.msra.mxu1 %v6628_v14 }
 0x829   :  { %4598 = vmatmul.mubr.msk.f32.vlgmr.msra.gmra.mrb[26].mxu1 %vm7449_vm3, %v1998_v45  ;;  %vm7467_vm3 = vnez %v7337_v2 }
 0x82a   :  { %4622 = vmatprep.mubr.msk.f32.mxu1 %vm7463_vm0, %v2263_v9  ;;  %vm7468_vm0 = vnez %v7339_v11 }
 0x894   :  { %v6682_v5 = vpop.permute.xlu0 %5375 }
 0x898   :  { %v6684_v55 = vpop.permute.xlu1 %5380 }
 0x8fc   :  { %v2068_v47 = vpop.f32.mrb[26].mxu1 }
 0x8fd   :  { %2140 = vrot.lane.b32.xlu0 %v2068_v47, %s7409_s4  ;;  %2136 = vrot.lane.b32.xlu1 %v2068_v47, %s7450_s8  ;;  %v4599_v53 = vpop.f32.mrb[27].mxu1  ;;  %v5384_v54 = vpack.i.bf16 %v6609_v29, %v2068_v47 }
 0x901   :  { %2076 = vrot.lane.b32.xlu0 %v2068_v47, %s7451_s22  ;;  %2072 = vrot.lane.b32.xlu1 %v2068_v47, %s7412_s13 }
 0x905   :  { %2080 = vrot.lane.b32.xlu0 %v2068_v47, %s7452_s18  ;;  %2144 = vrot.lane.b32.xlu1 %v2068_v47, %s7385_s14 }
 0x909   :  { %5385 = vrot.lane.b32.xlu0 %v5384_v54, %s7387_s9  ;;  %2084 = vrot.lane.b32.xlu1 %v2068_v47, %s7414_s11 }
 0x90d   :  { %2088 = vrot.lane.b32.xlu0 %v2068_v47, %s7415_s2  ;;  %2153 = vrot.lane.b32.xlu1 %v2068_v47, %s7416_s10 }
 0x911   :  { %2157 = vrot.lane.b32.xlu0 %v2068_v47, %s7417_s17  ;;  %2092 = vrot.lane.b32.xlu1 %v2068_v47, %s7418_s7 }
 0x915   :  { %2096 = vrot.lane.b32.xlu0 %v2068_v47, %s7419_s30  ;;  %2161 = vrot.lane.b32.xlu1 %v2068_v47, %s7363_s0 }
 0x919   :  { %2165 = vrot.lane.b32.xlu0 %v2068_v47, %s7364_s25  ;;  %2100 = vrot.lane.b32.xlu1 %v2068_v47, %s7365_s16 }
 0x91d   :  { %2104 = vrot.lane.b32.xlu0 %v2068_v47, %s7366_s20  ;;  %2169 = vrot.lane.b32.xlu1 %v2068_v47, %s7367_s12 }
 0x921   :  { %2173 = vrot.lane.b32.xlu0 %v2068_v47, %s7368_s3  ;;  %2108 = vrot.lane.b32.xlu1 %v2068_v47, %s7369_s1 }
 0x925   :  { %2197 = vrot.lane.b32.xlu0 %v2068_v47, %s7420_s19  ;;  %2177 = vrot.lane.b32.xlu1 %v2068_v47, %s7370_s6  ;;  %s7457_s19 = smov 6  }
 0x929   :  { %2112 = vrot.lane.b32.xlu0 %v2068_v47, %s7371_s5  ;;  %2201 = vrot.lane.b32.xlu1 %v2068_v47, %s7372_s29  ;;  %s7458_s5 = smov 110   ;;  %s7459_s29 = smov 117  }
 0x92d   :  { %2181 = vrot.lane.b32.xlu0 %v2068_v47, %s7373_s27  ;;  %2116 = vrot.lane.b32.xlu1 %v2068_v47, %s7374_s23  ;;  %s7460_s27 = smov 4   ;;  %s7461_s23 = smov 111  }
 0x931   :  { %2205 = vrot.lane.b32.xlu0 %v2068_v47, %s7453_s26  ;;  %2185 = vrot.lane.b32.xlu1 %v2068_v47, %s7454_s24 }
 0x935   :  { %2120 = vrot.lane.b32.xlu0 %v2068_v47, %s7377_s28  ;;  %2209 = vrot.lane.b32.xlu1 %v2068_v47, %s7455_s21  ;;  %s7462_s28 = smov 5  }
 0x939   :  { %2193 = vrot.lane.b32.xlu0 %v2068_v47, %s7456_s15  ;;  %2124 = vrot.lane.b32.xlu1 %v2068_v47, %s7457_s19  ;;  %s7464_s19 = smov 109  }
 0x93d   :  { %2217 = vrot.lane.b32.xlu0 %v2068_v47, %s7458_s5  ;;  %2189 = vrot.lane.b32.xlu1 %v2068_v47, %s7459_s29 }
 0x941   :  { %2132 = vrot.lane.b32.xlu0 %v2068_v47, %s7460_s27  ;;  %2213 = vrot.lane.b32.xlu1 %v2068_v47, %s7461_s23  ;;  %s7485_s23 = sld [smem:[#allocation25_spill]] }
 0x945   :  { %2241 = vrot.lane.b32.xlu0 %v6619_v10, %s7385_s14  ;;  %2128 = vrot.lane.b32.xlu1 %v2068_v47, %s7462_s28  ;;  %s7488_s28 = smov 9  }
 0x949   :  { %2231 = vrot.lane.b32.xlu0 %v6617_v61, %s7387_s9  ;;  %2221 = vrot.lane.b32.xlu1 %v2068_v47, %s7464_s19  ;;  %s7489_s19 = smov 114  }
 0x94d   :  { %2243 = vrot.lane.b32.xlu1 %v6617_v61, %s7385_s14 }
 0x96f   :  { %v2141_v57 = vpop.permute.xlu0 %2140  ;;  %v2137_v59 = vpop.permute.xlu1 %2136 }
 0x970   :  { %v5008_v62 = vpack.c.bf16 %v2141_v57, %v2137_v59 }
 0x972   :  { %5010 = vmatprep.subr.msk.bf16.mxu0 %vm5993_vm6, %v5008_v62 }
 0x973   :  { %v2077_v63 = vpop.permute.xlu0 %2076  ;;  %v2073_v4 = vpop.permute.xlu1 %2072 }
 0x974   :  { %v5011_v7 = vpack.c.bf16 %v2077_v63, %v2073_v4 }
 0x976   :  { %5013 = vmatpush3.bf16.msk.msra.mxu0 %vm5997_vm7, %v5011_v7 }
 0x977   :  { %v2081_v8 = vpop.permute.xlu0 %2080  ;;  %v2145_v12 = vpop.permute.xlu1 %2144 }
 0x978   :  { %v5014_v13 = vpack.c.bf16 %v2068_v47, %v2145_v12 }
 0x97a   :  { %5016 = vmatprep.subr.msk.bf16.mxu0 %vm6011_vm10, %v5014_v13 }
 0x97b   :  { %v6692_v15 = vpop.permute.xlu0 %5385  ;;  %v2085_v38 = vpop.permute.xlu1 %2084 }
 0x97c   :  { %v5017_v32 = vpack.c.bf16 %v2085_v38, %v2081_v8  ;;  %v5387_v50 = vunpack.i.l.bf16 %v6692_v15 }
 0x97e   :  { %5019 = vmatpush3.bf16.msk.msra.mxu0 %vm6022_vm13, %v5017_v32 }
 0x97f   :  { %v2089_v16 = vpop.permute.xlu0 %2088  ;;  %v2154_v51 = vpop.permute.xlu1 %2153 }
 0x980   :  { %v5020_v21 = vpack.c.bf16 %v2154_v51, %v5387_v50 }
 0x982   :  { %5022 = vmatprep.subr.msk.bf16.mxu0 %vm6033_vm2, %v5020_v21 }
 0x983   :  { %v2158_v22 = vpop.permute.xlu0 %2157  ;;  %v2093_v36 = vpop.permute.xlu1 %2092 }
 0x984   :  { %v5023_v25 = vpack.c.bf16 %v2093_v36, %v2089_v16 }
 0x986   :  { %5025 = vmatpush3.bf16.msk.msra.mxu0 %vm6041_vm5, %v5023_v25  ;;  %v5388_v25 = vunpack.i.h.bf16 %v6692_v15 }
 0x987   :  { %v2097_v37 = vpop.permute.xlu0 %2096  ;;  %v2162_v30 = vpop.permute.xlu1 %2161 }
 0x988   :  { %v5026_v1 = vpack.c.bf16 %v2162_v30, %v2158_v22 }
 0x98a   :  { %5028 = vmatprep.subr.msk.bf16.mxu0 %vm7465_vm9, %v5026_v1  ;;  %vm7469_vm9 = vnez %v7341_v18  ;;  %v5382_v1 = vunpack.i.l.bf16 %v6684_v55 }
 0x98b   :  { %v2166_v39 = vpop.permute.xlu0 %2165  ;;  %v2101_v60 = vpop.permute.xlu1 %2100 }
 0x98c   :  { %v5029_v48 = vpack.c.bf16 %v2101_v60, %v2097_v37  ;;  %v5377_v60 = vunpack.i.l.bf16 %v6682_v5 }
 0x98e   :  { %5031 = vmatpush3.bf16.msk.msra.mxu0 %vm7466_vm11, %v5029_v48  ;;  %vm7470_vm11 = vnez %v7353_v3  ;;  %v5378_v48 = vunpack.i.h.bf16 %v6682_v5 }
 0x98f   :  { %v2105_v44 = vpop.permute.xlu0 %2104  ;;  %v2170_v45 = vpop.permute.xlu1 %2169 }
 0x990   :  { %v5032_v47 = vpack.c.bf16 %v2170_v45, %v2166_v39 }
 0x992   :  { %5034 = vmatprep.subr.msk.bf16.mxu0 %vm7467_vm3, %v5032_v47 }
 0x993   :  { %v2174_v53 = vpop.permute.xlu0 %2173  ;;  %v2109_v54 = vpop.permute.xlu1 %2108 }
 0x994   :  { %v5035_v6 = vpack.c.bf16 %v2109_v54, %v2105_v44 }
 0x996   :  { %5037 = vmatpush3.bf16.msk.msra.mxu0 %vm7468_vm0, %v5035_v6  ;;  %vm7471_vm0 = vnez %v7343_v26 }
 0x997   :  { %v2198_v9 = vpop.permute.xlu0 %2197  ;;  %v2178_v57 = vpop.permute.xlu1 %2177 }
 0x998   :  { %v5038_v59 = vpack.c.bf16 %v2178_v57, %v2174_v53  ;;  %v5383_v53 = vunpack.i.h.bf16 %v6684_v55 }
 0x99a   :  { %5040 = vmatprep.subr.msk.bf16.mxu0 %vm7469_vm9, %v5038_v59  ;;  %vm7472_vm9 = vnez %v7357_v19 }
 0x99b   :  { %v2113_v62 = vpop.permute.xlu0 %2112  ;;  %v2202_v63 = vpop.permute.xlu1 %2201 }
 0x99c   :  { %v5056_v4 = vpack.c.bf16 %v2202_v63, %v2198_v9 }
 0x99e   :  { %5058 = vmatprep.subr.msk.bf16.mxu1 %vm7470_vm11, %v5056_v4 }
 0x99f   :  { %v2182_v7 = vpop.permute.xlu0 %2181  ;;  %5061 = vmatpush3.bf16.msk.msra.mxu1 %vm7470_vm11, %v5056_v4  ;;  %v2117_v8 = vpop.permute.xlu1 %2116 }
 0x9a0   :  { %v5041_v12 = vpack.c.bf16 %v2117_v8, %v2113_v62 }
 0x9a2   :  { %5043 = vmatpush3.bf16.msk.msra.mxu0 %vm7471_vm0, %v5041_v12  ;;  %v2261_v12 = vld [vmem:[#allocation10] sm:$0xff] }
 0x9a3   :  { %v2206_v13 = vpop.permute.xlu0 %2205  ;;  %v2186_v38 = vpop.permute.xlu1 %2185 }
 0x9a4   :  { %v5044_v32 = vpack.c.bf16 %v2186_v38, %v2182_v7 }
 0x9a6   :  { %5046 = vmatprep.subr.msk.bf16.mxu0 %vm7431_vm4, %v5044_v32  ;;  %vm7475_vm4 = vcmp.ge.s32.totalorder %v5991_v17, 0  ;;  %v2265_v32 = vld [vmem:[#allocation10 + $0x20] sm:$0xff] }
 0x9a7   :  { %v2121_v50 = vpop.permute.xlu0 %2120  ;;  %v2210_v16 = vpop.permute.xlu1 %2209  ;;  %v2245_v6 = vsel %vm7475_vm4, %v5377_v60, -inf  ;;  %vm7476_vm0 = vmmov %vm7475_vm4  ;;  %vm7479_vm4 = vnez %v7362_v33  ;;  %v2270_v60 = vld [vmem:[#allocation10 + $0x48] sm:$0xff] }
 0x9a8   :  { %v5062_v51 = vpack.c.bf16 %v2210_v16, %v2206_v13  ;;  %v2246_v5 = vsel %vm7476_vm0, %v5378_v48, -inf  ;;  %v2269_v48 = vld [vmem:[#allocation10 + $0x40] sm:$0xff] }
 0x9aa   :  { %5064 = vmatprep.subr.msk.bf16.mxu1 %vm7472_vm9, %v5062_v51 }
 0x9ab   :  { %v2194_v21 = vpop.permute.xlu0 %2193  ;;  %5067 = vmatpush3.bf16.msk.msra.mxu1 %vm7472_vm9, %v5062_v51  ;;  %v2125_v22 = vpop.permute.xlu1 %2124  ;;  %vm7473_vm9 = vcmp.lt.s32.totalorder %v6018_v31, 64 }
 0x9ac   :  { %v5047_v36 = vpack.c.bf16 %v2125_v22, %v2121_v50  ;;  %v2233_v47 = vsel %vm7473_vm9, %v5388_v25, -inf  ;;  %v2264_v22 = vld [vmem:[#allocation10 + $0x18] sm:$0xff] }
 0x9ad   :  { %v2249_v9 = vmax.f32 %v2233_v47, %v2245_v6 }
 0x9ae   :  { %5049 = vmatpush3.bf16.msk.msra.mxu0 %vm7436_vm1, %v5047_v36  ;;  %vm7474_vm1 = vmmov %vm7473_vm9  ;;  %v2268_v36 = vld [vmem:[#allocation10 + $0x38] sm:$0xff] }
 0x9af   :  { %v2218_v37 = vpop.permute.xlu0 %2217  ;;  %v2190_v30 = vpop.permute.xlu1 %2189  ;;  %v2234_v15 = vsel %vm7474_vm1, %v5382_v1, -inf  ;;  %vm7477_vm9 = vmmov %vm7474_vm1  ;;  %v2253_v8 = vmax.f32 %v6609_v29, %v2249_v9  ;;  %v2271_v1 = vld [vmem:[#allocation10 + $0x50] sm:$0xff] }
 0x9b0   :  { %v5050_v39 = vpack.c.bf16 %v2194_v21, %v2190_v30  ;;  %v2250_v57 = vmax.f32 %v2234_v15, %v2246_v5  ;;  %v2235_v62 = vsel %vm7477_vm9, %v5383_v53, -inf  ;;  %vm7478_vm1 = vmmov %vm7476_vm0 }
 0x9b1   :  { %vm7480_vm0 = vmmov %vm7477_vm9 }
 0x9b2   :  { %5052 = vmatprep.subr.msk.bf16.mxu0 %vm7395_vm15, %v5050_v39  ;;  %v2254_v50 = vmax.f32 %v6607_v24, %v2250_v57  ;;  %vm7481_vm9 = vmmov %vm7478_vm1  ;;  %v2266_v39 = vld [vmem:[#allocation10 + $0x28] sm:$0xff] }
 0x9b3   :  { %v2133_v44 = vpop.permute.xlu0 %2132  ;;  %v2214_v45 = vpop.permute.xlu1 %2213 }
 0x9b4   :  { %v5068_v54 = vpack.c.bf16 %v2218_v37, %v2214_v45  ;;  %v2267_v37 = vld [vmem:[#allocation10 + $0x30] sm:$0xff] }
 0x9b6   :  { %5070 = vmatprep.subr.msk.bf16.mxu1 %vm6170_vm8, %v5068_v54 }
 0x9b7   :  { %v2242_v59 = vpop.permute.xlu0 %2241  ;;  %5073 = vmatpush3.bf16.msk.msra.mxu1 %vm6170_vm8, %v5068_v54  ;;  %v2129_v55 = vpop.permute.xlu1 %2128 }
 0x9b8   :  { %v2247_v63 = vsel %vm7478_vm1, %v2242_v59, -inf  ;;  %v5053_v4 = vpack.c.bf16 %v2133_v44, %v2129_v55  ;;  %vm7482_vm1 = vcmask 719872   ;;  %v2272_v44 = vld [vmem:[#allocation10 + $0x58] sm:$0xff] }
 0x9b9   :  { %v2251_v7 = vmax.f32 %v2235_v62, %v2247_v63 }
 0x9ba   :  { %5055 = vmatpush3.bf16.msk.msra.mxu0 %vm7437_vm14, %v5053_v4 }
 0x9bb   :  { %v2255_v13 = vmax.f32 %v6619_v10, %v2251_v7  ;;  %v2222_v38 = vpop.permute.xlu1 %2221  ;;  %v2232_v51 = vpop.permute.xlu0 %2231 }
 0x9bc   :  { %v5074_v16 = vpack.c.bf16 %v2253_v8, %v2222_v38  ;;  %v2236_v10 = vsel %vm7480_vm0, %v2232_v51, -inf  ;;  %vm7483_vm0 = vmmov %vm7482_vm1 }
 0x9bd   :  { %2393 = vmatmul.mubr.f32.vlgmr.msra.gmra.mrb[20].mxu0 %v2261_v12  ;;  %v5080_v21 = vpack.c.bf16 %v2255_v13, %v2254_v50 }
 0x9be   :  { %5076 = vmatprep.subr.msk.bf16.mxu1 %vm7479_vm4, %v5074_v16  ;;  %2397 = vmatprep.mubr.f32.mxu0 %v2265_v32 }
 0x9bf   :  { %5079 = vmatpush3.bf16.msk.msra.mxu1 %vm7479_vm4, %v5074_v16  ;;  %v2244_v29 = vpop.permute.xlu1 %2243 }
 0x9c0   :  { %v2248_v24 = vsel %vm7481_vm9, %v2244_v29, -inf  ;;  %5081 = vmatprep.subr.bf16.mxu1 %v5080_v21  ;;  %vm7484_vm9 = vmmov %vm7483_vm0 }
 0x9c1   :  { %v2252_v25 = vmax.f32 %v2236_v10, %v2248_v24  ;;  %2398 = vmatmul.mubr.f32.gmra.mrb[22].mxu0 %v2264_v22  ;;  %v2502_v10 = vld [vmem:[%s7485_s23] sm:$0xff]  ;;  %s7487_s23 = smov 115  }
 0x9c2   :  { %2402 = vmatprep.mubr.f32.mxu0 %v2268_v36 }
 0x9c3   :  { %v2256_v30 = vmax.f32 %v6617_v61, %v2252_v25  ;;  %5083 = vmatpush3.bf16.msra.mxu1 %v5080_v21 }
 0x9c5   :  { %2403 = vmatmul.mubr.f32.gmra.mrb[24].mxu0 %v2267_v37  ;;  %4620 = vmatprep.subr.mxu1 %v2256_v30 }
 0x9c6   :  { %2407 = vmatprep.mubr.f32.mxu0 %v2271_v1  ;;  %v2767_v1 = vld [vmem:[#allocation11 + $0x10] sm:$0xff] }
 0x9c7   :  { %4621 = vmatpush3.msra.mxu1 %v2256_v30  ;;  %v2766_v30 = vld [vmem:[#allocation11 + $0x8] sm:$0xff] }
 0x9c8   :  { %4623 = vmatmul.mubr.msk.f32.vlgmr.msra.gmra.mrb[28].mxu1 %vm7482_vm1, %v2266_v39  ;;  %5084 = vmatprep.subr.bf16.mxu1 %v5664_v43  ;;  %vm7486_vm1 = vcmask 261120  }
 0x9c9   :  { %2408 = vmatmul.mubr.f32.gmra.mrb[26].mxu0 %v2270_v60  ;;  %4625 = vmatprep.mubr.msk.f32.mxu1 %vm7483_vm0, %v2269_v48 }
 0x9ca   :  { %2896 = vmatprep.mubr.f32.mxu0 %v2766_v30 }
 0x9cc   :  { %4626 = vmatmul.mubr.msk.f32.gmra.mrb[30].mxu1 %vm7484_vm9, %v2272_v44  ;;  %vm7497_vm9 = vnez %v7333_v52 }
 0x9cd   :  { %4636 = vmatprep.mubr.msk.f32.mxu1 %vm7407_vm12, %v5623_v0 }
 0xa90   :  { %v4291_v61 = vpop.f32.mrb[20].mxu0 }
 0xa91   :  { %v4292_v45 = vpop.f32.mrb[21].mxu0 }
 0xa92   :  { %v4293_v47 = vadd.f32 %v4292_v45, %v4291_v61 }
 0xa94   :  { %v4294_v53 = vpop.f32.mrb[22].mxu0 }
 0xa95   :  { %v4295_v15 = vpop.f32.mrb[23].mxu0 }
 0xa96   :  { %v4296_v54 = vadd.f32 %v4295_v15, %v4294_v53 }
 0xa98   :  { %v4297_v6 = vpop.f32.mrb[24].mxu0 }
 0xa99   :  { %v4298_v5 = vpop.f32.mrb[25].mxu0 }
 0xa9a   :  { %v4299_v9 = vadd.f32 %v4298_v5, %v4297_v6 }
 0xa9b   :  { %v4624_v57 = vpop.f32.mrb[28].mxu1 }
 0xa9c   :  { %v2485_v59 = vadd.f32 %v4624_v57, %v4296_v54  ;;  %v4300_v55 = vpop.f32.mrb[26].mxu0  ;;  %v2479_v62 = vpop.f32.mrb[29].mxu1 }
 0xa9d   :  { %v2480_v63 = vadd.f32 %v4293_v47, %v2479_v62  ;;  %v4301_v4 = vpop.f32.mrb[27].mxu0 }
 0xa9e   :  { %v6768_v7 = vmax.f32 %v2485_v59, 0.0  ;;  %v4302_v8 = vadd.f32 %v4301_v4, %v4300_v55 }
 0xa9f   :  { %v6770_v12 = vmax.f32 %v2480_v63, 0.0  ;;  %v4627_v13 = vpop.f32.mrb[30].mxu1 }
 0xaa0   :  { %v2495_v38 = vadd.f32 %v4627_v13, %v4302_v8  ;;  %v2489_v32 = vpop.f32.mrb[31].mxu1 }
 0xaa1   :  { %v2490_v50 = vadd.f32 %v4299_v9, %v2489_v32  ;;  %v5389_v16 = vpack.i.bf16 %v6768_v7, %v6770_v12  ;;  %v5085_v51 = vpack.c.bf16 %v6768_v7, %v6770_v12 }
 0xaa2   :  { %v6776_v21 = vmax.f32 %v2495_v38, 0.0 }
 0xaa3   :  { %v6778_v22 = vmax.f32 %v2490_v50, 0.0  ;;  %5390 = vrot.lane.b32.xlu1 %v5389_v16, %s7385_s14  ;;  %5086 = vmatpush3.bf16.msra.mxu1 %v5085_v51 }
 0xaa4   :  { %5087 = vmatprep.subr.bf16.mxu1 %v5664_v43 }
 0xaa5   :  { %v5394_v29 = vpack.i.bf16 %v6778_v22, %v6768_v7  ;;  %v5088_v36 = vpack.c.bf16 %v6776_v21, %v6778_v22 }
 0xaa7   :  { %5395 = vrot.lane.b32.xlu0 %v5394_v29, %s7387_s9  ;;  %5089 = vmatpush3.bf16.msra.mxu1 %v5088_v36 }
 0xaaa   :  { %4637 = vmatmul.mubr.msk.f32.vlgmr.msra.gmra.mrb[32].mxu1 %vm7486_vm1, %v2502_v10  ;;  %vm7498_vm1 = vnez %v7335_v58 }
 0xaab   :  { %4661 = vmatprep.mubr.msk.f32.mxu1 %vm7483_vm0, %v2767_v1  ;;  %vm7499_vm0 = vnez %v7339_v11 }
 0xb15   :  { %v6837_v39 = vpop.permute.xlu1 %5390 }
 0xb19   :  { %v6839_v60 = vpop.permute.xlu0 %5395 }
 0xb7d   :  { %v2572_v24 = vpop.f32.mrb[32].mxu1 }
 0xb7e   :  { %2644 = vrot.lane.b32.xlu1 %v2572_v24, %s7409_s4  ;;  %2640 = vrot.lane.b32.xlu0 %v2572_v24, %s7450_s8  ;;  %v4638_v25 = vpop.f32.mrb[33].mxu1  ;;  %v5399_v37 = vpack.i.bf16 %v6770_v12, %v2572_v24 }
 0xb82   :  { %2580 = vrot.lane.b32.xlu1 %v2572_v24, %s7451_s22  ;;  %2576 = vrot.lane.b32.xlu0 %v2572_v24, %s7412_s13 }
 0xb86   :  { %2584 = vrot.lane.b32.xlu1 %v2572_v24, %s7452_s18  ;;  %2648 = vrot.lane.b32.xlu0 %v2572_v24, %s7385_s14 }
 0xb8a   :  { %5400 = vrot.lane.b32.xlu1 %v5399_v37, %s7387_s9  ;;  %2588 = vrot.lane.b32.xlu0 %v2572_v24, %s7414_s11 }
 0xb8e   :  { %2592 = vrot.lane.b32.xlu1 %v2572_v24, %s7415_s2  ;;  %2657 = vrot.lane.b32.xlu0 %v2572_v24, %s7416_s10 }
 0xb92   :  { %2661 = vrot.lane.b32.xlu1 %v2572_v24, %s7417_s17  ;;  %2596 = vrot.lane.b32.xlu0 %v2572_v24, %s7418_s7 }
 0xb96   :  { %2600 = vrot.lane.b32.xlu1 %v2572_v24, %s7419_s30  ;;  %2665 = vrot.lane.b32.xlu0 %v2572_v24, %s7363_s0  ;;  %s7490_s0 = smov 119  }
 0xb9a   :  { %2669 = vrot.lane.b32.xlu1 %v2572_v24, %s7364_s25  ;;  %2604 = vrot.lane.b32.xlu0 %v2572_v24, %s7365_s16  ;;  %s7491_s25 = smov 8  }
 0xb9e   :  { %2608 = vrot.lane.b32.xlu1 %v2572_v24, %s7366_s20  ;;  %2673 = vrot.lane.b32.xlu0 %v2572_v24, %s7367_s12  ;;  %s7492_s20 = smov 7  }
 0xba2   :  { %2677 = vrot.lane.b32.xlu1 %v2572_v24, %s7368_s3  ;;  %2612 = vrot.lane.b32.xlu0 %v2572_v24, %s7369_s1  ;;  %s7493_s1 = smov 6  }
 0xba6   :  { %2701 = vrot.lane.b32.xlu1 %v2572_v24, %s7487_s23  ;;  %2681 = vrot.lane.b32.xlu0 %v2572_v24, %s7370_s6 }
 0xbaa   :  { %2616 = vrot.lane.b32.xlu1 %v2572_v24, %s7488_s28  ;;  %2705 = vrot.lane.b32.xlu0 %v2572_v24, %s7489_s19 }
 0xbae   :  { %2685 = vrot.lane.b32.xlu1 %v2572_v24, %s7490_s0  ;;  %2620 = vrot.lane.b32.xlu0 %v2572_v24, %s7491_s25  ;;  %s7494_s25 = smov 111  }
 0xbb2   :  { %2709 = vrot.lane.b32.xlu1 %v2572_v24, %s7453_s26  ;;  %2689 = vrot.lane.b32.xlu0 %v2572_v24, %s7454_s24 }
 0xbb6   :  { %2624 = vrot.lane.b32.xlu1 %v2572_v24, %s7492_s20  ;;  %2713 = vrot.lane.b32.xlu0 %v2572_v24, %s7455_s21  ;;  %s7495_s20 = smov 5  }
 0xbba   :  { %2697 = vrot.lane.b32.xlu1 %v2572_v24, %s7456_s15  ;;  %2628 = vrot.lane.b32.xlu0 %v2572_v24, %s7493_s1  ;;  %s7496_s15 = smov 109  }
 0xbbe   :  { %2721 = vrot.lane.b32.xlu1 %v2572_v24, %s7458_s5  ;;  %2693 = vrot.lane.b32.xlu0 %v2572_v24, %s7459_s29 }
 0xbc2   :  { %2636 = vrot.lane.b32.xlu1 %v2572_v24, %s7460_s27  ;;  %2717 = vrot.lane.b32.xlu0 %v2572_v24, %s7494_s25  ;;  %s7522_s27 = smov 124  }
 0xbc6   :  { %2745 = vrot.lane.b32.xlu1 %v6778_v22, %s7385_s14  ;;  %2632 = vrot.lane.b32.xlu0 %v2572_v24, %s7495_s20  ;;  %s7523_s20 = smov 123  }
 0xbca   :  { %2735 = vrot.lane.b32.xlu1 %v6776_v21, %s7387_s9  ;;  %2725 = vrot.lane.b32.xlu0 %v2572_v24, %s7496_s15  ;;  %s7516_s15 = sld [smem:[#allocation26_spill]] }
 0xbce   :  { %2747 = vrot.lane.b32.xlu0 %v6776_v21, %s7385_s14 }
 0xbf0   :  { %v2645_v48 = vpop.permute.xlu1 %2644  ;;  %v2641_v44 = vpop.permute.xlu0 %2640 }
 0xbf1   :  { %v5090_v61 = vpack.c.bf16 %v2645_v48, %v2641_v44 }
 0xbf3   :  { %5092 = vmatprep.subr.msk.bf16.mxu0 %vm5993_vm6, %v5090_v61 }
 0xbf4   :  { %v2581_v45 = vpop.permute.xlu1 %2580  ;;  %v2577_v47 = vpop.permute.xlu0 %2576 }
 0xbf5   :  { %v5093_v53 = vpack.c.bf16 %v2581_v45, %v2577_v47 }
 0xbf7   :  { %5095 = vmatpush3.bf16.msk.msra.mxu0 %vm5997_vm7, %v5093_v53 }
 0xbf8   :  { %v2585_v15 = vpop.permute.xlu1 %2584  ;;  %v2649_v54 = vpop.permute.xlu0 %2648 }
 0xbf9   :  { %v5096_v6 = vpack.c.bf16 %v2572_v24, %v2649_v54 }
 0xbfb   :  { %5098 = vmatprep.subr.msk.bf16.mxu0 %vm6011_vm10, %v5096_v6 }
 0xbfc   :  { %v6847_v5 = vpop.permute.xlu1 %5400  ;;  %v2589_v9 = vpop.permute.xlu0 %2588 }
 0xbfd   :  { %v5099_v57 = vpack.c.bf16 %v2589_v9, %v2585_v15  ;;  %v5402_v59 = vunpack.i.l.bf16 %v6847_v5 }
 0xbff   :  { %5101 = vmatpush3.bf16.msk.msra.mxu0 %vm6022_vm13, %v5099_v57 }
 0xc00   :  { %v2593_v55 = vpop.permute.xlu1 %2592  ;;  %v2658_v62 = vpop.permute.xlu0 %2657 }
 0xc01   :  { %v5102_v63 = vpack.c.bf16 %v2658_v62, %v5402_v59 }
 0xc03   :  { %5104 = vmatprep.subr.msk.bf16.mxu0 %vm6033_vm2, %v5102_v63 }
 0xc04   :  { %v2662_v4 = vpop.permute.xlu1 %2661  ;;  %v2597_v8 = vpop.permute.xlu0 %2596 }
 0xc05   :  { %v5105_v13 = vpack.c.bf16 %v2597_v8, %v2593_v55 }
 0xc07   :  { %5107 = vmatpush3.bf16.msk.msra.mxu0 %vm6041_vm5, %v5105_v13  ;;  %v5403_v13 = vunpack.i.h.bf16 %v6847_v5 }
 0xc08   :  { %v2601_v38 = vpop.permute.xlu1 %2600  ;;  %v2666_v32 = vpop.permute.xlu0 %2665 }
 0xc09   :  { %v5108_v50 = vpack.c.bf16 %v2666_v32, %v2662_v4 }
 0xc0b   :  { %5110 = vmatprep.subr.msk.bf16.mxu0 %vm7497_vm9, %v5108_v50  ;;  %vm7500_vm9 = vnez %v7341_v18  ;;  %v5397_v50 = vunpack.i.l.bf16 %v6839_v60 }
 0xc0c   :  { %v2670_v16 = vpop.permute.xlu1 %2669  ;;  %v2605_v51 = vpop.permute.xlu0 %2604 }
 0xc0d   :  { %v5111_v29 = vpack.c.bf16 %v2605_v51, %v2601_v38  ;;  %v5392_v51 = vunpack.i.l.bf16 %v6837_v39 }
 0xc0f   :  { %5113 = vmatpush3.bf16.msk.msra.mxu0 %vm7498_vm1, %v5111_v29  ;;  %v5393_v29 = vunpack.i.h.bf16 %v6837_v39 }
 0xc10   :  { %v2609_v36 = vpop.permute.xlu1 %2608  ;;  %v2674_v10 = vpop.permute.xlu0 %2673 }
 0xc11   :  { %v5114_v24 = vpack.c.bf16 %v2674_v10, %v2670_v16 }
 0xc13   :  { %5116 = vmatprep.subr.msk.bf16.mxu0 %vm7467_vm3, %v5114_v24  ;;  %vm7503_vm3 = vnez %v7357_v19 }
 0xc14   :  { %v2678_v25 = vpop.permute.xlu1 %2677  ;;  %v2613_v37 = vpop.permute.xlu0 %2612 }
 0xc15   :  { %v5117_v30 = vpack.c.bf16 %v2613_v37, %v2609_v36 }
 0xc17   :  { %5119 = vmatpush3.bf16.msk.msra.mxu0 %vm7499_vm0, %v5117_v30  ;;  %vm7501_vm0 = vnez %v7343_v26 }
 0xc18   :  { %v2702_v1 = vpop.permute.xlu1 %2701  ;;  %v2682_v48 = vpop.permute.xlu0 %2681 }
 0xc19   :  { %v5120_v44 = vpack.c.bf16 %v2682_v48, %v2678_v25  ;;  %v5398_v25 = vunpack.i.h.bf16 %v6839_v60 }
 0xc1b   :  { %5122 = vmatprep.subr.msk.bf16.mxu0 %vm7500_vm9, %v5120_v44  ;;  %vm7502_vm9 = vnez %v7345_v35 }
 0xc1c   :  { %v2617_v61 = vpop.permute.xlu1 %2616  ;;  %v2706_v45 = vpop.permute.xlu0 %2705 }
 0xc1d   :  { %v5138_v47 = vpack.c.bf16 %v2706_v45, %v2702_v1 }
 0xc1f   :  { %5140 = vmatprep.subr.msk.bf16.mxu1 %vm7470_vm11, %v5138_v47 }
 0xc20   :  { %v2686_v53 = vpop.permute.xlu1 %2685  ;;  %5143 = vmatpush3.bf16.msk.msra.mxu1 %vm7470_vm11, %v5138_v47  ;;  %v2621_v15 = vpop.permute.xlu0 %2620 }
 0xc21   :  { %v5123_v54 = vpack.c.bf16 %v2621_v15, %v2617_v61 }
 0xc23   :  { %5125 = vmatpush3.bf16.msk.msra.mxu0 %vm7501_vm0, %v5123_v54  ;;  %vm7504_vm0 = vnez %v7347_v42  ;;  %v2765_v54 = vld [vmem:[#allocation11] sm:$0xff] }
 0xc24   :  { %v2710_v6 = vpop.permute.xlu1 %2709  ;;  %v2690_v9 = vpop.permute.xlu0 %2689 }
 0xc25   :  { %v5126_v57 = vpack.c.bf16 %v2690_v9, %v2686_v53 }
 0xc27   :  { %5128 = vmatprep.subr.msk.bf16.mxu0 %vm7502_vm9, %v5126_v57  ;;  %vm7505_vm9 = vcmp.lt.s32.totalorder %v6018_v31, 64  ;;  %v2769_v57 = vld [vmem:[#allocation11 + $0x20] sm:$0xff] }
 0xc28   :  { %v2625_v59 = vpop.permute.xlu1 %2624  ;;  %v2714_v55 = vpop.permute.xlu0 %2713  ;;  %v2737_v36 = vsel %vm7505_vm9, %v5403_v13, -inf }
 0xc29   :  { %v5144_v62 = vpack.c.bf16 %v2714_v55, %v2710_v6 }
 0xc2b   :  { %5146 = vmatprep.subr.msk.bf16.mxu1 %vm7503_vm3, %v5144_v62 }
 0xc2c   :  { %v2698_v63 = vpop.permute.xlu1 %2697  ;;  %5149 = vmatpush3.bf16.msk.msra.mxu1 %vm7503_vm3, %v5144_v62  ;;  %v2629_v4 = vpop.permute.xlu0 %2628  ;;  %vm7507_vm3 = vcmp.ge.s32.totalorder %v5991_v17, 0 }
 0xc2d   :  { %v5129_v8 = vpack.c.bf16 %v2629_v4, %v2625_v59  ;;  %v2749_v30 = vsel %vm7507_vm3, %v5392_v51, -inf  ;;  %vm7508_vm11 = vmmov %vm7507_vm3  ;;  %v2768_v4 = vld [vmem:[#allocation11 + $0x18] sm:$0xff]  ;;  %v2774_v51 = vld [vmem:[#allocation11 + $0x48] sm:$0xff] }
 0xc2e   :  { %v2750_v39 = vsel %vm7508_vm11, %v5393_v29, -inf  ;;  %v2753_v1 = vmax.f32 %v2737_v36, %v2749_v30  ;;  %v2773_v29 = vld [vmem:[#allocation11 + $0x40] sm:$0xff]  ;;  %v2776_v36 = vld [vmem:[#allocation11 + $0x58] sm:$0xff] }
 0xc2f   :  { %5131 = vmatpush3.bf16.msk.msra.mxu0 %vm7504_vm0, %v5129_v8  ;;  %vm7506_vm0 = vmmov %vm7505_vm9  ;;  %v2772_v8 = vld [vmem:[#allocation11 + $0x38] sm:$0xff] }
 0xc30   :  { %v2722_v38 = vpop.permute.xlu1 %2721  ;;  %v2694_v32 = vpop.permute.xlu0 %2693  ;;  %v2738_v5 = vsel %vm7506_vm0, %v5397_v50, -inf  ;;  %vm7509_vm9 = vmmov %vm7506_vm0  ;;  %v2757_v15 = vmax.f32 %v6770_v12, %v2753_v1  ;;  %v2775_v50 = vld [vmem:[#allocation11 + $0x50] sm:$0xff] }
 0xc31   :  { %v5132_v16 = vpack.c.bf16 %v2698_v63, %v2694_v32  ;;  %v2754_v48 = vmax.f32 %v2738_v5, %v2750_v39  ;;  %v2739_v61 = vsel %vm7509_vm9, %v5398_v25, -inf  ;;  %vm7510_vm0 = vmmov %vm7507_vm3 }
 0xc32   :  { %vm7511_vm11 = vmmov %vm7509_vm9  ;;  %vm7513_vm9 = vcmask 719872  }
 0xc33   :  { %5134 = vmatprep.subr.msk.bf16.mxu0 %vm7395_vm15, %v5132_v16  ;;  %v2758_v59 = vmax.f32 %v6768_v7, %v2754_v48  ;;  %vm7512_vm3 = vmmov %vm7510_vm0  ;;  %v2770_v16 = vld [vmem:[#allocation11 + $0x28] sm:$0xff] }
 0xc34   :  { %v2637_v10 = vpop.permute.xlu1 %2636  ;;  %v2718_v24 = vpop.permute.xlu0 %2717 }
 0xc35   :  { %v5150_v37 = vpack.c.bf16 %v2722_v38, %v2718_v24  ;;  %v2771_v38 = vld [vmem:[#allocation11 + $0x30] sm:$0xff] }
 0xc37   :  { %5152 = vmatprep.subr.msk.bf16.mxu1 %vm6170_vm8, %v5150_v37 }
 0xc38   :  { %v2746_v44 = vpop.permute.xlu1 %2745  ;;  %5155 = vmatpush3.bf16.msk.msra.mxu1 %vm6170_vm8, %v5150_v37  ;;  %v2633_v60 = vpop.permute.xlu0 %2632 }
 0xc39   :  { %v2751_v45 = vsel %vm7510_vm0, %v2746_v44, -inf  ;;  %v5135_v47 = vpack.c.bf16 %v2637_v10, %v2633_v60  ;;  %vm7514_vm0 = vmmov %vm7513_vm9 }
 0xc3a   :  { %v2755_v53 = vmax.f32 %v2739_v61, %v2751_v45 }
 0xc3b   :  { %5137 = vmatpush3.bf16.msk.msra.mxu0 %vm7437_vm14, %v5135_v47 }
 0xc3c   :  { %v2759_v6 = vmax.f32 %v6778_v22, %v2755_v53  ;;  %v2726_v9 = vpop.permute.xlu0 %2725  ;;  %v2736_v62 = vpop.permute.xlu1 %2735 }
 0xc3d   :  { %v5156_v55 = vpack.c.bf16 %v2757_v15, %v2726_v9  ;;  %v2740_v22 = vsel %vm7511_vm11, %v2736_v62, -inf  ;;  %vm7515_vm11 = vmmov %vm7514_vm0 }
 0xc3e   :  { %2897 = vmatmul.mubr.f32.vlgmr.msra.gmra.mrb[28].mxu0 %v2765_v54  ;;  %v5162_v63 = vpack.c.bf16 %v2759_v6, %v2758_v59 }
 0xc3f   :  { %5158 = vmatprep.subr.msk.bf16.mxu1 %vm7479_vm4, %v5156_v55  ;;  %2901 = vmatprep.mubr.f32.mxu0 %v2769_v57 }
 0xc40   :  { %5161 = vmatpush3.bf16.msk.msra.mxu1 %vm7479_vm4, %v5156_v55  ;;  %v2748_v12 = vpop.permute.xlu0 %2747 }
 0xc41   :  { %v2752_v7 = vsel %vm7512_vm3, %v2748_v12, -inf  ;;  %5163 = vmatprep.subr.bf16.mxu1 %v5162_v63  ;;  %vm7517_vm3 = vcmask 261120  }
 0xc42   :  { %v2756_v13 = vmax.f32 %v2740_v22, %v2752_v7  ;;  %2902 = vmatmul.mubr.f32.gmra.mrb[30].mxu0 %v2768_v4 }
 0xc43   :  { %2906 = vmatprep.mubr.f32.mxu0 %v2772_v8  ;;  %v3006_v8 = vld [vmem:[%s7516_s15] sm:$0xff] }
 0xc44   :  { %v2760_v32 = vmax.f32 %v6776_v21, %v2756_v13  ;;  %5165 = vmatpush3.bf16.msra.mxu1 %v5162_v63 }
 0xc46   :  { %2907 = vmatmul.mubr.f32.gmra.mrb[32].mxu0 %v2771_v38  ;;  %4659 = vmatprep.subr.mxu1 %v2760_v32 }
 0xc47   :  { %2911 = vmatprep.mubr.f32.mxu0 %v2775_v50 }
 0xc48   :  { %4660 = vmatpush3.msra.mxu1 %v2760_v32 }
 0xc49   :  { %4662 = vmatmul.mubr.msk.f32.vlgmr.msra.gmra.mrb[34].mxu1 %vm7513_vm9, %v2770_v16  ;;  %5166 = vmatprep.subr.bf16.mxu1 %v5664_v43  ;;  %vm7518_vm9 = vcmp.ge.s32.totalorder %v5991_v17, 0  ;;  %v3279_v17 = vld [vmem:[#allocation13 + $0x50] sm:$0xff] }
 0xc4a   :  { %2912 = vmatmul.mubr.f32.gmra.mrb[34].mxu0 %v2774_v51  ;;  %4664 = vmatprep.mubr.msk.f32.mxu1 %vm7514_vm0, %v2773_v29  ;;  %vm7519_vm0 = vmmov %vm7518_vm9 }
 0xc4d   :  { %4665 = vmatmul.mubr.msk.f32.gmra.mrb[36].mxu1 %vm7515_vm11, %v2776_v36  ;;  %vm7520_vm11 = vcmp.lt.s32.totalorder %v6018_v31, 64  ;;  %v3280_v31 = vld [vmem:[#allocation13 + $0x58] sm:$0xff] }
 0xc4e   :  { %4675 = vmatprep.mubr.msk.f32.mxu1 %vm7407_vm12, %v5623_v0  ;;  %vm7521_vm12 = vmmov %vm7520_vm11 }
 0xd11   :  { %v4355_v21 = vpop.f32.mrb[28].mxu0 }
 0xd12   :  { %v4356_v10 = vpop.f32.mrb[29].mxu0 }
 0xd13   :  { %v4357_v24 = vadd.f32 %v4356_v10, %v4355_v21 }
 0xd15   :  { %v4358_v25 = vpop.f32.mrb[30].mxu0 }
 0xd16   :  { %v4359_v5 = vpop.f32.mrb[31].mxu0 }
 0xd17   :  { %v4360_v37 = vadd.f32 %v4359_v5, %v4358_v25 }
 0xd19   :  { %v4361_v30 = vpop.f32.mrb[32].mxu0 }
 0xd1a   :  { %v4362_v39 = vpop.f32.mrb[33].mxu0 }
 0xd1b   :  { %v4363_v1 = vadd.f32 %v4362_v39, %v4361_v30 }
 0xd1c   :  { %v4663_v48 = vpop.f32.mrb[34].mxu1 }
 0xd1d   :  { %v2989_v44 = vadd.f32 %v4663_v48, %v4360_v37  ;;  %v4364_v60 = vpop.f32.mrb[34].mxu0  ;;  %v2983_v61 = vpop.f32.mrb[35].mxu1  ;;  %v3271_v48 = vld [vmem:[#allocation13 + $0x10] sm:$0xff] }
 0xd1e   :  { %v2984_v45 = vadd.f32 %v4357_v24, %v2983_v61  ;;  %v4365_v47 = vpop.f32.mrb[35].mxu0 }
 0xd1f   :  { %v3003_v53 = vmax.f32 %v2989_v44, 0.0  ;;  %v4366_v15 = vadd.f32 %v4365_v47, %v4364_v60 }
 0xd20   :  { %v6923_v54 = vmax.f32 %v2984_v45, 0.0  ;;  %v4666_v6 = vpop.f32.mrb[36].mxu1 }
 0xd21   :  { %v2999_v9 = vadd.f32 %v4666_v6, %v4366_v15  ;;  %v2993_v57 = vpop.f32.mrb[37].mxu1 }
 0xd22   :  { %v2994_v59 = vadd.f32 %v4363_v1, %v2993_v57  ;;  %v5167_v55 = vpack.c.bf16 %v3003_v53, %v6923_v54  ;;  %v3270_v1 = vld [vmem:[#allocation13 + $0x8] sm:$0xff] }
 0xd23   :  { %v6926_v62 = vmax.f32 %v2999_v9, 0.0  ;;  %3400 = vmatprep.mubr.f32.mxu0 %v3270_v1 }
 0xd24   :  { %v3004_v63 = vmax.f32 %v2994_v59, 0.0  ;;  %5168 = vmatpush3.bf16.msra.mxu1 %v5167_v55 }
 0xd25   :  { %5169 = vmatprep.subr.bf16.mxu1 %v5664_v43 }
 0xd26   :  { %v5409_v4 = vpack.i.bf16 %v3004_v63, %v3003_v53  ;;  %v5170_v12 = vpack.c.bf16 %v6926_v62, %v3004_v63 }
 0xd28   :  { %5410 = vrot.lane.b32.xlu1 %v5409_v4, %s7385_s14  ;;  %5405 = vrot.lane.b32.xlu0 %v5409_v4, %s7387_s9 }
 0xd29   :  { %5171 = vmatpush3.bf16.msra.mxu1 %v5170_v12 }
 0xd2c   :  { %4676 = vmatmul.mubr.msk.f32.vlgmr.msra.gmra.mrb[38].mxu1 %vm7517_vm3, %v3006_v8  ;;  %vm7540_vm3 = vnez %v7345_v35 }
 0xd9a   :  { %v5411_v22 = vpop.permute.xlu1 %5410  ;;  %v5406_v7 = vpop.permute.xlu0 %5405 }
 0xd9b   :  { %v5413_v13 = vunpack.i.h.bf16 %v5411_v22  ;;  %v5412_v38 = vunpack.i.l.bf16 %v5411_v22  ;;  %v5408_v32 = vunpack.i.h.bf16 %v5406_v7  ;;  %v5407_v50 = vunpack.i.l.bf16 %v5406_v7 }
 0xd9d   :  { %v3255_v16 = vsel %vm7518_vm9, %v5413_v13, -inf  ;;  %v3254_v51 = vsel %vm7519_vm0, %v5412_v38, -inf  ;;  %v3243_v29 = vsel %vm7520_vm11, %v5408_v32, -inf  ;;  %v3242_v36 = vsel %vm7521_vm12, %v5407_v50, -inf  ;;  %vm7541_vm9 = vmmov %vm7520_vm11 }
 0xd9e   :  { %v3259_v21 = vmax.f32 %v3243_v29, %v3255_v16  ;;  %v3258_v10 = vmax.f32 %v3242_v36, %v3254_v51  ;;  %vm7530_vm12 = vcmask 719872   ;;  %vm7542_vm11 = vnez %v7347_v42  ;;  %v3269_v42 = vld [vmem:[#allocation13] sm:$0xff] }
 0xd9f   :  { %4700 = vmatprep.mubr.msk.f32.mxu1 %vm7530_vm12, %v3271_v48 }
 0xda0   :  { %v3262_v24 = vmax.f32 %v3003_v53, %v3258_v10  ;;  %v3263_v25 = vmax.f32 %v3004_v63, %v3259_v21 }
 0xda2   :  { %v6944_v5 = vpack.c.bf16 %v3263_v25, %v3262_v24 }
 0xdff   :  { %v3076_v37 = vpop.f32.mrb[38].mxu1 }
 0xe00   :  { %3148 = vrot.lane.b32.xlu0 %v3076_v37, %s7409_s4  ;;  %3144 = vrot.lane.b32.xlu1 %v3076_v37, %s7450_s8  ;;  %v4677_v30 = vpop.f32.mrb[39].mxu1  ;;  %v5414_v39 = vpack.i.bf16 %v6923_v54, %v3076_v37  ;;  %s7524_s4 = smov 11   ;;  %s7554_s8 = sld [smem:[#allocation29_spill]] }
 0xe04   :  { %3084 = vrot.lane.b32.xlu0 %v3076_v37, %s7451_s22  ;;  %3080 = vrot.lane.b32.xlu1 %v3076_v37, %s7412_s13  ;;  %s7525_s13 = smov 10  }
 0xe08   :  { %3088 = vrot.lane.b32.xlu0 %v3076_v37, %s7452_s18  ;;  %5415 = vrot.lane.b32.xlu1 %v5414_v39, %s7385_s14  ;;  %s7556_s18 = sld [smem:[#allocation30_spill]] }
 0xe0c   :  { %5420 = vrot.lane.b32.xlu0 %v5414_v39, %s7387_s9  ;;  %3092 = vrot.lane.b32.xlu1 %v3076_v37, %s7414_s11 }
 0xe10   :  { %3096 = vrot.lane.b32.xlu0 %v3076_v37, %s7415_s2  ;;  %3161 = vrot.lane.b32.xlu1 %v3076_v37, %s7416_s10 }
 0xe14   :  { %3165 = vrot.lane.b32.xlu0 %v3076_v37, %s7417_s17  ;;  %3100 = vrot.lane.b32.xlu1 %v3076_v37, %s7418_s7 }
 0xe18   :  { %3104 = vrot.lane.b32.xlu0 %v3076_v37, %s7419_s30  ;;  %3169 = vrot.lane.b32.xlu1 %v3076_v37, %s7522_s27 }
 0xe1c   :  { %3173 = vrot.lane.b32.xlu0 %v3076_v37, %s7523_s20  ;;  %3108 = vrot.lane.b32.xlu1 %v3076_v37, %s7365_s16  ;;  %s7526_s16 = smov 8  }
 0xe20   :  { %3205 = vrot.lane.b32.xlu0 %v3076_v37, %s7487_s23  ;;  %3177 = vrot.lane.b32.xlu1 %v3076_v37, %s7367_s12  ;;  %s7527_s12 = smov 7  }
 0xe24   :  { %3112 = vrot.lane.b32.xlu0 %v3076_v37, %s7524_s4  ;;  %3209 = vrot.lane.b32.xlu1 %v3076_v37, %s7489_s19 }
 0xe28   :  { %3181 = vrot.lane.b32.xlu0 %v3076_v37, %s7368_s3  ;;  %3116 = vrot.lane.b32.xlu1 %v3076_v37, %s7525_s13  ;;  %s7529_s3 = smov 116  }
 0xe2c   :  { %3213 = vrot.lane.b32.xlu0 %v3076_v37, %s7453_s26  ;;  %3185 = vrot.lane.b32.xlu1 %v3076_v37, %s7370_s6  ;;  %s7528_s6 = smov 109  }
 0xe30   :  { %3120 = vrot.lane.b32.xlu0 %v3076_v37, %s7488_s28  ;;  %3217 = vrot.lane.b32.xlu1 %v3076_v37, %s7455_s21  ;;  %s7557_s21 = sld [smem:[#allocation31_spill]] }
 0xe34   :  { %3189 = vrot.lane.b32.xlu0 %v3076_v37, %s7490_s0  ;;  %3124 = vrot.lane.b32.xlu1 %v3076_v37, %s7526_s16  ;;  %s7531_s0 = smov 4  }
 0xe38   :  { %3221 = vrot.lane.b32.xlu0 %v3076_v37, %s7494_s25  ;;  %3193 = vrot.lane.b32.xlu1 %v3076_v37, %s7454_s24  ;;  %s7532_s25 = smov 5  }
 0xe3c   :  { %3128 = vrot.lane.b32.xlu0 %v3076_v37, %s7527_s12  ;;  %3225 = vrot.lane.b32.xlu1 %v3076_v37, %s7458_s5 }
 0xe40   :  { %3197 = vrot.lane.b32.xlu0 %v3076_v37, %s7459_s29  ;;  %3132 = vrot.lane.b32.xlu1 %v3076_v37, %s7493_s1  ;;  %s7547_s29 = sld [smem:[#allocation28_spill]] }
 0xe44   :  { %3229 = vrot.lane.b32.xlu0 %v3076_v37, %s7528_s6  ;;  %3201 = vrot.lane.b32.xlu1 %v3076_v37, %s7529_s3 }
 0xe48   :  { %3140 = vrot.lane.b32.xlu0 %v3076_v37, %s7531_s0  ;;  %3136 = vrot.lane.b32.xlu1 %v3076_v37, %s7532_s25 }
 0xe4c   :  { %3251 = vrot.lane.b32.xlu0 %v6926_v62, %s7385_s14  ;;  %3239 = vrot.lane.b32.xlu1 %v6926_v62, %s7387_s9 }
 0xe72   :  { %v3149_v44 = vpop.permute.xlu0 %3148  ;;  %v3145_v60 = vpop.permute.xlu1 %3144 }
 0xe73   :  { %v5172_v61 = vpack.c.bf16 %v3149_v44, %v3145_v60 }
 0xe75   :  { %5174 = vmatprep.subr.msk.bf16.mxu0 %vm5993_vm6, %v5172_v61  ;;  %vm7533_vm6 = vnez %v7333_v52 }
 0xe76   :  { %v3085_v45 = vpop.permute.xlu0 %3084  ;;  %v3081_v47 = vpop.permute.xlu1 %3080 }
 0xe77   :  { %v5175_v53 = vpack.c.bf16 %v3085_v45, %v3081_v47 }
 0xe79   :  { %5177 = vmatpush3.bf16.msk.msra.mxu0 %vm5997_vm7, %v5175_v53  ;;  %vm7534_vm7 = vnez %v7337_v2 }
 0xe7a   :  { %v3089_v15 = vpop.permute.xlu0 %3088  ;;  %v5416_v6 = vpop.permute.xlu1 %5415 }
 0xe7b   :  { %v5417_v9 = vunpack.i.l.bf16 %v5416_v6  ;;  %v5418_v60 = vunpack.i.h.bf16 %v5416_v6 }
 0xe7d   :  { %v5178_v57 = vpack.c.bf16 %v3076_v37, %v5417_v9  ;;  %v3253_v53 = vsel %vm7519_vm0, %v5418_v60, -inf }
 0xe7e   :  { %v5421_v59 = vpop.permute.xlu0 %5420  ;;  %v3093_v55 = vpop.permute.xlu1 %3092 }
 0xe7f   :  { %v5181_v63 = vpack.c.bf16 %v3093_v55, %v3089_v15  ;;  %5180 = vmatprep.subr.msk.bf16.mxu0 %vm6011_vm10, %v5178_v57  ;;  %v5422_v4 = vunpack.i.l.bf16 %v5421_v59  ;;  %vm7535_vm10 = vnez %v7353_v3 }
 0xe81   :  { %5183 = vmatpush3.bf16.msk.msra.mxu0 %vm6022_vm13, %v5181_v63  ;;  %vm7536_vm13 = vnez %v7339_v11  ;;  %v5423_v11 = vunpack.i.h.bf16 %v5421_v59 }
 0xe82   :  { %v3097_v20 = vpop.permute.xlu0 %3096  ;;  %v3162_v12 = vpop.permute.xlu1 %3161 }
 0xe83   :  { %v5184_v8 = vpack.c.bf16 %v3162_v12, %v5422_v4  ;;  %v3241_v61 = vsel %vm7541_vm9, %v5423_v11, -inf  ;;  %v3707_v11 = vld [vmem:[%s7554_s8 + $0x70] sm:$0xff] }
 0xe85   :  { %5186 = vmatprep.subr.msk.bf16.mxu0 %vm6033_vm2, %v5184_v8  ;;  %vm7537_vm2 = vnez %v7341_v18 }
 0xe86   :  { %v3166_v23 = vpop.permute.xlu0 %3165  ;;  %v3101_v22 = vpop.permute.xlu1 %3100 }
 0xe87   :  { %v5187_v7 = vpack.c.bf16 %v3101_v22, %v3097_v20  ;;  %v3272_v22 = vld [vmem:[#allocation13 + $0x18] sm:$0xff] }
 0xe89   :  { %5189 = vmatpush3.bf16.msk.msra.mxu0 %vm6041_vm5, %v5187_v7  ;;  %vm7538_vm5 = vnez %v7357_v19  ;;  %v3276_v7 = vld [vmem:[#allocation13 + $0x38] sm:$0xff] }
 0xe8a   :  { %v3105_v13 = vpop.permute.xlu0 %3104  ;;  %v3170_v38 = vpop.permute.xlu1 %3169 }
 0xe8b   :  { %v5190_v28 = vpack.c.bf16 %v3170_v38, %v3166_v23  ;;  %v3275_v38 = vld [vmem:[#allocation13 + $0x30] sm:$0xff] }
 0xe8d   :  { %5192 = vmatprep.subr.msk.bf16.mxu0 %vm7533_vm6, %v5190_v28  ;;  %v3278_v28 = vld [vmem:[#allocation13 + $0x48] sm:$0xff]  ;;  %vm7549_vm6 = vcmask 261120  }
 0xe8e   :  { %v3174_v34 = vpop.permute.xlu0 %3173  ;;  %v3109_v32 = vpop.permute.xlu1 %3108 }
 0xe8f   :  { %v5193_v50 = vpack.c.bf16 %v3109_v32, %v3105_v13  ;;  %v3274_v13 = vld [vmem:[#allocation13 + $0x28] sm:$0xff] }
 0xe90   :  { %v3693_v32 = vld [vmem:[%s7554_s8] sm:$0xff] }
 0xe91   :  { %5195 = vmatpush3.bf16.msk.msra.mxu0 %vm7498_vm1, %v5193_v50  ;;  %vm7539_vm1 = vnez %v7343_v26  ;;  %v3257_v26 = vmax.f32 %v3241_v61, %v3253_v53  ;;  %v3694_v50 = vld [vmem:[%s7554_s8 + $0x8] sm:$0xff] }
 0xe92   :  { %v3206_v40 = vpop.permute.xlu0 %3205  ;;  %v3178_v16 = vpop.permute.xlu1 %3177 }
 0xe93   :  { %v5196_v51 = vpack.c.bf16 %v3178_v16, %v3174_v34  ;;  %v3261_v9 = vmax.f32 %v6923_v54, %v3257_v26  ;;  %v3512_v34 = vld [vmem:[%s7547_s29 + $0x10] sm:$0xff]  ;;  %v5263_v16 = vpack.c.bf16 %v3694_v50, %v3693_v32  ;;  %v3709_v32 = vld [vmem:[%s7556_s18] sm:$0x3]  ;;  %v5665_v50 = vmov 0  }
 0xe94   :  { %5424 = vset.pattern.permute.xlu1 %v5665_v50  ;;  %5425 = vset.pattern.permute.xlu0 %v5665_v50 }
 0xe95   :  { %5198 = vmatprep.subr.msk.bf16.mxu0 %vm7534_vm7, %v5196_v51  ;;  %vm7550_vm7 = vmmov 0   ;;  %v3696_v51 = vld [vmem:[%s7554_s8 + $0x18] sm:$0xff]  ;;  %3712 = vperm.xlu1 %5424, %v3709_v32  }
 0xe96   :  { %v3113_v46 = vpop.permute.xlu0 %3112  ;;  %v3210_v29 = vpop.permute.xlu1 %3209 }
 0xe97   :  { %v5220_v36 = vpack.c.bf16 %v3210_v29, %v3206_v40  ;;  %v3695_v40 = vld [vmem:[%s7554_s8 + $0x10] sm:$0xff]  ;;  %v3698_v29 = vld [vmem:[%s7554_s8 + $0x28] sm:$0xff] }
 0xe99   :  { %5222 = vmatprep.subr.msk.bf16.mxu1 %vm7535_vm10, %v5220_v36 }
 0xe9a   :  { %v3182_v52 = vpop.permute.xlu0 %3181  ;;  %5225 = vmatpush3.bf16.msk.msra.mxu1 %vm7535_vm10, %v5220_v36  ;;  %v3117_v21 = vpop.permute.xlu1 %3116  ;;  %vm7551_vm10 = vmmov %vm7549_vm6 }
 0xe9b   :  { %v5199_v10 = vpack.c.bf16 %v3117_v21, %v3113_v46  ;;  %v5266_v46 = vpack.c.bf16 %v3696_v51, %v3695_v40  ;;  %v3700_v21 = vld [vmem:[%s7554_s8 + $0x38] sm:$0xff] }
 0xe9d   :  { %5201 = vmatpush3.bf16.msk.msra.mxu0 %vm7536_vm13, %v5199_v10  ;;  %vm7552_vm13 = vmmov %vm7549_vm6 }
 0xe9e   :  { %v3214_v58 = vpop.permute.xlu0 %3213  ;;  %v3186_v24 = vpop.permute.xlu1 %3185 }
 0xe9f   :  { %v5202_v25 = vpack.c.bf16 %v3186_v24, %v3182_v52  ;;  %v3699_v52 = vld [vmem:[%s7554_s8 + $0x30] sm:$0xff]  ;;  %v3702_v24 = vld [vmem:[%s7554_s8 + $0x48] sm:$0xff] }
 0xea0   :  { %v5272_v10 = vpack.c.bf16 %v3700_v21, %v3699_v52 }
 0xea1   :  { %5204 = vmatprep.subr.msk.bf16.mxu0 %vm7537_vm2, %v5202_v25  ;;  %vm7553_vm2 = vmmov %vm7549_vm6 }
 0xea2   :  { %v3121_v2 = vpop.permute.xlu0 %3120  ;;  %v3218_v37 = vpop.permute.xlu1 %3217 }
 0xea3   :  { %v5226_v30 = vpack.c.bf16 %v3218_v37, %v3214_v58  ;;  %v3701_v58 = vld [vmem:[%s7554_s8 + $0x40] sm:$0xff]  ;;  %v3704_v37 = vld [vmem:[%s7554_s8 + $0x58] sm:$0xff] }
 0xea4   :  { %v5275_v25 = vpack.c.bf16 %v3702_v24, %v3701_v58 }
 0xea5   :  { %5228 = vmatprep.subr.msk.bf16.mxu1 %vm7538_vm5, %v5226_v30 }
 0xea6   :  { %v3190_v39 = vpop.permute.xlu0 %3189  ;;  %5231 = vmatpush3.bf16.msk.msra.mxu1 %vm7538_vm5, %v5226_v30  ;;  %v3125_v3 = vpop.permute.xlu1 %3124  ;;  %vm7555_vm5 = vmmov %vm7553_vm2 }
 0xea7   :  { %v5205_v1 = vpack.c.bf16 %v3125_v3, %v3121_v2  ;;  %v3703_v2 = vld [vmem:[%s7554_s8 + $0x50] sm:$0xff]  ;;  %v3706_v3 = vld [vmem:[%s7554_s8 + $0x68] sm:$0xff] }
 0xea8   :  { %v5278_v30 = vpack.c.bf16 %v3704_v37, %v3703_v2 }
 0xea9   :  { %5207 = vmatpush3.bf16.msk.msra.mxu0 %vm7539_vm1, %v5205_v1  ;;  %vm3785_vm1 = vcmask 9216  }
 0xeaa   :  { %v3222_v48 = vpop.permute.xlu0 %3221  ;;  %v3194_v44 = vpop.permute.xlu1 %3193 }
 0xeab   :  { %v5208_v18 = vpack.c.bf16 %v3194_v44, %v3190_v39  ;;  %v3705_v39 = vld [vmem:[%s7554_s8 + $0x60] sm:$0xff] }
 0xeac   :  { %v5281_v1 = vpack.c.bf16 %v3706_v3, %v3705_v39 }
 0xead   :  { %5210 = vmatprep.subr.msk.bf16.mxu0 %vm7540_vm3, %v5208_v18 }
 0xeae   :  { %v3129_v45 = vpop.permute.xlu0 %3128  ;;  %v3226_v47 = vpop.permute.xlu1 %3225 }
 0xeaf   :  { %v5232_v19 = vpack.c.bf16 %v3226_v47, %v3222_v48  ;;  %v3708_v48 = vld [vmem:[%s7554_s8 + $0x78] sm:$0xff] }
 0xeb0   :  { %v5284_v44 = vpack.c.bf16 %v3708_v48, %v3707_v11 }
 0xeb1   :  { %5234 = vmatprep.subr.msk.bf16.mxu1 %vm6170_vm8, %v5232_v19 }
 0xeb2   :  { %v3198_v15 = vpop.permute.xlu0 %3197  ;;  %5237 = vmatpush3.bf16.msk.msra.mxu1 %vm6170_vm8, %v5232_v19  ;;  %v3133_v6 = vpop.permute.xlu1 %3132  ;;  %vm7543_vm8 = vmmov %vm7519_vm0 }
 0xeb3   :  { %v5211_v35 = vpack.c.bf16 %v3133_v6, %v3129_v45 }
 0xeb5   :  { %5213 = vmatpush3.bf16.msk.msra.mxu0 %vm7542_vm11, %v5211_v35 }
 0xeb6   :  { %v3230_v57 = vpop.permute.xlu0 %3229  ;;  %v3202_v59 = vpop.permute.xlu1 %3201 }
 0xeb7   :  { %v5238_v55 = vpack.c.bf16 %v3261_v9, %v3230_v57  ;;  %v5214_v63 = vpack.c.bf16 %v3202_v59, %v3198_v15 }
 0xeb9   :  { %5216 = vmatprep.subr.msk.bf16.mxu0 %vm7395_vm15, %v5214_v63  ;;  %5240 = vmatprep.subr.msk.bf16.mxu1 %vm7479_vm4, %v5238_v55  ;;  %vm7544_vm15 = vmmov %vm7541_vm9 }
 0xeba   :  { %v3141_v4 = vpop.permute.xlu0 %3140  ;;  %v3137_v27 = vpop.permute.xlu1 %3136  ;;  %5243 = vmatpush3.bf16.msk.msra.mxu1 %vm7479_vm4, %v5238_v55  ;;  %vm7546_vm4 = vmmov %vm7530_vm12 }
 0xebb   :  { %v5217_v20 = vpack.c.bf16 %v3141_v4, %v3137_v27  ;;  %5245 = vmatprep.subr.bf16.mxu1 %v6944_v5 }
 0xebd   :  { %5219 = vmatpush3.bf16.msk.msra.mxu0 %vm7437_vm14, %v5217_v20  ;;  %vm7545_vm14 = vmmov %vm7530_vm12 }
 0xebe   :  { %v3252_v54 = vpop.permute.xlu0 %3251  ;;  %v3240_v12 = vpop.permute.xlu1 %3239  ;;  %5247 = vmatpush3.bf16.msra.mxu1 %v6944_v5  ;;  %5262 = vmatprep.subr.bf16.mxu0 %v5664_v43  ;;  %v3277_v5 = vld [vmem:[#allocation13 + $0x40] sm:$0xff]  ;;  %vm7548_vm12 = vmmov %vm7546_vm4 }
 0xebf   :  { %v3256_v8 = vsel %vm7543_vm8, %v3252_v54, -inf  ;;  %v3244_v33 = vsel %vm7544_vm15, %v3240_v12, -inf }
 0xec0   :  { %v3260_v23 = vmax.f32 %v3244_v33, %v3256_v8  ;;  %3401 = vmatmul.mubr.f32.vlgmr.msra.gmra.mrb[36].mxu0 %v3269_v42 }
 0xec1   :  { %3405 = vmatprep.mubr.f32.mxu0 %v3273_v49  ;;  %5264 = vmatpush3.bf16.msra.mxu0 %v5263_v16 }
 0xec2   :  { %v3264_v56 = vmax.f32 %v6926_v62, %v3260_v23  ;;  %v3510_v62 = vld [vmem:[%s7547_s29] sm:$0xff]  ;;  %5265 = vmatprep.subr.bf16.mxu0 %v5664_v43 }
 0xec4   :  { %3406 = vmatmul.mubr.f32.gmra.mrb[38].mxu0 %v3272_v22  ;;  %4698 = vmatprep.subr.mxu1 %v3264_v56 }
 0xec5   :  { %4699 = vmatpush3.msra.mxu1 %v3264_v56  ;;  %3410 = vmatprep.mubr.f32.mxu0 %v3276_v7 }
 0xec6   :  { %4701 = vmatmul.mubr.msk.f32.vlgmr.msra.gmra.mrb[40].mxu1 %vm7545_vm14, %v3274_v13  ;;  %5249 = vmatprep.subr.bf16.mxu1 %v6615_v41 }
 0xec7   :  { %5251 = vmatpush3.bf16.msra.mxu1 %v6615_v41  ;;  %4703 = vmatprep.mubr.msk.f32.mxu1 %vm7546_vm4, %v3277_v5  ;;  %v3511_v41 = vld [vmem:[%s7547_s29 + $0x8] sm:$0xff] }
 0xec8   :  { %3411 = vmatmul.mubr.f32.gmra.mrb[40].mxu0 %v3275_v38  ;;  %5253 = vmatprep.subr.bf16.mxu1 %v6628_v14 }
 0xec9   :  { %3415 = vmatprep.mubr.f32.mxu0 %v3279_v17  ;;  %5267 = vmatpush3.bf16.msra.mxu0 %v5266_v46 }
 0xeca   :  { %4704 = vmatmul.mubr.msk.f32.gmra.mrb[42].mxu1 %vm7548_vm12, %v3280_v31  ;;  %5268 = vmatprep.subr.bf16.mxu0 %v5664_v43 }
 0xecb   :  { %5255 = vmatpush3.bf16.msra.mxu1 %v6628_v14  ;;  %4714 = vmatprep.mubr.msk.f32.mxu1 %vm7549_vm6, %v3510_v62  ;;  %v3513_v14 = vld [vmem:[%s7547_s29 + $0x18] sm:$0xff] }
 0xecc   :  { %3416 = vmatmul.mubr.f32.gmra.mrb[42].mxu0 %v3278_v28  ;;  %5256 = vmatprep.subr.bf16.mxu1 %v5664_v43 }
 0xecd   :  { %4763 = vmatprep.mubr.msk.f32.mxu0 %vm7550_vm7, %v5623_v0 }
 0xece   :  { %4715 = vmatmul.mubr.msk.f32.vlgmr.msra.gmra.mrb[44].mxu1 %vm7551_vm10, %v3511_v41 }
 0xecf   :  { %4717 = vmatprep.mubr.msk.f32.mxu1 %vm7552_vm13, %v3512_v34 }
 0xed2   :  { %4718 = vmatmul.mubr.msk.f32.gmra.mrb[46].mxu1 %vm7553_vm2, %v3513_v14  ;;  %v3619_v14 = vld [vmem:[#allocation14] sm:$0x3] }
 0xed3   :  { %4728 = vmatprep.mubr.msk.f32.mxu1 %vm7550_vm7, %v5623_v0  ;;  %v3697_v0 = vld [vmem:[%s7554_s8 + $0x20] sm:$0xff] }
 0xed4   :  { %v5269_v36 = vpack.c.bf16 %v3698_v29, %v3697_v0 }
 0xed6   :  { %5270 = vmatpush3.bf16.msra.mxu0 %v5269_v36 }
 0xed7   :  { %5271 = vmatprep.subr.bf16.mxu0 %v5664_v43 }
 0xeda   :  { %5273 = vmatpush3.bf16.msra.mxu0 %v5272_v10 }
 0xedb   :  { %5274 = vmatprep.subr.bf16.mxu0 %v5664_v43 }
 0xede   :  { %5276 = vmatpush3.bf16.msra.mxu0 %v5275_v25 }
 0xedf   :  { %5277 = vmatprep.subr.bf16.mxu0 %v5664_v43 }
 0xee2   :  { %5279 = vmatpush3.bf16.msra.mxu0 %v5278_v30 }
 0xee3   :  { %5280 = vmatprep.subr.bf16.mxu0 %v5664_v43 }
 0xee6   :  { %5282 = vmatpush3.bf16.msra.mxu0 %v5281_v1 }
 0xee7   :  { %5283 = vmatprep.subr.bf16.mxu0 %v5664_v43 }
 0xeea   :  { %5285 = vmatpush3.bf16.msra.mxu0 %v5284_v44 }
 0xf14   :  { %v3713_v51 = vpop.permute.xlu1 %3712 }
 0xf93   :  { %v4419_v18 = vpop.f32.mrb[36].mxu0 }
 0xf94   :  { %v4420_v60 = vpop.f32.mrb[37].mxu0 }
 0xf95   :  { %v4421_v61 = vadd.f32 %v4420_v60, %v4419_v18 }
 0xf97   :  { %v4422_v45 = vpop.f32.mrb[38].mxu0 }
 0xf98   :  { %v4423_v47 = vpop.f32.mrb[39].mxu0 }
 0xf99   :  { %v4424_v19 = vadd.f32 %v4423_v47, %v4422_v45  ;;  %v4702_v53 = vpop.f32.mrb[40].mxu1 }
 0xf9a   :  { %v3487_v26 = vpop.f32.mrb[41].mxu1 }
 0xf9b   :  { %v3493_v15 = vadd.f32 %v4702_v53, %v4424_v19  ;;  %v3488_v6 = vadd.f32 %v4421_v61, %v3487_v26  ;;  %v4425_v35 = vpop.f32.mrb[40].mxu0 }
 0xf9c   :  { %v4426_v9 = vpop.f32.mrb[41].mxu0 }
 0xf9d   :  { %v4427_v57 = vadd.f32 %v4426_v9, %v4425_v35  ;;  %v4705_v59 = vpop.f32.mrb[42].mxu1  ;;  %v3507_v27 = vmax.f32 %v3493_v15, 0.0  ;;  %v3506_v42 = vmax.f32 %v3488_v6, 0.0 }
 0xf9e   :  { %v3497_v55 = vpop.f32.mrb[43].mxu1 }
 0xf9f   :  { %v3498_v63 = vadd.f32 %v4427_v57, %v3497_v55  ;;  %v4428_v4 = vpop.f32.mrb[42].mxu0 }
 0xfa0   :  { %v4429_v20 = vpop.f32.mrb[43].mxu0 }
 0xfa1   :  { %v4430_v54 = vadd.f32 %v4429_v20, %v4428_v4  ;;  %v4716_v12 = vpop.f32.mrb[44].mxu1  ;;  %v3508_v56 = vmax.f32 %v3498_v63, 0.0 }
 0xfa2   :  { %v3612_v49 = vadd.f32 %v4716_v12, %v3507_v27  ;;  %v3592_v8 = vpop.f32.mrb[45].mxu1 }
 0xfa3   :  { %v3503_v33 = vadd.f32 %v4705_v59, %v4430_v54  ;;  %v3611_v23 = vadd.f32 %v3592_v8, %v3506_v42 }
 0xfa4   :  { %v3616_v22 = vmax.f32 %v3612_v49, 0.0 }
 0xfa5   :  { %v3615_v7 = vmax.f32 %v3611_v23, 0.0  ;;  %v3509_v13 = vmax.f32 %v3503_v33, 0.0  ;;  %v4719_v5 = vpop.f32.mrb[46].mxu1 }
 0xfa6   :  { %v3602_v38 = vpop.f32.mrb[47].mxu1 }
 0xfa7   :  { %v5257_v17 = vpack.c.bf16 %v3616_v22, %v3615_v7  ;;  %v3614_v31 = vadd.f32 %v4719_v5, %v3509_v13  ;;  %v3613_v62 = vadd.f32 %v3602_v38, %v3508_v56 }
 0xfa9   :  { %v3618_v28 = vmax.f32 %v3614_v31, 0.0  ;;  %v3617_v41 = vmax.f32 %v3613_v62, 0.0  ;;  %5258 = vmatpush3.bf16.msra.mxu1 %v5257_v17 }
 0xfaa   :  { %5259 = vmatprep.subr.bf16.mxu1 %v5664_v43 }
 0xfab   :  { %v5260_v34 = vpack.c.bf16 %v3618_v28, %v3617_v41 }
 0xfad   :  { %5261 = vmatpush3.bf16.msra.mxu1 %v5260_v34 }
 0xfb0   :  { %4729 = vmatmul.mubr.msk.f32.vlgmr.msra.gmra.mrb[48].mxu1 %vm7555_vm5, %v3619_v14 }
0x1083   :  { %v3689_v40 = vpop.f32.mrb[48].mxu1 }
0x1084   :  { %v4730_v16 = vpop.f32.mrb[49].mxu1  ;;  %4764 = vmatmul.mubr.f32.vlgmr.msra.gmra.mrb[44].mxu0 %v3689_v40 }
0x1157   :  { %v3781_v46 = vpop.f32.mrb[44].mxu0 }
0x1158   :  { %v3782_v43 = vadd.f32 %v3781_v46, %v3713_v51  ;;  %v4765_v0 = vpop.f32.mrb[45].mxu0 }
0x115a   :  { %3786 = vst.msk [vmem:[%s7557_s21] sm:$0x3] %vm3785_vm1, %v3782_v43 }
0x115b   :  { %3791 = vsyncpa [#allocation4], 1 }
0x115c   :  { %3792 = vsyncpa [#allocation6], 1 }
0x115d   :  { %3793 = vsyncpa [#allocation9], 1 }
0x115e   :  { %3794 = vsyncpa [#allocation12], 1 }
0x115f   :  { %3795 = vsyncpa [#allocation15], 1 }

</bundles_post_ra>
